<compile_context>
chip_gen: v6e
topology: v6e:2x2x1
jax: 0.10.0
libtpu: 0.0.40
codegen_flags: <defaults>
</compile_context>

<pallas_src>
import functools
from dataclasses import dataclass

import numpy as np
import jax
import jax.numpy as jnp
import jax.tree_util as tree_util
from jax.experimental import pallas as pl
from jax.experimental.pallas import tpu as pltpu


ATROUS_RATES = (12, 24, 36)


def _round_up(x, m):
    return (x + m - 1) // m * m


# ----------------------------------------------------------------------------
# Pallas kernel: fused matmul (bf16 MXU, f32 accum) + affine (folded BN) + ReLU
# ----------------------------------------------------------------------------
def _matmul_affine_kernel(x_ref, w_ref, s_ref, b_ref, o_ref, acc_ref, *, relu):
    k = pl.program_id(2)

    @pl.when(k == 0)
    def _():
        acc_ref[...] = jnp.zeros_like(acc_ref)

    acc_ref[...] += jnp.dot(x_ref[...], w_ref[...],
                            preferred_element_type=jnp.float32)

    @pl.when(k == pl.num_programs(2) - 1)
    def _():
        y = acc_ref[...] * s_ref[...] + b_ref[...]
        if relu:
            y = jnp.maximum(y, 0.0)
        o_ref[...] = y.astype(o_ref.dtype)


# ----------------------------------------------------------------------------
# Prepared linear layer: weight pre-padded + pre-cast to bf16, affine in f32.
# Static tiling metadata stays Python ints (pytree aux data) so jit keeps it static.
# ----------------------------------------------------------------------------
@tree_util.register_pytree_node_class
@dataclass
class Linear:
    w: jax.Array        # [Kp, Np] bf16
    s: jax.Array        # [1, Np]  f32
    b: jax.Array        # [1, Np]  f32
    K: int
    N: int
    Kp: int
    Np: int
    tk: int
    tn: int

    def tree_flatten(self):
        return (self.w, self.s, self.b), (self.K, self.N, self.Kp, self.Np,
                                          self.tk, self.tn)

    @classmethod
    def tree_unflatten(cls, aux, children):
        w, s, b = children
        return cls(w, s, b, *aux)


def prep_linear(w, scale=None, bias=None, tk_cap=4096, tn_cap=256):
    """Pad/cast a [K, N] weight (+ folded BN affine) once, outside the forward."""
    K, N = w.shape
    tn = min(tn_cap, _round_up(N, 128))
    Np = _round_up(N, tn)
    tk = min(tk_cap, _round_up(K, 128))
    Kp = _round_up(K, tk)
    wp = jnp.zeros((Kp, Np), jnp.bfloat16).at[:K, :N].set(w.astype(jnp.bfloat16))
    s = jnp.ones((N,), jnp.float32) if scale is None else scale.astype(jnp.float32)
    b = jnp.zeros((N,), jnp.float32) if bias is None else bias.astype(jnp.float32)
    sp = jnp.zeros((1, Np), jnp.float32).at[0, :N].set(s)
    bp = jnp.zeros((1, Np), jnp.float32).at[0, :N].set(b)
    return Linear(wp, sp, bp, K, N, Kp, Np, tk, tn)


def apply_linear(x2d, lin: Linear, relu=False, tm=128):
    """out = maybe_relu((x2d @ W) * scale + bias) via the fused Pallas kernel."""
    M, K = x2d.shape
    assert K == lin.K, (K, lin.K)
    tm = min(tm, _round_up(M, 8))
    Mp = _round_up(M, tm)
    xp = x2d.astype(jnp.bfloat16)
    if (Mp, lin.Kp) != (M, K):
        xp = jnp.pad(xp, ((0, Mp - M), (0, lin.Kp - K)))

    grid = (Mp // tm, lin.Np // lin.tn, lin.Kp // lin.tk)
    out = pl.pallas_call(
        functools.partial(_matmul_affine_kernel, relu=relu),
        out_shape=jax.ShapeDtypeStruct((Mp, lin.Np), jnp.float32),
        grid_spec=pltpu.PrefetchScalarGridSpec(
            num_scalar_prefetch=0,
            grid=grid,
            in_specs=[
                pl.BlockSpec((tm, lin.tk), lambda i, j, k: (i, k)),
                pl.BlockSpec((lin.tk, lin.tn), lambda i, j, k: (k, j)),
                pl.BlockSpec((1, lin.tn), lambda i, j, k: (0, j)),
                pl.BlockSpec((1, lin.tn), lambda i, j, k: (0, j)),
            ],
            out_specs=pl.BlockSpec((tm, lin.tn), lambda i, j, k: (i, j)),
            scratch_shapes=[pltpu.VMEM((tm, lin.tn), jnp.float32)],
        ),
        compiler_params=pltpu.CompilerParams(
            dimension_semantics=("parallel", "parallel", "arbitrary")),
    )(xp, lin.w, lin.s, lin.b)

    if (Mp, lin.Np) != (M, lin.N):
        out = out[:M, :lin.N]
    return out


# ----------------------------------------------------------------------------
# Convs / resize built on top of the Pallas matmul kernel
# ----------------------------------------------------------------------------
def conv1x1(x_nhwc, lin, relu=True):
    n, h, w, _ = x_nhwc.shape
    out = apply_linear(x_nhwc.reshape(n * h * w, -1), lin, relu=relu)
    return out.reshape(n, h, w, -1)


def _im2col_3x3(x_nhwc, d):
    """Tap-major (ky, kx, cin) bf16 patches, matching w.reshape(9*Cin, Cout)."""
    n, h, w, c = x_nhwc.shape
    xp = jnp.pad(x_nhwc.astype(jnp.bfloat16), ((0, 0), (d, d), (d, d), (0, 0)))
    taps = []
    for ky in range(3):
        for kx in range(3):
            dy, dx = (ky - 1) * d, (kx - 1) * d
            taps.append(xp[:, d + dy:d + dy + h, d + dx:d + dx + w, :])
    return jnp.concatenate(taps, axis=-1).reshape(n * h * w, 9 * c)


def conv3x3(x_nhwc, lin, dilation, relu=True):
    n, h, w, _ = x_nhwc.shape
    patches = _im2col_3x3(x_nhwc, dilation)
    out = apply_linear(patches, lin, relu=relu)
    return out.reshape(n, h, w, -1)


def _lerp_coeffs(out_size, in_size):
    """align_corners=True 1-D interpolation indices/weights (static numpy)."""
    if out_size == 1 or in_size == 1:
        i0 = np.zeros((out_size,), np.int32)
        return i0, i0, np.zeros((out_size,), np.float32)
    src = np.arange(out_size, dtype=np.float64) * (in_size - 1) / (out_size - 1)
    i0 = np.floor(src).astype(np.int32)
    i1 = np.minimum(i0 + 1, in_size - 1).astype(np.int32)
    f = (src - i0).astype(np.float32)
    return i0, i1, f


def bilinear_resize(x_nhwc, out_h, out_w):
    """Bilinear, align_corners=True, as gather + lerp (tiny & memory-bound)."""
    i0, i1, fh = _lerp_coeffs(out_h, x_nhwc.shape[1])
    fh = jnp.asarray(fh)[None, :, None, None]
    xh = x_nhwc[:, i0] * (1.0 - fh) + x_nhwc[:, i1] * fh
    j0, j1, fw = _lerp_coeffs(out_w, x_nhwc.shape[2])
    fw = jnp.asarray(fw)[None, None, :, None]
    return xh[:, :, j0] * (1.0 - fw) + xh[:, :, j1] * fw


# ----------------------------------------------------------------------------
# Parameters (deterministic synthetic init; BN folded into scale/bias)
# ----------------------------------------------------------------------------
def make_params(key, nclass):
    keys = iter(jax.random.split(key, 64))
    eps = 1e-5

    def conv_w(shape, fan_in):
        return jax.random.normal(next(keys), shape, jnp.float32) / np.sqrt(fan_in)

    def bn(c):
        gamma = 1.0 + 0.1 * jax.random.normal(next(keys), (c,), jnp.float32)
        beta = 0.05 * jax.random.normal(next(keys), (c,), jnp.float32)
        mean = 0.1 * jax.random.normal(next(keys), (c,), jnp.float32)
        var = 1.0 + 0.1 * jax.random.uniform(next(keys), (c,), jnp.float32)
        scale = gamma / jnp.sqrt(var + eps)
        bias = beta - mean * scale
        return scale, bias

    cin_hi, cin_lo = 2048, 256
    cmid = cin_hi // 8  # 256

    p = {}
    p['b0_w'] = conv_w((cin_hi, cmid), cin_hi);               p['b0_bn'] = bn(cmid)
    p['b1_w'] = conv_w((3, 3, cin_hi, cmid), 9 * cin_hi);     p['b1_bn'] = bn(cmid)
    p['b2_w'] = conv_w((3, 3, cin_hi, cmid), 9 * cin_hi);     p['b2_bn'] = bn(cmid)
    p['b3_w'] = conv_w((3, 3, cin_hi, cmid), 9 * cin_hi);     p['b3_bn'] = bn(cmid)
    p['b4_w'] = conv_w((cin_hi, cmid), cin_hi);               p['b4_bn'] = bn(cmid)
    p['proj_w'] = conv_w((5 * cmid, cmid), 5 * cmid);         p['proj_bn'] = bn(cmid)
    p['red_w'] = conv_w((cin_lo, 48), cin_lo);                p['red_bn'] = bn(48)
    p['fuse1_w'] = conv_w((3, 3, cmid + 48, 256), 9 * (cmid + 48)); p['fuse1_bn'] = bn(256)
    p['fuse2_w'] = conv_w((3, 3, 256, 256), 9 * 256);         p['fuse2_bn'] = bn(256)
    p['cls_w'] = conv_w((256, nclass), 256)
    p['cls_b'] = 0.01 * jax.random.normal(next(keys), (nclass,), jnp.float32)
    return p


def prepare_inference(p, c4_hw):
    """Fold BN, pre-pad/pre-cast weights to bf16, fuse ASPP branches when valid."""
    hh, wh = c4_hw
    prep = {}
    fast = all(r >= hh and r >= wh for r in ATROUS_RATES)
    if fast:
        # With dilation >= spatial extent every non-centre tap of the dilated 3x3
        # convs reads only zero padding => contributes exactly 0.  Each branch is
        # therefore a 1x1 conv with the centre tap, and b0..b3 fuse into one matmul.
        w_fused = jnp.concatenate(
            [p['b0_w'], p['b1_w'][1, 1], p['b2_w'][1, 1], p['b3_w'][1, 1]], axis=1)
        s_fused = jnp.concatenate(
            [p['b0_bn'][0], p['b1_bn'][0], p['b2_bn'][0], p['b3_bn'][0]])
        b_fused = jnp.concatenate(
            [p['b0_bn'][1], p['b1_bn'][1], p['b2_bn'][1], p['b3_bn'][1]])
        prep['aspp_fused'] = prep_linear(w_fused, s_fused, b_fused)
    else:
        prep['b0'] = prep_linear(p['b0_w'], *p['b0_bn'])
        prep['b1'] = prep_linear(p['b1_w'].reshape(-1, p['b1_w'].shape[-1]), *p['b1_bn'])
        prep['b2'] = prep_linear(p['b2_w'].reshape(-1, p['b2_w'].shape[-1]), *p['b2_bn'])
        prep['b3'] = prep_linear(p['b3_w'].reshape(-1, p['b3_w'].shape[-1]), *p['b3_bn'])

    prep['b4_w'] = p['b4_w'].astype(jnp.float32)
    prep['b4_s'], prep['b4_b'] = p['b4_bn']
    prep['proj'] = prep_linear(p['proj_w'], *p['proj_bn'])
    prep['reduce'] = prep_linear(p['red_w'], *p['red_bn'])
    prep['fuse1'] = prep_linear(p['fuse1_w'].reshape(-1, p['fuse1_w'].shape[-1]),
                                *p['fuse1_bn'])
    prep['fuse2'] = prep_linear(p['fuse2_w'].reshape(-1, p['fuse2_w'].shape[-1]),
                                *p['fuse2_bn'])
    prep['cls'] = prep_linear(p['cls_w'], None, p['cls_b'])
    return prep


# ----------------------------------------------------------------------------
# DeepLabV3Plus forward (eval mode)
# ----------------------------------------------------------------------------
def deeplabv3plus_forward(h, w, c1_nchw, c4_nchw, prep):
    c1 = jnp.transpose(c1_nchw, (0, 2, 3, 1))  # NCHW -> NHWC
    c4 = jnp.transpose(c4_nchw, (0, 2, 3, 1))
    n, hh, wh, cin = c4.shape

    # ---- ASPP head ----
    if 'aspp_fused' in prep:
        assert all(r >= hh and r >= wh for r in ATROUS_RATES)
        f0123 = conv1x1(c4, prep['aspp_fused'], relu=True)   # feat0..feat3, one matmul
    else:
        feat0 = conv1x1(c4, prep['b0'], relu=True)
        feat1 = conv3x3(c4, prep['b1'], ATROUS_RATES[0], relu=True)
        feat2 = conv3x3(c4, prep['b2'], ATROUS_RATES[1], relu=True)
        feat3 = conv3x3(c4, prep['b3'], ATROUS_RATES[2], relu=True)
        f0123 = jnp.concatenate([feat0, feat1, feat2, feat3], axis=-1)

    # ASPPPooling: global avg pool -> 1x1 conv + BN + ReLU -> bilinear upsample of a
    # 1x1 map (== broadcast).  A few KB of data -> plain jnp, no MXU-tile padding waste.
    pooled = jnp.mean(c4, axis=(1, 2))                                       # [n, cin]
    pooled = jnp.maximum(pooled @ prep['b4_w'] * prep['b4_s'] + prep['b4_b'], 0.0)
    feat4 = jnp.broadcast_to(pooled[:, None, None, :], (n, hh, wh, pooled.shape[-1]))

    y = jnp.concatenate([f0123, feat4], axis=-1)
    c4p = conv1x1(y, prep['proj'], relu=True)
    # Dropout2d(0.5) -> identity (eval mode)

    # ---- decoder ----
    c4u = bilinear_resize(c4p, c1.shape[1], c1.shape[2])
    c1r = conv1x1(c1, prep['reduce'], relu=True)
    out = jnp.concatenate([c1r, c4u], axis=-1)
    out = conv3x3(out, prep['fuse1'], dilation=1, relu=True)
    out = conv3x3(out, prep['fuse2'], dilation=1, relu=True)
    # Dropout(0.1) -> identity (eval mode)

    out = conv1x1(out, prep['cls'], relu=False)
    out = bilinear_resize(out, h, w)
    return jnp.transpose(out, (0, 3, 1, 2))  # back to NCHW


# ----------------------------------------------------------------------------
if __name__ == "__main__":
    key = jax.random.PRNGKey(0)
    k_params, k_c1, k_c4 = jax.random.split(key, 3)

    nclass = 5
    batch = 2
    # c4: high-level features (2048 ch, stride-16-ish), c1: low-level (256 ch)
    c4 = jax.random.normal(k_c4, (batch, 2048, 8, 8), jnp.float32)
    c1 = jax.random.normal(k_c1, (batch, 256, 16, 16), jnp.float32)
    h, w = 32, 32

    params = make_params(k_params, nclass)
    prep = prepare_inference(params, c4_hw=(c4.shape[2], c4.shape[3]))

    fwd = jax.jit(deeplabv3plus_forward, static_argnums=(0, 1))
    out = fwd(h, w, c1, c4, prep)
    out = jax.block_until_ready(out)

    assert out.shape == (batch, nclass, h, w), out.shape
    assert bool(jnp.all(jnp.isfinite(out)))
    print("KERNEL_OK")
</pallas_src>

<mosaic_0001>
module attributes {stable_mosaic.version = 11 : i64} {
  func.func @_matmul_affine_kernel(%arg0: i32, %arg1: i32, %arg2: i32, %arg3: memref<128x2048xbf16, #tpu.memory_space<vmem>>, %arg4: memref<2048x256xbf16, #tpu.memory_space<vmem>>, %arg5: memref<1x256xf32, #tpu.memory_space<vmem>>, %arg6: memref<1x256xf32, #tpu.memory_space<vmem>>, %arg7: memref<128x256xf32, #tpu.memory_space<vmem>>, %arg8: memref<128x256xf32, #tpu.memory_space<vmem>>) attributes {dimension_semantics = [#tpu.dimension_semantics<parallel>, #tpu.dimension_semantics<parallel>, #tpu.dimension_semantics<arbitrary>], iteration_bounds = array<i64: 1, 4, 1>, scalar_prefetch = 0 : i64, scratch_operands = 1 : i64, tpu.core_type = #tpu.core_type<tc>, window_params = [{transform_indices = @transform_0, window_bounds = array<i64: 128, 2048>}, {transform_indices = @transform_1, window_bounds = array<i64: 2048, 256>}, {transform_indices = @transform_2, window_bounds = array<i64: 1, 256>}, {transform_indices = @transform_3, window_bounds = array<i64: 1, 256>}, {transform_indices = @transform_4, window_bounds = array<i64: 128, 256>}]} {
    %c0_i32 = arith.constant 0 : i32
    %0 = arith.cmpi eq, %arg2, %c0_i32 : i32
    %1 = arith.extui %0 : i1 to i32
    %c0_i32_0 = arith.constant 0 : i32
    %2 = arith.cmpi ne, %1, %c0_i32_0 : i32
    scf.if %2 {
      %cst_10 = arith.constant 0.000000e+00 : f32
      %12 = vector.broadcast %cst_10 : f32 to vector<128x256xf32>
      %c0_11 = arith.constant 0 : index
      %c0_12 = arith.constant 0 : index
      %13 = vector.load %arg8[%c0_11, %c0_12] : memref<128x256xf32, #tpu.memory_space<vmem>>, vector<128x256xf32>
      tpu.vector_store %arg8[%c0_11, %c0_12], %12 {strides = array<i32>} : memref<128x256xf32, #tpu.memory_space<vmem>>, vector<128x256xf32>,
    } else {
    }
    %c0 = arith.constant 0 : index
    %c0_1 = arith.constant 0 : index
    %3 = vector.load %arg8[%c0, %c0_1] : memref<128x256xf32, #tpu.memory_space<vmem>>, vector<128x256xf32>
    %c0_2 = arith.constant 0 : index
    %c0_3 = arith.constant 0 : index
    %4 = vector.load %arg3[%c0_2, %c0_3] : memref<128x2048xbf16, #tpu.memory_space<vmem>>, vector<128x2048xbf16>
    %c0_4 = arith.constant 0 : index
    %c0_5 = arith.constant 0 : index
    %5 = vector.load %arg4[%c0_4, %c0_5] : memref<2048x256xbf16, #tpu.memory_space<vmem>>, vector<2048x256xbf16>
    %cst = arith.constant dense<0.000000e+00> : vector<128x256xf32>
    %6 = tpu.matmul %4, %5, %cst {dimension_numbers = #tpu.dot_dimension_numbers<[1], [0], [0], [1], [0, 0, 1, 1], [], []>} : vector<128x2048xbf16>, vector<2048x256xbf16>, vector<128x256xf32> -> vector<128x256xf32>
    %7 = arith.addf %3, %6 : vector<128x256xf32>
    %c0_6 = arith.constant 0 : index
    %c0_7 = arith.constant 0 : index
    %8 = vector.load %arg8[%c0_6, %c0_7] : memref<128x256xf32, #tpu.memory_space<vmem>>, vector<128x256xf32>
    tpu.vector_store %arg8[%c0_6, %c0_7], %7 {strides = array<i32>} : memref<128x256xf32, #tpu.memory_space<vmem>>, vector<128x256xf32>,
    %c0_i32_8 = arith.constant 0 : i32
    %9 = arith.cmpi eq, %arg2, %c0_i32_8 : i32
    %10 = arith.extui %9 : i1 to i32
    %c0_i32_9 = arith.constant 0 : i32
    %11 = arith.cmpi ne, %10, %c0_i32_9 : i32
    scf.if %11 {
      %c0_10 = arith.constant 0 : index
      %c0_11 = arith.constant 0 : index
      %12 = vector.load %arg8[%c0_10, %c0_11] : memref<128x256xf32, #tpu.memory_space<vmem>>, vector<128x256xf32>
      %c0_12 = arith.constant 0 : index
      %c0_13 = arith.constant 0 : index
      %13 = vector.load %arg5[%c0_12, %c0_13] : memref<1x256xf32, #tpu.memory_space<vmem>>, vector<1x256xf32>
      %14 = vector.broadcast %13 : vector<1x256xf32> to vector<128x256xf32>
      %15 = arith.mulf %12, %14 : vector<128x256xf32>
      %c0_14 = arith.constant 0 : index
      %c0_15 = arith.constant 0 : index
      %16 = vector.load %arg6[%c0_14, %c0_15] : memref<1x256xf32, #tpu.memory_space<vmem>>, vector<1x256xf32>
      %17 = vector.broadcast %16 : vector<1x256xf32> to vector<128x256xf32>
      %18 = arith.addf %15, %17 : vector<128x256xf32>
      %cst_16 = arith.constant 0.000000e+00 : f32
      %19 = vector.broadcast %cst_16 : f32 to vector<128x256xf32>
      %20 = arith.maximumf %18, %19 : vector<128x256xf32>
      %c0_17 = arith.constant 0 : index
      %c0_18 = arith.constant 0 : index
      %21 = vector.load %arg7[%c0_17, %c0_18] : memref<128x256xf32, #tpu.memory_space<vmem>>, vector<128x256xf32>
      tpu.vector_store %arg7[%c0_17, %c0_18], %20 {strides = array<i32>} : memref<128x256xf32, #tpu.memory_space<vmem>>, vector<128x256xf32>,
    } else {
    }
    return
  }
  func.func @transform_0(%arg0: i32, %arg1: i32, %arg2: i32) -> (i32, i32) {
    %c0_i32 = arith.constant 0 : i32
    return %arg0, %arg2 : i32, i32
  }
  func.func @transform_1(%arg0: i32, %arg1: i32, %arg2: i32) -> (i32, i32) {
    %c0_i32 = arith.constant 0 : i32
    return %arg2, %arg1 : i32, i32
  }
  func.func @transform_2(%arg0: i32, %arg1: i32, %arg2: i32) -> (i32, i32) {
    %c0_i32 = arith.constant 0 : i32
    %c0_i32_0 = arith.constant 0 : i32
    return %c0_i32, %arg1 : i32, i32
  }
  func.func @transform_3(%arg0: i32, %arg1: i32, %arg2: i32) -> (i32, i32) {
    %c0_i32 = arith.constant 0 : i32
    %c0_i32_0 = arith.constant 0 : i32
    return %c0_i32, %arg1 : i32, i32
  }
  func.func @transform_4(%arg0: i32, %arg1: i32, %arg2: i32) -> (i32, i32) {
    %c0_i32 = arith.constant 0 : i32
    return %arg0, %arg1 : i32, i32
  }
}

module attributes {stable_mosaic.version = 11 : i64} {
  func.func @_matmul_affine_kernel(%arg0: i32, %arg1: i32, %arg2: i32, %arg3: memref<128x1280xbf16, #tpu.memory_space<vmem>>, %arg4: memref<1280x256xbf16, #tpu.memory_space<vmem>>, %arg5: memref<1x256xf32, #tpu.memory_space<vmem>>, %arg6: memref<1x256xf32, #tpu.memory_space<vmem>>, %arg7: memref<128x256xf32, #tpu.memory_space<vmem>>, %arg8: memref<128x256xf32, #tpu.memory_space<vmem>>) attributes {dimension_semantics = [#tpu.dimension_semantics<parallel>, #tpu.dimension_semantics<parallel>, #tpu.dimension_semantics<arbitrary>], iteration_bounds = array<i64: 1, 1, 1>, scalar_prefetch = 0 : i64, scratch_operands = 1 : i64, tpu.core_type = #tpu.core_type<tc>, window_params = [{transform_indices = @transform_0, window_bounds = array<i64: 128, 1280>}, {transform_indices = @transform_1, window_bounds = array<i64: 1280, 256>}, {transform_indices = @transform_2, window_bounds = array<i64: 1, 256>}, {transform_indices = @transform_3, window_bounds = array<i64: 1, 256>}, {transform_indices = @transform_4, window_bounds = array<i64: 128, 256>}]} {
    %c0_i32 = arith.constant 0 : i32
    %0 = arith.cmpi eq, %arg2, %c0_i32 : i32
    %1 = arith.extui %0 : i1 to i32
    %c0_i32_0 = arith.constant 0 : i32
    %2 = arith.cmpi ne, %1, %c0_i32_0 : i32
    scf.if %2 {
      %cst_10 = arith.constant 0.000000e+00 : f32
      %12 = vector.broadcast %cst_10 : f32 to vector<128x256xf32>
      %c0_11 = arith.constant 0 : index
      %c0_12 = arith.constant 0 : index
      %13 = vector.load %arg8[%c0_11, %c0_12] : memref<128x256xf32, #tpu.memory_space<vmem>>, vector<128x256xf32>
      tpu.vector_store %arg8[%c0_11, %c0_12], %12 {strides = array<i32>} : memref<128x256xf32, #tpu.memory_space<vmem>>, vector<128x256xf32>,
    } else {
    }
    %c0 = arith.constant 0 : index
    %c0_1 = arith.constant 0 : index
    %3 = vector.load %arg8[%c0, %c0_1] : memref<128x256xf32, #tpu.memory_space<vmem>>, vector<128x256xf32>
    %c0_2 = arith.constant 0 : index
    %c0_3 = arith.constant 0 : index
    %4 = vector.load %arg3[%c0_2, %c0_3] : memref<128x1280xbf16, #tpu.memory_space<vmem>>, vector<128x1280xbf16>
    %c0_4 = arith.constant 0 : index
    %c0_5 = arith.constant 0 : index
    %5 = vector.load %arg4[%c0_4, %c0_5] : memref<1280x256xbf16, #tpu.memory_space<vmem>>, vector<1280x256xbf16>
    %cst = arith.constant dense<0.000000e+00> : vector<128x256xf32>
    %6 = tpu.matmul %4, %5, %cst {dimension_numbers = #tpu.dot_dimension_numbers<[1], [0], [0], [1], [0, 0, 1, 1], [], []>} : vector<128x1280xbf16>, vector<1280x256xbf16>, vector<128x256xf32> -> vector<128x256xf32>
    %7 = arith.addf %3, %6 : vector<128x256xf32>
    %c0_6 = arith.constant 0 : index
    %c0_7 = arith.constant 0 : index
    %8 = vector.load %arg8[%c0_6, %c0_7] : memref<128x256xf32, #tpu.memory_space<vmem>>, vector<128x256xf32>
    tpu.vector_store %arg8[%c0_6, %c0_7], %7 {strides = array<i32>} : memref<128x256xf32, #tpu.memory_space<vmem>>, vector<128x256xf32>,
    %c0_i32_8 = arith.constant 0 : i32
    %9 = arith.cmpi eq, %arg2, %c0_i32_8 : i32
    %10 = arith.extui %9 : i1 to i32
    %c0_i32_9 = arith.constant 0 : i32
    %11 = arith.cmpi ne, %10, %c0_i32_9 : i32
    scf.if %11 {
      %c0_10 = arith.constant 0 : index
      %c0_11 = arith.constant 0 : index
      %12 = vector.load %arg8[%c0_10, %c0_11] : memref<128x256xf32, #tpu.memory_space<vmem>>, vector<128x256xf32>
      %c0_12 = arith.constant 0 : index
      %c0_13 = arith.constant 0 : index
      %13 = vector.load %arg5[%c0_12, %c0_13] : memref<1x256xf32, #tpu.memory_space<vmem>>, vector<1x256xf32>
      %14 = vector.broadcast %13 : vector<1x256xf32> to vector<128x256xf32>
      %15 = arith.mulf %12, %14 : vector<128x256xf32>
      %c0_14 = arith.constant 0 : index
      %c0_15 = arith.constant 0 : index
      %16 = vector.load %arg6[%c0_14, %c0_15] : memref<1x256xf32, #tpu.memory_space<vmem>>, vector<1x256xf32>
      %17 = vector.broadcast %16 : vector<1x256xf32> to vector<128x256xf32>
      %18 = arith.addf %15, %17 : vector<128x256xf32>
      %cst_16 = arith.constant 0.000000e+00 : f32
      %19 = vector.broadcast %cst_16 : f32 to vector<128x256xf32>
      %20 = arith.maximumf %18, %19 : vector<128x256xf32>
      %c0_17 = arith.constant 0 : index
      %c0_18 = arith.constant 0 : index
      %21 = vector.load %arg7[%c0_17, %c0_18] : memref<128x256xf32, #tpu.memory_space<vmem>>, vector<128x256xf32>
      tpu.vector_store %arg7[%c0_17, %c0_18], %20 {strides = array<i32>} : memref<128x256xf32, #tpu.memory_space<vmem>>, vector<128x256xf32>,
    } else {
    }
    return
  }
  func.func @transform_0(%arg0: i32, %arg1: i32, %arg2: i32) -> (i32, i32) {
    %c0_i32 = arith.constant 0 : i32
    return %arg0, %arg2 : i32, i32
  }
  func.func @transform_1(%arg0: i32, %arg1: i32, %arg2: i32) -> (i32, i32) {
    %c0_i32 = arith.constant 0 : i32
    return %arg2, %arg1 : i32, i32
  }
  func.func @transform_2(%arg0: i32, %arg1: i32, %arg2: i32) -> (i32, i32) {
    %c0_i32 = arith.constant 0 : i32
    %c0_i32_0 = arith.constant 0 : i32
    return %c0_i32, %arg1 : i32, i32
  }
  func.func @transform_3(%arg0: i32, %arg1: i32, %arg2: i32) -> (i32, i32) {
    %c0_i32 = arith.constant 0 : i32
    %c0_i32_0 = arith.constant 0 : i32
    return %c0_i32, %arg1 : i32, i32
  }
  func.func @transform_4(%arg0: i32, %arg1: i32, %arg2: i32) -> (i32, i32) {
    %c0_i32 = arith.constant 0 : i32
    return %arg0, %arg1 : i32, i32
  }
}

module attributes {stable_mosaic.version = 11 : i64} {
  func.func @_matmul_affine_kernel(%arg0: i32, %arg1: i32, %arg2: i32, %arg3: memref<128x256xbf16, #tpu.memory_space<vmem>>, %arg4: memref<256x128xbf16, #tpu.memory_space<vmem>>, %arg5: memref<1x128xf32, #tpu.memory_space<vmem>>, %arg6: memref<1x128xf32, #tpu.memory_space<vmem>>, %arg7: memref<128x128xf32, #tpu.memory_space<vmem>>, %arg8: memref<128x128xf32, #tpu.memory_space<vmem>>) attributes {dimension_semantics = [#tpu.dimension_semantics<parallel>, #tpu.dimension_semantics<parallel>, #tpu.dimension_semantics<arbitrary>], iteration_bounds = array<i64: 4, 1, 1>, scalar_prefetch = 0 : i64, scratch_operands = 1 : i64, tpu.core_type = #tpu.core_type<tc>, window_params = [{transform_indices = @transform_0, window_bounds = array<i64: 128, 256>}, {transform_indices = @transform_1, window_bounds = array<i64: 256, 128>}, {transform_indices = @transform_2, window_bounds = array<i64: 1, 128>}, {transform_indices = @transform_3, window_bounds = array<i64: 1, 128>}, {transform_indices = @transform_4, window_bounds = array<i64: 128, 128>}]} {
    %c0_i32 = arith.constant 0 : i32
    %0 = arith.cmpi eq, %arg2, %c0_i32 : i32
    %1 = arith.extui %0 : i1 to i32
    %c0_i32_0 = arith.constant 0 : i32
    %2 = arith.cmpi ne, %1, %c0_i32_0 : i32
    scf.if %2 {
      %cst_10 = arith.constant 0.000000e+00 : f32
      %12 = vector.broadcast %cst_10 : f32 to vector<128x128xf32>
      %c0_11 = arith.constant 0 : index
      %c0_12 = arith.constant 0 : index
      %13 = vector.load %arg8[%c0_11, %c0_12] : memref<128x128xf32, #tpu.memory_space<vmem>>, vector<128x128xf32>
      tpu.vector_store %arg8[%c0_11, %c0_12], %12 {strides = array<i32>} : memref<128x128xf32, #tpu.memory_space<vmem>>, vector<128x128xf32>,
    } else {
    }
    %c0 = arith.constant 0 : index
    %c0_1 = arith.constant 0 : index
    %3 = vector.load %arg8[%c0, %c0_1] : memref<128x128xf32, #tpu.memory_space<vmem>>, vector<128x128xf32>
    %c0_2 = arith.constant 0 : index
    %c0_3 = arith.constant 0 : index
    %4 = vector.load %arg3[%c0_2, %c0_3] : memref<128x256xbf16, #tpu.memory_space<vmem>>, vector<128x256xbf16>
    %c0_4 = arith.constant 0 : index
    %c0_5 = arith.constant 0 : index
    %5 = vector.load %arg4[%c0_4, %c0_5] : memref<256x128xbf16, #tpu.memory_space<vmem>>, vector<256x128xbf16>
    %cst = arith.constant dense<0.000000e+00> : vector<128x128xf32>
    %6 = tpu.matmul %4, %5, %cst {dimension_numbers = #tpu.dot_dimension_numbers<[1], [0], [0], [1], [0, 0, 1, 1], [], []>} : vector<128x256xbf16>, vector<256x128xbf16>, vector<128x128xf32> -> vector<128x128xf32>
    %7 = arith.addf %3, %6 : vector<128x128xf32>
    %c0_6 = arith.constant 0 : index
    %c0_7 = arith.constant 0 : index
    %8 = vector.load %arg8[%c0_6, %c0_7] : memref<128x128xf32, #tpu.memory_space<vmem>>, vector<128x128xf32>
    tpu.vector_store %arg8[%c0_6, %c0_7], %7 {strides = array<i32>} : memref<128x128xf32, #tpu.memory_space<vmem>>, vector<128x128xf32>,
    %c0_i32_8 = arith.constant 0 : i32
    %9 = arith.cmpi eq, %arg2, %c0_i32_8 : i32
    %10 = arith.extui %9 : i1 to i32
    %c0_i32_9 = arith.constant 0 : i32
    %11 = arith.cmpi ne, %10, %c0_i32_9 : i32
    scf.if %11 {
      %c0_10 = arith.constant 0 : index
      %c0_11 = arith.constant 0 : index
      %12 = vector.load %arg8[%c0_10, %c0_11] : memref<128x128xf32, #tpu.memory_space<vmem>>, vector<128x128xf32>
      %c0_12 = arith.constant 0 : index
      %c0_13 = arith.constant 0 : index
      %13 = vector.load %arg5[%c0_12, %c0_13] : memref<1x128xf32, #tpu.memory_space<vmem>>, vector<1x128xf32>
      %14 = vector.broadcast %13 : vector<1x128xf32> to vector<128x128xf32>
      %15 = arith.mulf %12, %14 : vector<128x128xf32>
      %c0_14 = arith.constant 0 : index
      %c0_15 = arith.constant 0 : index
      %16 = vector.load %arg6[%c0_14, %c0_15] : memref<1x128xf32, #tpu.memory_space<vmem>>, vector<1x128xf32>
      %17 = vector.broadcast %16 : vector<1x128xf32> to vector<128x128xf32>
      %18 = arith.addf %15, %17 : vector<128x128xf32>
      %cst_16 = arith.constant 0.000000e+00 : f32
      %19 = vector.broadcast %cst_16 : f32 to vector<128x128xf32>
      %20 = arith.maximumf %18, %19 : vector<128x128xf32>
      %c0_17 = arith.constant 0 : index
      %c0_18 = arith.constant 0 : index
      %21 = vector.load %arg7[%c0_17, %c0_18] : memref<128x128xf32, #tpu.memory_space<vmem>>, vector<128x128xf32>
      tpu.vector_store %arg7[%c0_17, %c0_18], %20 {strides = array<i32>} : memref<128x128xf32, #tpu.memory_space<vmem>>, vector<128x128xf32>,
    } else {
    }
    return
  }
  func.func @transform_0(%arg0: i32, %arg1: i32, %arg2: i32) -> (i32, i32) {
    %c0_i32 = arith.constant 0 : i32
    return %arg0, %arg2 : i32, i32
  }
  func.func @transform_1(%arg0: i32, %arg1: i32, %arg2: i32) -> (i32, i32) {
    %c0_i32 = arith.constant 0 : i32
    return %arg2, %arg1 : i32, i32
  }
  func.func @transform_2(%arg0: i32, %arg1: i32, %arg2: i32) -> (i32, i32) {
    %c0_i32 = arith.constant 0 : i32
    %c0_i32_0 = arith.constant 0 : i32
    return %c0_i32, %arg1 : i32, i32
  }
  func.func @transform_3(%arg0: i32, %arg1: i32, %arg2: i32) -> (i32, i32) {
    %c0_i32 = arith.constant 0 : i32
    %c0_i32_0 = arith.constant 0 : i32
    return %c0_i32, %arg1 : i32, i32
  }
  func.func @transform_4(%arg0: i32, %arg1: i32, %arg2: i32) -> (i32, i32) {
    %c0_i32 = arith.constant 0 : i32
    return %arg0, %arg1 : i32, i32
  }
}

module attributes {stable_mosaic.version = 11 : i64} {
  func.func @_matmul_affine_kernel(%arg0: i32, %arg1: i32, %arg2: i32, %arg3: memref<128x2816xbf16, #tpu.memory_space<vmem>>, %arg4: memref<2816x256xbf16, #tpu.memory_space<vmem>>, %arg5: memref<1x256xf32, #tpu.memory_space<vmem>>, %arg6: memref<1x256xf32, #tpu.memory_space<vmem>>, %arg7: memref<128x256xf32, #tpu.memory_space<vmem>>, %arg8: memref<128x256xf32, #tpu.memory_space<vmem>>) attributes {dimension_semantics = [#tpu.dimension_semantics<parallel>, #tpu.dimension_semantics<parallel>, #tpu.dimension_semantics<arbitrary>], iteration_bounds = array<i64: 4, 1, 1>, scalar_prefetch = 0 : i64, scratch_operands = 1 : i64, tpu.core_type = #tpu.core_type<tc>, window_params = [{transform_indices = @transform_0, window_bounds = array<i64: 128, 2816>}, {transform_indices = @transform_1, window_bounds = array<i64: 2816, 256>}, {transform_indices = @transform_2, window_bounds = array<i64: 1, 256>}, {transform_indices = @transform_3, window_bounds = array<i64: 1, 256>}, {transform_indices = @transform_4, window_bounds = array<i64: 128, 256>}]} {
    %c0_i32 = arith.constant 0 : i32
    %0 = arith.cmpi eq, %arg2, %c0_i32 : i32
    %1 = arith.extui %0 : i1 to i32
    %c0_i32_0 = arith.constant 0 : i32
    %2 = arith.cmpi ne, %1, %c0_i32_0 : i32
    scf.if %2 {
      %cst_10 = arith.constant 0.000000e+00 : f32
      %12 = vector.broadcast %cst_10 : f32 to vector<128x256xf32>
      %c0_11 = arith.constant 0 : index
      %c0_12 = arith.constant 0 : index
      %13 = vector.load %arg8[%c0_11, %c0_12] : memref<128x256xf32, #tpu.memory_space<vmem>>, vector<128x256xf32>
      tpu.vector_store %arg8[%c0_11, %c0_12], %12 {strides = array<i32>} : memref<128x256xf32, #tpu.memory_space<vmem>>, vector<128x256xf32>,
    } else {
    }
    %c0 = arith.constant 0 : index
    %c0_1 = arith.constant 0 : index
    %3 = vector.load %arg8[%c0, %c0_1] : memref<128x256xf32, #tpu.memory_space<vmem>>, vector<128x256xf32>
    %c0_2 = arith.constant 0 : index
    %c0_3 = arith.constant 0 : index
    %4 = vector.load %arg3[%c0_2, %c0_3] : memref<128x2816xbf16, #tpu.memory_space<vmem>>, vector<128x2816xbf16>
    %c0_4 = arith.constant 0 : index
    %c0_5 = arith.constant 0 : index
    %5 = vector.load %arg4[%c0_4, %c0_5] : memref<2816x256xbf16, #tpu.memory_space<vmem>>, vector<2816x256xbf16>
    %cst = arith.constant dense<0.000000e+00> : vector<128x256xf32>
    %6 = tpu.matmul %4, %5, %cst {dimension_numbers = #tpu.dot_dimension_numbers<[1], [0], [0], [1], [0, 0, 1, 1], [], []>} : vector<128x2816xbf16>, vector<2816x256xbf16>, vector<128x256xf32> -> vector<128x256xf32>
    %7 = arith.addf %3, %6 : vector<128x256xf32>
    %c0_6 = arith.constant 0 : index
    %c0_7 = arith.constant 0 : index
    %8 = vector.load %arg8[%c0_6, %c0_7] : memref<128x256xf32, #tpu.memory_space<vmem>>, vector<128x256xf32>
    tpu.vector_store %arg8[%c0_6, %c0_7], %7 {strides = array<i32>} : memref<128x256xf32, #tpu.memory_space<vmem>>, vector<128x256xf32>,
    %c0_i32_8 = arith.constant 0 : i32
    %9 = arith.cmpi eq, %arg2, %c0_i32_8 : i32
    %10 = arith.extui %9 : i1 to i32
    %c0_i32_9 = arith.constant 0 : i32
    %11 = arith.cmpi ne, %10, %c0_i32_9 : i32
    scf.if %11 {
      %c0_10 = arith.constant 0 : index
      %c0_11 = arith.constant 0 : index
      %12 = vector.load %arg8[%c0_10, %c0_11] : memref<128x256xf32, #tpu.memory_space<vmem>>, vector<128x256xf32>
      %c0_12 = arith.constant 0 : index
      %c0_13 = arith.constant 0 : index
      %13 = vector.load %arg5[%c0_12, %c0_13] : memref<1x256xf32, #tpu.memory_space<vmem>>, vector<1x256xf32>
      %14 = vector.broadcast %13 : vector<1x256xf32> to vector<128x256xf32>
      %15 = arith.mulf %12, %14 : vector<128x256xf32>
      %c0_14 = arith.constant 0 : index
      %c0_15 = arith.constant 0 : index
      %16 = vector.load %arg6[%c0_14, %c0_15] : memref<1x256xf32, #tpu.memory_space<vmem>>, vector<1x256xf32>
      %17 = vector.broadcast %16 : vector<1x256xf32> to vector<128x256xf32>
      %18 = arith.addf %15, %17 : vector<128x256xf32>
      %cst_16 = arith.constant 0.000000e+00 : f32
      %19 = vector.broadcast %cst_16 : f32 to vector<128x256xf32>
      %20 = arith.maximumf %18, %19 : vector<128x256xf32>
      %c0_17 = arith.constant 0 : index
      %c0_18 = arith.constant 0 : index
      %21 = vector.load %arg7[%c0_17, %c0_18] : memref<128x256xf32, #tpu.memory_space<vmem>>, vector<128x256xf32>
      tpu.vector_store %arg7[%c0_17, %c0_18], %20 {strides = array<i32>} : memref<128x256xf32, #tpu.memory_space<vmem>>, vector<128x256xf32>,
    } else {
    }
    return
  }
  func.func @transform_0(%arg0: i32, %arg1: i32, %arg2: i32) -> (i32, i32) {
    %c0_i32 = arith.constant 0 : i32
    return %arg0, %arg2 : i32, i32
  }
  func.func @transform_1(%arg0: i32, %arg1: i32, %arg2: i32) -> (i32, i32) {
    %c0_i32 = arith.constant 0 : i32
    return %arg2, %arg1 : i32, i32
  }
  func.func @transform_2(%arg0: i32, %arg1: i32, %arg2: i32) -> (i32, i32) {
    %c0_i32 = arith.constant 0 : i32
    %c0_i32_0 = arith.constant 0 : i32
    return %c0_i32, %arg1 : i32, i32
  }
  func.func @transform_3(%arg0: i32, %arg1: i32, %arg2: i32) -> (i32, i32) {
    %c0_i32 = arith.constant 0 : i32
    %c0_i32_0 = arith.constant 0 : i32
    return %c0_i32, %arg1 : i32, i32
  }
  func.func @transform_4(%arg0: i32, %arg1: i32, %arg2: i32) -> (i32, i32) {
    %c0_i32 = arith.constant 0 : i32
    return %arg0, %arg1 : i32, i32
  }
}

module attributes {stable_mosaic.version = 11 : i64} {
  func.func @_matmul_affine_kernel(%arg0: i32, %arg1: i32, %arg2: i32, %arg3: memref<128x2304xbf16, #tpu.memory_space<vmem>>, %arg4: memref<2304x256xbf16, #tpu.memory_space<vmem>>, %arg5: memref<1x256xf32, #tpu.memory_space<vmem>>, %arg6: memref<1x256xf32, #tpu.memory_space<vmem>>, %arg7: memref<128x256xf32, #tpu.memory_space<vmem>>, %arg8: memref<128x256xf32, #tpu.memory_space<vmem>>) attributes {dimension_semantics = [#tpu.dimension_semantics<parallel>, #tpu.dimension_semantics<parallel>, #tpu.dimension_semantics<arbitrary>], iteration_bounds = array<i64: 4, 1, 1>, scalar_prefetch = 0 : i64, scratch_operands = 1 : i64, tpu.core_type = #tpu.core_type<tc>, window_params = [{transform_indices = @transform_0, window_bounds = array<i64: 128, 2304>}, {transform_indices = @transform_1, window_bounds = array<i64: 2304, 256>}, {transform_indices = @transform_2, window_bounds = array<i64: 1, 256>}, {transform_indices = @transform_3, window_bounds = array<i64: 1, 256>}, {transform_indices = @transform_4, window_bounds = array<i64: 128, 256>}]} {
    %c0_i32 = arith.constant 0 : i32
    %0 = arith.cmpi eq, %arg2, %c0_i32 : i32
    %1 = arith.extui %0 : i1 to i32
    %c0_i32_0 = arith.constant 0 : i32
    %2 = arith.cmpi ne, %1, %c0_i32_0 : i32
    scf.if %2 {
      %cst_10 = arith.constant 0.000000e+00 : f32
      %12 = vector.broadcast %cst_10 : f32 to vector<128x256xf32>
      %c0_11 = arith.constant 0 : index
      %c0_12 = arith.constant 0 : index
      %13 = vector.load %arg8[%c0_11, %c0_12] : memref<128x256xf32, #tpu.memory_space<vmem>>, vector<128x256xf32>
      tpu.vector_store %arg8[%c0_11, %c0_12], %12 {strides = array<i32>} : memref<128x256xf32, #tpu.memory_space<vmem>>, vector<128x256xf32>,
    } else {
    }
    %c0 = arith.constant 0 : index
    %c0_1 = arith.constant 0 : index
    %3 = vector.load %arg8[%c0, %c0_1] : memref<128x256xf32, #tpu.memory_space<vmem>>, vector<128x256xf32>
    %c0_2 = arith.constant 0 : index
    %c0_3 = arith.constant 0 : index
    %4 = vector.load %arg3[%c0_2, %c0_3] : memref<128x2304xbf16, #tpu.memory_space<vmem>>, vector<128x2304xbf16>
    %c0_4 = arith.constant 0 : index
    %c0_5 = arith.constant 0 : index
    %5 = vector.load %arg4[%c0_4, %c0_5] : memref<2304x256xbf16, #tpu.memory_space<vmem>>, vector<2304x256xbf16>
    %cst = arith.constant dense<0.000000e+00> : vector<128x256xf32>
    %6 = tpu.matmul %4, %5, %cst {dimension_numbers = #tpu.dot_dimension_numbers<[1], [0], [0], [1], [0, 0, 1, 1], [], []>} : vector<128x2304xbf16>, vector<2304x256xbf16>, vector<128x256xf32> -> vector<128x256xf32>
    %7 = arith.addf %3, %6 : vector<128x256xf32>
    %c0_6 = arith.constant 0 : index
    %c0_7 = arith.constant 0 : index
    %8 = vector.load %arg8[%c0_6, %c0_7] : memref<128x256xf32, #tpu.memory_space<vmem>>, vector<128x256xf32>
    tpu.vector_store %arg8[%c0_6, %c0_7], %7 {strides = array<i32>} : memref<128x256xf32, #tpu.memory_space<vmem>>, vector<128x256xf32>,
    %c0_i32_8 = arith.constant 0 : i32
    %9 = arith.cmpi eq, %arg2, %c0_i32_8 : i32
    %10 = arith.extui %9 : i1 to i32
    %c0_i32_9 = arith.constant 0 : i32
    %11 = arith.cmpi ne, %10, %c0_i32_9 : i32
    scf.if %11 {
      %c0_10 = arith.constant 0 : index
      %c0_11 = arith.constant 0 : index
      %12 = vector.load %arg8[%c0_10, %c0_11] : memref<128x256xf32, #tpu.memory_space<vmem>>, vector<128x256xf32>
      %c0_12 = arith.constant 0 : index
      %c0_13 = arith.constant 0 : index
      %13 = vector.load %arg5[%c0_12, %c0_13] : memref<1x256xf32, #tpu.memory_space<vmem>>, vector<1x256xf32>
      %14 = vector.broadcast %13 : vector<1x256xf32> to vector<128x256xf32>
      %15 = arith.mulf %12, %14 : vector<128x256xf32>
      %c0_14 = arith.constant 0 : index
      %c0_15 = arith.constant 0 : index
      %16 = vector.load %arg6[%c0_14, %c0_15] : memref<1x256xf32, #tpu.memory_space<vmem>>, vector<1x256xf32>
      %17 = vector.broadcast %16 : vector<1x256xf32> to vector<128x256xf32>
      %18 = arith.addf %15, %17 : vector<128x256xf32>
      %cst_16 = arith.constant 0.000000e+00 : f32
      %19 = vector.broadcast %cst_16 : f32 to vector<128x256xf32>
      %20 = arith.maximumf %18, %19 : vector<128x256xf32>
      %c0_17 = arith.constant 0 : index
      %c0_18 = arith.constant 0 : index
      %21 = vector.load %arg7[%c0_17, %c0_18] : memref<128x256xf32, #tpu.memory_space<vmem>>, vector<128x256xf32>
      tpu.vector_store %arg7[%c0_17, %c0_18], %20 {strides = array<i32>} : memref<128x256xf32, #tpu.memory_space<vmem>>, vector<128x256xf32>,
    } else {
    }
    return
  }
  func.func @transform_0(%arg0: i32, %arg1: i32, %arg2: i32) -> (i32, i32) {
    %c0_i32 = arith.constant 0 : i32
    return %arg0, %arg2 : i32, i32
  }
  func.func @transform_1(%arg0: i32, %arg1: i32, %arg2: i32) -> (i32, i32) {
    %c0_i32 = arith.constant 0 : i32
    return %arg2, %arg1 : i32, i32
  }
  func.func @transform_2(%arg0: i32, %arg1: i32, %arg2: i32) -> (i32, i32) {
    %c0_i32 = arith.constant 0 : i32
    %c0_i32_0 = arith.constant 0 : i32
    return %c0_i32, %arg1 : i32, i32
  }
  func.func @transform_3(%arg0: i32, %arg1: i32, %arg2: i32) -> (i32, i32) {
    %c0_i32 = arith.constant 0 : i32
    %c0_i32_0 = arith.constant 0 : i32
    return %c0_i32, %arg1 : i32, i32
  }
  func.func @transform_4(%arg0: i32, %arg1: i32, %arg2: i32) -> (i32, i32) {
    %c0_i32 = arith.constant 0 : i32
    return %arg0, %arg1 : i32, i32
  }
}

module attributes {stable_mosaic.version = 11 : i64} {
  func.func @_matmul_affine_kernel(%arg0: i32, %arg1: i32, %arg2: i32, %arg3: memref<128x256xbf16, #tpu.memory_space<vmem>>, %arg4: memref<256x128xbf16, #tpu.memory_space<vmem>>, %arg5: memref<1x128xf32, #tpu.memory_space<vmem>>, %arg6: memref<1x128xf32, #tpu.memory_space<vmem>>, %arg7: memref<128x128xf32, #tpu.memory_space<vmem>>, %arg8: memref<128x128xf32, #tpu.memory_space<vmem>>) attributes {dimension_semantics = [#tpu.dimension_semantics<parallel>, #tpu.dimension_semantics<parallel>, #tpu.dimension_semantics<arbitrary>], iteration_bounds = array<i64: 4, 1, 1>, scalar_prefetch = 0 : i64, scratch_operands = 1 : i64, tpu.core_type = #tpu.core_type<tc>, window_params = [{transform_indices = @transform_0, window_bounds = array<i64: 128, 256>}, {transform_indices = @transform_1, window_bounds = array<i64: 256, 128>}, {transform_indices = @transform_2, window_bounds = array<i64: 1, 128>}, {transform_indices = @transform_3, window_bounds = array<i64: 1, 128>}, {transform_indices = @transform_4, window_bounds = array<i64: 128, 128>}]} {
    %c0_i32 = arith.constant 0 : i32
    %0 = arith.cmpi eq, %arg2, %c0_i32 : i32
    %1 = arith.extui %0 : i1 to i32
    %c0_i32_0 = arith.constant 0 : i32
    %2 = arith.cmpi ne, %1, %c0_i32_0 : i32
    scf.if %2 {
      %cst_10 = arith.constant 0.000000e+00 : f32
      %12 = vector.broadcast %cst_10 : f32 to vector<128x128xf32>
      %c0_11 = arith.constant 0 : index
      %c0_12 = arith.constant 0 : index
      %13 = vector.load %arg8[%c0_11, %c0_12] : memref<128x128xf32, #tpu.memory_space<vmem>>, vector<128x128xf32>
      tpu.vector_store %arg8[%c0_11, %c0_12], %12 {strides = array<i32>} : memref<128x128xf32, #tpu.memory_space<vmem>>, vector<128x128xf32>,
    } else {
    }
    %c0 = arith.constant 0 : index
    %c0_1 = arith.constant 0 : index
    %3 = vector.load %arg8[%c0, %c0_1] : memref<128x128xf32, #tpu.memory_space<vmem>>, vector<128x128xf32>
    %c0_2 = arith.constant 0 : index
    %c0_3 = arith.constant 0 : index
    %4 = vector.load %arg3[%c0_2, %c0_3] : memref<128x256xbf16, #tpu.memory_space<vmem>>, vector<128x256xbf16>
    %c0_4 = arith.constant 0 : index
    %c0_5 = arith.constant 0 : index
    %5 = vector.load %arg4[%c0_4, %c0_5] : memref<256x128xbf16, #tpu.memory_space<vmem>>, vector<256x128xbf16>
    %cst = arith.constant dense<0.000000e+00> : vector<128x128xf32>
    %6 = tpu.matmul %4, %5, %cst {dimension_numbers = #tpu.dot_dimension_numbers<[1], [0], [0], [1], [0, 0, 1, 1], [], []>} : vector<128x256xbf16>, vector<256x128xbf16>, vector<128x128xf32> -> vector<128x128xf32>
    %7 = arith.addf %3, %6 : vector<128x128xf32>
    %c0_6 = arith.constant 0 : index
    %c0_7 = arith.constant 0 : index
    %8 = vector.load %arg8[%c0_6, %c0_7] : memref<128x128xf32, #tpu.memory_space<vmem>>, vector<128x128xf32>
    tpu.vector_store %arg8[%c0_6, %c0_7], %7 {strides = array<i32>} : memref<128x128xf32, #tpu.memory_space<vmem>>, vector<128x128xf32>,
    %c0_i32_8 = arith.constant 0 : i32
    %9 = arith.cmpi eq, %arg2, %c0_i32_8 : i32
    %10 = arith.extui %9 : i1 to i32
    %c0_i32_9 = arith.constant 0 : i32
    %11 = arith.cmpi ne, %10, %c0_i32_9 : i32
    scf.if %11 {
      %c0_10 = arith.constant 0 : index
      %c0_11 = arith.constant 0 : index
      %12 = vector.load %arg8[%c0_10, %c0_11] : memref<128x128xf32, #tpu.memory_space<vmem>>, vector<128x128xf32>
      %c0_12 = arith.constant 0 : index
      %c0_13 = arith.constant 0 : index
      %13 = vector.load %arg5[%c0_12, %c0_13] : memref<1x128xf32, #tpu.memory_space<vmem>>, vector<1x128xf32>
      %14 = vector.broadcast %13 : vector<1x128xf32> to vector<128x128xf32>
      %15 = arith.mulf %12, %14 : vector<128x128xf32>
      %c0_14 = arith.constant 0 : index
      %c0_15 = arith.constant 0 : index
      %16 = vector.load %arg6[%c0_14, %c0_15] : memref<1x128xf32, #tpu.memory_space<vmem>>, vector<1x128xf32>
      %17 = vector.broadcast %16 : vector<1x128xf32> to vector<128x128xf32>
      %18 = arith.addf %15, %17 : vector<128x128xf32>
      %c0_16 = arith.constant 0 : index
      %c0_17 = arith.constant 0 : index
      %19 = vector.load %arg7[%c0_16, %c0_17] : memref<128x128xf32, #tpu.memory_space<vmem>>, vector<128x128xf32>
      tpu.vector_store %arg7[%c0_16, %c0_17], %18 {strides = array<i32>} : memref<128x128xf32, #tpu.memory_space<vmem>>, vector<128x128xf32>,
    } else {
    }
    return
  }
  func.func @transform_0(%arg0: i32, %arg1: i32, %arg2: i32) -> (i32, i32) {
    %c0_i32 = arith.constant 0 : i32
    return %arg0, %arg2 : i32, i32
  }
  func.func @transform_1(%arg0: i32, %arg1: i32, %arg2: i32) -> (i32, i32) {
    %c0_i32 = arith.constant 0 : i32
    return %arg2, %arg1 : i32, i32
  }
  func.func @transform_2(%arg0: i32, %arg1: i32, %arg2: i32) -> (i32, i32) {
    %c0_i32 = arith.constant 0 : i32
    %c0_i32_0 = arith.constant 0 : i32
    return %c0_i32, %arg1 : i32, i32
  }
  func.func @transform_3(%arg0: i32, %arg1: i32, %arg2: i32) -> (i32, i32) {
    %c0_i32 = arith.constant 0 : i32
    %c0_i32_0 = arith.constant 0 : i32
    return %c0_i32, %arg1 : i32, i32
  }
  func.func @transform_4(%arg0: i32, %arg1: i32, %arg2: i32) -> (i32, i32) {
    %c0_i32 = arith.constant 0 : i32
    return %arg0, %arg1 : i32, i32
  }
}

</mosaic_0001>

<bundles_post_ra>
// kernel: deeplabv3plus_forward.6
= control target key start
LH: loop header
LB: loop body
LE: loop exit
PB: predicated region body
PF: predicated region fallthrough
CT: control target
= control target key end

     0   :  { %s6525_s0 = inlined_call_operand.vmem [shape: bf16[128,2048], index: 0, kind: input, shape index: {}]   ;;  %s6526_s1 = inlined_call_operand.hbm [shape: bf16[2048,1024], index: 1, kind: input, shape index: {}]   ;;  %s6527_s2 = inlined_call_operand.hbm [shape: f32[1,1024], index: 2, kind: input, shape index: {}]   ;;  %s6528_s3 = inlined_call_operand.hbm [shape: f32[1,1024], index: 3, kind: input, shape index: {}]   ;;  %s6529_s4 = inlined_call_operand.vmem [shape: f32[128,1024], index: 4, kind: output, shape index: {}]  }
   0x1   :  { %6531 = sst [smem:[#allocation57_spill]] %s6526_s1 }
   0x2   :  { %9 = vsyncpa [#allocation4], 0 }
   0x3   :  { %11 = vsyncpa [#allocation4 + $0x1], 0 }
   0x4   :  { %12 = vsyncpa [#allocation6], 0 }
   0x5   :  { %14 = vsyncpa [#allocation6 + $0x1], 0  ;;  %s5155_s15 = smov 0   ;;  %s5157_s16 = smov 0  }
   0x6   :  { %s5159_s17 = smov 0   ;;  %s5161_s18 = smov 0  }
   0x7   :  { %s5163_s19 = smov 0   ;;  %s5165_s20 = smov 0  }
   0x8 LB: > { %s5184_s21 = sadd.s32 4294967295, %s5122_s20   ;;  %s35_s22 = sadd.s32 1, %s5118_s19  ;;  %s5122_s20 = sphi %s5165_s20, %s20_s20   ;;  %s5118_s19 = sphi %s5163_s19, %s6634_s19   ;;  %s5114_s18 = sphi %s5161_s18, %s6633_s18   ;;  %s5110_s17 = sphi %s5159_s17, %s6632_s17   ;;  %s5106_s16 = sphi %s5157_s16, %s6631_s16   ;;  %s5102_s15 = sphi %s5155_s15, %s6630_s15  }
   0x9   : > { %p37_p0 = scmp.ge.s32.totalorder %s35_s22, 4  ;;  %s76_s23 = sadd.s32 1, %s5110_s17 }
   0xa   : > { %p83_p1 = scmp.ne.s32.totalorder %s5110_s17, %s5106_s16  ;;  %p84_p2 = scmp.eq.s32.totalorder %s5122_s20, 0 }
   0xb   : > { %s6636_s22 = smov (%p37_p0, %s35_s22), 0  ;;  %p89_p4 = scmp.ne.s32.totalorder %s5106_s16, %s5102_s15 }
   0xc   : > { %6532 = sst [smem:[#allocation11_spill]] %s6636_s22  ;;  %p5193_p3 = por %p84_p2, %p83_p1 }
   0xd   : > { %s72_s25 = ssub.s32 %s5118_s19, %s6636_s22  ;;  %p90_p5 = scmp.eq.s32.totalorder %s5184_s21, 0 }
   0xe   : > { %p74_p6 = scmp.eq.s32.totalorder %s72_s25, 0  ;;  %p167_p7 = scmp.eq.s32.totalorder %s5184_s21, 3 }
   0xf   : > { %p5202_p8 = por %p90_p5, %p89_p4  ;;  %p4548_p10 = scmp.lt.s32.totalorder %s5122_s20, 4 }
  0x10   : > { %s5207_s27 = scalar_select %p74_p6, %s5110_s17, %s76_s23  }
  0x11   : > { %p5209_p9 = por %p167_p7, %p83_p1  ;;  %s5215_s29 = sand.u32 1, %s5110_s17  }
  0x12   : > { %s232_s30 = sand.u32 1, %s5122_s20   ;;  %s4125_s5 = sshll.u32 %s5215_s29, 11 }
  0x13   : > { %p5221_p11 = pnand %p4548_p10, %p5193_p3  ;;  %s212_s7 = scalar_lea.vmem [#allocation3], %s4125_s5 }
  0x14   : > { %s222_s8 = sshll.u32 %s212_s7, 4  ;;  %s4128_s9 = sshll.u32 %s5215_s29, 1  ;;  %s5225_s8 = int_to_ptr.vmem [resolvable:$true] %s222_s8 }
  0x15   : > { %s4529_s10 = sshll.u32 %s5118_s19, 5  ;;  %s236_s14 = scalar_lea.vmem [#allocation5], %s4128_s9 }
  0x16   : > { %s242_s13 = scalar_lea.hbm %s6527_s2, %s4529_s10  ;;  %s244_s15 = sshll.u32 %s236_s14, 4  ;;  %s245_s15 = int_to_ptr.vmem [resolvable:$true] %s244_s15 }
  0x17   : > { %s5237_s25 = scalar_lea.hbm %s6528_s3, %s4529_s10  ;;  %s5239_s22 = scalar_lea.sflag [#allocation6], %s232_s30 }
  0x18   : > { %p4986_p12 = pneg %p5221_p11  ;;  %s4997_s5 = scalar_lea.vmem %s245_s15, 32 }
  0x19   : > { %p4998_p13 = scmp.ne.s32.totalorder %s245_s15, %s4997_s5  ;;  %s5124_s7 = smov [#allocation5]  }
  0x1a   : > { %s5002_s11 = sshll.u32 %s5124_s7, 4  ;;  %s5003_s11 = int_to_ptr.vmem [resolvable:$false] %s5002_s11 }
  0x1b   : > { %p5000_p0 = pnand %p4998_p13, %p4986_p12  ;;  %s5004_s12 = scalar_lea.vmem %s5003_s11, 64 }
  0x1c   : > { %p5005_p2 = scmp.lt.s32.totalorder %s245_s15, %s5003_s11  ;;  %p5006_p3 = scmp.lt.s32.totalorder %s5004_s12, %s4997_s5 }
  0x1d   : > { %p5001_p1 = pneg %p5000_p0 }
  0x1e   : > { %p5007_p4 = por %p5006_p3, %p5005_p2 }
  0x20   : > { %p5008_p5 = pnand %p5007_p4, %p5001_p1 }
  0x22   : > { %5011 = shalt.err (!%p5008_p5)
}
  0x23   : > { %4544 = dma.hbm_to_vmem [thread:$0]  (!%p5221_p11), %s242_s13, 32, %s245_s15, %s5239_s22  }
  0x24   : > { %p4134_p6 = scmp.ge.s32.totalorder %s5122_s20, 1  ;;  %p268_p7 = scmp.lt.s32.totalorder %s5122_s20, 5 }
  0x25   : > { %s4528_s30 = sshll.u32 %s5118_s19, 7  ;;  %s6538_s1 = sld [smem:[#allocation57_spill]] }
  0x26   : > { %p5252_p10 = pnand %p4134_p6, %p268_p7  ;;  %s209_s5 = scalar_lea.sflag [#allocation4], %s5215_s29 }
  0x27   : > { %s5025_s7 = scalar_lea.vmem %s5225_s8, 32768  ;;  %s5125_s11 = smov [#allocation3]  }
  0x28   : > { %p5026_p13 = scmp.ne.s32.totalorder %s5225_s8, %s5025_s7  ;;  %s5030_s13 = sshll.u32 %s5125_s11, 4  ;;  %s5031_s13 = int_to_ptr.vmem [resolvable:$false] %s5030_s13 }
  0x29   : > { %s5032_s15 = scalar_lea.vmem %s5031_s13, 65536  ;;  %p5033_p2 = scmp.lt.s32.totalorder %s5225_s8, %s5031_s13 }
  0x2a   : > { %p5028_p0 = pnand %p5026_p13, %p4986_p12  ;;  %p5034_p3 = scmp.lt.s32.totalorder %s5032_s15, %s5025_s7 }
  0x2b   : > { %s221_s24 = scalar_lea.hbm %s6538_s1, %s4528_s30 }
  0x2c   : > { %p5029_p1 = pneg %p5028_p0  ;;  %p5035_p4 = por %p5034_p3, %p5033_p2 }
  0x2e   : > { %p5036_p5 = pnand %p5035_p4, %p5029_p1 }
  0x30   : > { %5039 = shalt.err (!%p5036_p5)
}
  0x31   : > { %s5126_s12 = smov 512   ;;  %s5127_s30 = smov 128  }
  0x32   : > { %s5128_s14 = smov 8   ;;  %s255_s23 = scalar_lea.vmem [#allocation7], %s4128_s9 }
  0x33   : > { %4541 = dma.hbm_to_vmem [thread:$0]  (!%p5221_p11), %s221_s24, 32768, %s5225_s8, %s209_s5, %s5126_s12, %s5127_s30, %s5128_s14  }
  0x34   : > { %s263_s1 = sshll.u32 %s255_s23, 4  ;;  %s5129_s7 = smov [#allocation7]   ;;  %s264_s1 = int_to_ptr.vmem [resolvable:$true] %s263_s1 }
  0x35   : > { %s5053_s11 = scalar_lea.vmem %s264_s1, 32  ;;  %s5058_s13 = sshll.u32 %s5129_s7, 4  ;;  %s5059_s13 = int_to_ptr.vmem [resolvable:$false] %s5058_s13 }
  0x36   : > { %p5054_p6 = scmp.ne.s32.totalorder %s264_s1, %s5053_s11  ;;  %s5060_s15 = scalar_lea.vmem %s5059_s13, 64 }
  0x37   : > { %p5061_p0 = scmp.lt.s32.totalorder %s264_s1, %s5059_s13  ;;  %p5062_p1 = scmp.lt.s32.totalorder %s5060_s15, %s5053_s11 }
  0x38   : > { %p5056_p7 = pnand %p5054_p6, %p4986_p12 }
  0x39   : > { %p5063_p2 = por %p5062_p1, %p5061_p0 }
  0x3a   : > { %p5057_p13 = pneg %p5056_p7 }
  0x3c   : > { %p5064_p3 = pnand %p5063_p2, %p5057_p13 }
  0x3e   : > { %5067 = shalt.err (!%p5064_p3)
}
  0x3f   : > { %4547 = dma.hbm_to_vmem [thread:$0]  (!%p5221_p11), %s5237_s25, 32, %s264_s1, %s5239_s22  }
  0x40   : > { %272 = sbr.rel (%p5252_p10) target bundleno = 607 (0x25f), region = 36 }
  0x45   : > { %s5281_s29 = sand.u32 1, %s5106_s16  }
  0x46   : > { %s4135_s8 = sshll.u32 %s5281_s29, 11  ;;  %s275_s9 = scalar_lea.sflag [#allocation4], %s5281_s29 }
  0x47   : > { %s5285_s24 = scalar_lea.vmem [#allocation3], %s4135_s8 }
  0x48   : > { %5093 = dma.done.wait (%p5202_p8), %s275_s9, 32768  }
  0x49   : > { %5095 = vsyncadd (%p5202_p8), %s275_s9, 4294934528  ;;  %s283_s1 = sand.u32 1, %s5184_s21   ;;  %s4136_s22 = sshll.u32 %s5281_s29, 1 }
  0x4a   : > { %s284_s6 = scalar_lea.sflag [#allocation6], %s283_s1  ;;  %s5295_s25 = scalar_lea.vmem [#allocation5], %s4136_s22 }
  0x4b   : > { %5097 = dma.done.wait (%p5202_p8), %s284_s6, 64  }
  0x4c   : > { %5099 = vsyncadd (%p5202_p8), %s284_s6, 4294967232  ;;  %v4600_v0 = vld [vmem:[%s5285_s24 + $0x74] ss:$8 sps:$4 sm:$0xff]   ;;  %v4604_v2 = vld [vmem:[%s5285_s24 + $0x70] ss:$8 sps:$4 sm:$0xff]   ;;  %s296_s9 = scalar_lea.vmem [#allocation7], %s4136_s22 }
  0x4d   : > { %v4602_v1 = vld [vmem:[%s5285_s24 + $0x174] ss:$8 sps:$4 sm:$0xff]   ;;  %2730 = vmatprep.subr.bf16.mxu0 %v4600_v0  ;;  %v4605_v3 = vld [vmem:[%s5285_s24 + $0x170] ss:$8 sps:$4 sm:$0xff]   ;;  %v4606_v4 = vld [vmem:[%s5285_s24 + $0x64] ss:$8 sps:$4 sm:$0xff]  }
  0x4e   : > { %2843 = vmatprep.subr.bf16.mxu1 %v4602_v1  ;;  %2731 = vmatpush1.bf16.msra.mxu0 %v4604_v2  ;;  %v4608_v5 = vld [vmem:[%s5285_s24 + $0x164] ss:$8 sps:$4 sm:$0xff]   ;;  %v4610_v6 = vld [vmem:[%s5285_s24 + $0x60] ss:$8 sps:$4 sm:$0xff]   ;;  %v4612_v8 = vld [vmem:[%s5285_s24 + $0x54] ss:$8 sps:$4 sm:$0xff]  }
  0x4f   : > { %2844 = vmatpush1.bf16.msra.mxu1 %v4605_v3  ;;  %2732 = vmatprep.subr.bf16.mxu0 %v4606_v4  ;;  %v4611_v7 = vld [vmem:[%s5285_s24 + $0x160] ss:$8 sps:$4 sm:$0xff]   ;;  %v4614_v9 = vld [vmem:[%s5285_s24 + $0x154] ss:$8 sps:$4 sm:$0xff]   ;;  %v4616_v10 = vld [vmem:[%s5285_s24 + $0x50] ss:$8 sps:$4 sm:$0xff]  }
  0x50   : > { %2845 = vmatprep.subr.bf16.mxu1 %v4608_v5  ;;  %v4617_v11 = vld [vmem:[%s5285_s24 + $0x150] ss:$8 sps:$4 sm:$0xff]   ;;  %v4618_v12 = vld [vmem:[%s5285_s24 + $0x44] ss:$8 sps:$4 sm:$0xff]   ;;  %v4622_v14 = vld [vmem:[%s5285_s24 + $0x40] ss:$8 sps:$4 sm:$0xff]  }
  0x51   : > { %v4620_v13 = vld [vmem:[%s5285_s24 + $0x144] ss:$8 sps:$4 sm:$0xff]   ;;  %v4623_v15 = vld [vmem:[%s5285_s24 + $0x140] ss:$8 sps:$4 sm:$0xff]   ;;  %v4624_v16 = vld [vmem:[%s5285_s24 + $0x34] ss:$8 sps:$4 sm:$0xff]  }
  0x52   : > { %2733 = vmatpush1.bf16.msra.mxu0 %v4610_v6  ;;  %v4626_v17 = vld [vmem:[%s5285_s24 + $0x134] ss:$8 sps:$4 sm:$0xff]   ;;  %v4628_v18 = vld [vmem:[%s5285_s24 + $0x30] ss:$8 sps:$4 sm:$0xff]   ;;  %v4630_v20 = vld [vmem:[%s5285_s24 + $0x24] ss:$8 sps:$4 sm:$0xff]  }
  0x53   : > { %2846 = vmatpush1.bf16.msra.mxu1 %v4611_v7  ;;  %2734 = vmatprep.subr.bf16.mxu0 %v4612_v8  ;;  %v4629_v19 = vld [vmem:[%s5285_s24 + $0x130] ss:$8 sps:$4 sm:$0xff]   ;;  %v4632_v21 = vld [vmem:[%s5285_s24 + $0x124] ss:$8 sps:$4 sm:$0xff]   ;;  %v4634_v22 = vld [vmem:[%s5285_s24 + $0x20] ss:$8 sps:$4 sm:$0xff]  }
  0x54   : > { %2847 = vmatprep.subr.bf16.mxu1 %v4614_v9  ;;  %v4635_v23 = vld [vmem:[%s5285_s24 + $0x120] ss:$8 sps:$4 sm:$0xff]   ;;  %v4636_v24 = vld [vmem:[%s5285_s24 + $0x14] ss:$8 sps:$4 sm:$0xff]   ;;  %v4640_v26 = vld [vmem:[%s5285_s24 + $0x10] ss:$8 sps:$4 sm:$0xff]  }
  0x55   : > { %v4638_v25 = vld [vmem:[%s5285_s24 + $0x114] ss:$8 sps:$4 sm:$0xff]   ;;  %v4641_v27 = vld [vmem:[%s5285_s24 + $0x110] ss:$8 sps:$4 sm:$0xff]   ;;  %v4642_v28 = vld [vmem:[%s5285_s24 + $0x4] ss:$8 sps:$4 sm:$0xff]  }
  0x56   : > { %2735 = vmatpush1.bf16.msra.mxu0 %v4616_v10  ;;  %v4644_v29 = vld [vmem:[%s5285_s24 + $0x104] ss:$8 sps:$4 sm:$0xff]   ;;  %v4646_v30 = vld [vmem:[%s5285_s24] ss:$8 sps:$4 sm:$0xff]   ;;  %v4648_v32 = vld [vmem:[%s5285_s24 + $0xf4] ss:$8 sps:$4 sm:$0xff]  }
  0x57   : > { %2848 = vmatpush1.bf16.msra.mxu1 %v4617_v11  ;;  %2736 = vmatprep.subr.bf16.mxu0 %v4618_v12  ;;  %v4647_v31 = vld [vmem:[%s5285_s24 + $0x100] ss:$8 sps:$4 sm:$0xff]   ;;  %v4650_v33 = vld [vmem:[%s5285_s24 + $0x1f4] ss:$8 sps:$4 sm:$0xff]   ;;  %v4652_v34 = vld [vmem:[%s5285_s24 + $0xf0] ss:$8 sps:$4 sm:$0xff]  }
  0x58   : > { %2849 = vmatprep.subr.bf16.mxu1 %v4620_v13  ;;  %v4653_v35 = vld [vmem:[%s5285_s24 + $0x1f0] ss:$8 sps:$4 sm:$0xff]   ;;  %v4654_v36 = vld [vmem:[%s5285_s24 + $0xe4] ss:$8 sps:$4 sm:$0xff]   ;;  %v4658_v38 = vld [vmem:[%s5285_s24 + $0xe0] ss:$8 sps:$4 sm:$0xff]  }
  0x59   : > { %v4656_v37 = vld [vmem:[%s5285_s24 + $0x1e4] ss:$8 sps:$4 sm:$0xff]   ;;  %v4659_v39 = vld [vmem:[%s5285_s24 + $0x1e0] ss:$8 sps:$4 sm:$0xff]   ;;  %v4660_v40 = vld [vmem:[%s5285_s24 + $0xd4] ss:$8 sps:$4 sm:$0xff]  }
  0x5a   : > { %2737 = vmatpush1.bf16.msra.mxu0 %v4622_v14  ;;  %v4662_v41 = vld [vmem:[%s5285_s24 + $0x1d4] ss:$8 sps:$4 sm:$0xff]   ;;  %v4664_v42 = vld [vmem:[%s5285_s24 + $0xd0] ss:$8 sps:$4 sm:$0xff]   ;;  %v4666_v44 = vld [vmem:[%s5285_s24 + $0xc4] ss:$8 sps:$4 sm:$0xff]  }
  0x5b   : > { %2850 = vmatpush1.bf16.msra.mxu1 %v4623_v15  ;;  %2738 = vmatprep.subr.bf16.mxu0 %v4624_v16  ;;  %v4665_v43 = vld [vmem:[%s5285_s24 + $0x1d0] ss:$8 sps:$4 sm:$0xff]   ;;  %v4668_v45 = vld [vmem:[%s5285_s24 + $0x1c4] ss:$8 sps:$4 sm:$0xff]   ;;  %v4670_v46 = vld [vmem:[%s5285_s24 + $0xc0] ss:$8 sps:$4 sm:$0xff]  }
  0x5c   : > { %2851 = vmatprep.subr.bf16.mxu1 %v4626_v17  ;;  %v4671_v47 = vld [vmem:[%s5285_s24 + $0x1c0] ss:$8 sps:$4 sm:$0xff]   ;;  %v4672_v52 = vld [vmem:[%s5285_s24 + $0xb4] ss:$8 sps:$4 sm:$0xff]   ;;  %v4676_v56 = vld [vmem:[%s5285_s24 + $0xb0] ss:$8 sps:$4 sm:$0xff]  }
  0x5d   : > { %v426_v48 = vld [vmem:[%s6525_s0] sm:$0xff]  ;;  %v427_v50 = vld [vmem:[%s6525_s0 + $0x8] sm:$0xff]  ;;  %v4674_v54 = vld [vmem:[%s5285_s24 + $0x1b4] ss:$8 sps:$4 sm:$0xff]   ;;  %s4138_s22 = sshll.u32 %s5281_s29, 8 }
  0x5e   : > { %2739 = vmatpush1.bf16.msra.mxu0 %v4628_v18  ;;  %v434_v49 = vld [vmem:[%s6525_s0 + $0x40] sm:$0xff]  ;;  %v435_v51 = vld [vmem:[%s6525_s0 + $0x48] sm:$0xff]  ;;  %v4677_v57 = vld [vmem:[%s5285_s24 + $0x1b0] ss:$8 sps:$4 sm:$0xff]   ;;  %s6271_s29 = scalar_lea.vmem [#allocation8], %s4138_s22 }
  0x5f   : > { %2852 = vmatpush1.bf16.msra.mxu1 %v4629_v19  ;;  %2740 = vmatprep.subr.bf16.mxu0 %v4630_v20  ;;  %v4140_v53 = vcombine.high %v426_v48, %v434_v49  ;;  %v4142_v55 = vcombine.high %v427_v50, %v435_v51  ;;  %v4678_v58 = vld [vmem:[%s5285_s24 + $0xa4] ss:$8 sps:$4 sm:$0xff]   ;;  %v4682_v60 = vld [vmem:[%s5285_s24 + $0xa0] ss:$8 sps:$4 sm:$0xff]   ;;  %v4684_v62 = vld [vmem:[%s5285_s24 + $0x94] ss:$8 sps:$4 sm:$0xff]   ;;  %v4139_v11 = vcombine.low %v426_v48, %v434_v49 }
  0x60   : > { %2853 = vmatprep.subr.bf16.mxu1 %v4632_v21  ;;  %v4680_v59 = vld [vmem:[%s5285_s24 + $0x1a4] ss:$8 sps:$4 sm:$0xff]   ;;  %v4683_v61 = vld [vmem:[%s5285_s24 + $0x1a0] ss:$8 sps:$4 sm:$0xff]   ;;  %v4686_v63 = vld [vmem:[%s5285_s24 + $0x194] ss:$8 sps:$4 sm:$0xff]   ;;  %v4141_v12 = vcombine.low %v427_v50, %v435_v51 }
  0x61   : > { %2762 = vmatprep.mubr.bf16.mxu0 %v4140_v53  ;;  %2875 = vmatprep.mubr.bf16.mxu1 %v4142_v55  ;;  %v4688_v0 = vld [vmem:[%s5285_s24 + $0x90] ss:$8 sps:$4 sm:$0xff]   ;;  %v4690_v2 = vld [vmem:[%s5285_s24 + $0x84] ss:$8 sps:$4 sm:$0xff]   ;;  %v4694_v4 = vld [vmem:[%s5285_s24 + $0x80] ss:$8 sps:$4 sm:$0xff]  }
  0x62   : > { %2741 = vmatpush1.bf16.msra.mxu0 %v4634_v22  ;;  %v4689_v1 = vld [vmem:[%s5285_s24 + $0x190] ss:$8 sps:$4 sm:$0xff]   ;;  %v4692_v3 = vld [vmem:[%s5285_s24 + $0x184] ss:$8 sps:$4 sm:$0xff]   ;;  %v4695_v5 = vld [vmem:[%s5285_s24 + $0x180] ss:$8 sps:$4 sm:$0xff]  }
  0x63   : > { %2854 = vmatpush1.bf16.msra.mxu1 %v4635_v23  ;;  %2742 = vmatprep.subr.bf16.mxu0 %v4636_v24  ;;  %v4698_v6 = vld [vmem:[%s5285_s24 + $0x274] ss:$8 sps:$4 sm:$0xff]   ;;  %v4696_v8 = vld [vmem:[%s5285_s24 + $0x270] ss:$8 sps:$4 sm:$0xff]   ;;  %v442_v10 = vld [vmem:[%s6525_s0 + $0x80] sm:$0xff] }
  0x64   : > { %2855 = vmatprep.subr.bf16.mxu1 %v4638_v25  ;;  %v4701_v7 = vld [vmem:[%s5285_s24 + $0x374] ss:$8 sps:$4 sm:$0xff]   ;;  %v4699_v9 = vld [vmem:[%s5285_s24 + $0x370] ss:$8 sps:$4 sm:$0xff]   ;;  %v450_v13 = vld [vmem:[%s6525_s0 + $0xc0] sm:$0xff] }
  0x65   : > { %v443_v14 = vld [vmem:[%s6525_s0 + $0x88] sm:$0xff]  ;;  %v4156_v18 = vcombine.high %v442_v10, %v450_v13  ;;  %v4710_v22 = vld [vmem:[%s5285_s24 + $0x254] ss:$8 sps:$4 sm:$0xff]   ;;  %v4708_v24 = vld [vmem:[%s5285_s24 + $0x250] ss:$8 sps:$4 sm:$0xff]  }
  0x66   : > { %2743 = vmatpush1.bf16.msra.mxu0 %v4640_v26  ;;  %v451_v15 = vld [vmem:[%s6525_s0 + $0xc8] sm:$0xff]  ;;  %v4713_v23 = vld [vmem:[%s5285_s24 + $0x354] ss:$8 sps:$4 sm:$0xff]   ;;  %v4711_v25 = vld [vmem:[%s5285_s24 + $0x350] ss:$8 sps:$4 sm:$0xff]  }
  0x67   : > { %2856 = vmatpush1.bf16.msra.mxu1 %v4641_v27  ;;  %2744 = vmatprep.subr.bf16.mxu0 %v4642_v28  ;;  %v4704_v16 = vld [vmem:[%s5285_s24 + $0x264] ss:$8 sps:$4 sm:$0xff]   ;;  %v4158_v19 = vcombine.high %v443_v14, %v451_v15  ;;  %v4702_v20 = vld [vmem:[%s5285_s24 + $0x260] ss:$8 sps:$4 sm:$0xff]   ;;  %v4155_v28 = vcombine.low %v442_v10, %v450_v13  ;;  %v4737_v55 = vld [vmem:[%s5285_s24 + $0x314] ss:$8 sps:$4 sm:$0xff]  }
  0x68   : > { %2857 = vmatprep.subr.bf16.mxu1 %v4644_v29  ;;  %v4707_v17 = vld [vmem:[%s5285_s24 + $0x364] ss:$8 sps:$4 sm:$0xff]   ;;  %v4705_v21 = vld [vmem:[%s5285_s24 + $0x360] ss:$8 sps:$4 sm:$0xff]   ;;  %v4157_v29 = vcombine.low %v443_v14, %v451_v15  ;;  %v4744_v14 = vld [vmem:[%s5285_s24 + $0x2f0] ss:$8 sps:$4 sm:$0xff]  }
  0x69   : > { %v458_v26 = vld [vmem:[%s6525_s0 + $0x100] sm:$0xff]  ;;  %v515_v13 = vld [vmem:[%s6525_s0 + $0x2c8] sm:$0xff]  ;;  %v4747_v15 = vld [vmem:[%s5285_s24 + $0x3f0] ss:$8 sps:$4 sm:$0xff]  }
  0x6a   : > { %2745 = vmatpush1.bf16.msra.mxu0 %v4646_v30  ;;  %v466_v27 = vld [vmem:[%s6525_s0 + $0x140] sm:$0xff]  ;;  %v459_v30 = vld [vmem:[%s6525_s0 + $0x108] sm:$0xff] }
  0x6b   : > { %2858 = vmatpush1.bf16.msra.mxu1 %v4647_v31  ;;  %2746 = vmatprep.subr.bf16.mxu0 %v4648_v32  ;;  %v467_v31 = vld [vmem:[%s6525_s0 + $0x148] sm:$0xff] }
  0x6c   : > { %2859 = vmatprep.subr.bf16.mxu1 %v4650_v33  ;;  %v4716_v32 = vld [vmem:[%s5285_s24 + $0x244] ss:$8 sps:$4 sm:$0xff]   ;;  %v4729_v53 = vld [vmem:[%s5285_s24 + $0x320] ss:$8 sps:$4 sm:$0xff]  }
  0x6d   : > { %v4719_v33 = vld [vmem:[%s5285_s24 + $0x344] ss:$8 sps:$4 sm:$0xff]  }
  0x6e   : > { %2747 = vmatpush2.bf16.msra.mxu0 %v4652_v34  ;;  %v4172_v34 = vcombine.high %v458_v26, %v466_v27  ;;  %v4728_v48 = vld [vmem:[%s5285_s24 + $0x224] ss:$8 sps:$4 sm:$0xff]  }
  0x6f   : > { %2860 = vmatpush2.bf16.msra.mxu1 %v4653_v35  ;;  %2748 = vmatprep.subr.bf16.mxu0 %v4654_v36  ;;  %v4174_v35 = vcombine.high %v459_v30, %v467_v31  ;;  %v4714_v36 = vld [vmem:[%s5285_s24 + $0x240] ss:$8 sps:$4 sm:$0xff]   ;;  %v4731_v49 = vld [vmem:[%s5285_s24 + $0x324] ss:$8 sps:$4 sm:$0xff]  }
  0x70   : > { %2861 = vmatprep.subr.bf16.mxu1 %v4656_v37  ;;  %v4717_v37 = vld [vmem:[%s5285_s24 + $0x340] ss:$8 sps:$4 sm:$0xff]  }
  0x72   : > { %2749 = vmatpush2.bf16.msra.mxu0 %v4658_v38  ;;  %v4722_v38 = vld [vmem:[%s5285_s24 + $0x234] ss:$8 sps:$4 sm:$0xff]  }
  0x73   : > { %2862 = vmatpush2.bf16.msra.mxu1 %v4659_v39  ;;  %2750 = vmatprep.subr.bf16.mxu0 %v4660_v40  ;;  %v4725_v39 = vld [vmem:[%s5285_s24 + $0x334] ss:$8 sps:$4 sm:$0xff]   ;;  %v4720_v40 = vld [vmem:[%s5285_s24 + $0x230] ss:$8 sps:$4 sm:$0xff]  }
  0x74   : > { %2863 = vmatprep.subr.bf16.mxu1 %v4662_v41  ;;  %v4723_v41 = vld [vmem:[%s5285_s24 + $0x330] ss:$8 sps:$4 sm:$0xff]  }
  0x76   : > { %2751 = vmatpush2.bf16.msra.mxu0 %v4664_v42  ;;  %v474_v42 = vld [vmem:[%s6525_s0 + $0x180] sm:$0xff] }
  0x77   : > { %2864 = vmatpush2.bf16.msra.mxu1 %v4665_v43  ;;  %2752 = vmatprep.subr.bf16.mxu0 %v4666_v44  ;;  %v482_v43 = vld [vmem:[%s6525_s0 + $0x1c0] sm:$0xff]  ;;  %v4171_v44 = vcombine.low %v458_v26, %v466_v27 }
  0x78   : > { %2865 = vmatprep.subr.bf16.mxu1 %v4668_v45  ;;  %v4173_v45 = vcombine.low %v459_v30, %v467_v31  ;;  %v4188_v50 = vcombine.high %v474_v42, %v482_v43  ;;  %v522_v26 = vld [vmem:[%s6525_s0 + $0x300] sm:$0xff]  ;;  %v523_v30 = vld [vmem:[%s6525_s0 + $0x308] sm:$0xff] }
  0x79   : > { %v531_v31 = vld [vmem:[%s6525_s0 + $0x348] sm:$0xff] }
  0x7a   : > { %2753 = vmatpush2.bf16.msra.mxu0 %v4670_v46  ;;  %v475_v46 = vld [vmem:[%s6525_s0 + $0x188] sm:$0xff] }
  0x7b   : > { %2866 = vmatpush2.bf16.msra.mxu1 %v4671_v47  ;;  %2754 = vmatprep.subr.bf16.mxu0 %v4672_v52  ;;  %v483_v47 = vld [vmem:[%s6525_s0 + $0x1c8] sm:$0xff] }
  0x7c   : > { %2867 = vmatprep.subr.bf16.mxu1 %v4674_v54  ;;  %v4190_v51 = vcombine.high %v475_v46, %v483_v47  ;;  %v4726_v52 = vld [vmem:[%s5285_s24 + $0x220] ss:$8 sps:$4 sm:$0xff]   ;;  %v4734_v54 = vld [vmem:[%s5285_s24 + $0x214] ss:$8 sps:$4 sm:$0xff]  }
  0x7e   : > { %2755 = vmatpush2.bf16.msra.mxu0 %v4676_v56  ;;  %v4732_v56 = vld [vmem:[%s5285_s24 + $0x210] ss:$8 sps:$4 sm:$0xff]  }
  0x7f   : > { %2868 = vmatpush2.bf16.msra.mxu1 %v4677_v57  ;;  %2756 = vmatprep.subr.bf16.mxu0 %v4678_v58  ;;  %v490_v57 = vld [vmem:[%s6525_s0 + $0x200] sm:$0xff] }
  0x80   : > { %2869 = vmatprep.subr.bf16.mxu1 %v4680_v59  ;;  %v498_v58 = vld [vmem:[%s6525_s0 + $0x240] sm:$0xff]  ;;  %v4187_v59 = vcombine.low %v474_v42, %v482_v43 }
  0x81   : > { %v4203_v10 = vcombine.low %v490_v57, %v498_v58  ;;  %v538_v42 = vld [vmem:[%s6525_s0 + $0x380] sm:$0xff] }
  0x82   : > { %2757 = vmatpush2.bf16.msra.mxu0 %v4682_v60  ;;  %v4189_v60 = vcombine.low %v475_v46, %v483_v47  ;;  %v546_v43 = vld [vmem:[%s6525_s0 + $0x3c0] sm:$0xff]  ;;  %v539_v46 = vld [vmem:[%s6525_s0 + $0x388] sm:$0xff] }
  0x83   : > { %2870 = vmatpush2.bf16.msra.mxu1 %v4683_v61  ;;  %2758 = vmatprep.subr.bf16.mxu0 %v4684_v62  ;;  %v491_v61 = vld [vmem:[%s6525_s0 + $0x208] sm:$0xff] }
  0x84   : > { %2871 = vmatprep.subr.bf16.mxu1 %v4686_v63  ;;  %v499_v62 = vld [vmem:[%s6525_s0 + $0x248] sm:$0xff]  ;;  %v4735_v63 = vld [vmem:[%s5285_s24 + $0x310] ss:$8 sps:$4 sm:$0xff]  }
  0x85   : > { %v547_v47 = vld [vmem:[%s6525_s0 + $0x3c8] sm:$0xff] }
  0x86   : > { %2759 = vmatpush2.bf16.msra.mxu0 %v4688_v0  ;;  %v4740_v0 = vld [vmem:[%s5285_s24 + $0x204] ss:$8 sps:$4 sm:$0xff]  }
  0x87   : > { %2872 = vmatpush2.bf16.msra.mxu1 %v4689_v1  ;;  %2760 = vmatprep.subr.bf16.mxu0 %v4690_v2  ;;  %v4743_v1 = vld [vmem:[%s5285_s24 + $0x304] ss:$8 sps:$4 sm:$0xff]   ;;  %v4204_v2 = vcombine.high %v490_v57, %v498_v58  ;;  %v4783_v57 = vld [vmem:[%s5285_s24 + $0x390] ss:$8 sps:$4 sm:$0xff]  }
  0x88   : > { %2873 = vmatprep.subr.bf16.mxu1 %v4692_v3  ;;  %v4206_v3 = vcombine.high %v491_v61, %v499_v62  ;;  %v428_v58 = vld [vmem:[%s6525_s0 + $0x10] sm:$0xff] }
  0x8a   : > { %2761 = vmatpush2.bf16.msra.mxu0 %v4694_v4  ;;  %v4738_v4 = vld [vmem:[%s5285_s24 + $0x200] ss:$8 sps:$4 sm:$0xff]  }
  0x8b   : > { %2874 = vmatpush2.bf16.msra.mxu1 %v4695_v5  ;;  %2956 = vmatprep.subr.bf16.mxu0 %v4698_v6  ;;  %v4741_v5 = vld [vmem:[%s5285_s24 + $0x300] ss:$8 sps:$4 sm:$0xff]   ;;  %v4746_v6 = vld [vmem:[%s5285_s24 + $0x2f4] ss:$8 sps:$4 sm:$0xff]  }
  0x8c   : > { %3069 = vmatprep.subr.bf16.mxu1 %v4701_v7  ;;  %v4749_v7 = vld [vmem:[%s5285_s24 + $0x3f4] ss:$8 sps:$4 sm:$0xff]  }
  0x8d   : > { %2763 = vmatmul.mubr.bf16.vlgmr.msra.gmra.mxu0 %v4139_v11  ;;  %v4205_v11 = vcombine.low %v491_v61, %v499_v62  ;;  %v4253_v61 = vcombine.low %v539_v46, %v547_v47  ;;  %v429_v62 = vld [vmem:[%s6525_s0 + $0x18] sm:$0xff] }
  0x8e   : > { %2876 = vmatmul.mubr.bf16.vlgmr.msra.gmra.mxu1 %v4141_v12  ;;  %2957 = vmatpush1.bf16.msra.mxu0 %v4696_v8  ;;  %v506_v8 = vld [vmem:[%s6525_s0 + $0x280] sm:$0xff]  ;;  %v507_v12 = vld [vmem:[%s6525_s0 + $0x288] sm:$0xff] }
  0x8f   : > { %3070 = vmatpush1.bf16.msra.mxu1 %v4699_v9  ;;  %2958 = vmatprep.subr.bf16.mxu0 %v4704_v16  ;;  %v514_v9 = vld [vmem:[%s6525_s0 + $0x2c0] sm:$0xff] }
  0x90   : > { %3071 = vmatprep.subr.bf16.mxu1 %v4707_v17  ;;  %2772 = vmatprep.mubr.bf16.mxu0 %v4156_v18  ;;  %v4752_v16 = vld [vmem:[%s5285_s24 + $0x2e4] ss:$8 sps:$4 sm:$0xff]   ;;  %v4220_v18 = vcombine.high %v506_v8, %v514_v9  ;;  %v4219_v27 = vcombine.low %v506_v8, %v514_v9  ;;  %v4792_v8 = vld [vmem:[%s5285_s24 + $0x470] ss:$8 sps:$4 sm:$0xff]  }
  0x91   : > { %2885 = vmatprep.mubr.bf16.mxu1 %v4158_v19  ;;  %v4755_v17 = vld [vmem:[%s5285_s24 + $0x3e4] ss:$8 sps:$4 sm:$0xff]   ;;  %v4222_v19 = vcombine.high %v507_v12, %v515_v13  ;;  %v444_v9 = vld [vmem:[%s6525_s0 + $0x90] sm:$0xff] }
  0x92   : > { %2959 = vmatpush1.bf16.msra.mxu0 %v4702_v20  ;;  %v4750_v20 = vld [vmem:[%s5285_s24 + $0x2e0] ss:$8 sps:$4 sm:$0xff]  }
  0x93   : > { %3072 = vmatpush1.bf16.msra.mxu1 %v4705_v21  ;;  %2960 = vmatprep.subr.bf16.mxu0 %v4710_v22  ;;  %v4753_v21 = vld [vmem:[%s5285_s24 + $0x3e0] ss:$8 sps:$4 sm:$0xff]   ;;  %v4758_v22 = vld [vmem:[%s5285_s24 + $0x2d4] ss:$8 sps:$4 sm:$0xff]  }
  0x94   : > { %3073 = vmatprep.subr.bf16.mxu1 %v4713_v23  ;;  %v4761_v23 = vld [vmem:[%s5285_s24 + $0x3d4] ss:$8 sps:$4 sm:$0xff]  }
  0x95   : > { %2773 = vmatmul.mubr.bf16.gmra.mxu0 %v4155_v28  ;;  %v4221_v28 = vcombine.low %v507_v12, %v515_v13  ;;  %v445_v13 = vld [vmem:[%s6525_s0 + $0x98] sm:$0xff] }
  0x96   : > { %2886 = vmatmul.mubr.bf16.gmra.mxu1 %v4157_v29  ;;  %2961 = vmatpush1.bf16.msra.mxu0 %v4708_v24  ;;  %v4756_v24 = vld [vmem:[%s5285_s24 + $0x2d0] ss:$8 sps:$4 sm:$0xff]   ;;  %v530_v29 = vld [vmem:[%s6525_s0 + $0x340] sm:$0xff] }
  0x97   : > { %3074 = vmatpush1.bf16.msra.mxu1 %v4711_v25  ;;  %2962 = vmatprep.subr.bf16.mxu0 %v4716_v32  ;;  %v4759_v25 = vld [vmem:[%s5285_s24 + $0x3d0] ss:$8 sps:$4 sm:$0xff]   ;;  %v4764_v32 = vld [vmem:[%s5285_s24 + $0x2c4] ss:$8 sps:$4 sm:$0xff]  }
  0x98   : > { %3075 = vmatprep.subr.bf16.mxu1 %v4719_v33  ;;  %2782 = vmatprep.mubr.bf16.mxu0 %v4172_v34  ;;  %v4767_v33 = vld [vmem:[%s5285_s24 + $0x3c4] ss:$8 sps:$4 sm:$0xff]   ;;  %v4236_v34 = vcombine.high %v522_v26, %v530_v29 }
  0x99   : > { %2895 = vmatprep.mubr.bf16.mxu1 %v4174_v35  ;;  %v4238_v35 = vcombine.high %v523_v30, %v531_v31 }
  0x9a   : > { %2963 = vmatpush1.bf16.msra.mxu0 %v4714_v36  ;;  %v4762_v36 = vld [vmem:[%s5285_s24 + $0x2c0] ss:$8 sps:$4 sm:$0xff]  }
  0x9b   : > { %3076 = vmatpush1.bf16.msra.mxu1 %v4717_v37  ;;  %2964 = vmatprep.subr.bf16.mxu0 %v4722_v38  ;;  %v4765_v37 = vld [vmem:[%s5285_s24 + $0x3c0] ss:$8 sps:$4 sm:$0xff]   ;;  %v4770_v38 = vld [vmem:[%s5285_s24 + $0x2b4] ss:$8 sps:$4 sm:$0xff]  }
  0x9c   : > { %3077 = vmatprep.subr.bf16.mxu1 %v4725_v39  ;;  %v4773_v39 = vld [vmem:[%s5285_s24 + $0x3b4] ss:$8 sps:$4 sm:$0xff]  }
  0x9d   : > { %2783 = vmatmul.mubr.bf16.gmra.mxu0 %v4171_v44  ;;  %v4235_v44 = vcombine.low %v522_v26, %v530_v29  ;;  %v469_v29 = vld [vmem:[%s6525_s0 + $0x158] sm:$0xff] }
  0x9e   : > { %2896 = vmatmul.mubr.bf16.gmra.mxu1 %v4173_v45  ;;  %2965 = vmatpush1.bf16.msra.mxu0 %v4720_v40  ;;  %v4768_v40 = vld [vmem:[%s5285_s24 + $0x2b0] ss:$8 sps:$4 sm:$0xff]   ;;  %v4237_v45 = vcombine.low %v523_v30, %v531_v31 }
  0x9f   : > { %3078 = vmatpush1.bf16.msra.mxu1 %v4723_v41  ;;  %2966 = vmatprep.subr.bf16.mxu0 %v4728_v48  ;;  %v4771_v41 = vld [vmem:[%s5285_s24 + $0x3b0] ss:$8 sps:$4 sm:$0xff]   ;;  %v4776_v48 = vld [vmem:[%s5285_s24 + $0x2a4] ss:$8 sps:$4 sm:$0xff]  }
  0xa0   : > { %3079 = vmatprep.subr.bf16.mxu1 %v4731_v49  ;;  %2792 = vmatprep.mubr.bf16.mxu0 %v4188_v50  ;;  %v4779_v49 = vld [vmem:[%s5285_s24 + $0x3a4] ss:$8 sps:$4 sm:$0xff]   ;;  %v4252_v50 = vcombine.high %v538_v42, %v546_v43  ;;  %v4804_v30 = vld [vmem:[%s5285_s24 + $0x450] ss:$8 sps:$4 sm:$0xff]  }
  0xa1   : > { %2905 = vmatprep.mubr.bf16.mxu1 %v4190_v51  ;;  %v4254_v51 = vcombine.high %v539_v46, %v547_v47  ;;  %v4807_v31 = vld [vmem:[%s5285_s24 + $0x550] ss:$8 sps:$4 sm:$0xff]  }
  0xa2   : > { %2967 = vmatpush1.bf16.msra.mxu0 %v4726_v52  ;;  %v4774_v52 = vld [vmem:[%s5285_s24 + $0x2a0] ss:$8 sps:$4 sm:$0xff]   ;;  %v477_v46 = vld [vmem:[%s6525_s0 + $0x198] sm:$0xff] }
  0xa3   : > { %3080 = vmatpush1.bf16.msra.mxu1 %v4729_v53  ;;  %2968 = vmatprep.subr.bf16.mxu0 %v4734_v54  ;;  %v4777_v53 = vld [vmem:[%s5285_s24 + $0x3a0] ss:$8 sps:$4 sm:$0xff]   ;;  %v4782_v54 = vld [vmem:[%s5285_s24 + $0x294] ss:$8 sps:$4 sm:$0xff]  }
  0xa4   : > { %3081 = vmatprep.subr.bf16.mxu1 %v4737_v55  ;;  %v4785_v55 = vld [vmem:[%s5285_s24 + $0x394] ss:$8 sps:$4 sm:$0xff]  }
  0xa5   : > { %2793 = vmatmul.mubr.bf16.gmra.mxu0 %v4187_v59  ;;  %v436_v59 = vld [vmem:[%s6525_s0 + $0x50] sm:$0xff]  ;;  %v485_v47 = vld [vmem:[%s6525_s0 + $0x1d8] sm:$0xff] }
  0xa6   : > { %2906 = vmatmul.mubr.bf16.gmra.mxu1 %v4189_v60  ;;  %2969 = vmatpush1.bf16.msra.mxu0 %v4732_v56  ;;  %v4780_v56 = vld [vmem:[%s5285_s24 + $0x290] ss:$8 sps:$4 sm:$0xff]   ;;  %v4251_v60 = vcombine.low %v538_v42, %v546_v43 }
  0xa7   : > { %3082 = vmatpush1.bf16.msra.mxu1 %v4735_v63  ;;  %2970 = vmatprep.subr.bf16.mxu0 %v4740_v0  ;;  %v437_v63 = vld [vmem:[%s6525_s0 + $0x58] sm:$0xff]  ;;  %v4788_v0 = vld [vmem:[%s5285_s24 + $0x284] ss:$8 sps:$4 sm:$0xff]   ;;  %v476_v42 = vld [vmem:[%s6525_s0 + $0x190] sm:$0xff] }
  0xa8   : > { %3083 = vmatprep.subr.bf16.mxu1 %v4743_v1  ;;  %2802 = vmatprep.mubr.bf16.mxu0 %v4204_v2  ;;  %v4791_v1 = vld [vmem:[%s5285_s24 + $0x384] ss:$8 sps:$4 sm:$0xff]   ;;  %v4144_v2 = vcombine.high %v428_v58, %v436_v59  ;;  %v4145_v12 = vcombine.low %v429_v62, %v437_v63 }
  0xa9   : > { %2915 = vmatprep.mubr.bf16.mxu1 %v4206_v3  ;;  %v4146_v3 = vcombine.high %v429_v62, %v437_v63  ;;  %v493_v62 = vld [vmem:[%s6525_s0 + $0x218] sm:$0xff] }
  0xaa   : > { %2971 = vmatpush1.bf16.msra.mxu0 %v4738_v4  ;;  %v4786_v4 = vld [vmem:[%s5285_s24 + $0x280] ss:$8 sps:$4 sm:$0xff]   ;;  %v501_v63 = vld [vmem:[%s6525_s0 + $0x258] sm:$0xff] }
  0xab   : > { %3084 = vmatpush1.bf16.msra.mxu1 %v4741_v5  ;;  %2972 = vmatprep.subr.bf16.mxu0 %v4746_v6  ;;  %v4789_v5 = vld [vmem:[%s5285_s24 + $0x380] ss:$8 sps:$4 sm:$0xff]   ;;  %v4794_v6 = vld [vmem:[%s5285_s24 + $0x474] ss:$8 sps:$4 sm:$0xff]  }
  0xac   : > { %3085 = vmatprep.subr.bf16.mxu1 %v4749_v7  ;;  %v4797_v7 = vld [vmem:[%s5285_s24 + $0x574] ss:$8 sps:$4 sm:$0xff]  }
  0xad   : > { %2803 = vmatmul.mubr.bf16.gmra.mxu0 %v4203_v10  ;;  %v452_v10 = vld [vmem:[%s6525_s0 + $0xd0] sm:$0xff] }
  0xae   : > { %2916 = vmatmul.mubr.bf16.gmra.mxu1 %v4205_v11  ;;  %2973 = vmatpush2.bf16.msra.mxu0 %v4744_v14  ;;  %v4143_v11 = vcombine.low %v428_v58, %v436_v59  ;;  %v453_v14 = vld [vmem:[%s6525_s0 + $0xd8] sm:$0xff]  ;;  %v4159_v26 = vcombine.low %v444_v9, %v452_v10  ;;  %v492_v58 = vld [vmem:[%s6525_s0 + $0x210] sm:$0xff] }
  0xaf   : > { %3086 = vmatpush2.bf16.msra.mxu1 %v4747_v15  ;;  %2974 = vmatprep.subr.bf16.mxu0 %v4752_v16  ;;  %v4795_v15 = vld [vmem:[%s5285_s24 + $0x570] ss:$8 sps:$4 sm:$0xff]   ;;  %v4800_v16 = vld [vmem:[%s5285_s24 + $0x464] ss:$8 sps:$4 sm:$0xff]  }
  0xb0   : > { %3087 = vmatprep.subr.bf16.mxu1 %v4755_v17  ;;  %2812 = vmatprep.mubr.bf16.mxu0 %v4220_v18  ;;  %v4803_v17 = vld [vmem:[%s5285_s24 + $0x564] ss:$8 sps:$4 sm:$0xff]   ;;  %v4160_v18 = vcombine.high %v444_v9, %v452_v10  ;;  %v500_v59 = vld [vmem:[%s6525_s0 + $0x250] sm:$0xff] }
  0xb1   : > { %2925 = vmatprep.mubr.bf16.mxu1 %v4222_v19  ;;  %v4162_v19 = vcombine.high %v445_v13, %v453_v14  ;;  %v4843_v9 = vld [vmem:[%s5285_s24 + $0x5f0] ss:$8 sps:$4 sm:$0xff]  }
  0xb2   : > { %2975 = vmatpush2.bf16.msra.mxu0 %v4750_v20  ;;  %v4798_v20 = vld [vmem:[%s5285_s24 + $0x460] ss:$8 sps:$4 sm:$0xff]   ;;  %v508_v10 = vld [vmem:[%s6525_s0 + $0x290] sm:$0xff] }
  0xb3   : > { %3088 = vmatpush2.bf16.msra.mxu1 %v4753_v21  ;;  %2976 = vmatprep.subr.bf16.mxu0 %v4758_v22  ;;  %v4801_v21 = vld [vmem:[%s5285_s24 + $0x560] ss:$8 sps:$4 sm:$0xff]   ;;  %v4806_v22 = vld [vmem:[%s5285_s24 + $0x454] ss:$8 sps:$4 sm:$0xff]  }
  0xb4   : > { %3089 = vmatprep.subr.bf16.mxu1 %v4761_v23  ;;  %v4809_v23 = vld [vmem:[%s5285_s24 + $0x554] ss:$8 sps:$4 sm:$0xff]  }
  0xb5   : > { %2813 = vmatmul.mubr.bf16.gmra.mxu0 %v4219_v27  ;;  %v4161_v27 = vcombine.low %v445_v13, %v453_v14  ;;  %v4209_v13 = vcombine.low %v493_v62, %v501_v63  ;;  %v509_v14 = vld [vmem:[%s6525_s0 + $0x298] sm:$0xff] }
  0xb6   : > { %2926 = vmatmul.mubr.bf16.gmra.mxu1 %v4221_v28  ;;  %2977 = vmatpush2.bf16.msra.mxu0 %v4756_v24  ;;  %v460_v24 = vld [vmem:[%s6525_s0 + $0x110] sm:$0xff]  ;;  %v461_v28 = vld [vmem:[%s6525_s0 + $0x118] sm:$0xff] }
  0xb7   : > { %3090 = vmatpush2.bf16.msra.mxu1 %v4759_v25  ;;  %2978 = vmatprep.subr.bf16.mxu0 %v4764_v32  ;;  %v468_v25 = vld [vmem:[%s6525_s0 + $0x150] sm:$0xff]  ;;  %v4812_v32 = vld [vmem:[%s5285_s24 + $0x444] ss:$8 sps:$4 sm:$0xff]  }
  0xb8   : > { %3091 = vmatprep.subr.bf16.mxu1 %v4767_v33  ;;  %2822 = vmatprep.mubr.bf16.mxu0 %v4236_v34  ;;  %v4815_v33 = vld [vmem:[%s5285_s24 + $0x544] ss:$8 sps:$4 sm:$0xff]   ;;  %v4176_v34 = vcombine.high %v460_v24, %v468_v25  ;;  %v4175_v43 = vcombine.low %v460_v24, %v468_v25  ;;  %v4852_v24 = vld [vmem:[%s5285_s24 + $0x4d0] ss:$8 sps:$4 sm:$0xff]  }
  0xb9   : > { %2935 = vmatprep.mubr.bf16.mxu1 %v4238_v35  ;;  %v4178_v35 = vcombine.high %v461_v28, %v469_v29  ;;  %v524_v25 = vld [vmem:[%s6525_s0 + $0x310] sm:$0xff] }
  0xba   : > { %2979 = vmatpush2.bf16.msra.mxu0 %v4762_v36  ;;  %v4810_v36 = vld [vmem:[%s5285_s24 + $0x440] ss:$8 sps:$4 sm:$0xff]  }
  0xbb   : > { %3092 = vmatpush2.bf16.msra.mxu1 %v4765_v37  ;;  %2980 = vmatprep.subr.bf16.mxu0 %v4770_v38  ;;  %v4813_v37 = vld [vmem:[%s5285_s24 + $0x540] ss:$8 sps:$4 sm:$0xff]   ;;  %v4818_v38 = vld [vmem:[%s5285_s24 + $0x434] ss:$8 sps:$4 sm:$0xff]  }
  0xbc   : > { %3093 = vmatprep.subr.bf16.mxu1 %v4773_v39  ;;  %v4821_v39 = vld [vmem:[%s5285_s24 + $0x534] ss:$8 sps:$4 sm:$0xff]  }
  0xbd   : > { %2823 = vmatmul.mubr.bf16.gmra.mxu0 %v4235_v44  ;;  %v4177_v44 = vcombine.low %v461_v28, %v469_v29  ;;  %v525_v29 = vld [vmem:[%s6525_s0 + $0x318] sm:$0xff] }
  0xbe   : > { %2936 = vmatmul.mubr.bf16.gmra.mxu1 %v4237_v45  ;;  %2981 = vmatpush2.bf16.msra.mxu0 %v4768_v40  ;;  %v4816_v40 = vld [vmem:[%s5285_s24 + $0x430] ss:$8 sps:$4 sm:$0xff]  }
  0xbf   : > { %3094 = vmatpush2.bf16.msra.mxu1 %v4771_v41  ;;  %2982 = vmatprep.subr.bf16.mxu0 %v4776_v48  ;;  %v4819_v41 = vld [vmem:[%s5285_s24 + $0x530] ss:$8 sps:$4 sm:$0xff]   ;;  %v4824_v48 = vld [vmem:[%s5285_s24 + $0x424] ss:$8 sps:$4 sm:$0xff]  }
  0xc0   : > { %3095 = vmatprep.subr.bf16.mxu1 %v4779_v49  ;;  %2832 = vmatprep.mubr.bf16.mxu0 %v4252_v50  ;;  %v484_v45 = vld [vmem:[%s6525_s0 + $0x1d0] sm:$0xff]  ;;  %v4827_v49 = vld [vmem:[%s5285_s24 + $0x524] ss:$8 sps:$4 sm:$0xff]  }
  0xc1   : > { %2945 = vmatprep.mubr.bf16.mxu1 %v4254_v51  ;;  %v4192_v50 = vcombine.high %v476_v42, %v484_v45  ;;  %v4194_v51 = vcombine.high %v477_v46, %v485_v47 }
  0xc2   : > { %2983 = vmatpush2.bf16.msra.mxu0 %v4774_v52  ;;  %v4822_v52 = vld [vmem:[%s5285_s24 + $0x420] ss:$8 sps:$4 sm:$0xff]  }
  0xc3   : > { %3096 = vmatpush2.bf16.msra.mxu1 %v4777_v53  ;;  %2984 = vmatprep.subr.bf16.mxu0 %v4782_v54  ;;  %v4825_v53 = vld [vmem:[%s5285_s24 + $0x520] ss:$8 sps:$4 sm:$0xff]   ;;  %v4830_v54 = vld [vmem:[%s5285_s24 + $0x414] ss:$8 sps:$4 sm:$0xff]  }
  0xc4   : > { %3097 = vmatprep.subr.bf16.mxu1 %v4785_v55  ;;  %v4833_v55 = vld [vmem:[%s5285_s24 + $0x514] ss:$8 sps:$4 sm:$0xff]  }
  0xc5   : > { %2833 = vmatmul.mubr.bf16.gmra.mxu0 %v4251_v60  ;;  %v4191_v60 = vcombine.low %v476_v42, %v484_v45  ;;  %v549_v45 = vld [vmem:[%s6525_s0 + $0x3d8] sm:$0xff] }
  0xc6   : > { %2946 = vmatmul.mubr.bf16.gmra.mxu1 %v4253_v61  ;;  %2985 = vmatpush2.bf16.msra.mxu0 %v4780_v56  ;;  %v4828_v56 = vld [vmem:[%s5285_s24 + $0x410] ss:$8 sps:$4 sm:$0xff]   ;;  %v4193_v61 = vcombine.low %v477_v46, %v485_v47 }
  0xc7   : > { %3098 = vmatpush2.bf16.msra.mxu1 %v4783_v57  ;;  %2986 = vmatprep.subr.bf16.mxu0 %v4788_v0  ;;  %v4831_v57 = vld [vmem:[%s5285_s24 + $0x510] ss:$8 sps:$4 sm:$0xff]   ;;  %v4836_v0 = vld [vmem:[%s5285_s24 + $0x404] ss:$8 sps:$4 sm:$0xff]  }
  0xc8   : > { %3099 = vmatprep.subr.bf16.mxu1 %v4791_v1  ;;  %2988 = vmatprep.mubr.bf16.mxu0 %v4144_v2  ;;  %v4839_v1 = vld [vmem:[%s5285_s24 + $0x504] ss:$8 sps:$4 sm:$0xff]   ;;  %v4208_v2 = vcombine.high %v492_v58, %v500_v59  ;;  %v4864_v46 = vld [vmem:[%s5285_s24 + $0x4b0] ss:$8 sps:$4 sm:$0xff]  }
  0xc9   : > { %3101 = vmatprep.mubr.bf16.mxu1 %v4146_v3  ;;  %v4210_v3 = vcombine.high %v493_v62, %v501_v63  ;;  %v4867_v47 = vld [vmem:[%s5285_s24 + $0x5b0] ss:$8 sps:$4 sm:$0xff]   ;;  %v431_v62 = vld [vmem:[%s6525_s0 + $0x28] sm:$0xff] }
  0xca   : > { %2987 = vmatpush2.bf16.msra.mxu0 %v4786_v4  ;;  %v4834_v4 = vld [vmem:[%s5285_s24 + $0x400] ss:$8 sps:$4 sm:$0xff]  }
  0xcb   : > { %3100 = vmatpush2.bf16.msra.mxu1 %v4789_v5  ;;  %3182 = vmatprep.subr.bf16.mxu0 %v4794_v6  ;;  %v4837_v5 = vld [vmem:[%s5285_s24 + $0x500] ss:$8 sps:$4 sm:$0xff]   ;;  %v4842_v6 = vld [vmem:[%s5285_s24 + $0x4f4] ss:$8 sps:$4 sm:$0xff]  }
  0xcc   : > { %3295 = vmatprep.subr.bf16.mxu1 %v4797_v7  ;;  %v4845_v7 = vld [vmem:[%s5285_s24 + $0x5f4] ss:$8 sps:$4 sm:$0xff]   ;;  %v439_v63 = vld [vmem:[%s6525_s0 + $0x68] sm:$0xff] }
  0xcd   : > { %2989 = vmatmul.mubr.bf16.vlgmr.msra.gmra.mxu0 %v4143_v11  ;;  %v516_v11 = vld [vmem:[%s6525_s0 + $0x2d0] sm:$0xff] }
  0xce   : > { %3102 = vmatmul.mubr.bf16.vlgmr.msra.gmra.mxu1 %v4145_v12  ;;  %3183 = vmatpush1.bf16.msra.mxu0 %v4792_v8  ;;  %v4840_v8 = vld [vmem:[%s5285_s24 + $0x4f0] ss:$8 sps:$4 sm:$0xff]   ;;  %v4207_v12 = vcombine.low %v492_v58, %v500_v59  ;;  %v430_v58 = vld [vmem:[%s6525_s0 + $0x20] sm:$0xff] }
  0xcf   : > { %3296 = vmatpush1.bf16.msra.mxu1 %v4795_v15  ;;  %3184 = vmatprep.subr.bf16.mxu0 %v4800_v16  ;;  %v517_v15 = vld [vmem:[%s6525_s0 + $0x2d8] sm:$0xff]  ;;  %v4848_v16 = vld [vmem:[%s5285_s24 + $0x4e4] ss:$8 sps:$4 sm:$0xff]  }
  0xd0   : > { %3297 = vmatprep.subr.bf16.mxu1 %v4803_v17  ;;  %2998 = vmatprep.mubr.bf16.mxu0 %v4160_v18  ;;  %v4851_v17 = vld [vmem:[%s5285_s24 + $0x5e4] ss:$8 sps:$4 sm:$0xff]   ;;  %v4224_v18 = vcombine.high %v508_v10, %v516_v11  ;;  %v4225_v28 = vcombine.low %v509_v14, %v517_v15 }
  0xd1   : > { %3111 = vmatprep.mubr.bf16.mxu1 %v4162_v19  ;;  %v4226_v19 = vcombine.high %v509_v14, %v517_v15  ;;  %v447_v14 = vld [vmem:[%s6525_s0 + $0xa8] sm:$0xff] }
  0xd2   : > { %3185 = vmatpush1.bf16.msra.mxu0 %v4798_v20  ;;  %v4846_v20 = vld [vmem:[%s5285_s24 + $0x4e0] ss:$8 sps:$4 sm:$0xff]  }
  0xd3   : > { %3298 = vmatpush1.bf16.msra.mxu1 %v4801_v21  ;;  %3186 = vmatprep.subr.bf16.mxu0 %v4806_v22  ;;  %v4849_v21 = vld [vmem:[%s5285_s24 + $0x5e0] ss:$8 sps:$4 sm:$0xff]   ;;  %v4854_v22 = vld [vmem:[%s5285_s24 + $0x4d4] ss:$8 sps:$4 sm:$0xff]  }
  0xd4   : > { %3299 = vmatprep.subr.bf16.mxu1 %v4809_v23  ;;  %v4857_v23 = vld [vmem:[%s5285_s24 + $0x5d4] ss:$8 sps:$4 sm:$0xff]   ;;  %v455_v15 = vld [vmem:[%s6525_s0 + $0xe8] sm:$0xff] }
  0xd5   : > { %2999 = vmatmul.mubr.bf16.gmra.mxu0 %v4159_v26  ;;  %v532_v26 = vld [vmem:[%s6525_s0 + $0x350] sm:$0xff] }
  0xd6   : > { %3112 = vmatmul.mubr.bf16.gmra.mxu1 %v4161_v27  ;;  %3187 = vmatpush1.bf16.msra.mxu0 %v4804_v30  ;;  %v4223_v27 = vcombine.low %v508_v10, %v516_v11  ;;  %v533_v30 = vld [vmem:[%s6525_s0 + $0x358] sm:$0xff]  ;;  %v4239_v42 = vcombine.low %v524_v25, %v532_v26  ;;  %v446_v10 = vld [vmem:[%s6525_s0 + $0xa0] sm:$0xff] }
  0xd7   : > { %3300 = vmatpush1.bf16.msra.mxu1 %v4807_v31  ;;  %3188 = vmatprep.subr.bf16.mxu0 %v4812_v32  ;;  %v4855_v31 = vld [vmem:[%s5285_s24 + $0x5d0] ss:$8 sps:$4 sm:$0xff]   ;;  %v4860_v32 = vld [vmem:[%s5285_s24 + $0x4c4] ss:$8 sps:$4 sm:$0xff]  }
  0xd8   : > { %3301 = vmatprep.subr.bf16.mxu1 %v4815_v33  ;;  %3008 = vmatprep.mubr.bf16.mxu0 %v4176_v34  ;;  %v4863_v33 = vld [vmem:[%s5285_s24 + $0x5c4] ss:$8 sps:$4 sm:$0xff]   ;;  %v4240_v34 = vcombine.high %v524_v25, %v532_v26  ;;  %v4903_v25 = vld [vmem:[%s5285_s24 + $0x750] ss:$8 sps:$4 sm:$0xff]  }
  0xd9   : > { %3121 = vmatprep.mubr.bf16.mxu1 %v4178_v35  ;;  %v4242_v35 = vcombine.high %v525_v29, %v533_v30  ;;  %v454_v11 = vld [vmem:[%s6525_s0 + $0xe0] sm:$0xff] }
  0xda   : > { %3189 = vmatpush1.bf16.msra.mxu0 %v4810_v36  ;;  %v4858_v36 = vld [vmem:[%s5285_s24 + $0x4c0] ss:$8 sps:$4 sm:$0xff]  }
  0xdb   : > { %3302 = vmatpush1.bf16.msra.mxu1 %v4813_v37  ;;  %3190 = vmatprep.subr.bf16.mxu0 %v4818_v38  ;;  %v4861_v37 = vld [vmem:[%s5285_s24 + $0x5c0] ss:$8 sps:$4 sm:$0xff]   ;;  %v4866_v38 = vld [vmem:[%s5285_s24 + $0x4b4] ss:$8 sps:$4 sm:$0xff]  }
  0xdc   : > { %3303 = vmatprep.subr.bf16.mxu1 %v4821_v39  ;;  %v4869_v39 = vld [vmem:[%s5285_s24 + $0x5b4] ss:$8 sps:$4 sm:$0xff]   ;;  %v462_v26 = vld [vmem:[%s6525_s0 + $0x120] sm:$0xff] }
  0xdd   : > { %3009 = vmatmul.mubr.bf16.gmra.mxu0 %v4175_v43  ;;  %v4241_v43 = vcombine.low %v525_v29, %v533_v30  ;;  %v4165_v29 = vcombine.low %v447_v14, %v455_v15  ;;  %v463_v30 = vld [vmem:[%s6525_s0 + $0x128] sm:$0xff] }
  0xde   : > { %3122 = vmatmul.mubr.bf16.gmra.mxu1 %v4177_v44  ;;  %3191 = vmatpush1.bf16.msra.mxu0 %v4816_v40  ;;  %v540_v40 = vld [vmem:[%s6525_s0 + $0x390] sm:$0xff]  ;;  %v541_v44 = vld [vmem:[%s6525_s0 + $0x398] sm:$0xff] }
  0xdf   : > { %3304 = vmatpush1.bf16.msra.mxu1 %v4819_v41  ;;  %3192 = vmatprep.subr.bf16.mxu0 %v4824_v48  ;;  %v548_v41 = vld [vmem:[%s6525_s0 + $0x3d0] sm:$0xff]  ;;  %v4872_v48 = vld [vmem:[%s5285_s24 + $0x4a4] ss:$8 sps:$4 sm:$0xff]  }
  0xe0   : > { %3305 = vmatprep.subr.bf16.mxu1 %v4827_v49  ;;  %3018 = vmatprep.mubr.bf16.mxu0 %v4192_v50  ;;  %v4875_v49 = vld [vmem:[%s5285_s24 + $0x5a4] ss:$8 sps:$4 sm:$0xff]   ;;  %v4256_v50 = vcombine.high %v540_v40, %v548_v41  ;;  %v4255_v59 = vcombine.low %v540_v40, %v548_v41 }
  0xe1   : > { %3131 = vmatprep.mubr.bf16.mxu1 %v4194_v51  ;;  %v4258_v51 = vcombine.high %v541_v44, %v549_v45  ;;  %v478_v40 = vld [vmem:[%s6525_s0 + $0x1a0] sm:$0xff] }
  0xe2   : > { %3193 = vmatpush1.bf16.msra.mxu0 %v4822_v52  ;;  %v4870_v52 = vld [vmem:[%s5285_s24 + $0x4a0] ss:$8 sps:$4 sm:$0xff]  }
  0xe3   : > { %3306 = vmatpush1.bf16.msra.mxu1 %v4825_v53  ;;  %3194 = vmatprep.subr.bf16.mxu0 %v4830_v54  ;;  %v4873_v53 = vld [vmem:[%s5285_s24 + $0x5a0] ss:$8 sps:$4 sm:$0xff]   ;;  %v4878_v54 = vld [vmem:[%s5285_s24 + $0x494] ss:$8 sps:$4 sm:$0xff]  }
  0xe4   : > { %3307 = vmatprep.subr.bf16.mxu1 %v4833_v55  ;;  %v4881_v55 = vld [vmem:[%s5285_s24 + $0x594] ss:$8 sps:$4 sm:$0xff]  }
  0xe5   : > { %3019 = vmatmul.mubr.bf16.gmra.mxu0 %v4191_v60  ;;  %v4257_v60 = vcombine.low %v541_v44, %v549_v45  ;;  %v479_v44 = vld [vmem:[%s6525_s0 + $0x1a8] sm:$0xff] }
  0xe6   : > { %3132 = vmatmul.mubr.bf16.gmra.mxu1 %v4193_v61  ;;  %3195 = vmatpush1.bf16.msra.mxu0 %v4828_v56  ;;  %v4876_v56 = vld [vmem:[%s5285_s24 + $0x490] ss:$8 sps:$4 sm:$0xff]   ;;  %v438_v61 = vld [vmem:[%s6525_s0 + $0x60] sm:$0xff]  ;;  %v487_v45 = vld [vmem:[%s6525_s0 + $0x1e8] sm:$0xff] }
  0xe7   : > { %3308 = vmatpush1.bf16.msra.mxu1 %v4831_v57  ;;  %3196 = vmatprep.subr.bf16.mxu0 %v4836_v0  ;;  %v4879_v57 = vld [vmem:[%s5285_s24 + $0x590] ss:$8 sps:$4 sm:$0xff]   ;;  %v4884_v0 = vld [vmem:[%s5285_s24 + $0x484] ss:$8 sps:$4 sm:$0xff]  }
  0xe8   : > { %3309 = vmatprep.subr.bf16.mxu1 %v4839_v1  ;;  %3028 = vmatprep.mubr.bf16.mxu0 %v4208_v2  ;;  %v4887_v1 = vld [vmem:[%s5285_s24 + $0x584] ss:$8 sps:$4 sm:$0xff]   ;;  %v4148_v2 = vcombine.high %v430_v58, %v438_v61 }
  0xe9   : > { %3141 = vmatprep.mubr.bf16.mxu1 %v4210_v3  ;;  %v4150_v3 = vcombine.high %v431_v62, %v439_v63 }
  0xea   : > { %3197 = vmatpush1.bf16.msra.mxu0 %v4834_v4  ;;  %v4882_v4 = vld [vmem:[%s5285_s24 + $0x480] ss:$8 sps:$4 sm:$0xff]  }
  0xeb   : > { %3310 = vmatpush1.bf16.msra.mxu1 %v4837_v5  ;;  %3198 = vmatprep.subr.bf16.mxu0 %v4842_v6  ;;  %v4885_v5 = vld [vmem:[%s5285_s24 + $0x580] ss:$8 sps:$4 sm:$0xff]   ;;  %v4890_v6 = vld [vmem:[%s5285_s24 + $0x674] ss:$8 sps:$4 sm:$0xff]  }
  0xec   : > { %3311 = vmatprep.subr.bf16.mxu1 %v4845_v7  ;;  %v4893_v7 = vld [vmem:[%s5285_s24 + $0x774] ss:$8 sps:$4 sm:$0xff]  }
  0xed   : > { %3029 = vmatmul.mubr.bf16.gmra.mxu0 %v4207_v12  ;;  %v4147_v12 = vcombine.low %v430_v58, %v438_v61  ;;  %v4197_v58 = vcombine.low %v479_v44, %v487_v45  ;;  %v503_v61 = vld [vmem:[%s6525_s0 + $0x268] sm:$0xff] }
  0xee   : > { %3142 = vmatmul.mubr.bf16.gmra.mxu1 %v4209_v13  ;;  %3199 = vmatpush2.bf16.msra.mxu0 %v4840_v8  ;;  %v4888_v8 = vld [vmem:[%s5285_s24 + $0x670] ss:$8 sps:$4 sm:$0xff]   ;;  %v4149_v13 = vcombine.low %v431_v62, %v439_v63 }
  0xef   : > { %3312 = vmatpush2.bf16.msra.mxu1 %v4843_v9  ;;  %3200 = vmatprep.subr.bf16.mxu0 %v4848_v16  ;;  %v4891_v9 = vld [vmem:[%s5285_s24 + $0x770] ss:$8 sps:$4 sm:$0xff]   ;;  %v4896_v16 = vld [vmem:[%s5285_s24 + $0x664] ss:$8 sps:$4 sm:$0xff]  }
  0xf0   : > { %3313 = vmatprep.subr.bf16.mxu1 %v4851_v17  ;;  %3038 = vmatprep.mubr.bf16.mxu0 %v4224_v18  ;;  %v4899_v17 = vld [vmem:[%s5285_s24 + $0x764] ss:$8 sps:$4 sm:$0xff]   ;;  %v4164_v18 = vcombine.high %v446_v10, %v454_v11  ;;  %v4924_v62 = vld [vmem:[%s5285_s24 + $0x610] ss:$8 sps:$4 sm:$0xff]  }
  0xf1   : > { %3151 = vmatprep.mubr.bf16.mxu1 %v4226_v19  ;;  %v4166_v19 = vcombine.high %v447_v14, %v455_v15  ;;  %v4927_v63 = vld [vmem:[%s5285_s24 + $0x710] ss:$8 sps:$4 sm:$0xff]  }
  0xf2   : > { %3201 = vmatpush2.bf16.msra.mxu0 %v4846_v20  ;;  %v4894_v20 = vld [vmem:[%s5285_s24 + $0x660] ss:$8 sps:$4 sm:$0xff]   ;;  %v4936_v14 = vld [vmem:[%s5285_s24 + $0x6f0] ss:$8 sps:$4 sm:$0xff]  }
  0xf3   : > { %3314 = vmatpush2.bf16.msra.mxu1 %v4849_v21  ;;  %3202 = vmatprep.subr.bf16.mxu0 %v4854_v22  ;;  %v4897_v21 = vld [vmem:[%s5285_s24 + $0x760] ss:$8 sps:$4 sm:$0xff]   ;;  %v4902_v22 = vld [vmem:[%s5285_s24 + $0x654] ss:$8 sps:$4 sm:$0xff]   ;;  %v4939_v15 = vld [vmem:[%s5285_s24 + $0x7f0] ss:$8 sps:$4 sm:$0xff]  }
  0xf4   : > { %3315 = vmatprep.subr.bf16.mxu1 %v4857_v23  ;;  %v4905_v23 = vld [vmem:[%s5285_s24 + $0x754] ss:$8 sps:$4 sm:$0xff]  }
  0xf5   : > { %3039 = vmatmul.mubr.bf16.gmra.mxu0 %v4223_v27  ;;  %v470_v27 = vld [vmem:[%s6525_s0 + $0x160] sm:$0xff] }
  0xf6   : > { %3152 = vmatmul.mubr.bf16.gmra.mxu1 %v4225_v28  ;;  %3203 = vmatpush2.bf16.msra.mxu0 %v4852_v24  ;;  %v4900_v24 = vld [vmem:[%s5285_s24 + $0x650] ss:$8 sps:$4 sm:$0xff]   ;;  %v4163_v28 = vcombine.low %v446_v10, %v454_v11  ;;  %v4179_v41 = vcombine.low %v462_v26, %v470_v27  ;;  %v518_v11 = vld [vmem:[%s6525_s0 + $0x2e0] sm:$0xff] }
  0xf7   : > { %3316 = vmatpush2.bf16.msra.mxu1 %v4855_v31  ;;  %3204 = vmatprep.subr.bf16.mxu0 %v4860_v32  ;;  %v471_v31 = vld [vmem:[%s6525_s0 + $0x168] sm:$0xff] }
  0xf8   : > { %3317 = vmatprep.subr.bf16.mxu1 %v4863_v33  ;;  %3048 = vmatprep.mubr.bf16.mxu0 %v4240_v34  ;;  %v4908_v32 = vld [vmem:[%s5285_s24 + $0x644] ss:$8 sps:$4 sm:$0xff]   ;;  %v4180_v34 = vcombine.high %v462_v26, %v470_v27 }
  0xf9   : > { %3161 = vmatprep.mubr.bf16.mxu1 %v4242_v35  ;;  %v4911_v33 = vld [vmem:[%s5285_s24 + $0x744] ss:$8 sps:$4 sm:$0xff]   ;;  %v4182_v35 = vcombine.high %v463_v30, %v471_v31 }
  0xfa   : > { %3205 = vmatpush2.bf16.msra.mxu0 %v4858_v36  ;;  %v4906_v36 = vld [vmem:[%s5285_s24 + $0x640] ss:$8 sps:$4 sm:$0xff]  }
  0xfb   : > { %3318 = vmatpush2.bf16.msra.mxu1 %v4861_v37  ;;  %3206 = vmatprep.subr.bf16.mxu0 %v4866_v38  ;;  %v4909_v37 = vld [vmem:[%s5285_s24 + $0x740] ss:$8 sps:$4 sm:$0xff]   ;;  %v4914_v38 = vld [vmem:[%s5285_s24 + $0x634] ss:$8 sps:$4 sm:$0xff]  }
  0xfc   : > { %3319 = vmatprep.subr.bf16.mxu1 %v4869_v39  ;;  %v4917_v39 = vld [vmem:[%s5285_s24 + $0x734] ss:$8 sps:$4 sm:$0xff]   ;;  %v534_v27 = vld [vmem:[%s6525_s0 + $0x360] sm:$0xff] }
  0xfd   : > { %3049 = vmatmul.mubr.bf16.gmra.mxu0 %v4239_v42  ;;  %v4181_v42 = vcombine.low %v463_v30, %v471_v31  ;;  %v4948_v30 = vld [vmem:[%s5285_s24 + $0x6d0] ss:$8 sps:$4 sm:$0xff]  }
  0xfe   : > { %3162 = vmatmul.mubr.bf16.gmra.mxu1 %v4241_v43  ;;  %3207 = vmatpush2.bf16.msra.mxu0 %v4864_v46  ;;  %v486_v43 = vld [vmem:[%s6525_s0 + $0x1e0] sm:$0xff]  ;;  %v4912_v46 = vld [vmem:[%s5285_s24 + $0x630] ss:$8 sps:$4 sm:$0xff]  }
  0xff   : > { %3320 = vmatpush2.bf16.msra.mxu1 %v4867_v47  ;;  %3208 = vmatprep.subr.bf16.mxu0 %v4872_v48  ;;  %v4915_v47 = vld [vmem:[%s5285_s24 + $0x730] ss:$8 sps:$4 sm:$0xff]   ;;  %v4920_v48 = vld [vmem:[%s5285_s24 + $0x624] ss:$8 sps:$4 sm:$0xff]  }
 0x100   : > { %3321 = vmatprep.subr.bf16.mxu1 %v4875_v49  ;;  %3058 = vmatprep.mubr.bf16.mxu0 %v4256_v50  ;;  %v4923_v49 = vld [vmem:[%s5285_s24 + $0x724] ss:$8 sps:$4 sm:$0xff]   ;;  %v4196_v50 = vcombine.high %v478_v40, %v486_v43  ;;  %v4951_v31 = vld [vmem:[%s5285_s24 + $0x7d0] ss:$8 sps:$4 sm:$0xff]  }
 0x101   : > { %3171 = vmatprep.mubr.bf16.mxu1 %v4258_v51  ;;  %v4198_v51 = vcombine.high %v479_v44, %v487_v45  ;;  %v543_v44 = vld [vmem:[%s6525_s0 + $0x3a8] sm:$0xff] }
 0x102   : > { %3209 = vmatpush2.bf16.msra.mxu0 %v4870_v52  ;;  %v4918_v52 = vld [vmem:[%s5285_s24 + $0x620] ss:$8 sps:$4 sm:$0xff]  }
 0x103   : > { %3322 = vmatpush2.bf16.msra.mxu1 %v4873_v53  ;;  %3210 = vmatprep.subr.bf16.mxu0 %v4878_v54  ;;  %v4921_v53 = vld [vmem:[%s5285_s24 + $0x720] ss:$8 sps:$4 sm:$0xff]   ;;  %v4926_v54 = vld [vmem:[%s5285_s24 + $0x614] ss:$8 sps:$4 sm:$0xff]  }
 0x104   : > { %3323 = vmatprep.subr.bf16.mxu1 %v4881_v55  ;;  %v4929_v55 = vld [vmem:[%s5285_s24 + $0x714] ss:$8 sps:$4 sm:$0xff]   ;;  %v551_v45 = vld [vmem:[%s6525_s0 + $0x3e8] sm:$0xff] }
 0x105   : > { %3059 = vmatmul.mubr.bf16.gmra.mxu0 %v4255_v59  ;;  %v502_v59 = vld [vmem:[%s6525_s0 + $0x260] sm:$0xff] }
 0x106   : > { %3172 = vmatmul.mubr.bf16.gmra.mxu1 %v4257_v60  ;;  %3211 = vmatpush2.bf16.msra.mxu0 %v4876_v56  ;;  %v494_v56 = vld [vmem:[%s6525_s0 + $0x220] sm:$0xff]  ;;  %v495_v60 = vld [vmem:[%s6525_s0 + $0x228] sm:$0xff] }
 0x107   : > { %3324 = vmatpush2.bf16.msra.mxu1 %v4879_v57  ;;  %3212 = vmatprep.subr.bf16.mxu0 %v4884_v0  ;;  %v4195_v57 = vcombine.low %v478_v40, %v486_v43  ;;  %v4932_v0 = vld [vmem:[%s5285_s24 + $0x604] ss:$8 sps:$4 sm:$0xff]   ;;  %v4213_v10 = vcombine.low %v495_v60, %v503_v61 }
 0x108   : > { %3325 = vmatprep.subr.bf16.mxu1 %v4887_v1  ;;  %3214 = vmatprep.mubr.bf16.mxu0 %v4148_v2  ;;  %v4935_v1 = vld [vmem:[%s5285_s24 + $0x704] ss:$8 sps:$4 sm:$0xff]   ;;  %v4212_v2 = vcombine.high %v494_v56, %v502_v59 }
 0x109   : > { %3327 = vmatprep.mubr.bf16.mxu1 %v4150_v3  ;;  %v4214_v3 = vcombine.high %v495_v60, %v503_v61  ;;  %v542_v40 = vld [vmem:[%s6525_s0 + $0x3a0] sm:$0xff]  ;;  %v433_v60 = vld [vmem:[%s6525_s0 + $0x38] sm:$0xff] }
 0x10a   : > { %3213 = vmatpush2.bf16.msra.mxu0 %v4882_v4  ;;  %v4930_v4 = vld [vmem:[%s5285_s24 + $0x600] ss:$8 sps:$4 sm:$0xff]   ;;  %v441_v61 = vld [vmem:[%s6525_s0 + $0x78] sm:$0xff] }
 0x10b   : > { %3326 = vmatpush2.bf16.msra.mxu1 %v4885_v5  ;;  %3408 = vmatprep.subr.bf16.mxu0 %v4890_v6  ;;  %v4933_v5 = vld [vmem:[%s5285_s24 + $0x700] ss:$8 sps:$4 sm:$0xff]   ;;  %v4938_v6 = vld [vmem:[%s5285_s24 + $0x6f4] ss:$8 sps:$4 sm:$0xff]  }
 0x10c   : > { %3521 = vmatprep.subr.bf16.mxu1 %v4893_v7  ;;  %v4941_v7 = vld [vmem:[%s5285_s24 + $0x7f4] ss:$8 sps:$4 sm:$0xff]   ;;  %v550_v43 = vld [vmem:[%s6525_s0 + $0x3e0] sm:$0xff] }
 0x10d   : > { %3215 = vmatmul.mubr.bf16.vlgmr.msra.gmra.mxu0 %v4147_v12  ;;  %v511_v12 = vld [vmem:[%s6525_s0 + $0x2a8] sm:$0xff] }
 0x10e   : > { %3328 = vmatmul.mubr.bf16.vlgmr.msra.gmra.mxu1 %v4149_v13  ;;  %3409 = vmatpush1.bf16.msra.mxu0 %v4888_v8  ;;  %v510_v8 = vld [vmem:[%s6525_s0 + $0x2a0] sm:$0xff]  ;;  %v519_v13 = vld [vmem:[%s6525_s0 + $0x2e8] sm:$0xff] }
 0x10f   : > { %3522 = vmatpush1.bf16.msra.mxu1 %v4891_v9  ;;  %3410 = vmatprep.subr.bf16.mxu0 %v4896_v16  ;;  %v4211_v9 = vcombine.low %v494_v56, %v502_v59  ;;  %v4944_v16 = vld [vmem:[%s5285_s24 + $0x6e4] ss:$8 sps:$4 sm:$0xff]   ;;  %v4229_v26 = vcombine.low %v511_v12, %v519_v13  ;;  %v432_v56 = vld [vmem:[%s6525_s0 + $0x30] sm:$0xff] }
 0x110   : > { %3523 = vmatprep.subr.bf16.mxu1 %v4899_v17  ;;  %3224 = vmatprep.mubr.bf16.mxu0 %v4164_v18  ;;  %v4947_v17 = vld [vmem:[%s5285_s24 + $0x7e4] ss:$8 sps:$4 sm:$0xff]   ;;  %v4228_v18 = vcombine.high %v510_v8, %v518_v11  ;;  %v440_v59 = vld [vmem:[%s6525_s0 + $0x70] sm:$0xff] }
 0x111   : > { %3337 = vmatprep.mubr.bf16.mxu1 %v4166_v19  ;;  %v4230_v19 = vcombine.high %v511_v12, %v519_v13 }
 0x112   : > { %3411 = vmatpush1.bf16.msra.mxu0 %v4894_v20  ;;  %v4942_v20 = vld [vmem:[%s5285_s24 + $0x6e0] ss:$8 sps:$4 sm:$0xff]  }
 0x113   : > { %3524 = vmatpush1.bf16.msra.mxu1 %v4897_v21  ;;  %3412 = vmatprep.subr.bf16.mxu0 %v4902_v22  ;;  %v4945_v21 = vld [vmem:[%s5285_s24 + $0x7e0] ss:$8 sps:$4 sm:$0xff]   ;;  %v4950_v22 = vld [vmem:[%s5285_s24 + $0x6d4] ss:$8 sps:$4 sm:$0xff]  }
 0x114   : > { %3525 = vmatprep.subr.bf16.mxu1 %v4905_v23  ;;  %v4953_v23 = vld [vmem:[%s5285_s24 + $0x7d4] ss:$8 sps:$4 sm:$0xff]  }
 0x115   : > { %3225 = vmatmul.mubr.bf16.gmra.mxu0 %v4163_v28  ;;  %v527_v28 = vld [vmem:[%s6525_s0 + $0x328] sm:$0xff] }
 0x116   : > { %3338 = vmatmul.mubr.bf16.gmra.mxu1 %v4165_v29  ;;  %3413 = vmatpush1.bf16.msra.mxu0 %v4900_v24  ;;  %v526_v24 = vld [vmem:[%s6525_s0 + $0x320] sm:$0xff]  ;;  %v535_v29 = vld [vmem:[%s6525_s0 + $0x368] sm:$0xff] }
 0x117   : > { %3526 = vmatpush1.bf16.msra.mxu1 %v4903_v25  ;;  %3414 = vmatprep.subr.bf16.mxu0 %v4908_v32  ;;  %v4227_v25 = vcombine.low %v510_v8, %v518_v11  ;;  %v4956_v32 = vld [vmem:[%s5285_s24 + $0x6c4] ss:$8 sps:$4 sm:$0xff]   ;;  %v449_v8 = vld [vmem:[%s6525_s0 + $0xb8] sm:$0xff]  ;;  %v4153_v11 = vcombine.low %v433_v60, %v441_v61 }
 0x118   : > { %3527 = vmatprep.subr.bf16.mxu1 %v4911_v33  ;;  %3234 = vmatprep.mubr.bf16.mxu0 %v4180_v34  ;;  %v4959_v33 = vld [vmem:[%s5285_s24 + $0x7c4] ss:$8 sps:$4 sm:$0xff]   ;;  %v4244_v34 = vcombine.high %v526_v24, %v534_v27 }
 0x119   : > { %3347 = vmatprep.mubr.bf16.mxu1 %v4182_v35  ;;  %v4246_v35 = vcombine.high %v527_v28, %v535_v29 }
 0x11a   : > { %3415 = vmatpush1.bf16.msra.mxu0 %v4906_v36  ;;  %v4954_v36 = vld [vmem:[%s5285_s24 + $0x6c0] ss:$8 sps:$4 sm:$0xff]  }
 0x11b   : > { %3528 = vmatpush1.bf16.msra.mxu1 %v4909_v37  ;;  %3416 = vmatprep.subr.bf16.mxu0 %v4914_v38  ;;  %v4957_v37 = vld [vmem:[%s5285_s24 + $0x7c0] ss:$8 sps:$4 sm:$0xff]   ;;  %v4962_v38 = vld [vmem:[%s5285_s24 + $0x6b4] ss:$8 sps:$4 sm:$0xff]  }
 0x11c   : > { %3529 = vmatprep.subr.bf16.mxu1 %v4917_v39  ;;  %v4965_v39 = vld [vmem:[%s5285_s24 + $0x7b4] ss:$8 sps:$4 sm:$0xff]  }
 0x11d   : > { %3235 = vmatmul.mubr.bf16.gmra.mxu0 %v4179_v41  ;;  %v4243_v41 = vcombine.low %v526_v24, %v534_v27 }
 0x11e   : > { %3348 = vmatmul.mubr.bf16.gmra.mxu1 %v4181_v42  ;;  %3417 = vmatpush1.bf16.msra.mxu0 %v4912_v46  ;;  %v4245_v42 = vcombine.low %v527_v28, %v535_v29  ;;  %v4960_v46 = vld [vmem:[%s5285_s24 + $0x6b0] ss:$8 sps:$4 sm:$0xff]  }
 0x11f   : > { %3530 = vmatpush1.bf16.msra.mxu1 %v4915_v47  ;;  %3418 = vmatprep.subr.bf16.mxu0 %v4920_v48  ;;  %v4963_v47 = vld [vmem:[%s5285_s24 + $0x7b0] ss:$8 sps:$4 sm:$0xff]   ;;  %v4968_v48 = vld [vmem:[%s5285_s24 + $0x6a4] ss:$8 sps:$4 sm:$0xff]  }
 0x120   : > { %3531 = vmatprep.subr.bf16.mxu1 %v4923_v49  ;;  %3244 = vmatprep.mubr.bf16.mxu0 %v4196_v50  ;;  %v4971_v49 = vld [vmem:[%s5285_s24 + $0x7a4] ss:$8 sps:$4 sm:$0xff]   ;;  %v4260_v50 = vcombine.high %v542_v40, %v550_v43 }
 0x121   : > { %3357 = vmatprep.mubr.bf16.mxu1 %v4198_v51  ;;  %v4262_v51 = vcombine.high %v543_v44, %v551_v45 }
 0x122   : > { %3419 = vmatpush1.bf16.msra.mxu0 %v4918_v52  ;;  %v4966_v52 = vld [vmem:[%s5285_s24 + $0x6a0] ss:$8 sps:$4 sm:$0xff]  }
 0x123   : > { %3532 = vmatpush1.bf16.msra.mxu1 %v4921_v53  ;;  %3420 = vmatprep.subr.bf16.mxu0 %v4926_v54  ;;  %v4969_v53 = vld [vmem:[%s5285_s24 + $0x7a0] ss:$8 sps:$4 sm:$0xff]   ;;  %v4974_v54 = vld [vmem:[%s5285_s24 + $0x694] ss:$8 sps:$4 sm:$0xff]  }
 0x124   : > { %3533 = vmatprep.subr.bf16.mxu1 %v4929_v55  ;;  %v4977_v55 = vld [vmem:[%s5285_s24 + $0x794] ss:$8 sps:$4 sm:$0xff]  }
 0x125   : > { %3245 = vmatmul.mubr.bf16.gmra.mxu0 %v4195_v57  ;;  %v4259_v57 = vcombine.low %v542_v40, %v550_v43  ;;  %v488_v40 = vld [vmem:[%s6525_s0 + $0x1f0] sm:$0xff] }
 0x126   : > { %3358 = vmatmul.mubr.bf16.gmra.mxu1 %v4197_v58  ;;  %3421 = vmatpush1.bf16.msra.mxu0 %v4924_v62  ;;  %v4261_v58 = vcombine.low %v543_v44, %v551_v45  ;;  %v4972_v62 = vld [vmem:[%s5285_s24 + $0x690] ss:$8 sps:$4 sm:$0xff]  }
 0x127   : > { %3534 = vmatpush1.bf16.msra.mxu1 %v4927_v63  ;;  %3422 = vmatprep.subr.bf16.mxu0 %v4932_v0  ;;  %v4975_v63 = vld [vmem:[%s5285_s24 + $0x790] ss:$8 sps:$4 sm:$0xff]   ;;  %v4980_v0 = vld [vmem:[%s5285_s24 + $0x684] ss:$8 sps:$4 sm:$0xff]  }
 0x128   : > { %3535 = vmatprep.subr.bf16.mxu1 %v4935_v1  ;;  %3254 = vmatprep.mubr.bf16.mxu0 %v4212_v2  ;;  %v4983_v1 = vld [vmem:[%s5285_s24 + $0x784] ss:$8 sps:$4 sm:$0xff]   ;;  %v4152_v2 = vcombine.high %v432_v56, %v440_v59 }
 0x129   : > { %3367 = vmatprep.mubr.bf16.mxu1 %v4214_v3  ;;  %v4154_v3 = vcombine.high %v433_v60, %v441_v61  ;;  %v504_v60 = vld [vmem:[%s6525_s0 + $0x270] sm:$0xff]  ;;  %v497_v61 = vld [vmem:[%s6525_s0 + $0x238] sm:$0xff] }
 0x12a   : > { %3423 = vmatpush1.bf16.msra.mxu0 %v4930_v4  ;;  %v4978_v4 = vld [vmem:[%s5285_s24 + $0x680] ss:$8 sps:$4 sm:$0xff]  }
 0x12b   : > { %3536 = vmatpush1.bf16.msra.mxu1 %v4933_v5  ;;  %3424 = vmatprep.subr.bf16.mxu0 %v4938_v6  ;;  %v4981_v5 = vld [vmem:[%s5285_s24 + $0x780] ss:$8 sps:$4 sm:$0xff]   ;;  %v448_v6 = vld [vmem:[%s6525_s0 + $0xb0] sm:$0xff] }
 0x12c   : > { %3537 = vmatprep.subr.bf16.mxu1 %v4941_v7  ;;  %v456_v7 = vld [vmem:[%s6525_s0 + $0xf0] sm:$0xff] }
 0x12d   : > { %3255 = vmatmul.mubr.bf16.gmra.mxu0 %v4211_v9  ;;  %v457_v9 = vld [vmem:[%s6525_s0 + $0xf8] sm:$0xff]  ;;  %v4168_v12 = vcombine.high %v448_v6, %v456_v7 }
 0x12e   : > { %3368 = vmatmul.mubr.bf16.gmra.mxu1 %v4213_v10  ;;  %3425 = vmatpush2.bf16.msra.mxu0 %v4936_v14  ;;  %v4151_v10 = vcombine.low %v432_v56, %v440_v59  ;;  %v4170_v13 = vcombine.high %v449_v8, %v457_v9  ;;  %v4169_v27 = vcombine.low %v449_v8, %v457_v9 }
 0x12f   : > { %3538 = vmatpush2.bf16.msra.mxu1 %v4939_v15  ;;  %3426 = vmatprep.subr.bf16.mxu0 %v4944_v16 }
 0x130   : > { %3539 = vmatprep.subr.bf16.mxu1 %v4947_v17  ;;  %3264 = vmatprep.mubr.bf16.mxu0 %v4228_v18  ;;  %v464_v17 = vld [vmem:[%s6525_s0 + $0x130] sm:$0xff] }
 0x131   : > { %3377 = vmatprep.mubr.bf16.mxu1 %v4230_v19 }
 0x132   : > { %3427 = vmatpush2.bf16.msra.mxu0 %v4942_v20  ;;  %v472_v20 = vld [vmem:[%s6525_s0 + $0x170] sm:$0xff] }
 0x133   : > { %3540 = vmatpush2.bf16.msra.mxu1 %v4945_v21  ;;  %3428 = vmatprep.subr.bf16.mxu0 %v4950_v22  ;;  %v465_v21 = vld [vmem:[%s6525_s0 + $0x138] sm:$0xff]  ;;  %v4184_v29 = vcombine.high %v464_v17, %v472_v20 }
 0x134   : > { %3541 = vmatprep.subr.bf16.mxu1 %v4953_v23  ;;  %v473_v22 = vld [vmem:[%s6525_s0 + $0x178] sm:$0xff] }
 0x135   : > { %3265 = vmatmul.mubr.bf16.gmra.mxu0 %v4227_v25 }
 0x136   : > { %3378 = vmatmul.mubr.bf16.gmra.mxu1 %v4229_v26  ;;  %3429 = vmatpush2.bf16.msra.mxu0 %v4948_v30  ;;  %v4167_v26 = vcombine.low %v448_v6, %v456_v7  ;;  %v4186_v30 = vcombine.high %v465_v21, %v473_v22 }
 0x137   : > { %3542 = vmatpush2.bf16.msra.mxu1 %v4951_v31  ;;  %3430 = vmatprep.subr.bf16.mxu0 %v4956_v32 }
 0x138   : > { %3543 = vmatprep.subr.bf16.mxu1 %v4959_v33  ;;  %3274 = vmatprep.mubr.bf16.mxu0 %v4244_v34 }
 0x139   : > { %3387 = vmatprep.mubr.bf16.mxu1 %v4246_v35 }
 0x13a   : > { %3431 = vmatpush2.bf16.msra.mxu0 %v4954_v36 }
 0x13b   : > { %3544 = vmatpush2.bf16.msra.mxu1 %v4957_v37  ;;  %3432 = vmatprep.subr.bf16.mxu0 %v4962_v38  ;;  %v480_v37 = vld [vmem:[%s6525_s0 + $0x1b0] sm:$0xff] }
 0x13c   : > { %3545 = vmatprep.subr.bf16.mxu1 %v4965_v39 }
 0x13d   : > { %3275 = vmatmul.mubr.bf16.gmra.mxu0 %v4243_v41  ;;  %v481_v41 = vld [vmem:[%s6525_s0 + $0x1b8] sm:$0xff] }
 0x13e   : > { %3388 = vmatmul.mubr.bf16.gmra.mxu1 %v4245_v42  ;;  %3433 = vmatpush2.bf16.msra.mxu0 %v4960_v46  ;;  %v489_v42 = vld [vmem:[%s6525_s0 + $0x1f8] sm:$0xff]  ;;  %v4183_v46 = vcombine.low %v464_v17, %v472_v20  ;;  %v520_v17 = vld [vmem:[%s6525_s0 + $0x2f0] sm:$0xff] }
 0x13f   : > { %3546 = vmatpush2.bf16.msra.mxu1 %v4963_v47  ;;  %3434 = vmatprep.subr.bf16.mxu0 %v4968_v48  ;;  %v4185_v47 = vcombine.low %v465_v21, %v473_v22 }
 0x140   : > { %3547 = vmatprep.subr.bf16.mxu1 %v4971_v49  ;;  %3284 = vmatprep.mubr.bf16.mxu0 %v4260_v50  ;;  %v4200_v49 = vcombine.high %v480_v37, %v488_v40  ;;  %v4202_v50 = vcombine.high %v481_v41, %v489_v42 }
 0x141   : > { %3397 = vmatprep.mubr.bf16.mxu1 %v4262_v51 }
 0x142   : > { %3435 = vmatpush2.bf16.msra.mxu0 %v4966_v52 }
 0x143   : > { %3548 = vmatpush2.bf16.msra.mxu1 %v4969_v53  ;;  %3436 = vmatprep.subr.bf16.mxu0 %v4974_v54 }
 0x144   : > { %3549 = vmatprep.subr.bf16.mxu1 %v4977_v55 }
 0x145   : > { %3285 = vmatmul.mubr.bf16.gmra.mxu0 %v4259_v57  ;;  %v496_v57 = vld [vmem:[%s6525_s0 + $0x230] sm:$0xff] }
 0x146   : > { %3398 = vmatmul.mubr.bf16.gmra.mxu1 %v4261_v58  ;;  %3437 = vmatpush2.bf16.msra.mxu0 %v4972_v62  ;;  %v505_v62 = vld [vmem:[%s6525_s0 + $0x278] sm:$0xff] }
 0x147   : > { %3550 = vmatpush2.bf16.msra.mxu1 %v4975_v63  ;;  %3438 = vmatprep.subr.bf16.mxu0 %v4980_v0  ;;  %v4218_v6 = vcombine.high %v497_v61, %v505_v62 }
 0x148   : > { %3551 = vmatprep.subr.bf16.mxu1 %v4983_v1  ;;  %3440 = vmatprep.mubr.bf16.mxu0 %v4152_v2  ;;  %v4199_v2 = vcombine.low %v480_v37, %v488_v40 }
 0x149   : > { %3553 = vmatprep.mubr.bf16.mxu1 %v4154_v3  ;;  %v4201_v3 = vcombine.low %v481_v41, %v489_v42  ;;  %v536_v41 = vld [vmem:[%s6525_s0 + $0x370] sm:$0xff]  ;;  %v529_v42 = vld [vmem:[%s6525_s0 + $0x338] sm:$0xff] }
 0x14a   : > { %3439 = vmatpush2.bf16.msra.mxu0 %v4978_v4 }
 0x14b   : > { %3552 = vmatpush2.bf16.msra.mxu1 %v4981_v5  ;;  %v4216_v5 = vcombine.high %v496_v57, %v504_v60 }
 0x14d   : > { %v2764_v14 = vpop.f32.mrf.mxu0  ;;  %3441 = vmatmul.mubr.bf16.vlgmr.msra.gmra.mxu0 %v4151_v10 }
 0x14e   : > { %v2877_v15 = vpop.f32.mrf.mxu1  ;;  %3554 = vmatmul.mubr.bf16.vlgmr.msra.gmra.mxu1 %v4153_v11  ;;  %3450 = vmatprep.mubr.bf16.mxu0 %v4168_v12 }
 0x14f   : > { %v5869_v16 = vadd.f32 %v2877_v15, %v2764_v14  ;;  %3563 = vmatprep.mubr.bf16.mxu1 %v4170_v13  ;;  %v2766_v18 = vpop.f32.mrf.mxu0  ;;  %v512_v13 = vld [vmem:[%s6525_s0 + $0x2b0] sm:$0xff] }
 0x150   : > { %v2879_v19 = vpop.f32.mrf.mxu1 }
 0x151   : > { %v5883_v23 = vadd.f32 %v2879_v19, %v2766_v18  ;;  %v2768_v24 = vpop.f32.mrf.mxu0  ;;  %v513_v18 = vld [vmem:[%s6525_s0 + $0x2b8] sm:$0xff] }
 0x152   : > { %v2881_v25 = vpop.f32.mrf.mxu1  ;;  %v521_v19 = vld [vmem:[%s6525_s0 + $0x2f8] sm:$0xff] }
 0x153   : > { %v5885_v28 = vadd.f32 %v2881_v25, %v2768_v24  ;;  %v2770_v31 = vpop.f32.mrf.mxu0  ;;  %v4215_v24 = vcombine.low %v496_v57, %v504_v60  ;;  %v4217_v25 = vcombine.low %v497_v61, %v505_v62  ;;  %v544_v62 = vld [vmem:[%s6525_s0 + $0x3b0] sm:$0xff] }
 0x154   : > { %v2883_v32 = vpop.f32.mrf.mxu1 }
 0x155   : > { %v5887_v33 = vadd.f32 %v2883_v32, %v2770_v31  ;;  %v2774_v34 = vpop.f32.mrf.mxu0  ;;  %3451 = vmatmul.mubr.bf16.gmra.mxu0 %v4167_v26 }
 0x156   : > { %v2887_v35 = vpop.f32.mrf.mxu1  ;;  %3564 = vmatmul.mubr.bf16.gmra.mxu1 %v4169_v27  ;;  %3460 = vmatprep.mubr.bf16.mxu0 %v4184_v29  ;;  %v4232_v27 = vcombine.high %v512_v13, %v520_v17  ;;  %v4234_v29 = vcombine.high %v513_v18, %v521_v19 }
 0x157   : > { %v5889_v36 = vadd.f32 %v2887_v35, %v2774_v34  ;;  %3573 = vmatprep.mubr.bf16.mxu1 %v4186_v30  ;;  %v2776_v38 = vpop.f32.mrf.mxu0 }
 0x158   : > { %v2889_v39 = vpop.f32.mrf.mxu1 }
 0x159   : > { %v5903_v43 = vadd.f32 %v2889_v39, %v2776_v38  ;;  %v2778_v44 = vpop.f32.mrf.mxu0  ;;  %v528_v38 = vld [vmem:[%s6525_s0 + $0x330] sm:$0xff] }
 0x15a   : > { %v2891_v45 = vpop.f32.mrf.mxu1 }
 0x15b   : > { %v5905_v48 = vadd.f32 %v2891_v45, %v2778_v44  ;;  %v2780_v51 = vpop.f32.mrf.mxu0  ;;  %v537_v44 = vld [vmem:[%s6525_s0 + $0x378] sm:$0xff] }
 0x15c   : > { %v2893_v52 = vpop.f32.mrf.mxu1 }
 0x15d   : > { %v5907_v53 = vadd.f32 %v2893_v52, %v2780_v51  ;;  %v2784_v54 = vpop.f32.mrf.mxu0  ;;  %3461 = vmatmul.mubr.bf16.gmra.mxu0 %v4183_v46  ;;  %v4248_v52 = vcombine.high %v528_v38, %v536_v41 }
 0x15e   : > { %v2897_v55 = vpop.f32.mrf.mxu1  ;;  %3574 = vmatmul.mubr.bf16.gmra.mxu1 %v4185_v47  ;;  %3470 = vmatprep.mubr.bf16.mxu0 %v4200_v49  ;;  %v4231_v49 = vcombine.low %v512_v13, %v520_v17 }
 0x15f   : > { %v5909_v56 = vadd.f32 %v2897_v55, %v2784_v54  ;;  %3583 = vmatprep.mubr.bf16.mxu1 %v4202_v50  ;;  %v2786_v58 = vpop.f32.mrf.mxu0  ;;  %v4233_v50 = vcombine.low %v513_v18, %v521_v19  ;;  %v4250_v54 = vcombine.high %v529_v42, %v537_v44 }
 0x160   : > { %v2899_v59 = vpop.f32.mrf.mxu1 }
 0x161   : > { %v5923_v63 = vadd.f32 %v2899_v59, %v2786_v58  ;;  %v2788_v0 = vpop.f32.mrf.mxu0 }
 0x162   : > { %v2901_v1 = vpop.f32.mrf.mxu1 }
 0x163   : > { %v5925_v4 = vadd.f32 %v2901_v1, %v2788_v0  ;;  %v2790_v7 = vpop.f32.mrf.mxu0 }
 0x164   : > { %v2903_v8 = vpop.f32.mrf.mxu1 }
 0x165   : > { %v5927_v9 = vadd.f32 %v2903_v8, %v2790_v7  ;;  %v2794_v10 = vpop.f32.mrf.mxu0  ;;  %3471 = vmatmul.mubr.bf16.gmra.mxu0 %v4199_v2  ;;  %v552_v2 = vld [vmem:[%s6525_s0 + $0x3f0] sm:$0xff] }
 0x166   : > { %v2907_v11 = vpop.f32.mrf.mxu1  ;;  %3584 = vmatmul.mubr.bf16.gmra.mxu1 %v4201_v3  ;;  %3480 = vmatprep.mubr.bf16.mxu0 %v4216_v5  ;;  %v545_v3 = vld [vmem:[%s6525_s0 + $0x3b8] sm:$0xff] }
 0x167   : > { %v5929_v12 = vadd.f32 %v2907_v11, %v2794_v10  ;;  %3593 = vmatprep.mubr.bf16.mxu1 %v4218_v6  ;;  %v2796_v14 = vpop.f32.mrf.mxu0  ;;  %v553_v5 = vld [vmem:[%s6525_s0 + $0x3f8] sm:$0xff]  ;;  %v4247_v10 = vcombine.low %v528_v38, %v536_v41  ;;  %v4249_v11 = vcombine.low %v529_v42, %v537_v44 }
 0x168   : > { %v2909_v15 = vpop.f32.mrf.mxu1 }
 0x169   : > { %v5943_v20 = vadd.f32 %v2909_v15, %v2796_v14  ;;  %v2798_v21 = vpop.f32.mrf.mxu0  ;;  %v4264_v14 = vcombine.high %v544_v62, %v552_v2  ;;  %v4266_v15 = vcombine.high %v545_v3, %v553_v5 }
 0x16a   : > { %v2911_v22 = vpop.f32.mrf.mxu1 }
 0x16b   : > { %v5945_v26 = vadd.f32 %v2911_v22, %v2798_v21  ;;  %v2800_v30 = vpop.f32.mrf.mxu0 }
 0x16c   : > { %v2913_v31 = vpop.f32.mrf.mxu1 }
 0x16d   : > { %v5947_v32 = vadd.f32 %v2913_v31, %v2800_v30  ;;  %v2804_v34 = vpop.f32.mrf.mxu0  ;;  %3481 = vmatmul.mubr.bf16.gmra.mxu0 %v4215_v24 }
 0x16e   : > { %v2917_v35 = vpop.f32.mrf.mxu1  ;;  %3594 = vmatmul.mubr.bf16.gmra.mxu1 %v4217_v25  ;;  %3490 = vmatprep.mubr.bf16.mxu0 %v4232_v27 }
 0x16f   : > { %v5949_v37 = vadd.f32 %v2917_v35, %v2804_v34  ;;  %3603 = vmatprep.mubr.bf16.mxu1 %v4234_v29  ;;  %v2806_v39 = vpop.f32.mrf.mxu0  ;;  %v4263_v34 = vcombine.low %v544_v62, %v552_v2  ;;  %v4265_v35 = vcombine.low %v545_v3, %v553_v5 }
 0x170   : > { %v2919_v40 = vpop.f32.mrf.mxu1 }
 0x171   : > { %v5963_v45 = vadd.f32 %v2919_v40, %v2806_v39  ;;  %v2808_v46 = vpop.f32.mrf.mxu0 }
 0x172   : > { %v2921_v47 = vpop.f32.mrf.mxu1 }
 0x173   : > { %v5965_v51 = vadd.f32 %v2921_v47, %v2808_v46  ;;  %v2810_v55 = vpop.f32.mrf.mxu0 }
 0x174   : > { %v2923_v57 = vpop.f32.mrf.mxu1 }
 0x175   : > { %v5967_v58 = vadd.f32 %v2923_v57, %v2810_v55  ;;  %v2814_v59 = vpop.f32.mrf.mxu0  ;;  %3491 = vmatmul.mubr.bf16.gmra.mxu0 %v4231_v49 }
 0x176   : > { %v2927_v60 = vpop.f32.mrf.mxu1  ;;  %3604 = vmatmul.mubr.bf16.gmra.mxu1 %v4233_v50  ;;  %3500 = vmatprep.mubr.bf16.mxu0 %v4248_v52 }
 0x177   : > { %v5969_v61 = vadd.f32 %v2927_v60, %v2814_v59  ;;  %3613 = vmatprep.mubr.bf16.mxu1 %v4250_v54  ;;  %v2816_v0 = vpop.f32.mrf.mxu0 }
 0x178   : > { %v2929_v1 = vpop.f32.mrf.mxu1 }
 0x179   : > { %v5983_v6 = vadd.f32 %v2929_v1, %v2816_v0  ;;  %v2818_v7 = vpop.f32.mrf.mxu0 }
 0x17a   : > { %v2931_v8 = vpop.f32.mrf.mxu1 }
 0x17b   : > { %v5985_v13 = vadd.f32 %v2931_v8, %v2818_v7  ;;  %v2820_v17 = vpop.f32.mrf.mxu0 }
 0x17c   : > { %v2933_v18 = vpop.f32.mrf.mxu1 }
 0x17d   : > { %v5987_v19 = vadd.f32 %v2933_v18, %v2820_v17  ;;  %v2824_v21 = vpop.f32.mrf.mxu0  ;;  %3501 = vmatmul.mubr.bf16.gmra.mxu0 %v4247_v10 }
 0x17e   : > { %v2937_v22 = vpop.f32.mrf.mxu1  ;;  %3614 = vmatmul.mubr.bf16.gmra.mxu1 %v4249_v11  ;;  %3510 = vmatprep.mubr.bf16.mxu0 %v4264_v14 }
 0x17f   : > { %v5989_v24 = vadd.f32 %v2937_v22, %v2824_v21  ;;  %3623 = vmatprep.mubr.bf16.mxu1 %v4266_v15  ;;  %v2826_v25 = vpop.f32.mrf.mxu0 }
 0x180   : > { %v2939_v27 = vpop.f32.mrf.mxu1 }
 0x181   : > { %v5991_v29 = vadd.f32 %v2939_v27, %v2826_v25  ;;  %v2828_v30 = vpop.f32.mrf.mxu0 }
 0x182   : > { %v2941_v31 = vpop.f32.mrf.mxu1 }
 0x183   : > { %v5993_v38 = vadd.f32 %v2941_v31, %v2828_v30  ;;  %v2830_v39 = vpop.f32.mrf.mxu0 }
 0x184   : > { %v2943_v40 = vpop.f32.mrf.mxu1 }
 0x185   : > { %v5995_v41 = vadd.f32 %v2943_v40, %v2830_v39  ;;  %v2834_v42 = vpop.f32.mrf.mxu0  ;;  %3511 = vmatmul.mubr.bf16.gmra.mxu0 %v4263_v34 }
 0x186   : > { %v2947_v44 = vpop.f32.mrf.mxu1  ;;  %3624 = vmatmul.mubr.bf16.gmra.mxu1 %v4265_v35 }
 0x187   : > { %v5997_v46 = vadd.f32 %v2947_v44, %v2834_v42  ;;  %v2836_v47 = vpop.f32.mrf.mxu0 }
 0x188   : > { %v2949_v49 = vpop.f32.mrf.mxu1 }
 0x189   : > { %v5999_v50 = vadd.f32 %v2949_v49, %v2836_v47  ;;  %v2838_v52 = vpop.f32.mrf.mxu0 }
 0x18a   : > { %v2951_v54 = vpop.f32.mrf.mxu1 }
 0x18b   : > { %v6001_v55 = vadd.f32 %v2951_v54, %v2838_v52  ;;  %v2840_v57 = vpop.f32.mrf.mxu0 }
 0x18c   : > { %v2953_v59 = vpop.f32.mrf.mxu1 }
 0x18d   : > { %v6003_v60 = vadd.f32 %v2953_v59, %v2840_v57  ;;  %v2990_v62 = vpop.f32.mrf.mxu0 }
 0x18e   : > { %v3103_v0 = vpop.f32.mrf.mxu1  ;;  %v2991_v1 = vadd.f32 %v2990_v62, %v5869_v16 }
 0x18f   : > { %v2992_v2 = vpop.f32.mrf.mxu0 }
 0x190   : > { %v3105_v3 = vpop.f32.mrf.mxu1  ;;  %v6006_v5 = vadd.f32 %v3103_v0, %v2991_v1  ;;  %v2993_v7 = vadd.f32 %v2992_v2, %v5883_v23 }
 0x191   : > { %v2994_v8 = vpop.f32.mrf.mxu0 }
 0x192   : > { %v3107_v10 = vpop.f32.mrf.mxu1  ;;  %v6009_v11 = vadd.f32 %v3105_v3, %v2993_v7  ;;  %v2995_v14 = vadd.f32 %v2994_v8, %v5885_v28 }
 0x193   : > { %v2996_v15 = vpop.f32.mrf.mxu0 }
 0x194   : > { %v3109_v17 = vpop.f32.mrf.mxu1  ;;  %v6012_v18 = vadd.f32 %v3107_v10, %v2995_v14  ;;  %v2997_v21 = vadd.f32 %v2996_v15, %v5887_v33 }
 0x195   : > { %v3000_v22 = vpop.f32.mrf.mxu0 }
 0x196   : > { %v3113_v16 = vpop.f32.mrf.mxu1  ;;  %v6015_v25 = vadd.f32 %v3109_v17, %v2997_v21  ;;  %v3001_v27 = vadd.f32 %v3000_v22, %v5889_v36 }
 0x197   : > { %v3002_v30 = vpop.f32.mrf.mxu0 }
 0x198   : > { %v3115_v23 = vpop.f32.mrf.mxu1  ;;  %v6018_v31 = vadd.f32 %v3113_v16, %v3001_v27  ;;  %v3003_v34 = vadd.f32 %v3002_v30, %v5903_v43 }
 0x199   : > { %v3004_v35 = vpop.f32.mrf.mxu0 }
 0x19a   : > { %v3117_v28 = vpop.f32.mrf.mxu1  ;;  %v6021_v39 = vadd.f32 %v3115_v23, %v3003_v34  ;;  %v3005_v40 = vadd.f32 %v3004_v35, %v5905_v48 }
 0x19b   : > { %v3006_v42 = vpop.f32.mrf.mxu0 }
 0x19c   : > { %v3119_v33 = vpop.f32.mrf.mxu1  ;;  %v6024_v44 = vadd.f32 %v3117_v28, %v3005_v40  ;;  %v3007_v47 = vadd.f32 %v3006_v42, %v5907_v53 }
 0x19d   : > { %v3010_v49 = vpop.f32.mrf.mxu0 }
 0x19e   : > { %v3123_v36 = vpop.f32.mrf.mxu1  ;;  %v6027_v52 = vadd.f32 %v3119_v33, %v3007_v47  ;;  %v3011_v54 = vadd.f32 %v3010_v49, %v5909_v56 }
 0x19f   : > { %v3012_v57 = vpop.f32.mrf.mxu0 }
 0x1a0   : > { %v3125_v43 = vpop.f32.mrf.mxu1  ;;  %v6030_v59 = vadd.f32 %v3123_v36, %v3011_v54  ;;  %v3013_v62 = vadd.f32 %v3012_v57, %v5923_v63 }
 0x1a1   : > { %v3014_v0 = vpop.f32.mrf.mxu0 }
 0x1a2   : > { %v3127_v48 = vpop.f32.mrf.mxu1  ;;  %v6033_v1 = vadd.f32 %v3125_v43, %v3013_v62  ;;  %v3015_v2 = vadd.f32 %v3014_v0, %v5925_v4 }
 0x1a3   : > { %v3016_v3 = vpop.f32.mrf.mxu0 }
 0x1a4   : > { %v3129_v53 = vpop.f32.mrf.mxu1  ;;  %v6036_v7 = vadd.f32 %v3127_v48, %v3015_v2  ;;  %v3017_v8 = vadd.f32 %v3016_v3, %v5927_v9 }
 0x1a5   : > { %v3020_v10 = vpop.f32.mrf.mxu0 }
 0x1a6   : > { %v3133_v56 = vpop.f32.mrf.mxu1  ;;  %v6039_v14 = vadd.f32 %v3129_v53, %v3017_v8  ;;  %v3021_v15 = vadd.f32 %v3020_v10, %v5929_v12 }
 0x1a7   : > { %v3022_v17 = vpop.f32.mrf.mxu0 }
 0x1a8   : > { %v3135_v63 = vpop.f32.mrf.mxu1  ;;  %v6042_v21 = vadd.f32 %v3133_v56, %v3021_v15  ;;  %v3023_v22 = vadd.f32 %v3022_v17, %v5943_v20 }
 0x1a9   : > { %v3024_v16 = vpop.f32.mrf.mxu0 }
 0x1aa   : > { %v3137_v4 = vpop.f32.mrf.mxu1  ;;  %v6045_v27 = vadd.f32 %v3135_v63, %v3023_v22  ;;  %v3025_v30 = vadd.f32 %v3024_v16, %v5945_v26 }
 0x1ab   : > { %v3026_v23 = vpop.f32.mrf.mxu0 }
 0x1ac   : > { %v3139_v9 = vpop.f32.mrf.mxu1  ;;  %v6048_v34 = vadd.f32 %v3137_v4, %v3025_v30  ;;  %v3027_v35 = vadd.f32 %v3026_v23, %v5947_v32 }
 0x1ad   : > { %v3030_v28 = vpop.f32.mrf.mxu0 }
 0x1ae   : > { %v3143_v12 = vpop.f32.mrf.mxu1  ;;  %v6051_v40 = vadd.f32 %v3139_v9, %v3027_v35  ;;  %v3031_v42 = vadd.f32 %v3030_v28, %v5949_v37 }
 0x1af   : > { %v3032_v33 = vpop.f32.mrf.mxu0 }
 0x1b0   : > { %v3145_v20 = vpop.f32.mrf.mxu1  ;;  %v6054_v47 = vadd.f32 %v3143_v12, %v3031_v42  ;;  %v3033_v49 = vadd.f32 %v3032_v33, %v5963_v45 }
 0x1b1   : > { %v3034_v36 = vpop.f32.mrf.mxu0 }
 0x1b2   : > { %v3147_v26 = vpop.f32.mrf.mxu1  ;;  %v6057_v54 = vadd.f32 %v3145_v20, %v3033_v49  ;;  %v3035_v57 = vadd.f32 %v3034_v36, %v5965_v51 }
 0x1b3   : > { %v3036_v43 = vpop.f32.mrf.mxu0 }
 0x1b4   : > { %v3149_v32 = vpop.f32.mrf.mxu1  ;;  %v6060_v62 = vadd.f32 %v3147_v26, %v3035_v57  ;;  %v3037_v0 = vadd.f32 %v3036_v43, %v5967_v58 }
 0x1b5   : > { %v3040_v48 = vpop.f32.mrf.mxu0 }
 0x1b6   : > { %6539 = vst [vmem:[#allocation12_spill] sm:$0xff] %v6060_v62  ;;  %v3153_v37 = vpop.f32.mrf.mxu1  ;;  %v6063_v2 = vadd.f32 %v3149_v32, %v3037_v0  ;;  %v3041_v3 = vadd.f32 %v3040_v48, %v5969_v61 }
 0x1b7   : > { %v3042_v53 = vpop.f32.mrf.mxu0 }
 0x1b8   : > { %6540 = vst [vmem:[#allocation13_spill] sm:$0xff] %v6063_v2  ;;  %v3155_v45 = vpop.f32.mrf.mxu1  ;;  %v6066_v8 = vadd.f32 %v3153_v37, %v3041_v3  ;;  %v3043_v10 = vadd.f32 %v3042_v53, %v5983_v6 }
 0x1b9   : > { %v3044_v56 = vpop.f32.mrf.mxu0 }
 0x1ba   : > { %6541 = vst [vmem:[#allocation14_spill] sm:$0xff] %v6066_v8  ;;  %v3157_v51 = vpop.f32.mrf.mxu1  ;;  %v6069_v15 = vadd.f32 %v3155_v45, %v3043_v10  ;;  %v3045_v17 = vadd.f32 %v3044_v56, %v5985_v13 }
 0x1bb   : > { %v3046_v63 = vpop.f32.mrf.mxu0 }
 0x1bc   : > { %6542 = vst [vmem:[#allocation15_spill] sm:$0xff] %v6069_v15  ;;  %v3159_v58 = vpop.f32.mrf.mxu1  ;;  %v6072_v22 = vadd.f32 %v3157_v51, %v3045_v17  ;;  %v3047_v16 = vadd.f32 %v3046_v63, %v5987_v19 }
 0x1bd   : > { %v3050_v4 = vpop.f32.mrf.mxu0 }
 0x1be   : > { %6543 = vst [vmem:[#allocation16_spill] sm:$0xff] %v6072_v22  ;;  %v3163_v61 = vpop.f32.mrf.mxu1  ;;  %v6075_v30 = vadd.f32 %v3159_v58, %v3047_v16  ;;  %v3051_v23 = vadd.f32 %v3050_v4, %v5989_v24 }
 0x1bf   : > { %v3052_v9 = vpop.f32.mrf.mxu0 }
 0x1c0   : > { %6544 = vst [vmem:[#allocation17_spill] sm:$0xff] %v6075_v30  ;;  %v3165_v6 = vpop.f32.mrf.mxu1  ;;  %v6078_v35 = vadd.f32 %v3163_v61, %v3051_v23  ;;  %v3053_v28 = vadd.f32 %v3052_v9, %v5991_v29 }
 0x1c1   : > { %v3054_v12 = vpop.f32.mrf.mxu0 }
 0x1c2   : > { %6545 = vst [vmem:[#allocation18_spill] sm:$0xff] %v6078_v35  ;;  %v3167_v13 = vpop.f32.mrf.mxu1  ;;  %v6081_v42 = vadd.f32 %v3165_v6, %v3053_v28  ;;  %v3055_v33 = vadd.f32 %v3054_v12, %v5993_v38 }
 0x1c3   : > { %v3056_v20 = vpop.f32.mrf.mxu0 }
 0x1c4   : > { %6546 = vst [vmem:[#allocation19_spill] sm:$0xff] %v6081_v42  ;;  %v3169_v19 = vpop.f32.mrf.mxu1  ;;  %v6084_v49 = vadd.f32 %v3167_v13, %v3055_v33  ;;  %v3057_v36 = vadd.f32 %v3056_v20, %v5995_v41 }
 0x1c5   : > { %v3060_v26 = vpop.f32.mrf.mxu0 }
 0x1c6   : > { %6547 = vst [vmem:[#allocation20_spill] sm:$0xff] %v6084_v49  ;;  %v3173_v24 = vpop.f32.mrf.mxu1  ;;  %v6087_v57 = vadd.f32 %v3169_v19, %v3057_v36  ;;  %v3061_v43 = vadd.f32 %v3060_v26, %v5997_v46 }
 0x1c7   : > { %v3062_v32 = vpop.f32.mrf.mxu0 }
 0x1c8   : > { %6548 = vst [vmem:[#allocation21_spill] sm:$0xff] %v6087_v57  ;;  %v3175_v29 = vpop.f32.mrf.mxu1  ;;  %v6090_v0 = vadd.f32 %v3173_v24, %v3061_v43  ;;  %v3063_v48 = vadd.f32 %v3062_v32, %v5999_v50 }
 0x1c9   : > { %v3064_v37 = vpop.f32.mrf.mxu0 }
 0x1ca   : > { %6549 = vst [vmem:[#allocation22_spill] sm:$0xff] %v6090_v0  ;;  %v3177_v38 = vpop.f32.mrf.mxu1  ;;  %v6093_v3 = vadd.f32 %v3175_v29, %v3063_v48  ;;  %v3065_v53 = vadd.f32 %v3064_v37, %v6001_v55 }
 0x1cb   : > { %v3066_v45 = vpop.f32.mrf.mxu0 }
 0x1cc   : > { %6550 = vst [vmem:[#allocation23_spill] sm:$0xff] %v6093_v3  ;;  %v3179_v41 = vpop.f32.mrf.mxu1  ;;  %v6096_v10 = vadd.f32 %v3177_v38, %v3065_v53  ;;  %v3067_v56 = vadd.f32 %v3066_v45, %v6003_v60 }
 0x1cd   : > { %v6099_v51 = vpop.f32.mrf.mxu0 }
 0x1ce   : > { %6551 = vst [vmem:[#allocation24_spill] sm:$0xff] %v6096_v10  ;;  %v6101_v46 = vpop.f32.mrf.mxu1  ;;  %v6103_v17 = vadd.f32 %v3179_v41, %v3067_v56 }
 0x1cf   : > { %v6105_v63 = vpop.f32.mrf.mxu0 }
 0x1d0   : > { %6552 = vst [vmem:[#allocation25_spill] sm:$0xff] %v6103_v17  ;;  %v6107_v50 = vpop.f32.mrf.mxu1 }
 0x1d1   : > { %v6109_v58 = vpop.f32.mrf.mxu0 }
 0x1d2   : > { %v6111_v16 = vpop.f32.mrf.mxu1 }
 0x1d3   : > { %v6113_v55 = vpop.f32.mrf.mxu0 }
 0x1d4   : > { %v6115_v4 = vpop.f32.mrf.mxu1 }
 0x1d5   : > { %v6117_v61 = vpop.f32.mrf.mxu0 }
 0x1d6   : > { %v6119_v60 = vpop.f32.mrf.mxu1 }
 0x1d7   : > { %v6121_v23 = vpop.f32.mrf.mxu0 }
 0x1d8   : > { %v6123_v9 = vpop.f32.mrf.mxu1 }
 0x1d9   : > { %v6125_v6 = vpop.f32.mrf.mxu0 }
 0x1da   : > { %v6127_v28 = vpop.f32.mrf.mxu1 }
 0x1db   : > { %v6129_v12 = vpop.f32.mrf.mxu0 }
 0x1dc   : > { %v6131_v13 = vpop.f32.mrf.mxu1 }
 0x1dd   : > { %v6133_v33 = vpop.f32.mrf.mxu0 }
 0x1de   : > { %v6135_v20 = vpop.f32.mrf.mxu1 }
 0x1df   : > { %v6137_v19 = vpop.f32.mrf.mxu0 }
 0x1e0   : > { %v6139_v36 = vpop.f32.mrf.mxu1 }
 0x1e1   : > { %v6141_v26 = vpop.f32.mrf.mxu0 }
 0x1e2   : > { %v6143_v24 = vpop.f32.mrf.mxu1 }
 0x1e3   : > { %v6145_v43 = vpop.f32.mrf.mxu0 }
 0x1e4   : > { %v6147_v32 = vpop.f32.mrf.mxu1 }
 0x1e5   : > { %v6149_v29 = vpop.f32.mrf.mxu0 }
 0x1e6   : > { %v6151_v48 = vpop.f32.mrf.mxu1 }
 0x1e7   : > { %v6153_v37 = vpop.f32.mrf.mxu0 }
 0x1e8   : > { %v6155_v38 = vpop.f32.mrf.mxu1 }
 0x1e9   : > { %v6157_v53 = vpop.f32.mrf.mxu0 }
 0x1ea   : > { %v6159_v45 = vpop.f32.mrf.mxu1 }
 0x1eb   : > { %v6161_v41 = vpop.f32.mrf.mxu0 }
 0x1ec   : > { %v6163_v56 = vpop.f32.mrf.mxu1 }
 0x1ed   : > { %v6165_v17 = vpop.f32.mrf.mxu0 }
 0x1ee   : > { %v6167_v10 = vpop.f32.mrf.mxu1 }
 0x1ef   : > { %6553 = vst [vmem:[#allocation26_spill] sm:$0xff] %v6167_v10  ;;  %v6169_v3 = vpop.f32.mrf.mxu0 }
 0x1f0   : > { %6554 = vst [vmem:[#allocation27_spill] sm:$0xff] %v6169_v3  ;;  %v6171_v0 = vpop.f32.mrf.mxu1 }
 0x1f1   : > { %6555 = vst [vmem:[#allocation28_spill] sm:$0xff] %v6171_v0  ;;  %v6173_v57 = vpop.f32.mrf.mxu0 }
 0x1f2   : > { %6556 = vst [vmem:[#allocation29_spill] sm:$0xff] %v6173_v57  ;;  %v6175_v49 = vpop.f32.mrf.mxu1 }
 0x1f3   : > { %6557 = vst [vmem:[#allocation30_spill] sm:$0xff] %v6175_v49  ;;  %v6177_v42 = vpop.f32.mrf.mxu0 }
 0x1f4   : > { %6558 = vst [vmem:[#allocation31_spill] sm:$0xff] %v6177_v42  ;;  %v6179_v35 = vpop.f32.mrf.mxu1 }
 0x1f5   : > { %6559 = vst [vmem:[#allocation32_spill] sm:$0xff] %v6179_v35  ;;  %v6181_v30 = vpop.f32.mrf.mxu0 }
 0x1f6   : > { %6560 = vst [vmem:[#allocation33_spill] sm:$0xff] %v6181_v30  ;;  %v6183_v22 = vpop.f32.mrf.mxu1 }
 0x1f7   : > { %6561 = vst [vmem:[#allocation34_spill] sm:$0xff] %v6183_v22  ;;  %v6185_v15 = vpop.f32.mrf.mxu0 }
 0x1f8   : > { %6562 = vst [vmem:[#allocation35_spill] sm:$0xff] %v6185_v15  ;;  %v6187_v8 = vpop.f32.mrf.mxu1 }
 0x1f9   : > { %6563 = vst [vmem:[#allocation36_spill] sm:$0xff] %v6187_v8  ;;  %v6189_v2 = vpop.f32.mrf.mxu0  ;;  %v3735_v8 = vlaneseq }
 0x1fa   : > { %6564 = vst [vmem:[#allocation37_spill] sm:$0xff] %v6189_v2  ;;  %v6191_v62 = vpop.f32.mrf.mxu1 }
 0x1fb   : > { %6565 = vst [vmem:[#allocation38_spill] sm:$0xff] %v6191_v62  ;;  %v6193_v0 = vpop.f32.mrf.mxu0 }
 0x1fc   : > { %6566 = vst [vmem:[#allocation39_spill] sm:$0xff] %v6193_v0  ;;  %v6195_v57 = vpop.f32.mrf.mxu1 }
 0x1fd   : > { %6567 = vst [vmem:[#allocation40_spill] sm:$0xff] %v6195_v57  ;;  %v6197_v49 = vpop.f32.mrf.mxu0 }
 0x1fe   : > { %6568 = vst [vmem:[#allocation41_spill] sm:$0xff] %v6197_v49  ;;  %v6199_v42 = vpop.f32.mrf.mxu1 }
 0x1ff   : > { %6569 = vst [vmem:[#allocation42_spill] sm:$0xff] %v6199_v42  ;;  %v6201_v35 = vpop.f32.mrf.mxu0  ;;  %v3736_v42 = vshrl.u32 %v3735_v8, 7  ;;  %v3733_v8 = vld [vmem:[%s5295_s25] sm:$0x3]  ;;  %s4531_s25 = sshll.u32 (%p5209_p9), %s5114_s18, 4 }
 0x200   : > { %6570 = vst [vmem:[#allocation43_spill] sm:$0xff] %v6201_v35  ;;  %v6203_v30 = vpop.f32.mrf.mxu1  ;;  %s6444_s24 = scalar_lea.vmem (%p5209_p9), %s6529_s4, %s4531_s25 }
 0x201   : > { %6571 = vst [vmem:[#allocation44_spill] sm:$0xff] %v6203_v30  ;;  %v6205_v22 = vpop.f32.mrf.mxu0  ;;  %v3217_v30 = vadd.f32 %v6099_v51, %v6006_v5  ;;  %v3777_v5 = vld [vmem:[%s296_s9] sm:$0x3]  ;;  %v3741_v51 = vsub.s32 1, %v3736_v42 }
 0x202   : > { %6572 = vst [vmem:[#allocation45_spill] sm:$0xff] %v6205_v22  ;;  %v6207_v15 = vpop.f32.mrf.mxu1 }
 0x203   : > { %6573 = vst [vmem:[#allocation46_spill] sm:$0xff] %v6207_v15  ;;  %v6209_v2 = vpop.f32.mrf.mxu0 }
 0x204   : > { %6574 = vst [vmem:[#allocation47_spill] sm:$0xff] %v6209_v2  ;;  %v6211_v62 = vpop.f32.mrf.mxu1  ;;  %v3737_v2 = vsub.s32 0, %v3736_v42  ;;  %v6247_v42 = vrot.slane %v3733_v8, %v3741_v51 }
 0x205   : > { %6575 = vst [vmem:[#allocation48_spill] sm:$0xff] %v6211_v62  ;;  %v6213_v57 = vpop.f32.mrf.mxu0  ;;  %v3219_v62 = vadd.f32 %v6105_v63, %v6009_v11  ;;  %v3223_v11 = vadd.f32 %v6113_v55, %v6015_v25  ;;  %v3229_v25 = vadd.f32 %v6121_v23, %v6021_v39 }
 0x206   : > { %6576 = vst [vmem:[#allocation49_spill] sm:$0xff] %v6213_v57  ;;  %v6215_v49 = vpop.f32.mrf.mxu1 }
 0x207   : > { %6577 = vst [vmem:[#allocation50_spill] sm:$0xff] %v6215_v49  ;;  %v6217_v0 = vpop.f32.mrf.mxu0  ;;  %v3332_v49 = vadd.f32 %v6107_v50, %v3219_v62  ;;  %v3227_v62 = vadd.f32 %v6117_v61, %v6018_v31  ;;  %v6253_v50 = vrot.slane %v3777_v5, %v3741_v51  ;;  %v3233_v51 = vadd.f32 %v6129_v12, %v6027_v52 }
 0x208   : > { %6578 = vst [vmem:[#allocation51_spill] sm:$0xff] %v6217_v0  ;;  %v6219_v35 = vpop.f32.mrf.mxu1  ;;  %v3330_v0 = vadd.f32 %v6101_v46, %v3217_v30 }
 0x209   : > { %6579 = vst [vmem:[#allocation52_spill] sm:$0xff] %v6219_v35  ;;  %v6223_v15 = vpop.f32.mrf.mxu0  ;;  %v3221_v35 = vadd.f32 %v6109_v58, %v6012_v18 }
 0x20a   : > { %6580 = vst [vmem:[#allocation53_spill] sm:$0xff] %v6223_v15  ;;  %v6225_v22 = vpop.f32.mrf.mxu1 }
 0x20b   : > { %6581 = vst [vmem:[#allocation54_spill] sm:$0xff] %v6225_v22  ;;  %v6229_v10 = vpop.f32.mrf.mxu0  ;;  %v3334_v18 = vadd.f32 %v6111_v16, %v3221_v35 }
 0x20c   : > { %6582 = vst [vmem:[#allocation55_spill] sm:$0xff] %v6229_v10  ;;  %v6231_v57 = vpop.f32.mrf.mxu1  ;;  %v6244_v10 = vrot.slane %v3777_v5, %v3737_v2  ;;  %v3340_v5 = vadd.f32 %v6119_v60, %v3227_v62 }
 0x20d   : > { %6583 = vst [vmem:[#allocation56_spill] sm:$0xff] %v6231_v57  ;;  %v3442_v15 = vpop.f32.mrf.mxu0  ;;  %v6242_v57 = vrot.slane %v3733_v8, %v3737_v2  ;;  %v3336_v2 = vadd.f32 %v6115_v4, %v3223_v11  ;;  %v3342_v4 = vadd.f32 %v6123_v9, %v3229_v25 }
 0x20e   : > { %v3555_v22 = vpop.f32.mrf.mxu1  ;;  %v3443_v63 = vadd.f32 %v3442_v15, %v3330_v0 }
 0x20f   : > { %v3444_v30 = vpop.f32.mrf.mxu0 }
 0x210   : > { %v3557_v46 = vpop.f32.mrf.mxu1  ;;  %v3556_v58 = vadd.f32 %v3555_v22, %v3443_v63  ;;  %v3445_v3 = vadd.f32 %v3444_v30, %v3332_v49  ;;  %v3231_v49 = vadd.f32 %v6125_v6, %v6024_v44 }
 0x211   : > { %v3446_v15 = vpop.f32.mrf.mxu0 }
 0x212   : > { %v3559_v0 = vpop.f32.mrf.mxu1  ;;  %v3745_v55 = vmul.f32 %v6242_v57, %v3556_v58  ;;  %v3558_v35 = vadd.f32 %v3557_v46, %v3445_v3  ;;  %v3447_v22 = vadd.f32 %v3446_v15, %v3334_v18  ;;  %v3344_v46 = vadd.f32 %v6127_v28, %v3231_v49 }
 0x213   : > { %v3448_v16 = vpop.f32.mrf.mxu0  ;;  %v3237_v18 = vadd.f32 %v6133_v33, %v6030_v59  ;;  %v3346_v28 = vadd.f32 %v6131_v13, %v3233_v51  ;;  %v3239_v49 = vadd.f32 %v6137_v19, %v6033_v1 }
 0x214   : > { %v3561_v8 = vpop.f32.mrf.mxu1  ;;  %v3789_v31 = vadd.f32 %v6244_v10, %v3745_v55  ;;  %v3746_v39 = vmul.f32 %v6247_v42, %v3558_v35  ;;  %v3560_v61 = vadd.f32 %v3559_v0, %v3447_v22  ;;  %v3449_v23 = vadd.f32 %v3448_v16, %v3336_v2 }
 0x215   : > { %v3452_v3 = vpop.f32.mrf.mxu0  ;;  %v3350_v22 = vadd.f32 %v6135_v20, %v3237_v18  ;;  %v3241_v16 = vadd.f32 %v6141_v26, %v6036_v7 }
 0x216   : > { %v3565_v11 = vpop.f32.mrf.mxu1  ;;  %v3821_v63 = vmax.f32 %v3789_v31, 0.0  ;;  %v3790_v44 = vadd.f32 %v6253_v50, %v3746_v39  ;;  %v3747_v6 = vmul.f32 %v6242_v57, %v3560_v61  ;;  %v3562_v30 = vadd.f32 %v3561_v8, %v3449_v23 }
 0x217   : > { %v3453_v58 = vadd.f32 %v3452_v3, %v3340_v5  ;;  %v3454_v60 = vpop.f32.mrf.mxu0 }
 0x218   : > { %v3567_v62 = vpop.f32.mrf.mxu1  ;;  %3853 = vst [vmem:[%s6271_s29] sm:$0xff] %v3821_v63  ;;  %v3822_v52 = vmax.f32 %v3790_v44, 0.0  ;;  %v3791_v9 = vadd.f32 %v6244_v10, %v3747_v6  ;;  %v3748_v12 = vmul.f32 %v6247_v42, %v3562_v30  ;;  %v3455_v25 = vadd.f32 %v3454_v60, %v3342_v4 }
 0x219   : > { %v3566_v15 = vadd.f32 %v3565_v11, %v3453_v58  ;;  %v3456_v0 = vpop.f32.mrf.mxu0  ;;  %v3243_v4 = vadd.f32 %v6145_v43, %v6039_v14  ;;  %v3352_v11 = vadd.f32 %v6139_v36, %v3239_v49  ;;  %v3354_v63 = vadd.f32 %v6143_v24, %v3241_v16 }
 0x21a   : > { %v3569_v59 = vpop.f32.mrf.mxu1  ;;  %3854 = vst [vmem:[%s6271_s29 + $0x8] sm:$0xff] %v3822_v52  ;;  %v3823_v33 = vmax.f32 %v3791_v9, 0.0  ;;  %v3792_v2 = vadd.f32 %v6253_v50, %v3748_v12  ;;  %v3568_v55 = vadd.f32 %v3567_v62, %v3455_v25  ;;  %v3457_v35 = vadd.f32 %v3456_v0, %v3344_v46 }
 0x21b   : > { %v3749_v13 = vmul.f32 %v6242_v57, %v3566_v15  ;;  %v3458_v8 = vpop.f32.mrf.mxu0  ;;  %v3247_v14 = vadd.f32 %v6149_v29, %v6042_v21  ;;  %v3356_v60 = vadd.f32 %v6147_v32, %v3243_v4  ;;  %v3249_v36 = vadd.f32 %v6153_v37, %v6045_v27  ;;  %v6584_v4 = vld [vmem:[#allocation27_spill] sm:$0xff] }
 0x21c   : > { %v3571_v31 = vpop.f32.mrf.mxu1  ;;  %3855 = vst [vmem:[%s6271_s29 + $0x10] sm:$0xff] %v3823_v33  ;;  %v3824_v39 = vmax.f32 %v3792_v2, 0.0  ;;  %v3750_v61 = vmul.f32 %v6247_v42, %v3568_v55  ;;  %v3570_v23 = vadd.f32 %v3569_v59, %v3457_v35  ;;  %v3459_v5 = vadd.f32 %v3458_v8, %v3346_v28 }
 0x21d   : > { %v3793_v20 = vadd.f32 %v6244_v10, %v3749_v13  ;;  %v3462_v51 = vpop.f32.mrf.mxu0  ;;  %v3360_v25 = vadd.f32 %v6151_v48, %v3247_v14  ;;  %v3362_v33 = vadd.f32 %v6155_v38, %v3249_v36  ;;  %v3251_v2 = vadd.f32 %v6157_v53, %v6048_v34 }
 0x21e   : > { %v3575_v1 = vpop.f32.mrf.mxu1  ;;  %3856 = vst [vmem:[%s6271_s29 + $0x18] sm:$0xff] %v3824_v39  ;;  %v3794_v7 = vadd.f32 %v6253_v50, %v3750_v61  ;;  %v3751_v19 = vmul.f32 %v6242_v57, %v3570_v23  ;;  %v3572_v26 = vadd.f32 %v3571_v31, %v3459_v5  ;;  %v3463_v3 = vadd.f32 %v3462_v51, %v3350_v22 }
 0x21f   : > { %v3825_v43 = vmax.f32 %v3793_v20, 0.0  ;;  %v3464_v44 = vpop.f32.mrf.mxu0  ;;  %v3253_v55 = vadd.f32 %v6161_v41, %v6051_v40  ;;  %v3257_v31 = vadd.f32 %v6165_v17, %v6054_v47  ;;  %v3364_v23 = vadd.f32 %v6159_v45, %v3251_v2  ;;  %v6587_v45 = vld [vmem:[#allocation29_spill] sm:$0xff] }
 0x220   : > { %v3577_v6 = vpop.f32.mrf.mxu1  ;;  %v3826_v30 = vmax.f32 %v3794_v7, 0.0  ;;  %v3795_v46 = vadd.f32 %v6244_v10, %v3751_v19  ;;  %v3752_v18 = vmul.f32 %v6247_v42, %v3572_v26  ;;  %v3576_v58 = vadd.f32 %v3575_v1, %v3463_v3  ;;  %v6585_v3 = vld [vmem:[#allocation26_spill] sm:$0xff] }
 0x221   : > { %3857 = vst [vmem:[%s6271_s29 + $0x20] sm:$0xff] %v3825_v43  ;;  %v3465_v24 = vadd.f32 %v3464_v44, %v3352_v11  ;;  %v3466_v62 = vpop.f32.mrf.mxu0  ;;  %v3366_v5 = vadd.f32 %v6163_v56, %v3253_v55  ;;  %v3259_v47 = vadd.f32 %v6584_v4, %v6057_v54  ;;  %v3370_v11 = vadd.f32 %v6585_v3, %v3257_v31  ;;  %v6599_v4 = vld [vmem:[#allocation37_spill] sm:$0xff]  ;;  %v6600_v3 = vld [vmem:[#allocation36_spill] sm:$0xff] }
 0x222   : > { %v3579_v52 = vpop.f32.mrf.mxu1  ;;  %3858 = vst [vmem:[%s6271_s29 + $0x28] sm:$0xff] %v3826_v30  ;;  %v3827_v21 = vmax.f32 %v3795_v46, 0.0  ;;  %v3796_v29 = vadd.f32 %v6253_v50, %v3752_v18  ;;  %v3753_v9 = vmul.f32 %v6242_v57, %v3576_v58  ;;  %v3467_v12 = vadd.f32 %v3466_v62, %v3354_v63  ;;  %v6586_v63 = vld [vmem:[#allocation12_spill] sm:$0xff] }
 0x223   : > { %v3578_v28 = vadd.f32 %v3577_v6, %v3465_v24  ;;  %v3468_v15 = vpop.f32.mrf.mxu0  ;;  %v3261_v14 = vadd.f32 %v6587_v45, %v6586_v63  ;;  %v6588_v18 = vld [vmem:[#allocation28_spill] sm:$0xff]  ;;  %v6601_v63 = vld [vmem:[#allocation17_spill] sm:$0xff]  ;;  %v6602_v45 = vld [vmem:[#allocation39_spill] sm:$0xff] }
 0x224   : > { %v3581_v32 = vpop.f32.mrf.mxu1  ;;  %3859 = vst [vmem:[%s6271_s29 + $0x30] sm:$0xff] %v3827_v21  ;;  %v3828_v0 = vmax.f32 %v3796_v29, 0.0  ;;  %v3797_v27 = vadd.f32 %v6244_v10, %v3753_v9  ;;  %v3580_v37 = vadd.f32 %v3579_v52, %v3467_v12  ;;  %v3469_v59 = vadd.f32 %v3468_v15, %v3356_v60  ;;  %v6589_v9 = vld [vmem:[#allocation30_spill] sm:$0xff] }
 0x225   : > { %v3754_v48 = vmul.f32 %v6247_v42, %v3578_v28  ;;  %v3472_v35 = vpop.f32.mrf.mxu0  ;;  %v3372_v58 = vadd.f32 %v6588_v18, %v3259_v47  ;;  %v3374_v12 = vadd.f32 %v6589_v9, %v3261_v14  ;;  %v6591_v28 = vld [vmem:[#allocation31_spill] sm:$0xff]  ;;  %v3273_v14 = vadd.f32 %v6602_v45, %v6601_v63  ;;  %v6603_v18 = vld [vmem:[#allocation38_spill] sm:$0xff]  ;;  %v6604_v9 = vld [vmem:[#allocation40_spill] sm:$0xff] }
 0x226   : > { %v3585_v22 = vpop.f32.mrf.mxu1  ;;  %3860 = vst [vmem:[%s6271_s29 + $0x38] sm:$0xff] %v3828_v0  ;;  %v3829_v49 = vmax.f32 %v3797_v27, 0.0  ;;  %v3755_v16 = vmul.f32 %v6242_v57, %v3580_v37  ;;  %v3582_v13 = vadd.f32 %v3581_v32, %v3469_v59  ;;  %v3473_v8 = vadd.f32 %v3472_v35, %v3360_v25  ;;  %v6590_v25 = vld [vmem:[#allocation13_spill] sm:$0xff]  ;;  %v6592_v32 = vld [vmem:[#allocation14_spill] sm:$0xff] }
 0x227   : > { %v3798_v38 = vadd.f32 %v6253_v50, %v3754_v48  ;;  %v3474_v39 = vpop.f32.mrf.mxu0  ;;  %v3263_v15 = vadd.f32 %v6591_v28, %v6590_v25  ;;  %v6593_v0 = vld [vmem:[#allocation33_spill] sm:$0xff]  ;;  %v6605_v25 = vld [vmem:[#allocation18_spill] sm:$0xff] }
 0x228   : > { %v3587_v34 = vpop.f32.mrf.mxu1  ;;  %3861 = vst [vmem:[%s6271_s29 + $0x40] sm:$0xff] %v3829_v49  ;;  %v3799_v40 = vadd.f32 %v6244_v10, %v3755_v16  ;;  %v3756_v53 = vmul.f32 %v6247_v42, %v3582_v13  ;;  %v3586_v41 = vadd.f32 %v3585_v22, %v3473_v8  ;;  %v3475_v61 = vadd.f32 %v3474_v39, %v3362_v33  ;;  %v6594_v22 = vld [vmem:[#allocation15_spill] sm:$0xff]  ;;  %v6606_v28 = vld [vmem:[#allocation41_spill] sm:$0xff]  ;;  %v6616_v63 = vld [vmem:[#allocation22_spill] sm:$0xff] }
 0x229   : > { %v3830_v17 = vmax.f32 %v3798_v38, 0.0  ;;  %v3476_v20 = vpop.f32.mrf.mxu0  ;;  %v3267_v27 = vadd.f32 %v6593_v0, %v6592_v32  ;;  %v6595_v49 = vld [vmem:[#allocation35_spill] sm:$0xff]  ;;  %v6617_v45 = vld [vmem:[#allocation49_spill] sm:$0xff] }
 0x22a   : > { %v3589_v51 = vpop.f32.mrf.mxu1  ;;  %v3831_v1 = vmax.f32 %v3799_v40, 0.0  ;;  %v3800_v7 = vadd.f32 %v6253_v50, %v3756_v53  ;;  %v3757_v19 = vmul.f32 %v6242_v57, %v3586_v41  ;;  %v3588_v26 = vadd.f32 %v3587_v34, %v3475_v61  ;;  %v6596_v53 = vld [vmem:[#allocation32_spill] sm:$0xff]  ;;  %v6597_v61 = vld [vmem:[#allocation34_spill] sm:$0xff]  ;;  %v6607_v32 = vld [vmem:[#allocation19_spill] sm:$0xff] }
 0x22b   : > { %3862 = vst [vmem:[%s6271_s29 + $0x48] sm:$0xff] %v3830_v17  ;;  %v3477_v56 = vadd.f32 %v3476_v20, %v3364_v23  ;;  %v3478_v43 = vpop.f32.mrf.mxu0  ;;  %v3269_v16 = vadd.f32 %v6595_v49, %v6594_v22  ;;  %v3376_v41 = vadd.f32 %v6596_v53, %v3263_v15  ;;  %v3380_v23 = vadd.f32 %v6597_v61, %v3267_v27  ;;  %v6608_v0 = vld [vmem:[#allocation43_spill] sm:$0xff]  ;;  %v6609_v22 = vld [vmem:[#allocation20_spill] sm:$0xff]  ;;  %v6610_v49 = vld [vmem:[#allocation45_spill] sm:$0xff] }
 0x22c   : > { %v3591_v44 = vpop.f32.mrf.mxu1  ;;  %3863 = vst [vmem:[%s6271_s29 + $0x50] sm:$0xff] %v3831_v1  ;;  %v3832_v54 = vmax.f32 %v3800_v7, 0.0  ;;  %v3801_v6 = vadd.f32 %v6244_v10, %v3757_v19  ;;  %v3758_v30 = vmul.f32 %v6247_v42, %v3588_v26  ;;  %v3479_v46 = vadd.f32 %v3478_v43, %v3366_v5  ;;  %v6598_v5 = vld [vmem:[#allocation16_spill] sm:$0xff]  ;;  %v6611_v53 = vld [vmem:[#allocation42_spill] sm:$0xff] }
 0x22d   : > { %v3590_v60 = vadd.f32 %v3589_v51, %v3477_v56  ;;  %v3482_v36 = vpop.f32.mrf.mxu0  ;;  %v3271_v47 = vadd.f32 %v6599_v4, %v6598_v5  ;;  %v3277_v15 = vadd.f32 %v6606_v28, %v6605_v25  ;;  %v3279_v27 = vadd.f32 %v6608_v0, %v6607_v32  ;;  %v6612_v61 = vld [vmem:[#allocation44_spill] sm:$0xff]  ;;  %v6613_v5 = vld [vmem:[#allocation21_spill] sm:$0xff]  ;;  %v6614_v4 = vld [vmem:[#allocation47_spill] sm:$0xff] }
 0x22e   : > { %v3595_v24 = vpop.f32.mrf.mxu1  ;;  %3864 = vst [vmem:[%s6271_s29 + $0x58] sm:$0xff] %v3832_v54  ;;  %v3833_v62 = vmax.f32 %v3801_v6, 0.0  ;;  %v3802_v52 = vadd.f32 %v6253_v50, %v3758_v30  ;;  %v3592_v21 = vadd.f32 %v3591_v44, %v3479_v46  ;;  %v3483_v29 = vadd.f32 %v3482_v36, %v3370_v11  ;;  %v6620_v25 = vld [vmem:[#allocation23_spill] sm:$0xff]  ;;  %v6622_v32 = vld [vmem:[#allocation24_spill] sm:$0xff]  ;;  %v6623_v0 = vld [vmem:[#allocation53_spill] sm:$0xff] }
 0x22f   : > { %v3759_v37 = vmul.f32 %v6242_v57, %v3590_v60  ;;  %v3484_v59 = vpop.f32.mrf.mxu0  ;;  %v3382_v11 = vadd.f32 %v6600_v3, %v3269_v16  ;;  %v3281_v16 = vadd.f32 %v6610_v49, %v6609_v22  ;;  %v6615_v3 = vld [vmem:[#allocation46_spill] sm:$0xff]  ;;  %v6621_v28 = vld [vmem:[#allocation51_spill] sm:$0xff]  ;;  %v6624_v22 = vld [vmem:[#allocation25_spill] sm:$0xff] }
 0x230   : > { %v3597_v33 = vpop.f32.mrf.mxu1  ;;  %3865 = vst [vmem:[%s6271_s29 + $0x60] sm:$0xff] %v3833_v62  ;;  %v3834_v2 = vmax.f32 %v3802_v52, 0.0  ;;  %v3760_v55 = vmul.f32 %v6247_v42, %v3592_v21  ;;  %v3596_v48 = vadd.f32 %v3595_v24, %v3483_v29  ;;  %v3485_v35 = vadd.f32 %v3484_v59, %v3372_v58  ;;  %v6625_v49 = vld [vmem:[#allocation55_spill] sm:$0xff] }
 0x231   : > { %v3803_v13 = vadd.f32 %v6244_v10, %v3759_v37  ;;  %v3486_v8 = vpop.f32.mrf.mxu0  ;;  %v3384_v58 = vadd.f32 %v6603_v18, %v3271_v47  ;;  %v3283_v47 = vadd.f32 %v6614_v4, %v6613_v5  ;;  %v6618_v18 = vld [vmem:[#allocation48_spill] sm:$0xff] }
 0x232   : > { %v3599_v31 = vpop.f32.mrf.mxu1  ;;  %3866 = vst [vmem:[%s6271_s29 + $0x68] sm:$0xff] %v3834_v2  ;;  %v3804_v38 = vadd.f32 %v6253_v50, %v3760_v55  ;;  %v3761_v39 = vmul.f32 %v6242_v57, %v3596_v48  ;;  %v3598_v34 = vadd.f32 %v3597_v33, %v3485_v35  ;;  %v3487_v40 = vadd.f32 %v3486_v8, %v3374_v12 }
 0x233   : > { %v3835_v17 = vmax.f32 %v3803_v13, 0.0  ;;  %v3488_v20 = vpop.f32.mrf.mxu0  ;;  %v3386_v12 = vadd.f32 %v6604_v9, %v3273_v14  ;;  %v3287_v14 = vadd.f32 %v6617_v45, %v6616_v63  ;;  %v6619_v9 = vld [vmem:[#allocation50_spill] sm:$0xff] }
 0x234   : > { %v3601_v51 = vpop.f32.mrf.mxu1  ;;  %v3836_v1 = vmax.f32 %v3804_v38, 0.0  ;;  %v3805_v7 = vadd.f32 %v6244_v10, %v3761_v39  ;;  %v3762_v19 = vmul.f32 %v6247_v42, %v3598_v34  ;;  %v3600_v26 = vadd.f32 %v3599_v31, %v3487_v40 }
 0x235   : > { %3867 = vst [vmem:[%s6271_s29 + $0x70] sm:$0xff] %v3835_v17  ;;  %v3489_v56 = vadd.f32 %v3488_v20, %v3376_v41  ;;  %v3492_v43 = vpop.f32.mrf.mxu0  ;;  %v3390_v41 = vadd.f32 %v6611_v53, %v3277_v15  ;;  %v3289_v15 = vadd.f32 %v6621_v28, %v6620_v25  ;;  %v6626_v53 = vld [vmem:[#allocation52_spill] sm:$0xff] }
 0x236   : > { %v3605_v44 = vpop.f32.mrf.mxu1  ;;  %3868 = vst [vmem:[%s6271_s29 + $0x78] sm:$0xff] %v3836_v1  ;;  %v3837_v54 = vmax.f32 %v3805_v7, 0.0  ;;  %v3806_v6 = vadd.f32 %v6253_v50, %v3762_v19  ;;  %v3763_v30 = vmul.f32 %v6242_v57, %v3600_v26  ;;  %v3493_v46 = vadd.f32 %v3492_v43, %v3380_v23  ;;  %v3918_v28 = vld [vmem:[%s6271_s29 + $0x20] sm:$0xff] (%p5209_p9) }
 0x237   : > { %v3602_v60 = vadd.f32 %v3601_v51, %v3489_v56  ;;  %v3494_v36 = vpop.f32.mrf.mxu0  ;;  %v3392_v23 = vadd.f32 %v6612_v61, %v3279_v27  ;;  %v3291_v27 = vadd.f32 %v6623_v0, %v6622_v32  ;;  %v6627_v61 = vld [vmem:[#allocation54_spill] sm:$0xff]  ;;  %3919 = vst [vmem:[%s6444_s24 + $0x80] sm:$0xff] (%p5209_p9), %v3918_v28  ;;  %v3924_v0 = vld [vmem:[%s6271_s29 + $0x38] sm:$0xff] (%p5209_p9) }
 0x238   : > { %v3607_v24 = vpop.f32.mrf.mxu1  ;;  %3869 = vst [vmem:[%s6271_s29 + $0x80] sm:$0xff] %v3837_v54  ;;  %v3838_v62 = vmax.f32 %v3806_v6, 0.0  ;;  %v3807_v52 = vadd.f32 %v6244_v10, %v3763_v30  ;;  %v3606_v21 = vadd.f32 %v3605_v44, %v3493_v46  ;;  %v3495_v29 = vadd.f32 %v3494_v36, %v3382_v11  ;;  %v3922_v32 = vld [vmem:[%s6271_s29 + $0x30] sm:$0xff] (%p5209_p9)  ;;  %3925 = vst [vmem:[%s6444_s24 + $0xc8] sm:$0xff] (%p5209_p9), %v3924_v0 }
 0x239   : > { %v3764_v37 = vmul.f32 %v6247_v42, %v3602_v60  ;;  %v3496_v59 = vpop.f32.mrf.mxu0  ;;  %v3394_v11 = vadd.f32 %v6615_v3, %v3281_v16  ;;  %v3293_v16 = vadd.f32 %v6625_v49, %v6624_v22  ;;  %3923 = vst [vmem:[%s6444_s24 + $0xc0] sm:$0xff] (%p5209_p9), %v3922_v32 }
 0x23a   : > { %v3609_v33 = vpop.f32.mrf.mxu1  ;;  %3870 = vst [vmem:[%s6271_s29 + $0x88] sm:$0xff] %v3838_v62  ;;  %v3839_v2 = vmax.f32 %v3807_v52, 0.0  ;;  %v3765_v55 = vmul.f32 %v6242_v57, %v3606_v21  ;;  %v3608_v48 = vadd.f32 %v3607_v24, %v3495_v29  ;;  %v3497_v35 = vadd.f32 %v3496_v59, %v3384_v58 }
 0x23b   : > { %v3808_v13 = vadd.f32 %v6253_v50, %v3764_v37  ;;  %v3498_v8 = vpop.f32.mrf.mxu0  ;;  %v3396_v58 = vadd.f32 %v6618_v18, %v3283_v47 }
 0x23c   : > { %v3611_v31 = vpop.f32.mrf.mxu1  ;;  %3871 = vst [vmem:[%s6271_s29 + $0x90] sm:$0xff] %v3839_v2  ;;  %v3809_v38 = vadd.f32 %v6244_v10, %v3765_v55  ;;  %v3766_v39 = vmul.f32 %v6247_v42, %v3608_v48  ;;  %v3610_v34 = vadd.f32 %v3609_v33, %v3497_v35  ;;  %v3499_v40 = vadd.f32 %v3498_v8, %v3386_v12 }
 0x23d   : > { %v3840_v17 = vmax.f32 %v3808_v13, 0.0  ;;  %v3502_v20 = vpop.f32.mrf.mxu0  ;;  %v3400_v12 = vadd.f32 %v6619_v9, %v3287_v14 }
 0x23e   : > { %v3615_v51 = vpop.f32.mrf.mxu1  ;;  %v3841_v1 = vmax.f32 %v3809_v38, 0.0  ;;  %v3810_v7 = vadd.f32 %v6253_v50, %v3766_v39  ;;  %v3767_v19 = vmul.f32 %v6242_v57, %v3610_v34  ;;  %v3612_v26 = vadd.f32 %v3611_v31, %v3499_v40 }
 0x23f   : > { %3872 = vst [vmem:[%s6271_s29 + $0x98] sm:$0xff] %v3840_v17  ;;  %v3503_v56 = vadd.f32 %v3502_v20, %v3390_v41  ;;  %v3504_v43 = vpop.f32.mrf.mxu0  ;;  %v3402_v41 = vadd.f32 %v6626_v53, %v3289_v15  ;;  %v3920_v15 = vld [vmem:[%s6271_s29 + $0x28] sm:$0xff] (%p5209_p9)  ;;  %v3942_v22 = vld [vmem:[%s6271_s29 + $0x80] sm:$0xff] (%p5209_p9) }
 0x240   : > { %v3617_v44 = vpop.f32.mrf.mxu1  ;;  %3873 = vst [vmem:[%s6271_s29 + $0xa0] sm:$0xff] %v3841_v1  ;;  %v3842_v54 = vmax.f32 %v3810_v7, 0.0  ;;  %v3811_v6 = vadd.f32 %v6244_v10, %v3767_v19  ;;  %v3768_v30 = vmul.f32 %v6247_v42, %v3612_v26  ;;  %v3505_v46 = vadd.f32 %v3504_v43, %v3392_v23  ;;  %v6628_v7 = vld [vmem:[#allocation56_spill] sm:$0xff]  ;;  %3921 = vst [vmem:[%s6444_s24 + $0x88] sm:$0xff] (%p5209_p9), %v3920_v15 }
 0x241   : > { %v3616_v60 = vadd.f32 %v3615_v51, %v3503_v56  ;;  %v3506_v36 = vpop.f32.mrf.mxu0  ;;  %v3404_v23 = vadd.f32 %v6627_v61, %v3291_v27  ;;  %v3406_v19 = vadd.f32 %v6628_v7, %v3293_v16  ;;  %v3926_v27 = vld [vmem:[%s6271_s29 + $0x40] sm:$0xff] (%p5209_p9)  ;;  %v3944_v49 = vld [vmem:[%s6271_s29 + $0x88] sm:$0xff] (%p5209_p9)  ;;  %3943 = vst [vmem:[%s6444_s24 + $0x200] sm:$0xff] (%p5209_p9), %v3942_v22 }
 0x242   : > { %v3619_v24 = vpop.f32.mrf.mxu1  ;;  %3874 = vst [vmem:[%s6271_s29 + $0xa8] sm:$0xff] %v3842_v54  ;;  %v3843_v62 = vmax.f32 %v3811_v6, 0.0  ;;  %v3812_v52 = vadd.f32 %v6253_v50, %v3768_v30  ;;  %v3618_v21 = vadd.f32 %v3617_v44, %v3505_v46  ;;  %v3507_v29 = vadd.f32 %v3506_v36, %v3394_v11  ;;  %3927 = vst [vmem:[%s6444_s24 + $0x100] sm:$0xff] (%p5209_p9), %v3926_v27 }
 0x243   : > { %v3769_v37 = vmul.f32 %v6242_v57, %v3616_v60  ;;  %v3508_v59 = vpop.f32.mrf.mxu0  ;;  %3945 = vst [vmem:[%s6444_s24 + $0x208] sm:$0xff] (%p5209_p9), %v3944_v49  ;;  %v3946_v16 = vld [vmem:[%s6271_s29 + $0x90] sm:$0xff] (%p5209_p9) }
 0x244   : > { %v3621_v33 = vpop.f32.mrf.mxu1  ;;  %3875 = vst [vmem:[%s6271_s29 + $0xb0] sm:$0xff] %v3843_v62  ;;  %v3844_v2 = vmax.f32 %v3812_v52, 0.0  ;;  %v3770_v55 = vmul.f32 %v6247_v42, %v3618_v21  ;;  %v3620_v48 = vadd.f32 %v3619_v24, %v3507_v29  ;;  %v3509_v35 = vadd.f32 %v3508_v59, %v3396_v58  ;;  %v3930_v59 = vld [vmem:[%s6271_s29 + $0x50] sm:$0xff] (%p5209_p9)  ;;  %3947 = vst [vmem:[%s6444_s24 + $0x240] sm:$0xff] (%p5209_p9), %v3946_v16 }
 0x245   : > { %v3813_v13 = vadd.f32 %v6244_v10, %v3769_v37  ;;  %v3512_v8 = vpop.f32.mrf.mxu0  ;;  %v3928_v37 = vld [vmem:[%s6271_s29 + $0x48] sm:$0xff] (%p5209_p9)  ;;  %3931 = vst [vmem:[%s6444_s24 + $0x140] sm:$0xff] (%p5209_p9), %v3930_v59 }
 0x246   : > { %v3625_v31 = vpop.f32.mrf.mxu1  ;;  %3876 = vst [vmem:[%s6271_s29 + $0xb8] sm:$0xff] %v3844_v2  ;;  %v3814_v38 = vadd.f32 %v6253_v50, %v3770_v55  ;;  %v3771_v39 = vmul.f32 %v6242_v57, %v3620_v48  ;;  %v3622_v34 = vadd.f32 %v3621_v33, %v3509_v35  ;;  %v3513_v40 = vadd.f32 %v3512_v8, %v3400_v12  ;;  %v3932_v33 = vld [vmem:[%s6271_s29 + $0x58] sm:$0xff] (%p5209_p9)  ;;  %v3934_v2 = vld [vmem:[%s6271_s29 + $0x60] sm:$0xff] (%p5209_p9)  ;;  %v3936_v55 = vld [vmem:[%s6271_s29 + $0x68] sm:$0xff] (%p5209_p9) }
 0x247   : > { %v3845_v5 = vmax.f32 %v3813_v13, 0.0  ;;  %v3514_v4 = vpop.f32.mrf.mxu0  ;;  %3929 = vst [vmem:[%s6444_s24 + $0x108] sm:$0xff] (%p5209_p9), %v3928_v37  ;;  %3933 = vst [vmem:[%s6444_s24 + $0x148] sm:$0xff] (%p5209_p9), %v3932_v33  ;;  %v3938_v48 = vld [vmem:[%s6271_s29 + $0x70] sm:$0xff] (%p5209_p9)  ;;  %v3940_v35 = vld [vmem:[%s6271_s29 + $0x78] sm:$0xff] (%p5209_p9) }
 0x248   : > { %v3627_v47 = vpop.f32.mrf.mxu1  ;;  %v3846_v17 = vmax.f32 %v3814_v38, 0.0  ;;  %v3815_v20 = vadd.f32 %v6244_v10, %v3771_v39  ;;  %v3772_v51 = vmul.f32 %v6247_v42, %v3622_v34  ;;  %v3626_v1 = vadd.f32 %v3625_v31, %v3513_v40  ;;  %3935 = vst [vmem:[%s6444_s24 + $0x180] sm:$0xff] (%p5209_p9), %v3934_v2  ;;  %3937 = vst [vmem:[%s6444_s24 + $0x188] sm:$0xff] (%p5209_p9), %v3936_v55  ;;  %v3948_v13 = vld [vmem:[%s6271_s29 + $0x98] sm:$0xff] (%p5209_p9)  ;;  %v3950_v8 = vld [vmem:[%s6271_s29 + $0xa0] sm:$0xff] (%p5209_p9) }
 0x249   : > { %3877 = vst [vmem:[%s6271_s29 + $0xc0] sm:$0xff] %v3845_v5  ;;  %v3515_v26 = vadd.f32 %v3514_v4, %v3402_v41  ;;  %v3516_v3 = vpop.f32.mrf.mxu0  ;;  %3939 = vst [vmem:[%s6444_s24 + $0x1c0] sm:$0xff] (%p5209_p9), %v3938_v48  ;;  %v3952_v31 = vld [vmem:[%s6271_s29 + $0xa8] sm:$0xff] (%p5209_p9) }
 0x24a   : > { %v3629_v11 = vpop.f32.mrf.mxu1  ;;  %3878 = vst [vmem:[%s6271_s29 + $0xc8] sm:$0xff] %v3846_v17  ;;  %v3847_v63 = vmax.f32 %v3815_v20, 0.0  ;;  %v3816_v45 = vadd.f32 %v6253_v50, %v3772_v51  ;;  %v3773_v14 = vmul.f32 %v6242_v57, %v3626_v1  ;;  %v3517_v56 = vadd.f32 %v3516_v3, %v3404_v23  ;;  %3941 = vst [vmem:[%s6444_s24 + $0x1c8] sm:$0xff] (%p5209_p9), %v3940_v35 }
 0x24b   : > { %v3628_v43 = vadd.f32 %v3627_v47, %v3515_v26  ;;  %v3518_v44 = vpop.f32.mrf.mxu0  ;;  %3949 = vst [vmem:[%s6444_s24 + $0x248] sm:$0xff] (%p5209_p9), %v3948_v13  ;;  %3951 = vst [vmem:[%s6444_s24 + $0x280] sm:$0xff] (%p5209_p9), %v3950_v8  ;;  %v3954_v38 = vld [vmem:[%s6271_s29 + $0xb0] sm:$0xff] (%p5209_p9) }
 0x24c   : > { %3879 = vst [vmem:[%s6271_s29 + $0xd0] sm:$0xff] %v3847_v63  ;;  %v3848_v54 = vmax.f32 %v3816_v45, 0.0  ;;  %v3817_v6 = vadd.f32 %v6244_v10, %v3773_v14  ;;  %v3630_v30 = vadd.f32 %v3629_v11, %v3517_v56  ;;  %v3519_v46 = vadd.f32 %v3518_v44, %v3406_v19  ;;  %v3631_v58 = vpop.f32.mrf.mxu1  ;;  %3953 = vst [vmem:[%s6444_s24 + $0x288] sm:$0xff] (%p5209_p9), %v3952_v31 }
 0x24d   : > { %v3774_v18 = vmul.f32 %v6247_v42, %v3628_v43  ;;  %v3956_v39 = vld [vmem:[%s6271_s29 + $0xb8] sm:$0xff] (%p5209_p9)  ;;  %3955 = vst [vmem:[%s6444_s24 + $0x2c0] sm:$0xff] (%p5209_p9), %v3954_v38 }
 0x24e   : > { %3880 = vst [vmem:[%s6271_s29 + $0xd8] sm:$0xff] %v3848_v54  ;;  %v3849_v60 = vmax.f32 %v3817_v6, 0.0  ;;  %v3775_v36 = vmul.f32 %v6242_v57, %v3630_v30  ;;  %v3632_v24 = vadd.f32 %v3631_v58, %v3519_v46  ;;  %v3910_v57 = vld [vmem:[%s6271_s29] sm:$0xff] (%p5209_p9)  ;;  %3957 = vst [vmem:[%s6444_s24 + $0x2c8] sm:$0xff] (%p5209_p9), %v3956_v39 }
 0x24f   : > { %v3818_v62 = vadd.f32 %v6253_v50, %v3774_v18  ;;  %3911 = vst [vmem:[%s6444_s24] sm:$0xff] (%p5209_p9), %v3910_v57 }
 0x250   : > { %3881 = vst [vmem:[%s6271_s29 + $0xe0] sm:$0xff] %v3849_v60  ;;  %v3819_v52 = vadd.f32 %v6244_v10, %v3775_v36  ;;  %v3776_v21 = vmul.f32 %v6247_v42, %v3632_v24  ;;  %v3912_v10 = vld [vmem:[%s6271_s29 + $0x8] sm:$0xff] (%p5209_p9)  ;;  %v3914_v42 = vld [vmem:[%s6271_s29 + $0x10] sm:$0xff] (%p5209_p9)  ;;  %v3958_v34 = vld [vmem:[%s6271_s29 + $0xc0] sm:$0xff] (%p5209_p9) }
 0x251   : > { %v3850_v29 = vmax.f32 %v3818_v62, 0.0  ;;  %3913 = vst [vmem:[%s6444_s24 + $0x8] sm:$0xff] (%p5209_p9), %v3912_v10  ;;  %3915 = vst [vmem:[%s6444_s24 + $0x40] sm:$0xff] (%p5209_p9), %v3914_v42  ;;  %v3960_v40 = vld [vmem:[%s6271_s29 + $0xc8] sm:$0xff] (%p5209_p9) }
 0x252   : > { %v3851_v9 = vmax.f32 %v3819_v52, 0.0  ;;  %v3820_v12 = vadd.f32 %v6253_v50, %v3776_v21  ;;  %3891 = sbr.rel (!%p5209_p9) target bundleno = 607 (0x25f), region = 60  ;;  %v3916_v50 = vld [vmem:[%s6271_s29 + $0x18] sm:$0xff] (%p5209_p9)  ;;  %3959 = vst [vmem:[%s6444_s24 + $0x300] sm:$0xff] (%p5209_p9), %v3958_v34  ;;  %3961 = vst [vmem:[%s6444_s24 + $0x308] sm:$0xff] (%p5209_p9), %v3960_v40 }
 0x253   : > { %3882 = vst [vmem:[%s6271_s29 + $0xe8] sm:$0xff] %v3850_v29  ;;  %3917 = vst [vmem:[%s6444_s24 + $0x48] sm:$0xff] (%p5209_p9), %v3916_v50  ;;  %v3962_v53 = vld [vmem:[%s6271_s29 + $0xd0] sm:$0xff] (%p5209_p9) }
 0x254   : > { %3883 = vst [vmem:[%s6271_s29 + $0xf0] sm:$0xff] %v3851_v9  ;;  %v3852_v25 = vmax.f32 %v3820_v12, 0.0  ;;  %3963 = vst [vmem:[%s6444_s24 + $0x340] sm:$0xff] (%p5209_p9), %v3962_v53 }
 0x255   : > { %v3964_v41 = vld [vmem:[%s6271_s29 + $0xd8] sm:$0xff] (%p5209_p9) }
 0x256   : > { %3884 = vst [vmem:[%s6271_s29 + $0xf8] sm:$0xff] %v3852_v25  ;;  %3965 = vst [vmem:[%s6444_s24 + $0x348] sm:$0xff] (%p5209_p9), %v3964_v41 }
 0x257   : > { %v3966_v61 = vld [vmem:[%s6271_s29 + $0xe0] sm:$0xff] }
 0x258   : > { %3967 = vst [vmem:[%s6444_s24 + $0x380] sm:$0xff] %v3966_v61 }
 0x25a   : > { %v3968_v23 = vld [vmem:[%s6271_s29 + $0xe8] sm:$0xff] }
 0x25b   : > { %3969 = vst [vmem:[%s6444_s24 + $0x388] sm:$0xff] %v3968_v23  ;;  %v3970_v5 = vld [vmem:[%s6271_s29 + $0xf0] sm:$0xff] }
 0x25c   : > { %3971 = vst [vmem:[%s6444_s24 + $0x3c0] sm:$0xff] %v3970_v5 }
 0x25d   : > { %v3972_v4 = vld [vmem:[%s6271_s29 + $0xf8] sm:$0xff] }
 0x25e   : > { %3973 = vst [vmem:[%s6444_s24 + $0x3c8] sm:$0xff] %v3972_v4 }
 0x25f PF: > { %s20_s20 = sadd.s32 1, %s5122_s20   ;;  %s6629_s28 = sld [smem:[#allocation11_spill]] }
 0x260   : > { %p17_p8 = scmp.ge.s32.totalorder %s20_s20, 6   ;;  %s6630_s15 = smov %s5106_s16 }
 0x261   : > { %s6631_s16 = smov %s5110_s17  ;;  %s6632_s17 = smov %s5207_s27 }
 0x262   : > { %s6633_s18 = smov %s5118_s19  ;;  %19 = sbr.rel (!%p17_p8) target bundleno = 8 (0x8), region = 134 }
 0x265   : > { %s6634_s19 = smov %s6629_s28 }
 0x267   :  { %3989 = vsyncpa [#allocation4], 1 }
 0x268   :  { %3991 = vsyncpa [#allocation4 + $0x1], 1 }
 0x269   :  { %3992 = vsyncpa [#allocation6], 1 }
 0x26a   :  { %3994 = vsyncpa [#allocation6 + $0x1], 1 }

// kernel: deeplabv3plus_forward.7
= control target key start
LH: loop header
LB: loop body
LE: loop exit
PB: predicated region body
PF: predicated region fallthrough
CT: control target
= control target key end

     0   :  { %s4187_s1 = inlined_call_operand.vmem [shape: bf16[1280,256], index: 1, kind: input, shape index: {}]   ;;  %s4188_s0 = inlined_call_operand.vmem [shape: bf16[128,1280], index: 0, kind: input, shape index: {}]   ;;  %s4189_s2 = inlined_call_operand.vmem [shape: f32[1,256], index: 2, kind: input, shape index: {}]   ;;  %s4190_s3 = inlined_call_operand.vmem [shape: f32[1,256], index: 3, kind: input, shape index: {}]   ;;  %s4191_s4 = inlined_call_operand.vmem [shape: f32[128,256], index: 4, kind: output, shape index: {}]  }
   0x1   :  { %v2617_v0 = vld [vmem:[%s4187_s1 + $0x74] ss:$8 sps:$4 sm:$0xff]   ;;  %v2621_v2 = vld [vmem:[%s4187_s1 + $0x70] ss:$8 sps:$4 sm:$0xff]   ;;  %v2623_v4 = vld [vmem:[%s4187_s1 + $0x64] ss:$8 sps:$4 sm:$0xff]  }
   0x2   :  { %v2619_v1 = vld [vmem:[%s4187_s1 + $0x174] ss:$8 sps:$4 sm:$0xff]   ;;  %1525 = vmatprep.subr.bf16.mxu0 %v2617_v0  ;;  %v2622_v3 = vld [vmem:[%s4187_s1 + $0x170] ss:$8 sps:$4 sm:$0xff]   ;;  %v2625_v5 = vld [vmem:[%s4187_s1 + $0x164] ss:$8 sps:$4 sm:$0xff]  }
   0x3   :  { %1638 = vmatprep.subr.bf16.mxu1 %v2619_v1  ;;  %1526 = vmatpush1.bf16.msra.mxu0 %v2621_v2  ;;  %v2627_v6 = vld [vmem:[%s4187_s1 + $0x60] ss:$8 sps:$4 sm:$0xff]   ;;  %v2629_v8 = vld [vmem:[%s4187_s1 + $0x54] ss:$8 sps:$4 sm:$0xff]   ;;  %v2633_v10 = vld [vmem:[%s4187_s1 + $0x50] ss:$8 sps:$4 sm:$0xff]  }
   0x4   :  { %1639 = vmatpush1.bf16.msra.mxu1 %v2622_v3  ;;  %1527 = vmatprep.subr.bf16.mxu0 %v2623_v4  ;;  %v2628_v7 = vld [vmem:[%s4187_s1 + $0x160] ss:$8 sps:$4 sm:$0xff]   ;;  %v2631_v9 = vld [vmem:[%s4187_s1 + $0x154] ss:$8 sps:$4 sm:$0xff]   ;;  %v2634_v11 = vld [vmem:[%s4187_s1 + $0x150] ss:$8 sps:$4 sm:$0xff]  }
   0x5   :  { %1640 = vmatprep.subr.bf16.mxu1 %v2625_v5  ;;  %v2635_v12 = vld [vmem:[%s4187_s1 + $0x44] ss:$8 sps:$4 sm:$0xff]   ;;  %v2639_v14 = vld [vmem:[%s4187_s1 + $0x40] ss:$8 sps:$4 sm:$0xff]   ;;  %v2641_v16 = vld [vmem:[%s4187_s1 + $0x34] ss:$8 sps:$4 sm:$0xff]  }
   0x6   :  { %v2637_v13 = vld [vmem:[%s4187_s1 + $0x144] ss:$8 sps:$4 sm:$0xff]   ;;  %v2640_v15 = vld [vmem:[%s4187_s1 + $0x140] ss:$8 sps:$4 sm:$0xff]   ;;  %v2643_v17 = vld [vmem:[%s4187_s1 + $0x134] ss:$8 sps:$4 sm:$0xff]  }
   0x7   :  { %1528 = vmatpush1.bf16.msra.mxu0 %v2627_v6  ;;  %v2645_v18 = vld [vmem:[%s4187_s1 + $0x30] ss:$8 sps:$4 sm:$0xff]   ;;  %v2647_v20 = vld [vmem:[%s4187_s1 + $0x24] ss:$8 sps:$4 sm:$0xff]   ;;  %v2651_v22 = vld [vmem:[%s4187_s1 + $0x20] ss:$8 sps:$4 sm:$0xff]  }
   0x8   :  { %1641 = vmatpush1.bf16.msra.mxu1 %v2628_v7  ;;  %1529 = vmatprep.subr.bf16.mxu0 %v2629_v8  ;;  %v2646_v19 = vld [vmem:[%s4187_s1 + $0x130] ss:$8 sps:$4 sm:$0xff]   ;;  %v2649_v21 = vld [vmem:[%s4187_s1 + $0x124] ss:$8 sps:$4 sm:$0xff]   ;;  %v2652_v23 = vld [vmem:[%s4187_s1 + $0x120] ss:$8 sps:$4 sm:$0xff]  }
   0x9   :  { %1642 = vmatprep.subr.bf16.mxu1 %v2631_v9  ;;  %v2653_v24 = vld [vmem:[%s4187_s1 + $0x14] ss:$8 sps:$4 sm:$0xff]   ;;  %v2657_v26 = vld [vmem:[%s4187_s1 + $0x10] ss:$8 sps:$4 sm:$0xff]   ;;  %v2659_v28 = vld [vmem:[%s4187_s1 + $0x4] ss:$8 sps:$4 sm:$0xff]  }
   0xa   :  { %v2655_v25 = vld [vmem:[%s4187_s1 + $0x114] ss:$8 sps:$4 sm:$0xff]   ;;  %v2658_v27 = vld [vmem:[%s4187_s1 + $0x110] ss:$8 sps:$4 sm:$0xff]   ;;  %v2661_v29 = vld [vmem:[%s4187_s1 + $0x104] ss:$8 sps:$4 sm:$0xff]  }
   0xb   :  { %1530 = vmatpush1.bf16.msra.mxu0 %v2633_v10  ;;  %v2663_v30 = vld [vmem:[%s4187_s1] ss:$8 sps:$4 sm:$0xff]   ;;  %v2665_v32 = vld [vmem:[%s4187_s1 + $0xf4] ss:$8 sps:$4 sm:$0xff]   ;;  %v2669_v34 = vld [vmem:[%s4187_s1 + $0xf0] ss:$8 sps:$4 sm:$0xff]  }
   0xc   :  { %1643 = vmatpush1.bf16.msra.mxu1 %v2634_v11  ;;  %1531 = vmatprep.subr.bf16.mxu0 %v2635_v12  ;;  %v2664_v31 = vld [vmem:[%s4187_s1 + $0x100] ss:$8 sps:$4 sm:$0xff]   ;;  %v2667_v33 = vld [vmem:[%s4187_s1 + $0x1f4] ss:$8 sps:$4 sm:$0xff]   ;;  %v2670_v35 = vld [vmem:[%s4187_s1 + $0x1f0] ss:$8 sps:$4 sm:$0xff]  }
   0xd   :  { %1644 = vmatprep.subr.bf16.mxu1 %v2637_v13  ;;  %v2671_v36 = vld [vmem:[%s4187_s1 + $0xe4] ss:$8 sps:$4 sm:$0xff]   ;;  %v2675_v38 = vld [vmem:[%s4187_s1 + $0xe0] ss:$8 sps:$4 sm:$0xff]   ;;  %v2677_v40 = vld [vmem:[%s4187_s1 + $0xd4] ss:$8 sps:$4 sm:$0xff]  }
   0xe   :  { %v2673_v37 = vld [vmem:[%s4187_s1 + $0x1e4] ss:$8 sps:$4 sm:$0xff]   ;;  %v2676_v39 = vld [vmem:[%s4187_s1 + $0x1e0] ss:$8 sps:$4 sm:$0xff]   ;;  %v2679_v41 = vld [vmem:[%s4187_s1 + $0x1d4] ss:$8 sps:$4 sm:$0xff]  }
   0xf   :  { %1532 = vmatpush1.bf16.msra.mxu0 %v2639_v14  ;;  %v2681_v42 = vld [vmem:[%s4187_s1 + $0xd0] ss:$8 sps:$4 sm:$0xff]   ;;  %v2683_v44 = vld [vmem:[%s4187_s1 + $0xc4] ss:$8 sps:$4 sm:$0xff]   ;;  %v2687_v46 = vld [vmem:[%s4187_s1 + $0xc0] ss:$8 sps:$4 sm:$0xff]  }
  0x10   :  { %1645 = vmatpush1.bf16.msra.mxu1 %v2640_v15  ;;  %1533 = vmatprep.subr.bf16.mxu0 %v2641_v16  ;;  %v2682_v43 = vld [vmem:[%s4187_s1 + $0x1d0] ss:$8 sps:$4 sm:$0xff]   ;;  %v2685_v45 = vld [vmem:[%s4187_s1 + $0x1c4] ss:$8 sps:$4 sm:$0xff]   ;;  %v2688_v47 = vld [vmem:[%s4187_s1 + $0x1c0] ss:$8 sps:$4 sm:$0xff]  }
  0x11   :  { %1646 = vmatprep.subr.bf16.mxu1 %v2643_v17  ;;  %v2689_v48 = vld [vmem:[%s4187_s1 + $0xb4] ss:$8 sps:$4 sm:$0xff]   ;;  %v2715_v49 = vld [vmem:[%s4188_s0 + $0x4] ss:$40 sps:$4 sm:$0xff]   ;;  %v2693_v52 = vld [vmem:[%s4187_s1 + $0xb0] ss:$8 sps:$4 sm:$0xff]  }
  0x12   :  { %v2691_v50 = vld [vmem:[%s4187_s1 + $0x1b4] ss:$8 sps:$4 sm:$0xff]   ;;  %1557 = vmatprep.mubr.bf16.mxu0 %v2715_v49  ;;  %v2694_v53 = vld [vmem:[%s4187_s1 + $0x1b0] ss:$8 sps:$4 sm:$0xff]   ;;  %v2695_v54 = vld [vmem:[%s4187_s1 + $0xa4] ss:$8 sps:$4 sm:$0xff]  }
  0x13   :  { %1534 = vmatpush1.bf16.msra.mxu0 %v2645_v18  ;;  %v2718_v51 = vld [vmem:[%s4188_s0 + $0xc] ss:$40 sps:$4 sm:$0xff]   ;;  %v2699_v56 = vld [vmem:[%s4187_s1 + $0xa0] ss:$8 sps:$4 sm:$0xff]   ;;  %v2705_v60 = vld [vmem:[%s4187_s1 + $0x90] ss:$8 sps:$4 sm:$0xff]  }
  0x14   :  { %1647 = vmatpush1.bf16.msra.mxu1 %v2646_v19  ;;  %1535 = vmatprep.subr.bf16.mxu0 %v2647_v20  ;;  %v2697_v55 = vld [vmem:[%s4187_s1 + $0x1a4] ss:$8 sps:$4 sm:$0xff]   ;;  %v2700_v57 = vld [vmem:[%s4187_s1 + $0x1a0] ss:$8 sps:$4 sm:$0xff]   ;;  %v2701_v58 = vld [vmem:[%s4187_s1 + $0x94] ss:$8 sps:$4 sm:$0xff]  }
  0x15   :  { %1648 = vmatprep.subr.bf16.mxu1 %v2649_v21  ;;  %1670 = vmatprep.mubr.bf16.mxu1 %v2718_v51  ;;  %v2703_v59 = vld [vmem:[%s4187_s1 + $0x194] ss:$8 sps:$4 sm:$0xff]   ;;  %v2706_v61 = vld [vmem:[%s4187_s1 + $0x190] ss:$8 sps:$4 sm:$0xff]   ;;  %v2707_v62 = vld [vmem:[%s4187_s1 + $0x84] ss:$8 sps:$4 sm:$0xff]  }
  0x16   :  { %v2709_v63 = vld [vmem:[%s4187_s1 + $0x184] ss:$8 sps:$4 sm:$0xff]   ;;  %v2711_v0 = vld [vmem:[%s4187_s1 + $0x80] ss:$8 sps:$4 sm:$0xff]   ;;  %v2721_v2 = vld [vmem:[%s4187_s1 + $0x274] ss:$8 sps:$4 sm:$0xff]  }
  0x17   :  { %1536 = vmatpush1.bf16.msra.mxu0 %v2651_v22  ;;  %v2712_v1 = vld [vmem:[%s4187_s1 + $0x180] ss:$8 sps:$4 sm:$0xff]   ;;  %v2724_v3 = vld [vmem:[%s4187_s1 + $0x374] ss:$8 sps:$4 sm:$0xff]   ;;  %v2719_v6 = vld [vmem:[%s4187_s1 + $0x270] ss:$8 sps:$4 sm:$0xff]  }
  0x18   :  { %1649 = vmatpush1.bf16.msra.mxu1 %v2652_v23  ;;  %1537 = vmatprep.subr.bf16.mxu0 %v2653_v24  ;;  %v2713_v4 = vld [vmem:[%s4188_s0] ss:$40 sps:$4 sm:$0xff]   ;;  %v2722_v7 = vld [vmem:[%s4187_s1 + $0x370] ss:$8 sps:$4 sm:$0xff]   ;;  %v2727_v8 = vld [vmem:[%s4187_s1 + $0x264] ss:$8 sps:$4 sm:$0xff]  }
  0x19   :  { %1650 = vmatprep.subr.bf16.mxu1 %v2655_v25  ;;  %v2716_v5 = vld [vmem:[%s4188_s0 + $0x8] ss:$40 sps:$4 sm:$0xff]   ;;  %v2730_v9 = vld [vmem:[%s4187_s1 + $0x364] ss:$8 sps:$4 sm:$0xff]   ;;  %v2731_v10 = vld [vmem:[%s4188_s0 + $0x54] ss:$40 sps:$4 sm:$0xff]  }
  0x1a   :  { %v2733_v11 = vld [vmem:[%s4188_s0 + $0x5c] ss:$40 sps:$4 sm:$0xff]   ;;  %v2725_v12 = vld [vmem:[%s4187_s1 + $0x260] ss:$8 sps:$4 sm:$0xff]   ;;  %v2735_v16 = vld [vmem:[%s4188_s0 + $0x50] ss:$40 sps:$4 sm:$0xff]  }
  0x1b   :  { %1538 = vmatpush1.bf16.msra.mxu0 %v2657_v26  ;;  %v2728_v13 = vld [vmem:[%s4187_s1 + $0x360] ss:$8 sps:$4 sm:$0xff]   ;;  %v2739_v14 = vld [vmem:[%s4187_s1 + $0x254] ss:$8 sps:$4 sm:$0xff]   ;;  %v2737_v18 = vld [vmem:[%s4187_s1 + $0x250] ss:$8 sps:$4 sm:$0xff]  }
  0x1c   :  { %1651 = vmatpush1.bf16.msra.mxu1 %v2658_v27  ;;  %1539 = vmatprep.subr.bf16.mxu0 %v2659_v28  ;;  %v2742_v15 = vld [vmem:[%s4187_s1 + $0x354] ss:$8 sps:$4 sm:$0xff]   ;;  %v2736_v17 = vld [vmem:[%s4188_s0 + $0x58] ss:$40 sps:$4 sm:$0xff]   ;;  %v2745_v20 = vld [vmem:[%s4187_s1 + $0x244] ss:$8 sps:$4 sm:$0xff]  }
  0x1d   :  { %1652 = vmatprep.subr.bf16.mxu1 %v2661_v29  ;;  %v2740_v19 = vld [vmem:[%s4187_s1 + $0x350] ss:$8 sps:$4 sm:$0xff]   ;;  %v2748_v21 = vld [vmem:[%s4187_s1 + $0x344] ss:$8 sps:$4 sm:$0xff]   ;;  %v2743_v24 = vld [vmem:[%s4187_s1 + $0x240] ss:$8 sps:$4 sm:$0xff]  }
  0x1e   :  { %v2749_v22 = vld [vmem:[%s4188_s0 + $0xa4] ss:$40 sps:$4 sm:$0xff]   ;;  %v2746_v25 = vld [vmem:[%s4187_s1 + $0x340] ss:$8 sps:$4 sm:$0xff]   ;;  %v2757_v26 = vld [vmem:[%s4187_s1 + $0x234] ss:$8 sps:$4 sm:$0xff]  }
  0x1f   :  { %1540 = vmatpush1.bf16.msra.mxu0 %v2663_v30  ;;  %v2751_v23 = vld [vmem:[%s4188_s0 + $0xac] ss:$40 sps:$4 sm:$0xff]   ;;  %v2753_v28 = vld [vmem:[%s4188_s0 + $0xa0] ss:$40 sps:$4 sm:$0xff]   ;;  %v2755_v30 = vld [vmem:[%s4187_s1 + $0x230] ss:$8 sps:$4 sm:$0xff]  }
  0x20   :  { %1653 = vmatpush1.bf16.msra.mxu1 %v2664_v31  ;;  %1541 = vmatprep.subr.bf16.mxu0 %v2665_v32  ;;  %v2760_v27 = vld [vmem:[%s4187_s1 + $0x334] ss:$8 sps:$4 sm:$0xff]   ;;  %v2754_v29 = vld [vmem:[%s4188_s0 + $0xa8] ss:$40 sps:$4 sm:$0xff]   ;;  %v2763_v32 = vld [vmem:[%s4187_s1 + $0x224] ss:$8 sps:$4 sm:$0xff]  }
  0x21   :  { %1654 = vmatprep.subr.bf16.mxu1 %v2667_v33  ;;  %v2758_v31 = vld [vmem:[%s4187_s1 + $0x330] ss:$8 sps:$4 sm:$0xff]   ;;  %v2766_v33 = vld [vmem:[%s4187_s1 + $0x324] ss:$8 sps:$4 sm:$0xff]   ;;  %v2782_v49 = vld [vmem:[%s4187_s1 + $0x300] ss:$8 sps:$4 sm:$0xff]  }
  0x22   :  { %v2796_v51 = vld [vmem:[%s4187_s1 + $0x3f4] ss:$8 sps:$4 sm:$0xff]  }
  0x23   :  { %1542 = vmatpush2.bf16.msra.mxu0 %v2669_v34  ;;  %v2767_v34 = vld [vmem:[%s4188_s0 + $0xf4] ss:$40 sps:$4 sm:$0xff]  }
  0x24   :  { %1655 = vmatpush2.bf16.msra.mxu1 %v2670_v35  ;;  %1543 = vmatprep.subr.bf16.mxu0 %v2671_v36  ;;  %v2769_v35 = vld [vmem:[%s4188_s0 + $0xfc] ss:$40 sps:$4 sm:$0xff]   ;;  %v2761_v36 = vld [vmem:[%s4187_s1 + $0x220] ss:$8 sps:$4 sm:$0xff]  }
  0x25   :  { %1656 = vmatprep.subr.bf16.mxu1 %v2673_v37  ;;  %v2764_v37 = vld [vmem:[%s4187_s1 + $0x320] ss:$8 sps:$4 sm:$0xff]  }
  0x27   :  { %1544 = vmatpush2.bf16.msra.mxu0 %v2675_v38  ;;  %v2775_v38 = vld [vmem:[%s4187_s1 + $0x214] ss:$8 sps:$4 sm:$0xff]  }
  0x28   :  { %1657 = vmatpush2.bf16.msra.mxu1 %v2676_v39  ;;  %1545 = vmatprep.subr.bf16.mxu0 %v2677_v40  ;;  %v2778_v39 = vld [vmem:[%s4187_s1 + $0x314] ss:$8 sps:$4 sm:$0xff]   ;;  %v2771_v40 = vld [vmem:[%s4188_s0 + $0xf0] ss:$40 sps:$4 sm:$0xff]  }
  0x29   :  { %1658 = vmatprep.subr.bf16.mxu1 %v2679_v41  ;;  %v2772_v41 = vld [vmem:[%s4188_s0 + $0xf8] ss:$40 sps:$4 sm:$0xff]  }
  0x2b   :  { %1546 = vmatpush2.bf16.msra.mxu0 %v2681_v42  ;;  %v2773_v42 = vld [vmem:[%s4187_s1 + $0x210] ss:$8 sps:$4 sm:$0xff]  }
  0x2c   :  { %1659 = vmatpush2.bf16.msra.mxu1 %v2682_v43  ;;  %1547 = vmatprep.subr.bf16.mxu0 %v2683_v44  ;;  %v2776_v43 = vld [vmem:[%s4187_s1 + $0x310] ss:$8 sps:$4 sm:$0xff]   ;;  %v2781_v44 = vld [vmem:[%s4187_s1 + $0x204] ss:$8 sps:$4 sm:$0xff]  }
  0x2d   :  { %1660 = vmatprep.subr.bf16.mxu1 %v2685_v45  ;;  %v2784_v45 = vld [vmem:[%s4187_s1 + $0x304] ss:$8 sps:$4 sm:$0xff]  }
  0x2f   :  { %1548 = vmatpush2.bf16.msra.mxu0 %v2687_v46  ;;  %v2785_v46 = vld [vmem:[%s4188_s0 + $0x144] ss:$40 sps:$4 sm:$0xff]  }
  0x30   :  { %1661 = vmatpush2.bf16.msra.mxu1 %v2688_v47  ;;  %1549 = vmatprep.subr.bf16.mxu0 %v2689_v48  ;;  %v2787_v47 = vld [vmem:[%s4188_s0 + $0x14c] ss:$40 sps:$4 sm:$0xff]   ;;  %v2779_v48 = vld [vmem:[%s4187_s1 + $0x200] ss:$8 sps:$4 sm:$0xff]  }
  0x31   :  { %1662 = vmatprep.subr.bf16.mxu1 %v2691_v50  ;;  %v2793_v50 = vld [vmem:[%s4187_s1 + $0x2f4] ss:$8 sps:$4 sm:$0xff]  }
  0x33   :  { %1550 = vmatpush2.bf16.msra.mxu0 %v2693_v52  ;;  %v2789_v52 = vld [vmem:[%s4188_s0 + $0x140] ss:$40 sps:$4 sm:$0xff]  }
  0x34   :  { %1663 = vmatpush2.bf16.msra.mxu1 %v2694_v53  ;;  %1551 = vmatprep.subr.bf16.mxu0 %v2695_v54  ;;  %v2790_v53 = vld [vmem:[%s4188_s0 + $0x148] ss:$40 sps:$4 sm:$0xff]  }
  0x35   :  { %1664 = vmatprep.subr.bf16.mxu1 %v2697_v55  ;;  %v2791_v54 = vld [vmem:[%s4187_s1 + $0x2f0] ss:$8 sps:$4 sm:$0xff]  }
  0x36   :  { %v2794_v55 = vld [vmem:[%s4187_s1 + $0x3f0] ss:$8 sps:$4 sm:$0xff]  }
  0x37   :  { %1552 = vmatpush2.bf16.msra.mxu0 %v2699_v56  ;;  %v2799_v56 = vld [vmem:[%s4187_s1 + $0x2e4] ss:$8 sps:$4 sm:$0xff]  }
  0x38   :  { %1665 = vmatpush2.bf16.msra.mxu1 %v2700_v57  ;;  %1553 = vmatprep.subr.bf16.mxu0 %v2701_v58  ;;  %v2802_v57 = vld [vmem:[%s4187_s1 + $0x3e4] ss:$8 sps:$4 sm:$0xff]   ;;  %v2803_v58 = vld [vmem:[%s4188_s0 + $0x194] ss:$40 sps:$4 sm:$0xff]  }
  0x39   :  { %1666 = vmatprep.subr.bf16.mxu1 %v2703_v59  ;;  %v2805_v59 = vld [vmem:[%s4188_s0 + $0x19c] ss:$40 sps:$4 sm:$0xff]  }
  0x3b   :  { %1554 = vmatpush2.bf16.msra.mxu0 %v2705_v60  ;;  %v2797_v60 = vld [vmem:[%s4187_s1 + $0x2e0] ss:$8 sps:$4 sm:$0xff]  }
  0x3c   :  { %1667 = vmatpush2.bf16.msra.mxu1 %v2706_v61  ;;  %1555 = vmatprep.subr.bf16.mxu0 %v2707_v62  ;;  %v2800_v61 = vld [vmem:[%s4187_s1 + $0x3e0] ss:$8 sps:$4 sm:$0xff]   ;;  %v2811_v62 = vld [vmem:[%s4187_s1 + $0x2d4] ss:$8 sps:$4 sm:$0xff]  }
  0x3d   :  { %1668 = vmatprep.subr.bf16.mxu1 %v2709_v63  ;;  %v2814_v63 = vld [vmem:[%s4187_s1 + $0x3d4] ss:$8 sps:$4 sm:$0xff]  }
  0x3f   :  { %1556 = vmatpush2.bf16.msra.mxu0 %v2711_v0  ;;  %v2807_v0 = vld [vmem:[%s4188_s0 + $0x190] ss:$40 sps:$4 sm:$0xff]  }
  0x40   :  { %1669 = vmatpush2.bf16.msra.mxu1 %v2712_v1  ;;  %1751 = vmatprep.subr.bf16.mxu0 %v2721_v2  ;;  %v2808_v1 = vld [vmem:[%s4188_s0 + $0x198] ss:$40 sps:$4 sm:$0xff]  }
  0x41   :  { %1864 = vmatprep.subr.bf16.mxu1 %v2724_v3  ;;  %v2809_v2 = vld [vmem:[%s4187_s1 + $0x2d0] ss:$8 sps:$4 sm:$0xff]  }
  0x42   :  { %1558 = vmatmul.mubr.bf16.vlgmr.msra.gmra.mxu0 %v2713_v4  ;;  %v2812_v3 = vld [vmem:[%s4187_s1 + $0x3d0] ss:$8 sps:$4 sm:$0xff]   ;;  %v2817_v4 = vld [vmem:[%s4187_s1 + $0x2c4] ss:$8 sps:$4 sm:$0xff]  }
  0x43   :  { %1671 = vmatmul.mubr.bf16.vlgmr.msra.gmra.mxu1 %v2716_v5  ;;  %1752 = vmatpush1.bf16.msra.mxu0 %v2719_v6  ;;  %v2820_v5 = vld [vmem:[%s4187_s1 + $0x3c4] ss:$8 sps:$4 sm:$0xff]  }
  0x44   :  { %1865 = vmatpush1.bf16.msra.mxu1 %v2722_v7  ;;  %1753 = vmatprep.subr.bf16.mxu0 %v2727_v8  ;;  %v2821_v6 = vld [vmem:[%s4188_s0 + $0x1e4] ss:$40 sps:$4 sm:$0xff]   ;;  %v2815_v8 = vld [vmem:[%s4187_s1 + $0x2c0] ss:$8 sps:$4 sm:$0xff]  }
  0x45   :  { %1866 = vmatprep.subr.bf16.mxu1 %v2730_v9  ;;  %1567 = vmatprep.mubr.bf16.mxu0 %v2731_v10  ;;  %v2823_v7 = vld [vmem:[%s4188_s0 + $0x1ec] ss:$40 sps:$4 sm:$0xff]   ;;  %v2818_v9 = vld [vmem:[%s4187_s1 + $0x3c0] ss:$8 sps:$4 sm:$0xff]  }
  0x46   :  { %1680 = vmatprep.mubr.bf16.mxu1 %v2733_v11  ;;  %v2829_v10 = vld [vmem:[%s4187_s1 + $0x2b4] ss:$8 sps:$4 sm:$0xff]  }
  0x47   :  { %1754 = vmatpush1.bf16.msra.mxu0 %v2725_v12  ;;  %v2832_v11 = vld [vmem:[%s4187_s1 + $0x3b4] ss:$8 sps:$4 sm:$0xff]   ;;  %v2825_v12 = vld [vmem:[%s4188_s0 + $0x1e0] ss:$40 sps:$4 sm:$0xff]  }
  0x48   :  { %1867 = vmatpush1.bf16.msra.mxu1 %v2728_v13  ;;  %1755 = vmatprep.subr.bf16.mxu0 %v2739_v14  ;;  %v2826_v13 = vld [vmem:[%s4188_s0 + $0x1e8] ss:$40 sps:$4 sm:$0xff]  }
  0x49   :  { %1868 = vmatprep.subr.bf16.mxu1 %v2742_v15  ;;  %v2827_v14 = vld [vmem:[%s4187_s1 + $0x2b0] ss:$8 sps:$4 sm:$0xff]  }
  0x4a   :  { %1568 = vmatmul.mubr.bf16.gmra.mxu0 %v2735_v16  ;;  %v2830_v15 = vld [vmem:[%s4187_s1 + $0x3b0] ss:$8 sps:$4 sm:$0xff]   ;;  %v2835_v16 = vld [vmem:[%s4187_s1 + $0x2a4] ss:$8 sps:$4 sm:$0xff]  }
  0x4b   :  { %1681 = vmatmul.mubr.bf16.gmra.mxu1 %v2736_v17  ;;  %1756 = vmatpush1.bf16.msra.mxu0 %v2737_v18  ;;  %v2838_v17 = vld [vmem:[%s4187_s1 + $0x3a4] ss:$8 sps:$4 sm:$0xff]   ;;  %v2839_v18 = vld [vmem:[%s4188_s0 + $0x234] ss:$40 sps:$4 sm:$0xff]  }
  0x4c   :  { %1869 = vmatpush1.bf16.msra.mxu1 %v2740_v19  ;;  %1757 = vmatprep.subr.bf16.mxu0 %v2745_v20  ;;  %v2841_v19 = vld [vmem:[%s4188_s0 + $0x23c] ss:$40 sps:$4 sm:$0xff]   ;;  %v2833_v20 = vld [vmem:[%s4187_s1 + $0x2a0] ss:$8 sps:$4 sm:$0xff]  }
  0x4d   :  { %1870 = vmatprep.subr.bf16.mxu1 %v2748_v21  ;;  %1577 = vmatprep.mubr.bf16.mxu0 %v2749_v22  ;;  %v2836_v21 = vld [vmem:[%s4187_s1 + $0x3a0] ss:$8 sps:$4 sm:$0xff]   ;;  %v2847_v22 = vld [vmem:[%s4187_s1 + $0x294] ss:$8 sps:$4 sm:$0xff]  }
  0x4e   :  { %1690 = vmatprep.mubr.bf16.mxu1 %v2751_v23  ;;  %v2850_v23 = vld [vmem:[%s4187_s1 + $0x394] ss:$8 sps:$4 sm:$0xff]  }
  0x4f   :  { %1758 = vmatpush1.bf16.msra.mxu0 %v2743_v24  ;;  %v2843_v24 = vld [vmem:[%s4188_s0 + $0x230] ss:$40 sps:$4 sm:$0xff]  }
  0x50   :  { %1871 = vmatpush1.bf16.msra.mxu1 %v2746_v25  ;;  %1759 = vmatprep.subr.bf16.mxu0 %v2757_v26  ;;  %v2844_v25 = vld [vmem:[%s4188_s0 + $0x238] ss:$40 sps:$4 sm:$0xff]  }
  0x51   :  { %1872 = vmatprep.subr.bf16.mxu1 %v2760_v27  ;;  %v2845_v26 = vld [vmem:[%s4187_s1 + $0x290] ss:$8 sps:$4 sm:$0xff]  }
  0x52   :  { %1578 = vmatmul.mubr.bf16.gmra.mxu0 %v2753_v28  ;;  %v2848_v27 = vld [vmem:[%s4187_s1 + $0x390] ss:$8 sps:$4 sm:$0xff]   ;;  %v2853_v28 = vld [vmem:[%s4187_s1 + $0x284] ss:$8 sps:$4 sm:$0xff]  }
  0x53   :  { %1691 = vmatmul.mubr.bf16.gmra.mxu1 %v2754_v29  ;;  %1760 = vmatpush1.bf16.msra.mxu0 %v2755_v30  ;;  %v2856_v29 = vld [vmem:[%s4187_s1 + $0x384] ss:$8 sps:$4 sm:$0xff]   ;;  %v2859_v30 = vld [vmem:[%s4188_s0 + $0x14] ss:$40 sps:$4 sm:$0xff]  }
  0x54   :  { %1873 = vmatpush1.bf16.msra.mxu1 %v2758_v31  ;;  %1761 = vmatprep.subr.bf16.mxu0 %v2763_v32  ;;  %v2862_v31 = vld [vmem:[%s4188_s0 + $0x1c] ss:$40 sps:$4 sm:$0xff]   ;;  %v2851_v32 = vld [vmem:[%s4187_s1 + $0x280] ss:$8 sps:$4 sm:$0xff]  }
  0x55   :  { %1874 = vmatprep.subr.bf16.mxu1 %v2766_v33  ;;  %1587 = vmatprep.mubr.bf16.mxu0 %v2767_v34  ;;  %v2854_v33 = vld [vmem:[%s4187_s1 + $0x380] ss:$8 sps:$4 sm:$0xff]   ;;  %v2865_v34 = vld [vmem:[%s4187_s1 + $0x474] ss:$8 sps:$4 sm:$0xff]  }
  0x56   :  { %1700 = vmatprep.mubr.bf16.mxu1 %v2769_v35  ;;  %v2857_v35 = vld [vmem:[%s4188_s0 + $0x10] ss:$40 sps:$4 sm:$0xff]  }
  0x57   :  { %1762 = vmatpush1.bf16.msra.mxu0 %v2761_v36  ;;  %v2860_v36 = vld [vmem:[%s4188_s0 + $0x18] ss:$40 sps:$4 sm:$0xff]  }
  0x58   :  { %1875 = vmatpush1.bf16.msra.mxu1 %v2764_v37  ;;  %1763 = vmatprep.subr.bf16.mxu0 %v2775_v38  ;;  %v2863_v37 = vld [vmem:[%s4187_s1 + $0x470] ss:$8 sps:$4 sm:$0xff]   ;;  %v2868_v38 = vld [vmem:[%s4187_s1 + $0x464] ss:$8 sps:$4 sm:$0xff]  }
  0x59   :  { %1876 = vmatprep.subr.bf16.mxu1 %v2778_v39  ;;  %v2869_v39 = vld [vmem:[%s4188_s0 + $0x64] ss:$40 sps:$4 sm:$0xff]  }
  0x5a   :  { %1588 = vmatmul.mubr.bf16.gmra.mxu0 %v2771_v40  ;;  %v2871_v40 = vld [vmem:[%s4188_s0 + $0x6c] ss:$40 sps:$4 sm:$0xff]  }
  0x5b   :  { %1701 = vmatmul.mubr.bf16.gmra.mxu1 %v2772_v41  ;;  %1764 = vmatpush1.bf16.msra.mxu0 %v2773_v42  ;;  %v2866_v41 = vld [vmem:[%s4187_s1 + $0x460] ss:$8 sps:$4 sm:$0xff]   ;;  %v2877_v42 = vld [vmem:[%s4187_s1 + $0x454] ss:$8 sps:$4 sm:$0xff]  }
  0x5c   :  { %1877 = vmatpush1.bf16.msra.mxu1 %v2776_v43  ;;  %1765 = vmatprep.subr.bf16.mxu0 %v2781_v44  ;;  %v2873_v43 = vld [vmem:[%s4188_s0 + $0x60] ss:$40 sps:$4 sm:$0xff]  }
  0x5d   :  { %1878 = vmatprep.subr.bf16.mxu1 %v2784_v45  ;;  %1597 = vmatprep.mubr.bf16.mxu0 %v2785_v46  ;;  %v2874_v44 = vld [vmem:[%s4188_s0 + $0x68] ss:$40 sps:$4 sm:$0xff]   ;;  %v2880_v46 = vld [vmem:[%s4187_s1 + $0x444] ss:$8 sps:$4 sm:$0xff]  }
  0x5e   :  { %1710 = vmatprep.mubr.bf16.mxu1 %v2787_v47  ;;  %v2875_v45 = vld [vmem:[%s4187_s1 + $0x450] ss:$8 sps:$4 sm:$0xff]   ;;  %v2881_v47 = vld [vmem:[%s4188_s0 + $0xb4] ss:$40 sps:$4 sm:$0xff]  }
  0x5f   :  { %1766 = vmatpush1.bf16.msra.mxu0 %v2779_v48  ;;  %v2883_v48 = vld [vmem:[%s4188_s0 + $0xbc] ss:$40 sps:$4 sm:$0xff]  }
  0x60   :  { %1879 = vmatpush1.bf16.msra.mxu1 %v2782_v49  ;;  %1767 = vmatprep.subr.bf16.mxu0 %v2793_v50  ;;  %v2878_v49 = vld [vmem:[%s4187_s1 + $0x440] ss:$8 sps:$4 sm:$0xff]   ;;  %v2889_v50 = vld [vmem:[%s4187_s1 + $0x434] ss:$8 sps:$4 sm:$0xff]  }
  0x61   :  { %1880 = vmatprep.subr.bf16.mxu1 %v2796_v51  ;;  %v2885_v51 = vld [vmem:[%s4188_s0 + $0xb0] ss:$40 sps:$4 sm:$0xff]  }
  0x62   :  { %1598 = vmatmul.mubr.bf16.gmra.mxu0 %v2789_v52  ;;  %v2886_v52 = vld [vmem:[%s4188_s0 + $0xb8] ss:$40 sps:$4 sm:$0xff]  }
  0x63   :  { %1711 = vmatmul.mubr.bf16.gmra.mxu1 %v2790_v53  ;;  %1768 = vmatpush2.bf16.msra.mxu0 %v2791_v54  ;;  %v2887_v53 = vld [vmem:[%s4187_s1 + $0x430] ss:$8 sps:$4 sm:$0xff]   ;;  %v2892_v54 = vld [vmem:[%s4187_s1 + $0x424] ss:$8 sps:$4 sm:$0xff]  }
  0x64   :  { %1881 = vmatpush2.bf16.msra.mxu1 %v2794_v55  ;;  %1769 = vmatprep.subr.bf16.mxu0 %v2799_v56  ;;  %v2893_v55 = vld [vmem:[%s4188_s0 + $0x104] ss:$40 sps:$4 sm:$0xff]  }
  0x65   :  { %1882 = vmatprep.subr.bf16.mxu1 %v2802_v57  ;;  %1607 = vmatprep.mubr.bf16.mxu0 %v2803_v58  ;;  %v2895_v56 = vld [vmem:[%s4188_s0 + $0x10c] ss:$40 sps:$4 sm:$0xff]   ;;  %v2890_v57 = vld [vmem:[%s4187_s1 + $0x420] ss:$8 sps:$4 sm:$0xff]  }
  0x66   :  { %1720 = vmatprep.mubr.bf16.mxu1 %v2805_v59  ;;  %v2901_v58 = vld [vmem:[%s4187_s1 + $0x414] ss:$8 sps:$4 sm:$0xff]   ;;  %v2897_v59 = vld [vmem:[%s4188_s0 + $0x100] ss:$40 sps:$4 sm:$0xff]  }
  0x67   :  { %1770 = vmatpush2.bf16.msra.mxu0 %v2797_v60  ;;  %v2898_v60 = vld [vmem:[%s4188_s0 + $0x108] ss:$40 sps:$4 sm:$0xff]  }
  0x68   :  { %1883 = vmatpush2.bf16.msra.mxu1 %v2800_v61  ;;  %1771 = vmatprep.subr.bf16.mxu0 %v2811_v62  ;;  %v2899_v61 = vld [vmem:[%s4187_s1 + $0x410] ss:$8 sps:$4 sm:$0xff]   ;;  %v2904_v62 = vld [vmem:[%s4187_s1 + $0x404] ss:$8 sps:$4 sm:$0xff]  }
  0x69   :  { %1884 = vmatprep.subr.bf16.mxu1 %v2814_v63  ;;  %v2905_v63 = vld [vmem:[%s4188_s0 + $0x154] ss:$40 sps:$4 sm:$0xff]  }
  0x6a   :  { %1608 = vmatmul.mubr.bf16.gmra.mxu0 %v2807_v0  ;;  %v2907_v0 = vld [vmem:[%s4188_s0 + $0x15c] ss:$40 sps:$4 sm:$0xff]  }
  0x6b   :  { %1721 = vmatmul.mubr.bf16.gmra.mxu1 %v2808_v1  ;;  %1772 = vmatpush2.bf16.msra.mxu0 %v2809_v2  ;;  %v2902_v1 = vld [vmem:[%s4187_s1 + $0x400] ss:$8 sps:$4 sm:$0xff]   ;;  %v2913_v2 = vld [vmem:[%s4187_s1 + $0x4f4] ss:$8 sps:$4 sm:$0xff]  }
  0x6c   :  { %1885 = vmatpush2.bf16.msra.mxu1 %v2812_v3  ;;  %1773 = vmatprep.subr.bf16.mxu0 %v2817_v4  ;;  %v2909_v3 = vld [vmem:[%s4188_s0 + $0x150] ss:$40 sps:$4 sm:$0xff]  }
  0x6d   :  { %1886 = vmatprep.subr.bf16.mxu1 %v2820_v5  ;;  %1617 = vmatprep.mubr.bf16.mxu0 %v2821_v6  ;;  %v2910_v4 = vld [vmem:[%s4188_s0 + $0x158] ss:$40 sps:$4 sm:$0xff]   ;;  %v2916_v6 = vld [vmem:[%s4187_s1 + $0x4e4] ss:$8 sps:$4 sm:$0xff]  }
  0x6e   :  { %1730 = vmatprep.mubr.bf16.mxu1 %v2823_v7  ;;  %v2911_v5 = vld [vmem:[%s4187_s1 + $0x4f0] ss:$8 sps:$4 sm:$0xff]   ;;  %v2917_v7 = vld [vmem:[%s4188_s0 + $0x1a4] ss:$40 sps:$4 sm:$0xff]  }
  0x6f   :  { %1774 = vmatpush2.bf16.msra.mxu0 %v2815_v8  ;;  %v2919_v8 = vld [vmem:[%s4188_s0 + $0x1ac] ss:$40 sps:$4 sm:$0xff]  }
  0x70   :  { %1887 = vmatpush2.bf16.msra.mxu1 %v2818_v9  ;;  %1775 = vmatprep.subr.bf16.mxu0 %v2829_v10  ;;  %v2914_v9 = vld [vmem:[%s4187_s1 + $0x4e0] ss:$8 sps:$4 sm:$0xff]   ;;  %v2925_v10 = vld [vmem:[%s4187_s1 + $0x4d4] ss:$8 sps:$4 sm:$0xff]  }
  0x71   :  { %1888 = vmatprep.subr.bf16.mxu1 %v2832_v11  ;;  %v2921_v11 = vld [vmem:[%s4188_s0 + $0x1a0] ss:$40 sps:$4 sm:$0xff]  }
  0x72   :  { %1618 = vmatmul.mubr.bf16.gmra.mxu0 %v2825_v12  ;;  %v2922_v12 = vld [vmem:[%s4188_s0 + $0x1a8] ss:$40 sps:$4 sm:$0xff]  }
  0x73   :  { %1731 = vmatmul.mubr.bf16.gmra.mxu1 %v2826_v13  ;;  %1776 = vmatpush2.bf16.msra.mxu0 %v2827_v14  ;;  %v2923_v13 = vld [vmem:[%s4187_s1 + $0x4d0] ss:$8 sps:$4 sm:$0xff]   ;;  %v2928_v14 = vld [vmem:[%s4187_s1 + $0x4c4] ss:$8 sps:$4 sm:$0xff]  }
  0x74   :  { %1889 = vmatpush2.bf16.msra.mxu1 %v2830_v15  ;;  %1777 = vmatprep.subr.bf16.mxu0 %v2835_v16  ;;  %v2929_v15 = vld [vmem:[%s4188_s0 + $0x1f4] ss:$40 sps:$4 sm:$0xff]  }
  0x75   :  { %1890 = vmatprep.subr.bf16.mxu1 %v2838_v17  ;;  %1627 = vmatprep.mubr.bf16.mxu0 %v2839_v18  ;;  %v2931_v16 = vld [vmem:[%s4188_s0 + $0x1fc] ss:$40 sps:$4 sm:$0xff]   ;;  %v2926_v17 = vld [vmem:[%s4187_s1 + $0x4c0] ss:$8 sps:$4 sm:$0xff]  }
  0x76   :  { %1740 = vmatprep.mubr.bf16.mxu1 %v2841_v19  ;;  %v2937_v18 = vld [vmem:[%s4187_s1 + $0x4b4] ss:$8 sps:$4 sm:$0xff]   ;;  %v2933_v19 = vld [vmem:[%s4188_s0 + $0x1f0] ss:$40 sps:$4 sm:$0xff]  }
  0x77   :  { %1778 = vmatpush2.bf16.msra.mxu0 %v2833_v20  ;;  %v2934_v20 = vld [vmem:[%s4188_s0 + $0x1f8] ss:$40 sps:$4 sm:$0xff]  }
  0x78   :  { %1891 = vmatpush2.bf16.msra.mxu1 %v2836_v21  ;;  %1779 = vmatprep.subr.bf16.mxu0 %v2847_v22  ;;  %v2935_v21 = vld [vmem:[%s4187_s1 + $0x4b0] ss:$8 sps:$4 sm:$0xff]   ;;  %v2940_v22 = vld [vmem:[%s4187_s1 + $0x4a4] ss:$8 sps:$4 sm:$0xff]  }
  0x79   :  { %1892 = vmatprep.subr.bf16.mxu1 %v2850_v23  ;;  %v2941_v23 = vld [vmem:[%s4188_s0 + $0x244] ss:$40 sps:$4 sm:$0xff]  }
  0x7a   :  { %1628 = vmatmul.mubr.bf16.gmra.mxu0 %v2843_v24  ;;  %v2943_v24 = vld [vmem:[%s4188_s0 + $0x24c] ss:$40 sps:$4 sm:$0xff]  }
  0x7b   :  { %1741 = vmatmul.mubr.bf16.gmra.mxu1 %v2844_v25  ;;  %1780 = vmatpush2.bf16.msra.mxu0 %v2845_v26  ;;  %v2938_v25 = vld [vmem:[%s4187_s1 + $0x4a0] ss:$8 sps:$4 sm:$0xff]   ;;  %v2949_v26 = vld [vmem:[%s4187_s1 + $0x494] ss:$8 sps:$4 sm:$0xff]  }
  0x7c   :  { %1893 = vmatpush2.bf16.msra.mxu1 %v2848_v27  ;;  %1781 = vmatprep.subr.bf16.mxu0 %v2853_v28  ;;  %v2945_v27 = vld [vmem:[%s4188_s0 + $0x240] ss:$40 sps:$4 sm:$0xff]  }
  0x7d   :  { %1894 = vmatprep.subr.bf16.mxu1 %v2856_v29  ;;  %1783 = vmatprep.mubr.bf16.mxu0 %v2859_v30  ;;  %v2946_v28 = vld [vmem:[%s4188_s0 + $0x248] ss:$40 sps:$4 sm:$0xff]   ;;  %v2952_v30 = vld [vmem:[%s4187_s1 + $0x484] ss:$8 sps:$4 sm:$0xff]  }
  0x7e   :  { %1896 = vmatprep.mubr.bf16.mxu1 %v2862_v31  ;;  %v2947_v29 = vld [vmem:[%s4187_s1 + $0x490] ss:$8 sps:$4 sm:$0xff]   ;;  %v2955_v31 = vld [vmem:[%s4188_s0 + $0x24] ss:$40 sps:$4 sm:$0xff]  }
  0x7f   :  { %1782 = vmatpush2.bf16.msra.mxu0 %v2851_v32  ;;  %v2958_v32 = vld [vmem:[%s4188_s0 + $0x164] ss:$40 sps:$4 sm:$0xff]  }
  0x80   :  { %1895 = vmatpush2.bf16.msra.mxu1 %v2854_v33  ;;  %1977 = vmatprep.subr.bf16.mxu0 %v2865_v34  ;;  %v2950_v33 = vld [vmem:[%s4187_s1 + $0x480] ss:$8 sps:$4 sm:$0xff]  }
  0x81   :  { %2585 = vmatprep.subr.bf16.mxu1 %v2865_v34  ;;  %v2953_v34 = vld [vmem:[%s4188_s0 + $0x20] ss:$40 sps:$4 sm:$0xff]  }
  0x82   :  { %1784 = vmatmul.mubr.bf16.vlgmr.msra.gmra.mxu0 %v2857_v35  ;;  %v2956_v35 = vld [vmem:[%s4188_s0 + $0x160] ss:$40 sps:$4 sm:$0xff]  }
  0x83   :  { %1897 = vmatmul.mubr.bf16.vlgmr.msra.gmra.mxu1 %v2860_v36  ;;  %1978 = vmatpush1.bf16.msra.mxu0 %v2863_v37  ;;  %v2959_v36 = vld [vmem:[%s4188_s0 + $0x74] ss:$40 sps:$4 sm:$0xff]  }
  0x84   :  { %2601 = vmatpush1.bf16.msra.mxu1 %v2863_v37  ;;  %1979 = vmatprep.subr.bf16.mxu0 %v2868_v38  ;;  %v2961_v37 = vld [vmem:[%s4188_s0 + $0x1b4] ss:$40 sps:$4 sm:$0xff]  }
  0x85   :  { %2586 = vmatprep.subr.bf16.mxu1 %v2868_v38  ;;  %1793 = vmatprep.mubr.bf16.mxu0 %v2869_v39  ;;  %v2963_v38 = vld [vmem:[%s4188_s0 + $0x70] ss:$40 sps:$4 sm:$0xff]  }
  0x86   :  { %1906 = vmatprep.mubr.bf16.mxu1 %v2871_v40  ;;  %v2964_v39 = vld [vmem:[%s4188_s0 + $0x1b0] ss:$40 sps:$4 sm:$0xff]   ;;  %v2965_v40 = vld [vmem:[%s4188_s0 + $0xc4] ss:$40 sps:$4 sm:$0xff]  }
  0x87   :  { %1980 = vmatpush1.bf16.msra.mxu0 %v2866_v41 }
  0x88   :  { %2602 = vmatpush1.bf16.msra.mxu1 %v2866_v41  ;;  %1981 = vmatprep.subr.bf16.mxu0 %v2877_v42  ;;  %v2967_v41 = vld [vmem:[%s4188_s0 + $0x204] ss:$40 sps:$4 sm:$0xff]  }
  0x89   :  { %2587 = vmatprep.subr.bf16.mxu1 %v2877_v42  ;;  %v2969_v42 = vld [vmem:[%s4188_s0 + $0xc0] ss:$40 sps:$4 sm:$0xff]  }
  0x8a   :  { %1794 = vmatmul.mubr.bf16.gmra.mxu0 %v2873_v43  ;;  %v2970_v43 = vld [vmem:[%s4188_s0 + $0x200] ss:$40 sps:$4 sm:$0xff]  }
  0x8b   :  { %1907 = vmatmul.mubr.bf16.gmra.mxu1 %v2874_v44  ;;  %1982 = vmatpush1.bf16.msra.mxu0 %v2875_v45  ;;  %v2971_v44 = vld [vmem:[%s4188_s0 + $0x114] ss:$40 sps:$4 sm:$0xff]  }
  0x8c   :  { %2603 = vmatpush1.bf16.msra.mxu1 %v2875_v45  ;;  %1983 = vmatprep.subr.bf16.mxu0 %v2880_v46  ;;  %v2973_v45 = vld [vmem:[%s4188_s0 + $0x254] ss:$40 sps:$4 sm:$0xff]  }
  0x8d   :  { %2588 = vmatprep.subr.bf16.mxu1 %v2880_v46  ;;  %1803 = vmatprep.mubr.bf16.mxu0 %v2881_v47  ;;  %v2975_v46 = vld [vmem:[%s4188_s0 + $0x110] ss:$40 sps:$4 sm:$0xff]  }
  0x8e   :  { %1916 = vmatprep.mubr.bf16.mxu1 %v2883_v48  ;;  %v2976_v47 = vld [vmem:[%s4188_s0 + $0x250] ss:$40 sps:$4 sm:$0xff]  }
  0x8f   :  { %1984 = vmatpush1.bf16.msra.mxu0 %v2878_v49 }
  0x90   :  { %2604 = vmatpush1.bf16.msra.mxu1 %v2878_v49  ;;  %1985 = vmatprep.subr.bf16.mxu0 %v2889_v50 }
  0x91   :  { %2589 = vmatprep.subr.bf16.mxu1 %v2889_v50 }
  0x92   :  { %1804 = vmatmul.mubr.bf16.gmra.mxu0 %v2885_v51 }
  0x93   :  { %1917 = vmatmul.mubr.bf16.gmra.mxu1 %v2886_v52  ;;  %1986 = vmatpush1.bf16.msra.mxu0 %v2887_v53 }
  0x94   :  { %2605 = vmatpush1.bf16.msra.mxu1 %v2887_v53  ;;  %1987 = vmatprep.subr.bf16.mxu0 %v2892_v54 }
  0x95   :  { %2590 = vmatprep.subr.bf16.mxu1 %v2892_v54  ;;  %1813 = vmatprep.mubr.bf16.mxu0 %v2893_v55 }
  0x96   :  { %1926 = vmatprep.mubr.bf16.mxu1 %v2895_v56 }
  0x97   :  { %1988 = vmatpush1.bf16.msra.mxu0 %v2890_v57 }
  0x98   :  { %2606 = vmatpush1.bf16.msra.mxu1 %v2890_v57  ;;  %1989 = vmatprep.subr.bf16.mxu0 %v2901_v58 }
  0x99   :  { %2591 = vmatprep.subr.bf16.mxu1 %v2901_v58 }
  0x9a   :  { %1814 = vmatmul.mubr.bf16.gmra.mxu0 %v2897_v59 }
  0x9b   :  { %1927 = vmatmul.mubr.bf16.gmra.mxu1 %v2898_v60  ;;  %1990 = vmatpush1.bf16.msra.mxu0 %v2899_v61 }
  0x9c   :  { %2607 = vmatpush1.bf16.msra.mxu1 %v2899_v61  ;;  %1991 = vmatprep.subr.bf16.mxu0 %v2904_v62 }
  0x9d   :  { %2592 = vmatprep.subr.bf16.mxu1 %v2904_v62  ;;  %1823 = vmatprep.mubr.bf16.mxu0 %v2905_v63 }
  0x9e   :  { %1936 = vmatprep.mubr.bf16.mxu1 %v2907_v0 }
  0x9f   :  { %1992 = vmatpush1.bf16.msra.mxu0 %v2902_v1 }
  0xa0   :  { %2608 = vmatpush1.bf16.msra.mxu1 %v2902_v1  ;;  %1993 = vmatprep.subr.bf16.mxu0 %v2913_v2 }
  0xa1   :  { %2593 = vmatprep.subr.bf16.mxu1 %v2913_v2 }
  0xa2   :  { %1824 = vmatmul.mubr.bf16.gmra.mxu0 %v2909_v3 }
  0xa3   :  { %1937 = vmatmul.mubr.bf16.gmra.mxu1 %v2910_v4  ;;  %1994 = vmatpush2.bf16.msra.mxu0 %v2911_v5 }
  0xa4   :  { %2609 = vmatpush2.bf16.msra.mxu1 %v2911_v5  ;;  %1995 = vmatprep.subr.bf16.mxu0 %v2916_v6 }
  0xa5   :  { %2594 = vmatprep.subr.bf16.mxu1 %v2916_v6  ;;  %1833 = vmatprep.mubr.bf16.mxu0 %v2917_v7 }
  0xa6   :  { %1946 = vmatprep.mubr.bf16.mxu1 %v2919_v8 }
  0xa7   :  { %1996 = vmatpush2.bf16.msra.mxu0 %v2914_v9 }
  0xa8   :  { %2610 = vmatpush2.bf16.msra.mxu1 %v2914_v9  ;;  %1997 = vmatprep.subr.bf16.mxu0 %v2925_v10 }
  0xa9   :  { %2595 = vmatprep.subr.bf16.mxu1 %v2925_v10 }
  0xaa   :  { %1834 = vmatmul.mubr.bf16.gmra.mxu0 %v2921_v11 }
  0xab   :  { %1947 = vmatmul.mubr.bf16.gmra.mxu1 %v2922_v12  ;;  %1998 = vmatpush2.bf16.msra.mxu0 %v2923_v13 }
  0xac   :  { %2611 = vmatpush2.bf16.msra.mxu1 %v2923_v13  ;;  %1999 = vmatprep.subr.bf16.mxu0 %v2928_v14 }
  0xad   :  { %2596 = vmatprep.subr.bf16.mxu1 %v2928_v14  ;;  %1843 = vmatprep.mubr.bf16.mxu0 %v2929_v15 }
  0xae   :  { %1956 = vmatprep.mubr.bf16.mxu1 %v2931_v16 }
  0xaf   :  { %2000 = vmatpush2.bf16.msra.mxu0 %v2926_v17 }
  0xb0   :  { %2612 = vmatpush2.bf16.msra.mxu1 %v2926_v17  ;;  %2001 = vmatprep.subr.bf16.mxu0 %v2937_v18 }
  0xb1   :  { %2597 = vmatprep.subr.bf16.mxu1 %v2937_v18 }
  0xb2   :  { %1844 = vmatmul.mubr.bf16.gmra.mxu0 %v2933_v19 }
  0xb3   :  { %1957 = vmatmul.mubr.bf16.gmra.mxu1 %v2934_v20  ;;  %2002 = vmatpush2.bf16.msra.mxu0 %v2935_v21 }
  0xb4   :  { %2613 = vmatpush2.bf16.msra.mxu1 %v2935_v21  ;;  %2003 = vmatprep.subr.bf16.mxu0 %v2940_v22 }
  0xb5   :  { %2598 = vmatprep.subr.bf16.mxu1 %v2940_v22  ;;  %1853 = vmatprep.mubr.bf16.mxu0 %v2941_v23 }
  0xb6   :  { %1966 = vmatprep.mubr.bf16.mxu1 %v2943_v24 }
  0xb7   :  { %2004 = vmatpush2.bf16.msra.mxu0 %v2938_v25 }
  0xb8   :  { %2614 = vmatpush2.bf16.msra.mxu1 %v2938_v25  ;;  %2005 = vmatprep.subr.bf16.mxu0 %v2949_v26 }
  0xb9   :  { %2599 = vmatprep.subr.bf16.mxu1 %v2949_v26 }
  0xba   :  { %1854 = vmatmul.mubr.bf16.gmra.mxu0 %v2945_v27 }
  0xbb   :  { %1967 = vmatmul.mubr.bf16.gmra.mxu1 %v2946_v28  ;;  %2006 = vmatpush2.bf16.msra.mxu0 %v2947_v29 }
  0xbc   :  { %2615 = vmatpush2.bf16.msra.mxu1 %v2947_v29  ;;  %2007 = vmatprep.subr.bf16.mxu0 %v2952_v30 }
  0xbd   :  { %2600 = vmatprep.subr.bf16.mxu1 %v2952_v30  ;;  %2009 = vmatprep.mubr.bf16.mxu0 %v2955_v31 }
  0xbe   :  { %2049 = vmatprep.mubr.bf16.mxu1 %v2958_v32 }
  0xbf   :  { %2008 = vmatpush2.bf16.msra.mxu0 %v2950_v33 }
  0xc0   :  { %2616 = vmatpush2.bf16.msra.mxu1 %v2950_v33 }
  0xc2   :  { %2010 = vmatmul.mubr.bf16.vlgmr.msra.gmra.mxu0 %v2953_v34 }
  0xc3   :  { %2050 = vmatmul.mubr.bf16.vlgmr.msra.gmra.mxu1 %v2956_v35  ;;  %2019 = vmatprep.mubr.bf16.mxu0 %v2959_v36 }
  0xc4   :  { %2059 = vmatprep.mubr.bf16.mxu1 %v2961_v37 }
  0xca   :  { %2020 = vmatmul.mubr.bf16.gmra.mxu0 %v2963_v38 }
  0xcb   :  { %2060 = vmatmul.mubr.bf16.gmra.mxu1 %v2964_v39  ;;  %2029 = vmatprep.mubr.bf16.mxu0 %v2965_v40 }
  0xcc   :  { %2069 = vmatprep.mubr.bf16.mxu1 %v2967_v41 }
  0xd2   :  { %2030 = vmatmul.mubr.bf16.gmra.mxu0 %v2969_v42 }
  0xd3   :  { %2070 = vmatmul.mubr.bf16.gmra.mxu1 %v2970_v43  ;;  %2039 = vmatprep.mubr.bf16.mxu0 %v2971_v44 }
  0xd4   :  { %2079 = vmatprep.mubr.bf16.mxu1 %v2973_v45 }
  0xda   :  { %2040 = vmatmul.mubr.bf16.gmra.mxu0 %v2975_v46 }
  0xdb   :  { %2080 = vmatmul.mubr.bf16.gmra.mxu1 %v2976_v47 }
 0x102   :  { %v1559_v48 = vpop.f32.mrf.mxu0 }
 0x103   :  { %v1672_v49 = vpop.f32.mrf.mxu1 }
 0x104   :  { %v3722_v50 = vadd.f32 %v1672_v49, %v1559_v48  ;;  %v1561_v51 = vpop.f32.mrf.mxu0 }
 0x105   :  { %v1674_v52 = vpop.f32.mrf.mxu1 }
 0x106   :  { %v3724_v53 = vadd.f32 %v1674_v52, %v1561_v51  ;;  %v1563_v54 = vpop.f32.mrf.mxu0 }
 0x107   :  { %v1676_v55 = vpop.f32.mrf.mxu1 }
 0x108   :  { %v3726_v56 = vadd.f32 %v1676_v55, %v1563_v54  ;;  %v1565_v57 = vpop.f32.mrf.mxu0 }
 0x109   :  { %v1678_v58 = vpop.f32.mrf.mxu1 }
 0x10a   :  { %v3728_v59 = vadd.f32 %v1678_v58, %v1565_v57  ;;  %v1569_v60 = vpop.f32.mrf.mxu0 }
 0x10b   :  { %v1682_v61 = vpop.f32.mrf.mxu1 }
 0x10c   :  { %v3730_v62 = vadd.f32 %v1682_v61, %v1569_v60  ;;  %v1571_v63 = vpop.f32.mrf.mxu0 }
 0x10d   :  { %v1684_v0 = vpop.f32.mrf.mxu1 }
 0x10e   :  { %v3732_v1 = vadd.f32 %v1684_v0, %v1571_v63  ;;  %v1573_v2 = vpop.f32.mrf.mxu0 }
 0x10f   :  { %v1686_v3 = vpop.f32.mrf.mxu1 }
 0x110   :  { %v3734_v4 = vadd.f32 %v1686_v3, %v1573_v2  ;;  %v1575_v5 = vpop.f32.mrf.mxu0 }
 0x111   :  { %v1688_v6 = vpop.f32.mrf.mxu1 }
 0x112   :  { %v3736_v7 = vadd.f32 %v1688_v6, %v1575_v5  ;;  %v1579_v8 = vpop.f32.mrf.mxu0 }
 0x113   :  { %v1692_v9 = vpop.f32.mrf.mxu1 }
 0x114   :  { %v3738_v10 = vadd.f32 %v1692_v9, %v1579_v8  ;;  %v1581_v11 = vpop.f32.mrf.mxu0 }
 0x115   :  { %v1694_v12 = vpop.f32.mrf.mxu1 }
 0x116   :  { %v3740_v13 = vadd.f32 %v1694_v12, %v1581_v11  ;;  %v1583_v14 = vpop.f32.mrf.mxu0 }
 0x117   :  { %v1696_v15 = vpop.f32.mrf.mxu1 }
 0x118   :  { %v3742_v16 = vadd.f32 %v1696_v15, %v1583_v14  ;;  %v1585_v17 = vpop.f32.mrf.mxu0 }
 0x119   :  { %v1698_v18 = vpop.f32.mrf.mxu1 }
 0x11a   :  { %v3744_v19 = vadd.f32 %v1698_v18, %v1585_v17  ;;  %v1589_v20 = vpop.f32.mrf.mxu0 }
 0x11b   :  { %v1702_v21 = vpop.f32.mrf.mxu1 }
 0x11c   :  { %v3746_v22 = vadd.f32 %v1702_v21, %v1589_v20  ;;  %v1591_v23 = vpop.f32.mrf.mxu0 }
 0x11d   :  { %v1704_v24 = vpop.f32.mrf.mxu1 }
 0x11e   :  { %v3748_v25 = vadd.f32 %v1704_v24, %v1591_v23  ;;  %v1593_v26 = vpop.f32.mrf.mxu0 }
 0x11f   :  { %v1706_v27 = vpop.f32.mrf.mxu1 }
 0x120   :  { %v3750_v28 = vadd.f32 %v1706_v27, %v1593_v26  ;;  %v1595_v29 = vpop.f32.mrf.mxu0 }
 0x121   :  { %v1708_v30 = vpop.f32.mrf.mxu1 }
 0x122   :  { %v3752_v31 = vadd.f32 %v1708_v30, %v1595_v29  ;;  %v1599_v32 = vpop.f32.mrf.mxu0 }
 0x123   :  { %v1712_v33 = vpop.f32.mrf.mxu1 }
 0x124   :  { %v3754_v34 = vadd.f32 %v1712_v33, %v1599_v32  ;;  %v1601_v35 = vpop.f32.mrf.mxu0 }
 0x125   :  { %v1714_v36 = vpop.f32.mrf.mxu1 }
 0x126   :  { %v3756_v37 = vadd.f32 %v1714_v36, %v1601_v35  ;;  %v1603_v38 = vpop.f32.mrf.mxu0 }
 0x127   :  { %v1716_v39 = vpop.f32.mrf.mxu1 }
 0x128   :  { %v3758_v40 = vadd.f32 %v1716_v39, %v1603_v38  ;;  %v1605_v41 = vpop.f32.mrf.mxu0 }
 0x129   :  { %v1718_v42 = vpop.f32.mrf.mxu1 }
 0x12a   :  { %4192 = vst [vmem:[#allocation3_spill] sm:$0xff] %v3758_v40  ;;  %v3760_v43 = vadd.f32 %v1718_v42, %v1605_v41  ;;  %v1609_v44 = vpop.f32.mrf.mxu0 }
 0x12b   :  { %v1722_v45 = vpop.f32.mrf.mxu1 }
 0x12c   :  { %4193 = vst [vmem:[#allocation4_spill] sm:$0xff] %v3760_v43  ;;  %v3762_v46 = vadd.f32 %v1722_v45, %v1609_v44  ;;  %v1611_v47 = vpop.f32.mrf.mxu0 }
 0x12d   :  { %v1724_v48 = vpop.f32.mrf.mxu1 }
 0x12e   :  { %4194 = vst [vmem:[#allocation5_spill] sm:$0xff] %v3762_v46  ;;  %v3764_v49 = vadd.f32 %v1724_v48, %v1611_v47  ;;  %v1613_v51 = vpop.f32.mrf.mxu0 }
 0x12f   :  { %v1726_v52 = vpop.f32.mrf.mxu1 }
 0x130   :  { %4195 = vst [vmem:[#allocation6_spill] sm:$0xff] %v3764_v49  ;;  %v3766_v54 = vadd.f32 %v1726_v52, %v1613_v51  ;;  %v1615_v55 = vpop.f32.mrf.mxu0 }
 0x131   :  { %v1728_v57 = vpop.f32.mrf.mxu1 }
 0x132   :  { %4196 = vst [vmem:[#allocation7_spill] sm:$0xff] %v3766_v54  ;;  %v3768_v58 = vadd.f32 %v1728_v57, %v1615_v55  ;;  %v1619_v60 = vpop.f32.mrf.mxu0 }
 0x133   :  { %v1732_v61 = vpop.f32.mrf.mxu1 }
 0x134   :  { %4197 = vst [vmem:[#allocation8_spill] sm:$0xff] %v3768_v58  ;;  %v3770_v63 = vadd.f32 %v1732_v61, %v1619_v60  ;;  %v1621_v0 = vpop.f32.mrf.mxu0 }
 0x135   :  { %v1734_v2 = vpop.f32.mrf.mxu1 }
 0x136   :  { %4198 = vst [vmem:[#allocation9_spill] sm:$0xff] %v3770_v63  ;;  %v3772_v3 = vadd.f32 %v1734_v2, %v1621_v0  ;;  %v1623_v5 = vpop.f32.mrf.mxu0 }
 0x137   :  { %v1736_v6 = vpop.f32.mrf.mxu1 }
 0x138   :  { %4199 = vst [vmem:[#allocation10_spill] sm:$0xff] %v3772_v3  ;;  %v3774_v8 = vadd.f32 %v1736_v6, %v1623_v5  ;;  %v1625_v9 = vpop.f32.mrf.mxu0 }
 0x139   :  { %v1738_v11 = vpop.f32.mrf.mxu1 }
 0x13a   :  { %4200 = vst [vmem:[#allocation11_spill] sm:$0xff] %v3774_v8  ;;  %v3776_v12 = vadd.f32 %v1738_v11, %v1625_v9  ;;  %v1629_v14 = vpop.f32.mrf.mxu0 }
 0x13b   :  { %v1742_v15 = vpop.f32.mrf.mxu1 }
 0x13c   :  { %4201 = vst [vmem:[#allocation12_spill] sm:$0xff] %v3776_v12  ;;  %v3778_v17 = vadd.f32 %v1742_v15, %v1629_v14  ;;  %v1631_v18 = vpop.f32.mrf.mxu0 }
 0x13d   :  { %v1744_v20 = vpop.f32.mrf.mxu1 }
 0x13e   :  { %4202 = vst [vmem:[#allocation13_spill] sm:$0xff] %v3778_v17  ;;  %v3780_v21 = vadd.f32 %v1744_v20, %v1631_v18  ;;  %v1633_v23 = vpop.f32.mrf.mxu0 }
 0x13f   :  { %v1746_v24 = vpop.f32.mrf.mxu1 }
 0x140   :  { %4203 = vst [vmem:[#allocation14_spill] sm:$0xff] %v3780_v21  ;;  %v3782_v26 = vadd.f32 %v1746_v24, %v1633_v23  ;;  %v1635_v27 = vpop.f32.mrf.mxu0 }
 0x141   :  { %v1748_v29 = vpop.f32.mrf.mxu1 }
 0x142   :  { %4204 = vst [vmem:[#allocation15_spill] sm:$0xff] %v3782_v26  ;;  %v3784_v30 = vadd.f32 %v1748_v29, %v1635_v27  ;;  %v1785_v32 = vpop.f32.mrf.mxu0 }
 0x143   :  { %v3786_v33 = vpop.f32.mrf.mxu1 }
 0x144   :  { %4205 = vst [vmem:[#allocation16_spill] sm:$0xff] %v3784_v30  ;;  %v1787_v35 = vpop.f32.mrf.mxu0 }
 0x145   :  { %v3788_v36 = vpop.f32.mrf.mxu1 }
 0x146   :  { %v1789_v38 = vpop.f32.mrf.mxu0 }
 0x147   :  { %v3790_v39 = vpop.f32.mrf.mxu1 }
 0x148   :  { %v1791_v41 = vpop.f32.mrf.mxu0 }
 0x149   :  { %v3792_v42 = vpop.f32.mrf.mxu1 }
 0x14a   :  { %v1795_v44 = vpop.f32.mrf.mxu0 }
 0x14b   :  { %v3794_v45 = vpop.f32.mrf.mxu1  ;;  %v1796_v46 = vadd.f32 %v1795_v44, %v3730_v62 }
 0x14c   :  { %v1797_v47 = vpop.f32.mrf.mxu0 }
 0x14d   :  { %v3796_v48 = vpop.f32.mrf.mxu1 }
 0x14e   :  { %v1799_v51 = vpop.f32.mrf.mxu0 }
 0x14f   :  { %v3798_v52 = vpop.f32.mrf.mxu1 }
 0x150   :  { %v1801_v55 = vpop.f32.mrf.mxu0 }
 0x151   :  { %v3800_v57 = vpop.f32.mrf.mxu1 }
 0x152   :  { %v1805_v60 = vpop.f32.mrf.mxu0 }
 0x153   :  { %v3802_v61 = vpop.f32.mrf.mxu1 }
 0x154   :  { %v1807_v0 = vpop.f32.mrf.mxu0 }
 0x155   :  { %v3804_v2 = vpop.f32.mrf.mxu1 }
 0x156   :  { %v3806_v5 = vpop.f32.mrf.mxu0 }
 0x157   :  { %v3808_v6 = vpop.f32.mrf.mxu1 }
 0x158   :  { %4206 = vst [vmem:[#allocation17_spill] sm:$0xff] %v3808_v6  ;;  %v3810_v9 = vpop.f32.mrf.mxu0 }
 0x159   :  { %v3812_v11 = vpop.f32.mrf.mxu1 }
 0x15a   :  { %4207 = vst [vmem:[#allocation18_spill] sm:$0xff] %v3812_v11  ;;  %v1815_v14 = vpop.f32.mrf.mxu0 }
 0x15b   :  { %v3814_v15 = vpop.f32.mrf.mxu1 }
 0x15c   :  { %4208 = vst [vmem:[#allocation19_spill] sm:$0xff] %v3814_v15  ;;  %v1817_v18 = vpop.f32.mrf.mxu0 }
 0x15d   :  { %v3816_v20 = vpop.f32.mrf.mxu1 }
 0x15e   :  { %4209 = vst [vmem:[#allocation20_spill] sm:$0xff] %v3816_v20  ;;  %v3818_v23 = vpop.f32.mrf.mxu0 }
 0x15f   :  { %v3820_v24 = vpop.f32.mrf.mxu1 }
 0x160   :  { %4210 = vst [vmem:[#allocation21_spill] sm:$0xff] %v3820_v24  ;;  %v3822_v27 = vpop.f32.mrf.mxu0 }
 0x161   :  { %v3824_v29 = vpop.f32.mrf.mxu1 }
 0x162   :  { %4211 = vst [vmem:[#allocation22_spill] sm:$0xff] %v3824_v29  ;;  %v3826_v30 = vpop.f32.mrf.mxu0  ;;  %v2191_v29 = vlaneseq }
 0x163   :  { %v3828_v26 = vpop.f32.mrf.mxu1 }
 0x164   :  { %4212 = vst [vmem:[#allocation23_spill] sm:$0xff] %v3828_v26  ;;  %v3830_v21 = vpop.f32.mrf.mxu0 }
 0x165   :  { %v3832_v17 = vpop.f32.mrf.mxu1 }
 0x166   :  { %4213 = vst [vmem:[#allocation24_spill] sm:$0xff] %v3832_v17  ;;  %v3834_v12 = vpop.f32.mrf.mxu0  ;;  %v2192_v17 = vshrl.u32 %v2191_v29, 7  ;;  %v1786_v29 = vadd.f32 %v1785_v32, %v3722_v50  ;;  %v1800_v50 = vadd.f32 %v1799_v51, %v3734_v4 }
 0x167   :  { %4214 = vst [vmem:[#allocation25_spill] sm:$0xff] %v3834_v12  ;;  %v3836_v8 = vpop.f32.mrf.mxu1 }
 0x168   :  { %4215 = vst [vmem:[#allocation26_spill] sm:$0xff] %v3836_v8  ;;  %v3838_v3 = vpop.f32.mrf.mxu0 }
 0x169   :  { %4216 = vst [vmem:[#allocation27_spill] sm:$0xff] %v3838_v3  ;;  %v3840_v63 = vpop.f32.mrf.mxu1  ;;  %v1798_v3 = vadd.f32 %v1797_v47, %v3732_v1  ;;  %v1806_v1 = vadd.f32 %v1805_v60, %v3738_v10  ;;  %v1810_v10 = vadd.f32 %v3806_v5, %v3742_v16  ;;  %v1822_v16 = vadd.f32 %v3822_v27, %v3752_v31 }
 0x16a   :  { %4217 = vst [vmem:[#allocation28_spill] sm:$0xff] %v3840_v63  ;;  %v1835_v58 = vpop.f32.mrf.mxu0  ;;  %v2193_v63 = vsub.s32 0, %v2192_v17 }
 0x16b   :  { %v3842_v54 = vpop.f32.mrf.mxu1 }
 0x16c   :  { %4218 = vst [vmem:[#allocation29_spill] sm:$0xff] %v3842_v54  ;;  %v1837_v24 = vpop.f32.mrf.mxu0  ;;  %v2189_v54 = vld [vmem:[%s4189_s2] sm:$0x3] }
 0x16d   :  { %v3844_v20 = vpop.f32.mrf.mxu1  ;;  %v3874_v40 = vrot.slane %v2189_v54, %v2193_v63 }
 0x16e   :  { %4219 = vst [vmem:[#allocation30_spill] sm:$0xff] %v3844_v20  ;;  %v3846_v26 = vpop.f32.mrf.mxu0  ;;  %v2233_v20 = vld [vmem:[%s4190_s3] sm:$0x3]  ;;  %v4227_v47 = vld [vmem:[#allocation25_spill] sm:$0xff] }
 0x16f   :  { %4220 = vst [vmem:[#allocation31_spill] sm:$0xff] %v3846_v26  ;;  %v3848_v15 = vpop.f32.mrf.mxu1  ;;  %v2197_v26 = vsub.s32 1, %v2192_v17  ;;  %v3876_v17 = vrot.slane %v2233_v20, %v2193_v63 }
 0x170   :  { %4221 = vst [vmem:[#allocation32_spill] sm:$0xff] %v3848_v15  ;;  %v3850_v11 = vpop.f32.mrf.mxu0  ;;  %v1788_v15 = vadd.f32 %v1787_v35, %v3724_v53  ;;  %v1802_v53 = vadd.f32 %v1801_v55, %v3736_v7  ;;  %v1808_v35 = vadd.f32 %v1807_v0, %v3740_v13  ;;  %v1812_v13 = vadd.f32 %v3810_v9, %v3744_v19  ;;  %v4229_v51 = vld [vmem:[#allocation27_spill] sm:$0xff] }
 0x171   :  { %4222 = vst [vmem:[#allocation33_spill] sm:$0xff] %v3850_v11  ;;  %v3852_v6 = vpop.f32.mrf.mxu1  ;;  %v3880_v32 = vrot.slane %v2189_v54, %v2197_v26  ;;  %v3899_v54 = vadd.f32 %v3794_v45, %v1796_v46  ;;  %v3921_v19 = vadd.f32 %v3802_v61, %v1806_v1  ;;  %v4226_v45 = vld [vmem:[#allocation3_spill] sm:$0xff]  ;;  %v4232_v61 = vld [vmem:[#allocation17_spill] sm:$0xff] }
 0x172   :  { %4223 = vst [vmem:[#allocation34_spill] sm:$0xff] %v3852_v6  ;;  %v3854_v8 = vpop.f32.mrf.mxu0  ;;  %v3886_v62 = vadd.f32 %v3788_v36, %v1788_v15  ;;  %v3914_v46 = vadd.f32 %v3800_v57, %v1802_v53  ;;  %v4231_v57 = vld [vmem:[#allocation6_spill] sm:$0xff]  ;;  %v3937_v0 = vadd.f32 %v4232_v61, %v1810_v10  ;;  %v4236_v15 = vld [vmem:[#allocation21_spill] sm:$0xff]  ;;  %v4242_v1 = vld [vmem:[#allocation23_spill] sm:$0xff] }
 0x173   :  { %4224 = vst [vmem:[#allocation35_spill] sm:$0xff] %v3854_v8  ;;  %v3856_v49 = vpop.f32.mrf.mxu1  ;;  %v1790_v8 = vadd.f32 %v1789_v38, %v3726_v56  ;;  %v3882_v56 = vrot.slane %v2233_v20, %v2197_v26  ;;  %v3902_v26 = vadd.f32 %v3796_v48, %v1798_v3  ;;  %v1820_v3 = vadd.f32 %v3818_v23, %v3750_v28  ;;  %v4228_v48 = vld [vmem:[#allocation4_spill] sm:$0xff]  ;;  %v4238_v23 = vld [vmem:[#allocation7_spill] sm:$0xff] }
 0x174   :  { %4225 = vst [vmem:[#allocation36_spill] sm:$0xff] %v3856_v49  ;;  %v1847_v11 = vpop.f32.mrf.mxu0  ;;  %v1792_v49 = vadd.f32 %v1791_v41, %v3728_v59  ;;  %v1899_v59 = vadd.f32 %v3786_v33, %v1786_v29  ;;  %v1816_v33 = vadd.f32 %v1815_v14, %v3746_v22  ;;  %v3924_v22 = vadd.f32 %v3804_v2, %v1808_v35  ;;  %v4233_v2 = vld [vmem:[#allocation18_spill] sm:$0xff]  ;;  %v4240_v29 = vld [vmem:[#allocation8_spill] sm:$0xff] }
 0x175   :  { %v3866_v6 = vpop.f32.mrf.mxu1  ;;  %v3893_v4 = vadd.f32 %v3790_v39, %v1790_v8  ;;  %v1818_v8 = vadd.f32 %v1817_v18, %v3748_v25  ;;  %v1826_v25 = vadd.f32 %v3826_v30, %v3754_v34  ;;  %v1828_v41 = vadd.f32 %v3830_v21, %v3756_v37  ;;  %v4234_v30 = vld [vmem:[#allocation19_spill] sm:$0xff]  ;;  %v4235_v21 = vld [vmem:[#allocation20_spill] sm:$0xff] }
 0x176   :  { %v1849_v43 = vpop.f32.mrf.mxu0  ;;  %v3896_v7 = vadd.f32 %v3792_v42, %v1792_v49  ;;  %v3911_v49 = vadd.f32 %v3798_v52, %v1800_v50  ;;  %v1830_v28 = vadd.f32 %v4227_v47, %v4226_v45  ;;  %v1832_v31 = vadd.f32 %v4229_v51, %v4228_v48  ;;  %v4230_v52 = vld [vmem:[#allocation5_spill] sm:$0xff]  ;;  %v4243_v10 = vld [vmem:[#allocation24_spill] sm:$0xff]  ;;  %v4246_v47 = vld [vmem:[#allocation10_spill] sm:$0xff] }
 0x177   :  { %v3872_v12 = vpop.f32.mrf.mxu1  ;;  %v1836_v55 = vadd.f32 %v1835_v58, %v4230_v52  ;;  %v1838_v60 = vadd.f32 %v1837_v24, %v4231_v57  ;;  %v3940_v34 = vadd.f32 %v4233_v2, %v1812_v13  ;;  %v3943_v37 = vadd.f32 %v4234_v30, %v1816_v33  ;;  %v4237_v58 = vld [vmem:[#allocation22_spill] sm:$0xff]  ;;  %v4239_v24 = vld [vmem:[#allocation31_spill] sm:$0xff]  ;;  %v4244_v33 = vld [vmem:[#allocation9_spill] sm:$0xff] }
 0x178   :  { %v1851_v38 = vpop.f32.mrf.mxu0  ;;  %v3946_v5 = vadd.f32 %v4235_v21, %v1818_v8  ;;  %v3949_v18 = vadd.f32 %v4236_v15, %v1820_v3  ;;  %v3952_v20 = vadd.f32 %v4237_v58, %v1822_v16  ;;  %v1840_v27 = vadd.f32 %v4239_v24, %v4238_v23  ;;  %v4241_v50 = vld [vmem:[#allocation33_spill] sm:$0xff]  ;;  %v4247_v52 = vld [vmem:[#allocation26_spill] sm:$0xff]  ;;  %v4248_v57 = vld [vmem:[#allocation28_spill] sm:$0xff] }
 0x179   :  { %v3890_v63 = vpop.f32.mrf.mxu1  ;;  %v1842_v53 = vadd.f32 %v4241_v50, %v4240_v29  ;;  %v1939_v35 = vadd.f32 %v4242_v1, %v1826_v25  ;;  %v1941_v13 = vadd.f32 %v4243_v10, %v1828_v41  ;;  %v1848_v48 = vadd.f32 %v1847_v11, %v4246_v47  ;;  %v4249_v2 = vld [vmem:[#allocation29_spill] sm:$0xff]  ;;  %v4250_v21 = vld [vmem:[#allocation30_spill] sm:$0xff]  ;;  %v4251_v58 = vld [vmem:[#allocation11_spill] sm:$0xff] }
 0x17a   :  { %v1855_v36 = vpop.f32.mrf.mxu0  ;;  %v4245_v8 = vld [vmem:[#allocation35_spill] sm:$0xff]  ;;  %v1943_v16 = vadd.f32 %v4247_v52, %v1830_v28  ;;  %v1945_v61 = vadd.f32 %v4248_v57, %v1832_v31  ;;  %v1949_v30 = vadd.f32 %v4249_v2, %v1836_v55  ;;  %v3967_v15 = vadd.f32 %v4250_v21, %v1838_v60  ;;  %v4252_v23 = vld [vmem:[#allocation12_spill] sm:$0xff]  ;;  %v4253_v24 = vld [vmem:[#allocation13_spill] sm:$0xff] }
 0x17b   :  { %v1968_v39 = vpop.f32.mrf.mxu1  ;;  %v1846_v45 = vadd.f32 %v4245_v8, %v4244_v33  ;;  %v1850_v25 = vadd.f32 %v1849_v43, %v4251_v58  ;;  %v1852_v41 = vadd.f32 %v1851_v38, %v4252_v23  ;;  %v1856_v29 = vadd.f32 %v1855_v36, %v4253_v24  ;;  %v4254_v50 = vld [vmem:[#allocation14_spill] sm:$0xff]  ;;  %v4255_v33 = vld [vmem:[#allocation32_spill] sm:$0xff]  ;;  %v4258_v38 = vld [vmem:[#allocation15_spill] sm:$0xff] }
 0x17c   :  { %v1857_v42 = vpop.f32.mrf.mxu0  ;;  %v3974_v8 = vadd.f32 %v4255_v33, %v1840_v27  ;;  %v4256_v28 = vld [vmem:[#allocation34_spill] sm:$0xff]  ;;  %v4257_v60 = vld [vmem:[#allocation36_spill] sm:$0xff]  ;;  %v3983_v43 = vadd.f32 %v3866_v6, %v1848_v48 }
 0x17d   :  { %v1970_v44 = vpop.f32.mrf.mxu1  ;;  %v1858_v1 = vadd.f32 %v1857_v42, %v4254_v50  ;;  %v3977_v31 = vadd.f32 %v4256_v28, %v1842_v53  ;;  %v3980_v52 = vadd.f32 %v4257_v60, %v1846_v45  ;;  %v4259_v57 = vld [vmem:[#allocation16_spill] sm:$0xff]  ;;  %v3994_v45 = vadd.f32 %v3890_v63, %v1852_v41 }
 0x17e   :  { %v1859_v9 = vpop.f32.mrf.mxu0  ;;  %v3996_v6 = vadd.f32 %v1968_v39, %v1856_v29 }
 0x17f   :  { %v1972_v14 = vpop.f32.mrf.mxu1  ;;  %v1860_v36 = vadd.f32 %v1859_v9, %v4258_v38  ;;  %v3998_v9 = vadd.f32 %v1970_v44, %v1858_v1 }
 0x180   :  { %v1861_v3 = vpop.f32.mrf.mxu0 }
 0x181   :  { %v1974_v51 = vpop.f32.mrf.mxu1  ;;  %v1862_v42 = vadd.f32 %v1861_v3, %v4259_v57 }
 0x182   :  { %v2011_v11 = vpop.f32.mrf.mxu0 }
 0x183   :  { %v2051_v10 = vpop.f32.mrf.mxu1  ;;  %v2012_v55 = vadd.f32 %v2011_v11, %v1899_v59 }
 0x184   :  { %v2052_v47 = vadd.f32 %v2051_v10, %v1939_v35  ;;  %v2013_v2 = vpop.f32.mrf.mxu0  ;;  %v3991_v35 = vadd.f32 %v3872_v12, %v1850_v25  ;;  %v4006_v12 = vadd.f32 %v1974_v51, %v1862_v42 }
 0x185   :  { %v2053_v21 = vpop.f32.mrf.mxu1  ;;  %v2201_v27 = vmul.f32 %v3874_v40, %v2012_v55  ;;  %v2014_v53 = vadd.f32 %v2013_v2, %v3886_v62 }
 0x186   :  { %v2217_v58 = vmul.f32 %v3874_v40, %v2052_v47  ;;  %v2054_v59 = vadd.f32 %v2053_v21, %v1941_v13  ;;  %v2015_v48 = vpop.f32.mrf.mxu0  ;;  %v4004_v13 = vadd.f32 %v1972_v14, %v1860_v36 }
 0x187   :  { %v2055_v3 = vpop.f32.mrf.mxu1  ;;  %v2245_v23 = vadd.f32 %v3876_v17, %v2201_v27  ;;  %v2202_v50 = vmul.f32 %v3880_v32, %v2014_v53  ;;  %v2016_v63 = vadd.f32 %v2015_v48, %v3893_v4 }
 0x188   :  { %v2261_v24 = vadd.f32 %v3876_v17, %v2217_v58  ;;  %v2218_v62 = vmul.f32 %v3880_v32, %v2054_v59  ;;  %v2056_v39 = vadd.f32 %v2055_v3, %v1943_v16  ;;  %v2017_v25 = vpop.f32.mrf.mxu0 }
 0x189   :  { %v2057_v44 = vpop.f32.mrf.mxu1  ;;  %v2277_v41 = vmax.f32 %v2245_v23, 0.0  ;;  %v2246_v1 = vadd.f32 %v3882_v56, %v2202_v50  ;;  %v2203_v10 = vmul.f32 %v3874_v40, %v2016_v63  ;;  %v2018_v14 = vadd.f32 %v2017_v25, %v3896_v7 }
 0x18a   :  { %v2293_v29 = vmax.f32 %v2261_v24, 0.0  ;;  %v2262_v11 = vadd.f32 %v3882_v56, %v2218_v62  ;;  %v2219_v33 = vmul.f32 %v3874_v40, %v2056_v39  ;;  %v2058_v28 = vadd.f32 %v2057_v44, %v1945_v61  ;;  %v2021_v51 = vpop.f32.mrf.mxu0 }
 0x18b   :  { %v2061_v55 = vpop.f32.mrf.mxu1  ;;  %2309 = vst [vmem:[%s4191_s4] sm:$0xff] %v2277_v41  ;;  %v2278_v4 = vmax.f32 %v2246_v1, 0.0  ;;  %v2022_v47 = vadd.f32 %v2021_v51, %v3899_v54  ;;  %v2247_v38 = vadd.f32 %v3876_v17, %v2203_v10  ;;  %v2204_v61 = vmul.f32 %v3880_v32, %v2018_v14 }
 0x18c   :  { %2325 = vst [vmem:[%s4191_s4 + $0x80] sm:$0xff] %v2293_v29  ;;  %v2294_v16 = vmax.f32 %v2262_v11, 0.0  ;;  %v2062_v60 = vadd.f32 %v2061_v55, %v1949_v30  ;;  %v2263_v7 = vadd.f32 %v3876_v17, %v2219_v33  ;;  %v2220_v36 = vmul.f32 %v3880_v32, %v2058_v28  ;;  %v2023_v57 = vpop.f32.mrf.mxu0 }
 0x18d   :  { %v2063_v42 = vpop.f32.mrf.mxu1  ;;  %2310 = vst [vmem:[%s4191_s4 + $0x8] sm:$0xff] %v2278_v4  ;;  %v2205_v54 = vmul.f32 %v3874_v40, %v2022_v47  ;;  %v2024_v2 = vadd.f32 %v2023_v57, %v3902_v26  ;;  %v2279_v27 = vmax.f32 %v2247_v38, 0.0  ;;  %v2248_v53 = vadd.f32 %v3882_v56, %v2204_v61 }
 0x18e   :  { %2326 = vst [vmem:[%s4191_s4 + $0x88] sm:$0xff] %v2294_v16  ;;  %v2221_v30 = vmul.f32 %v3874_v40, %v2062_v60  ;;  %v2064_v21 = vadd.f32 %v2063_v42, %v3967_v15  ;;  %v2295_v58 = vmax.f32 %v2263_v7, 0.0  ;;  %v2264_v59 = vadd.f32 %v3882_v56, %v2220_v36  ;;  %v2025_v48 = vpop.f32.mrf.mxu0 }
 0x18f   :  { %v2065_v3 = vpop.f32.mrf.mxu1  ;;  %v2249_v23 = vadd.f32 %v3876_v17, %v2205_v54  ;;  %v2206_v50 = vmul.f32 %v3880_v32, %v2024_v2  ;;  %2311 = vst [vmem:[%s4191_s4 + $0x10] sm:$0xff] %v2279_v27  ;;  %v2280_v26 = vmax.f32 %v2248_v53, 0.0  ;;  %v2026_v63 = vadd.f32 %v2025_v48, %v3911_v49 }
 0x190   :  { %v2265_v24 = vadd.f32 %v3876_v17, %v2221_v30  ;;  %v2222_v62 = vmul.f32 %v3880_v32, %v2064_v21  ;;  %2327 = vst [vmem:[%s4191_s4 + $0x90] sm:$0xff] %v2295_v58  ;;  %v2296_v15 = vmax.f32 %v2264_v59, 0.0  ;;  %v2066_v39 = vadd.f32 %v2065_v3, %v3974_v8  ;;  %v2027_v25 = vpop.f32.mrf.mxu0 }
 0x191   :  { %v2067_v44 = vpop.f32.mrf.mxu1  ;;  %v2281_v41 = vmax.f32 %v2249_v23, 0.0  ;;  %v2250_v1 = vadd.f32 %v3882_v56, %v2206_v50  ;;  %2312 = vst [vmem:[%s4191_s4 + $0x18] sm:$0xff] %v2280_v26  ;;  %v2207_v49 = vmul.f32 %v3874_v40, %v2026_v63  ;;  %v2028_v10 = vadd.f32 %v2027_v25, %v3914_v46 }
 0x192   :  { %v2297_v29 = vmax.f32 %v2265_v24, 0.0  ;;  %v2266_v11 = vadd.f32 %v3882_v56, %v2222_v62  ;;  %2328 = vst [vmem:[%s4191_s4 + $0x98] sm:$0xff] %v2296_v15  ;;  %v2223_v8 = vmul.f32 %v3874_v40, %v2066_v39  ;;  %v2068_v33 = vadd.f32 %v2067_v44, %v3977_v31  ;;  %v2031_v14 = vpop.f32.mrf.mxu0 }
 0x193   :  { %v2071_v28 = vpop.f32.mrf.mxu1  ;;  %2313 = vst [vmem:[%s4191_s4 + $0x20] sm:$0xff] %v2281_v41  ;;  %v2282_v51 = vmax.f32 %v2250_v1, 0.0  ;;  %v2032_v4 = vadd.f32 %v2031_v14, %v3921_v19  ;;  %v2251_v46 = vadd.f32 %v3876_v17, %v2207_v49  ;;  %v2208_v47 = vmul.f32 %v3880_v32, %v2028_v10 }
 0x194   :  { %2329 = vst [vmem:[%s4191_s4 + $0xa0] sm:$0xff] %v2297_v29  ;;  %v2298_v55 = vmax.f32 %v2266_v11, 0.0  ;;  %v2072_v16 = vadd.f32 %v2071_v28, %v3980_v52  ;;  %v2267_v31 = vadd.f32 %v3876_v17, %v2223_v8  ;;  %v2224_v60 = vmul.f32 %v3880_v32, %v2068_v33  ;;  %v2033_v38 = vpop.f32.mrf.mxu0 }
 0x195   :  { %v2073_v7 = vpop.f32.mrf.mxu1  ;;  %2314 = vst [vmem:[%s4191_s4 + $0x28] sm:$0xff] %v2282_v51  ;;  %v2209_v19 = vmul.f32 %v3874_v40, %v2032_v4  ;;  %v2034_v61 = vadd.f32 %v2033_v38, %v3924_v22  ;;  %v2283_v57 = vmax.f32 %v2251_v46, 0.0  ;;  %v2252_v54 = vadd.f32 %v3882_v56, %v2208_v47 }
 0x196   :  { %2330 = vst [vmem:[%s4191_s4 + $0xa8] sm:$0xff] %v2298_v55  ;;  %v2225_v52 = vmul.f32 %v3874_v40, %v2072_v16  ;;  %v2074_v36 = vadd.f32 %v2073_v7, %v3983_v43  ;;  %v2299_v42 = vmax.f32 %v2267_v31, 0.0  ;;  %v2268_v30 = vadd.f32 %v3882_v56, %v2224_v60  ;;  %v2035_v2 = vpop.f32.mrf.mxu0 }
 0x197   :  { %v2075_v21 = vpop.f32.mrf.mxu1  ;;  %v2253_v27 = vadd.f32 %v3876_v17, %v2209_v19  ;;  %v2210_v53 = vmul.f32 %v3880_v32, %v2034_v61  ;;  %2315 = vst [vmem:[%s4191_s4 + $0x30] sm:$0xff] %v2283_v57  ;;  %v2284_v22 = vmax.f32 %v2252_v54, 0.0  ;;  %v2036_v48 = vadd.f32 %v2035_v2, %v3937_v0 }
 0x198   :  { %v2269_v58 = vadd.f32 %v3876_v17, %v2225_v52  ;;  %v2226_v59 = vmul.f32 %v3880_v32, %v2074_v36  ;;  %2331 = vst [vmem:[%s4191_s4 + $0xb0] sm:$0xff] %v2299_v42  ;;  %v2300_v43 = vmax.f32 %v2268_v30, 0.0  ;;  %v2076_v3 = vadd.f32 %v2075_v21, %v3991_v35  ;;  %v2037_v23 = vpop.f32.mrf.mxu0 }
 0x199   :  { %v2077_v24 = vpop.f32.mrf.mxu1  ;;  %v2285_v50 = vmax.f32 %v2253_v27, 0.0  ;;  %v2254_v26 = vadd.f32 %v3882_v56, %v2210_v53  ;;  %2316 = vst [vmem:[%s4191_s4 + $0x38] sm:$0xff] %v2284_v22  ;;  %v2211_v0 = vmul.f32 %v3874_v40, %v2036_v48  ;;  %v2038_v63 = vadd.f32 %v2037_v23, %v3940_v34 }
 0x19a   :  { %v2301_v62 = vmax.f32 %v2269_v58, 0.0  ;;  %v2270_v15 = vadd.f32 %v3882_v56, %v2226_v59  ;;  %2332 = vst [vmem:[%s4191_s4 + $0xb8] sm:$0xff] %v2300_v43  ;;  %v2227_v35 = vmul.f32 %v3874_v40, %v2076_v3  ;;  %v2078_v39 = vadd.f32 %v2077_v24, %v3994_v45  ;;  %v2041_v25 = vpop.f32.mrf.mxu0 }
 0x19b   :  { %v2081_v44 = vpop.f32.mrf.mxu1  ;;  %2317 = vst [vmem:[%s4191_s4 + $0x40] sm:$0xff] %v2285_v50  ;;  %v2286_v41 = vmax.f32 %v2254_v26, 0.0  ;;  %v2042_v1 = vadd.f32 %v2041_v25, %v3943_v37  ;;  %v2255_v34 = vadd.f32 %v3876_v17, %v2211_v0  ;;  %v2212_v49 = vmul.f32 %v3880_v32, %v2038_v63 }
 0x19c   :  { %2333 = vst [vmem:[%s4191_s4 + $0xc0] sm:$0xff] %v2301_v62  ;;  %v2302_v29 = vmax.f32 %v2270_v15, 0.0  ;;  %v2082_v11 = vadd.f32 %v2081_v44, %v3996_v6  ;;  %v2271_v45 = vadd.f32 %v3876_v17, %v2227_v35  ;;  %v2228_v8 = vmul.f32 %v3880_v32, %v2078_v39  ;;  %v2043_v10 = vpop.f32.mrf.mxu0 }
 0x19d   :  { %v2083_v33 = vpop.f32.mrf.mxu1  ;;  %2318 = vst [vmem:[%s4191_s4 + $0x48] sm:$0xff] %v2286_v41  ;;  %v2213_v37 = vmul.f32 %v3874_v40, %v2042_v1  ;;  %v2044_v14 = vadd.f32 %v2043_v10, %v3946_v5  ;;  %v2287_v51 = vmax.f32 %v2255_v34, 0.0  ;;  %v2256_v4 = vadd.f32 %v3882_v56, %v2212_v49 }
 0x19e   :  { %2334 = vst [vmem:[%s4191_s4 + $0xc8] sm:$0xff] %v2302_v29  ;;  %v2229_v6 = vmul.f32 %v3874_v40, %v2082_v11  ;;  %v2084_v28 = vadd.f32 %v2083_v33, %v3998_v9  ;;  %v2303_v55 = vmax.f32 %v2271_v45, 0.0  ;;  %v2272_v16 = vadd.f32 %v3882_v56, %v2228_v8  ;;  %v2045_v46 = vpop.f32.mrf.mxu0 }
 0x19f   :  { %v2085_v31 = vpop.f32.mrf.mxu1  ;;  %v2257_v47 = vadd.f32 %v3876_v17, %v2213_v37  ;;  %v2214_v38 = vmul.f32 %v3880_v32, %v2044_v14  ;;  %2319 = vst [vmem:[%s4191_s4 + $0x50] sm:$0xff] %v2287_v51  ;;  %v2288_v5 = vmax.f32 %v2256_v4, 0.0  ;;  %v2046_v19 = vadd.f32 %v2045_v46, %v3949_v18 }
 0x1a0   :  { %v2273_v60 = vadd.f32 %v3876_v17, %v2229_v6  ;;  %v2230_v7 = vmul.f32 %v3880_v32, %v2084_v28  ;;  %2335 = vst [vmem:[%s4191_s4 + $0xd0] sm:$0xff] %v2303_v55  ;;  %v2304_v9 = vmax.f32 %v2272_v16, 0.0  ;;  %v2086_v52 = vadd.f32 %v2085_v31, %v4004_v13  ;;  %v2047_v61 = vpop.f32.mrf.mxu0 }
 0x1a1   :  { %v2087_v36 = vpop.f32.mrf.mxu1  ;;  %v2289_v57 = vmax.f32 %v2257_v47, 0.0  ;;  %v2258_v54 = vadd.f32 %v3882_v56, %v2214_v38  ;;  %2320 = vst [vmem:[%s4191_s4 + $0x58] sm:$0xff] %v2288_v5  ;;  %v2215_v18 = vmul.f32 %v3874_v40, %v2046_v19  ;;  %v2048_v2 = vadd.f32 %v2047_v61, %v3952_v20 }
 0x1a2   :  { %v2305_v42 = vmax.f32 %v2273_v60, 0.0  ;;  %v2274_v30 = vadd.f32 %v3882_v56, %v2230_v7  ;;  %2336 = vst [vmem:[%s4191_s4 + $0xd8] sm:$0xff] %v2304_v9  ;;  %v2231_v13 = vmul.f32 %v3874_v40, %v2086_v52  ;;  %v2088_v21 = vadd.f32 %v2087_v36, %v4006_v12 }
 0x1a3   :  { %2321 = vst [vmem:[%s4191_s4 + $0x60] sm:$0xff] %v2289_v57  ;;  %v2290_v27 = vmax.f32 %v2258_v54, 0.0  ;;  %v2259_v53 = vadd.f32 %v3876_v17, %v2215_v18  ;;  %v2216_v40 = vmul.f32 %v3880_v32, %v2048_v2 }
 0x1a4   :  { %2337 = vst [vmem:[%s4191_s4 + $0xe0] sm:$0xff] %v2305_v42  ;;  %v2306_v58 = vmax.f32 %v2274_v30, 0.0  ;;  %v2275_v59 = vadd.f32 %v3876_v17, %v2231_v13  ;;  %v2232_v20 = vmul.f32 %v3880_v32, %v2088_v21 }
 0x1a5   :  { %2322 = vst [vmem:[%s4191_s4 + $0x68] sm:$0xff] %v2290_v27  ;;  %v2291_v12 = vmax.f32 %v2259_v53, 0.0  ;;  %v2260_v43 = vadd.f32 %v3882_v56, %v2216_v40 }
 0x1a6   :  { %2338 = vst [vmem:[%s4191_s4 + $0xe8] sm:$0xff] %v2306_v58  ;;  %v2307_v22 = vmax.f32 %v2275_v59, 0.0  ;;  %v2276_v48 = vadd.f32 %v3882_v56, %v2232_v20 }
 0x1a7   :  { %2323 = vst [vmem:[%s4191_s4 + $0x70] sm:$0xff] %v2291_v12  ;;  %v2292_v17 = vmax.f32 %v2260_v43, 0.0 }
 0x1a8   :  { %2339 = vst [vmem:[%s4191_s4 + $0xf0] sm:$0xff] %v2307_v22  ;;  %v2308_v32 = vmax.f32 %v2276_v48, 0.0 }
 0x1a9   :  { %2324 = vst [vmem:[%s4191_s4 + $0x78] sm:$0xff] %v2292_v17 }
 0x1aa   :  { %2340 = vst [vmem:[%s4191_s4 + $0xf8] sm:$0xff] %v2308_v32 }

// kernel: deeplabv3plus_forward.8
= control target key start
LH: loop header
LB: loop body
LE: loop exit
PB: predicated region body
PF: predicated region fallthrough
CT: control target
= control target key end

     0   :  { %s1164_s15 = smov 0   ;;  %s1166_s16 = smov 0   ;;  %s1330_s0 = inlined_call_operand.vmem [shape: bf16[512,256], index: 0, kind: input, shape index: {}]   ;;  %s1331_s1 = inlined_call_operand.vmem [shape: bf16[256,128], index: 1, kind: input, shape index: {}]   ;;  %s1332_s2 = inlined_call_operand.vmem [shape: f32[1,128], index: 2, kind: input, shape index: {}]   ;;  %s1333_s3 = inlined_call_operand.vmem [shape: f32[1,128], index: 3, kind: input, shape index: {}]   ;;  %s1334_s4 = inlined_call_operand.vmem [shape: f32[512,128], index: 4, kind: output, shape index: {}]  }
   0x1   :  { %s1168_s17 = smov 0  }
   0x2 LB: > { %s33_s18 = sadd.s32 1, %s1133_s16  ;;  %p928_p0 = scmp.ge.s32.totalorder %s1137_s17, 1  ;;  %s1137_s17 = sphi %s1168_s17, %s14_s17   ;;  %s1133_s16 = sphi %s1166_s16, %s1336_s16   ;;  %s1129_s15 = sphi %s1164_s15, %s1335_s15  }
   0x3   : > { %p35_p1 = scmp.ge.s32.totalorder %s33_s18, 4  ;;  %p224_p2 = scmp.lt.s32.totalorder %s1137_s17, 5 }
   0x5   : > { %s1338_s18 = smov (%p35_p1, %s33_s18), 0  ;;  %p225_p3 = pnand %p928_p0, %p224_p2 }
   0x6   : > { %s929_s21 = sshll.u32 (!%p225_p3), %s1129_s15, 4 }
   0x7   : > { %228 = sbr.rel (%p225_p3) target bundleno = 277 (0x115), region = 36  ;;  %p274_p4 = scmp.lt.s32.totalorder (!%p225_p3), %s929_s21, 63 }
   0xc   : > { %v1075_v0 = vld [vmem:[%s1331_s1 + $0x78] sm:$0xff]   ;;  %v1077_v2 = vld [vmem:[%s1331_s1 + $0x70] sm:$0xff]   ;;  %v1079_v4 = vld [vmem:[%s1331_s1 + $0x68] sm:$0xff]   ;;  %s1340_s21 = smov (!%p274_p4, %s929_s21), 63 }
   0xd   : > { %v1076_v1 = vld [vmem:[%s1331_s1 + $0x38] sm:$0xff]   ;;  %971 = vmatprep.subr.bf16.mxu0 %v1075_v0  ;;  %1035 = vmatprep.subr.bf16.mxu1 %v1075_v0  ;;  %v1078_v3 = vld [vmem:[%s1331_s1 + $0x30] sm:$0xff]   ;;  %v1080_v5 = vld [vmem:[%s1331_s1 + $0x28] sm:$0xff]   ;;  %s970_s10 = sshll.u32 %s1340_s21, 3 }
   0xe   : > { %972 = vmatpush3.bf16.msra.mxu0 %v1076_v1  ;;  %1043 = vmatpush3.bf16.msra.mxu1 %v1076_v1  ;;  %v1081_v6 = vld [vmem:[%s1331_s1 + $0x60] sm:$0xff]   ;;  %v1083_v8 = vld [vmem:[%s1331_s1 + $0x58] sm:$0xff]   ;;  %s1217_s15 = scalar_lea.vmem %s1330_s0, %s970_s10  ;;  %v1085_v10 = vld [vmem:[%s1331_s1 + $0x50] sm:$0xff]  }
   0xf   : > { %973 = vmatprep.subr.bf16.mxu0 %v1077_v2  ;;  %1036 = vmatprep.subr.bf16.mxu1 %v1077_v2  ;;  %v1082_v7 = vld [vmem:[%s1331_s1 + $0x20] sm:$0xff]   ;;  %v1084_v9 = vld [vmem:[%s1331_s1 + $0x18] sm:$0xff]   ;;  %v1086_v13 = vld [vmem:[%s1331_s1 + $0x10] sm:$0xff]  }
  0x10   : > { %v1093_v11 = vld [vmem:[%s1217_s15 + $0x4] ss:$8 sps:$4 sm:$0xff]   ;;  %v1091_v18 = vld [vmem:[%s1217_s15] ss:$8 sps:$4 sm:$0xff]   ;;  %v1097_v20 = vld [vmem:[%s1217_s15 + $0x14] ss:$8 sps:$4 sm:$0xff]  }
  0x11   : > { %v1096_v12 = vld [vmem:[%s1217_s15 + $0x44] ss:$8 sps:$4 sm:$0xff]   ;;  %601 = vmatprep.mubr.bf16.mxu0 %v1093_v11  ;;  %v1094_v19 = vld [vmem:[%s1217_s15 + $0x40] ss:$8 sps:$4 sm:$0xff]   ;;  %v1099_v21 = vld [vmem:[%s1217_s15 + $0x54] ss:$8 sps:$4 sm:$0xff]  }
  0x12   : > { %974 = vmatpush3.bf16.msra.mxu0 %v1078_v3  ;;  %1044 = vmatpush3.bf16.msra.mxu1 %v1078_v3  ;;  %v1087_v14 = vld [vmem:[%s1331_s1 + $0x48] sm:$0xff]   ;;  %v1089_v16 = vld [vmem:[%s1331_s1 + $0x40] sm:$0xff]   ;;  %v1101_v22 = vld [vmem:[%s1217_s15 + $0x10] ss:$8 sps:$4 sm:$0xff]  }
  0x13   : > { %975 = vmatprep.subr.bf16.mxu0 %v1079_v4  ;;  %1037 = vmatprep.subr.bf16.mxu1 %v1079_v4  ;;  %v1088_v15 = vld [vmem:[%s1331_s1 + $0x8] sm:$0xff]   ;;  %v1090_v17 = vld [vmem:[%s1331_s1] sm:$0xff]   ;;  %v1102_v23 = vld [vmem:[%s1217_s15 + $0x50] ss:$8 sps:$4 sm:$0xff]  }
  0x14   : > { %633 = vmatprep.mubr.bf16.mxu1 %v1096_v12  ;;  %v1103_v24 = vld [vmem:[%s1217_s15 + $0x24] ss:$8 sps:$4 sm:$0xff]   ;;  %v1107_v26 = vld [vmem:[%s1217_s15 + $0x20] ss:$8 sps:$4 sm:$0xff]   ;;  %v1109_v28 = vld [vmem:[%s1217_s15 + $0x34] ss:$8 sps:$4 sm:$0xff]  }
  0x15   : > { %v1105_v25 = vld [vmem:[%s1217_s15 + $0x64] ss:$8 sps:$4 sm:$0xff]   ;;  %v1108_v27 = vld [vmem:[%s1217_s15 + $0x60] ss:$8 sps:$4 sm:$0xff]   ;;  %v1111_v29 = vld [vmem:[%s1217_s15 + $0x74] ss:$8 sps:$4 sm:$0xff]  }
  0x16   : > { %976 = vmatpush3.bf16.msra.mxu0 %v1080_v5  ;;  %1045 = vmatpush3.bf16.msra.mxu1 %v1080_v5  ;;  %v1113_v30 = vld [vmem:[%s1217_s15 + $0x30] ss:$8 sps:$4 sm:$0xff]   ;;  %v1259_v35 = vld [vmem:[%s1332_s2] ss:$0 sm:$0xff] }
  0x17   : > { %977 = vmatprep.subr.bf16.mxu0 %v1081_v6  ;;  %1038 = vmatprep.subr.bf16.mxu1 %v1081_v6  ;;  %v1114_v31 = vld [vmem:[%s1217_s15 + $0x70] ss:$8 sps:$4 sm:$0xff]   ;;  %v1264_v39 = vld [vmem:[%s1333_s3] ss:$0 sm:$0xff]  ;;  %s1275_s15 = scalar_lea.vmem %s1334_s4, %s970_s10 }
  0x1a   : > { %978 = vmatpush3.bf16.msra.mxu0 %v1082_v7  ;;  %1046 = vmatpush3.bf16.msra.mxu1 %v1082_v7 }
  0x1b   : > { %979 = vmatprep.subr.bf16.mxu0 %v1083_v8  ;;  %1039 = vmatprep.subr.bf16.mxu1 %v1083_v8 }
  0x1e   : > { %980 = vmatpush3.bf16.msra.mxu0 %v1084_v9  ;;  %1047 = vmatpush3.bf16.msra.mxu1 %v1084_v9 }
  0x1f   : > { %981 = vmatprep.subr.bf16.mxu0 %v1085_v10  ;;  %1040 = vmatprep.subr.bf16.mxu1 %v1085_v10 }
  0x22   : > { %982 = vmatpush3.bf16.msra.mxu0 %v1086_v13  ;;  %1048 = vmatpush3.bf16.msra.mxu1 %v1086_v13 }
  0x23   : > { %983 = vmatprep.subr.bf16.mxu0 %v1087_v14  ;;  %1041 = vmatprep.subr.bf16.mxu1 %v1087_v14 }
  0x26   : > { %984 = vmatpush3.bf16.msra.mxu0 %v1088_v15  ;;  %1049 = vmatpush3.bf16.msra.mxu1 %v1088_v15 }
  0x27   : > { %985 = vmatprep.subr.bf16.mxu0 %v1089_v16  ;;  %1042 = vmatprep.subr.bf16.mxu1 %v1089_v16 }
  0x2a   : > { %986 = vmatpush3.bf16.msra.mxu0 %v1090_v17  ;;  %1050 = vmatpush3.bf16.msra.mxu1 %v1090_v17 }
  0x2d   : > { %602 = vmatmul.mubr.bf16.vlgmr.msra.gmra.mxu0 %v1091_v18  ;;  %634 = vmatmul.mubr.bf16.vlgmr.msra.gmra.mxu1 %v1094_v19 }
  0x2e   : > { %609 = vmatprep.mubr.bf16.mxu0 %v1097_v20  ;;  %641 = vmatprep.mubr.bf16.mxu1 %v1099_v21 }
  0x35   : > { %610 = vmatmul.mubr.bf16.gmra.mxu0 %v1101_v22  ;;  %642 = vmatmul.mubr.bf16.gmra.mxu1 %v1102_v23 }
  0x36   : > { %617 = vmatprep.mubr.bf16.mxu0 %v1103_v24  ;;  %649 = vmatprep.mubr.bf16.mxu1 %v1105_v25 }
  0x3d   : > { %618 = vmatmul.mubr.bf16.gmra.mxu0 %v1107_v26  ;;  %650 = vmatmul.mubr.bf16.gmra.mxu1 %v1108_v27 }
  0x3e   : > { %625 = vmatprep.mubr.bf16.mxu0 %v1109_v28  ;;  %657 = vmatprep.mubr.bf16.mxu1 %v1111_v29 }
  0x45   : > { %626 = vmatmul.mubr.bf16.gmra.mxu0 %v1113_v30  ;;  %658 = vmatmul.mubr.bf16.gmra.mxu1 %v1114_v31 }
  0xed   : > { %v987_v32 = vpop.f32.mrf.mxu0  ;;  %v1011_v33 = vpop.f32.mrf.mxu1 }
  0xef   : > { %v988_v34 = vpop.f32.mrf.mxu0  ;;  %v1012_v36 = vpop.f32.mrf.mxu1 }
  0xf0   : > { %v989_v37 = vadd.f32 %v988_v34, %v987_v32  ;;  %v1013_v38 = vadd.f32 %v1012_v36, %v1011_v33 }
  0xf1   : > { %v990_v40 = vpop.f32.mrf.mxu0  ;;  %v1014_v41 = vpop.f32.mrf.mxu1 }
  0xf2   : > { %v724_v42 = vmul.f32 %v989_v37, %v1259_v35  ;;  %v732_v43 = vmul.f32 %v1013_v38, %v1259_v35 }
  0xf3   : > { %v991_v44 = vpop.f32.mrf.mxu0  ;;  %v1015_v45 = vpop.f32.mrf.mxu1 }
  0xf4   : > { %v747_v46 = vadd.f32 %v1264_v39, %v724_v42  ;;  %v755_v47 = vadd.f32 %v1264_v39, %v732_v43  ;;  %v992_v48 = vadd.f32 %v991_v44, %v990_v40  ;;  %v1016_v49 = vadd.f32 %v1015_v45, %v1014_v41 }
  0xf5   : > { %v993_v50 = vpop.f32.mrf.mxu0  ;;  %v1017_v51 = vpop.f32.mrf.mxu1 }
  0xf6   : > { %v763_v52 = vmax.f32 %v747_v46, 0.0  ;;  %v771_v53 = vmax.f32 %v755_v47, 0.0  ;;  %v725_v54 = vmul.f32 %v992_v48, %v1259_v35  ;;  %v733_v55 = vmul.f32 %v1016_v49, %v1259_v35 }
  0xf7   : > { %v994_v56 = vpop.f32.mrf.mxu0  ;;  %v1018_v57 = vpop.f32.mrf.mxu1 }
  0xf8   : > { %779 = vst [vmem:[%s1275_s15] sm:$0xff] %v763_v52  ;;  %787 = vst [vmem:[%s1275_s15 + $0x40] sm:$0xff] %v771_v53  ;;  %v748_v58 = vadd.f32 %v1264_v39, %v725_v54  ;;  %v756_v59 = vadd.f32 %v1264_v39, %v733_v55  ;;  %v995_v60 = vadd.f32 %v994_v56, %v993_v50 }
  0xf9   : > { %v1019_v61 = vadd.f32 %v1018_v57, %v1017_v51  ;;  %v996_v62 = vpop.f32.mrf.mxu0  ;;  %v1020_v63 = vpop.f32.mrf.mxu1 }
  0xfa   : > { %v764_v0 = vmax.f32 %v748_v58, 0.0  ;;  %v772_v1 = vmax.f32 %v756_v59, 0.0  ;;  %v726_v2 = vmul.f32 %v995_v60, %v1259_v35 }
  0xfb   : > { %v734_v3 = vmul.f32 %v1019_v61, %v1259_v35  ;;  %v997_v4 = vpop.f32.mrf.mxu0  ;;  %v1021_v5 = vpop.f32.mrf.mxu1 }
  0xfc   : > { %780 = vst [vmem:[%s1275_s15 + $0x8] sm:$0xff] %v764_v0  ;;  %788 = vst [vmem:[%s1275_s15 + $0x48] sm:$0xff] %v772_v1  ;;  %v749_v6 = vadd.f32 %v1264_v39, %v726_v2  ;;  %v998_v8 = vadd.f32 %v997_v4, %v996_v62  ;;  %v1022_v9 = vadd.f32 %v1021_v5, %v1020_v63 }
  0xfd   : > { %v757_v7 = vadd.f32 %v1264_v39, %v734_v3  ;;  %v999_v10 = vpop.f32.mrf.mxu0  ;;  %v1023_v11 = vpop.f32.mrf.mxu1 }
  0xfe   : > { %v765_v12 = vmax.f32 %v749_v6, 0.0  ;;  %v727_v14 = vmul.f32 %v998_v8, %v1259_v35  ;;  %v735_v15 = vmul.f32 %v1022_v9, %v1259_v35 }
  0xff   : > { %v773_v13 = vmax.f32 %v757_v7, 0.0  ;;  %v1000_v16 = vpop.f32.mrf.mxu0  ;;  %v1024_v17 = vpop.f32.mrf.mxu1 }
 0x100   : > { %781 = vst [vmem:[%s1275_s15 + $0x10] sm:$0xff] %v765_v12  ;;  %v750_v18 = vadd.f32 %v1264_v39, %v727_v14  ;;  %v758_v19 = vadd.f32 %v1264_v39, %v735_v15  ;;  %v1001_v20 = vadd.f32 %v1000_v16, %v999_v10  ;;  %v1025_v21 = vadd.f32 %v1024_v17, %v1023_v11 }
 0x101   : > { %789 = vst [vmem:[%s1275_s15 + $0x50] sm:$0xff] %v773_v13  ;;  %v1002_v22 = vpop.f32.mrf.mxu0  ;;  %v1026_v23 = vpop.f32.mrf.mxu1 }
 0x102   : > { %v766_v24 = vmax.f32 %v750_v18, 0.0  ;;  %v774_v25 = vmax.f32 %v758_v19, 0.0  ;;  %v728_v26 = vmul.f32 %v1001_v20, %v1259_v35  ;;  %v736_v27 = vmul.f32 %v1025_v21, %v1259_v35 }
 0x103   : > { %v1003_v28 = vpop.f32.mrf.mxu0  ;;  %v1027_v29 = vpop.f32.mrf.mxu1 }
 0x104   : > { %782 = vst [vmem:[%s1275_s15 + $0x18] sm:$0xff] %v766_v24  ;;  %790 = vst [vmem:[%s1275_s15 + $0x58] sm:$0xff] %v774_v25  ;;  %v751_v30 = vadd.f32 %v1264_v39, %v728_v26  ;;  %v759_v31 = vadd.f32 %v1264_v39, %v736_v27  ;;  %v1004_v32 = vadd.f32 %v1003_v28, %v1002_v22 }
 0x105   : > { %v1028_v33 = vadd.f32 %v1027_v29, %v1026_v23  ;;  %v1005_v34 = vpop.f32.mrf.mxu0  ;;  %v1029_v36 = vpop.f32.mrf.mxu1 }
 0x106   : > { %v767_v37 = vmax.f32 %v751_v30, 0.0  ;;  %v775_v38 = vmax.f32 %v759_v31, 0.0  ;;  %v729_v40 = vmul.f32 %v1004_v32, %v1259_v35 }
 0x107   : > { %v737_v41 = vmul.f32 %v1028_v33, %v1259_v35  ;;  %v1006_v42 = vpop.f32.mrf.mxu0  ;;  %v1030_v43 = vpop.f32.mrf.mxu1 }
 0x108   : > { %783 = vst [vmem:[%s1275_s15 + $0x20] sm:$0xff] %v767_v37  ;;  %791 = vst [vmem:[%s1275_s15 + $0x60] sm:$0xff] %v775_v38  ;;  %v752_v44 = vadd.f32 %v1264_v39, %v729_v40  ;;  %v1007_v46 = vadd.f32 %v1006_v42, %v1005_v34  ;;  %v1031_v47 = vadd.f32 %v1030_v43, %v1029_v36 }
 0x109   : > { %v760_v45 = vadd.f32 %v1264_v39, %v737_v41  ;;  %v1008_v48 = vpop.f32.mrf.mxu0  ;;  %v1032_v49 = vpop.f32.mrf.mxu1 }
 0x10a   : > { %v768_v50 = vmax.f32 %v752_v44, 0.0  ;;  %v730_v52 = vmul.f32 %v1007_v46, %v1259_v35  ;;  %v738_v53 = vmul.f32 %v1031_v47, %v1259_v35 }
 0x10b   : > { %v776_v51 = vmax.f32 %v760_v45, 0.0  ;;  %v1009_v54 = vpop.f32.mrf.mxu0  ;;  %v1033_v55 = vpop.f32.mrf.mxu1 }
 0x10c   : > { %784 = vst [vmem:[%s1275_s15 + $0x28] sm:$0xff] %v768_v50  ;;  %v753_v56 = vadd.f32 %v1264_v39, %v730_v52  ;;  %v761_v57 = vadd.f32 %v1264_v39, %v738_v53  ;;  %v1010_v58 = vadd.f32 %v1009_v54, %v1008_v48  ;;  %v1034_v59 = vadd.f32 %v1033_v55, %v1032_v49 }
 0x10d   : > { %792 = vst [vmem:[%s1275_s15 + $0x68] sm:$0xff] %v776_v51 }
 0x10e   : > { %v769_v60 = vmax.f32 %v753_v56, 0.0  ;;  %v777_v61 = vmax.f32 %v761_v57, 0.0  ;;  %v731_v62 = vmul.f32 %v1010_v58, %v1259_v35  ;;  %v739_v63 = vmul.f32 %v1034_v59, %v1259_v35 }
 0x110   : > { %785 = vst [vmem:[%s1275_s15 + $0x30] sm:$0xff] %v769_v60  ;;  %793 = vst [vmem:[%s1275_s15 + $0x70] sm:$0xff] %v777_v61  ;;  %v754_v0 = vadd.f32 %v1264_v39, %v731_v62  ;;  %v762_v1 = vadd.f32 %v1264_v39, %v739_v63 }
 0x112   : > { %v770_v2 = vmax.f32 %v754_v0, 0.0  ;;  %v778_v3 = vmax.f32 %v762_v1, 0.0 }
 0x114   : > { %786 = vst [vmem:[%s1275_s15 + $0x38] sm:$0xff] %v770_v2  ;;  %794 = vst [vmem:[%s1275_s15 + $0x78] sm:$0xff] %v778_v3 }
 0x115 PF: > { %s14_s17 = sadd.s32 1, %s1137_s17   ;;  %s1335_s15 = smov %s1133_s16 }
 0x116   : > { %p11_p5 = scmp.ge.s32.totalorder %s14_s17, 6   ;;  %s1336_s16 = smov %s1338_s18 }
 0x118   :  { %13 = sbr.rel (!%p11_p5) target bundleno = 2 (0x2), region = 83 }

// kernel: deeplabv3plus_forward.9
= control target key start
LH: loop header
LB: loop body
LE: loop exit
PB: predicated region body
PF: predicated region fallthrough
CT: control target
= control target key end

     0   :  { %s6641_s15 = smov 0   ;;  %s6643_s16 = smov 0   ;;  %s8582_s0 = inlined_call_operand.vmem [shape: bf16[512,2816], index: 0, kind: input, shape index: {}]   ;;  %s8583_s1 = inlined_call_operand.vmem [shape: bf16[2816,256], index: 1, kind: input, shape index: {}]   ;;  %s8584_s2 = inlined_call_operand.vmem [shape: f32[1,256], index: 2, kind: input, shape index: {}]   ;;  %s8585_s3 = inlined_call_operand.vmem [shape: f32[1,256], index: 3, kind: input, shape index: {}]   ;;  %s8586_s4 = inlined_call_operand.vmem [shape: f32[512,256], index: 4, kind: output, shape index: {}]  }
   0x1   :  { %s6645_s17 = smov 0  }
   0x2 LB: > { %s33_s18 = sadd.s32 1, %s6610_s16  ;;  %p5206_p0 = scmp.ge.s32.totalorder %s6614_s17, 1  ;;  %s6614_s17 = sphi %s6645_s17, %s14_s17   ;;  %s6610_s16 = sphi %s6643_s16, %s8656_s16   ;;  %s6606_s15 = sphi %s6641_s15, %s8655_s15  }
   0x3   : > { %p35_p1 = scmp.ge.s32.totalorder %s33_s18, 4  ;;  %p231_p2 = scmp.lt.s32.totalorder %s6614_s17, 5 }
   0x5   : > { %s8658_s18 = smov (%p35_p1, %s33_s18), 0  ;;  %p232_p3 = pnand %p5206_p0, %p231_p2 }
   0x7   : > { %235 = sbr.rel (%p232_p3) target bundleno = 630 (0x276), region = 36 }
   0xc   : > { %v5800_v0 = vld [vmem:[%s8583_s1 + $0x74] ss:$8 sps:$4 sm:$0xff]   ;;  %v5804_v2 = vld [vmem:[%s8583_s1 + $0x70] ss:$8 sps:$4 sm:$0xff]   ;;  %v5806_v4 = vld [vmem:[%s8583_s1 + $0x64] ss:$8 sps:$4 sm:$0xff]  }
   0xd   : > { %v5802_v1 = vld [vmem:[%s8583_s1 + $0x174] ss:$8 sps:$4 sm:$0xff]   ;;  %3567 = vmatprep.subr.bf16.mxu0 %v5800_v0  ;;  %v5805_v3 = vld [vmem:[%s8583_s1 + $0x170] ss:$8 sps:$4 sm:$0xff]   ;;  %v5808_v5 = vld [vmem:[%s8583_s1 + $0x164] ss:$8 sps:$4 sm:$0xff]  }
   0xe   : > { %3680 = vmatprep.subr.bf16.mxu1 %v5802_v1  ;;  %3568 = vmatpush1.bf16.msra.mxu0 %v5804_v2  ;;  %v5810_v6 = vld [vmem:[%s8583_s1 + $0x60] ss:$8 sps:$4 sm:$0xff]   ;;  %v5812_v8 = vld [vmem:[%s8583_s1 + $0x54] ss:$8 sps:$4 sm:$0xff]   ;;  %v5816_v10 = vld [vmem:[%s8583_s1 + $0x50] ss:$8 sps:$4 sm:$0xff]  }
   0xf   : > { %3681 = vmatpush1.bf16.msra.mxu1 %v5805_v3  ;;  %3569 = vmatprep.subr.bf16.mxu0 %v5806_v4  ;;  %v5811_v7 = vld [vmem:[%s8583_s1 + $0x160] ss:$8 sps:$4 sm:$0xff]   ;;  %v5814_v9 = vld [vmem:[%s8583_s1 + $0x154] ss:$8 sps:$4 sm:$0xff]   ;;  %v5817_v11 = vld [vmem:[%s8583_s1 + $0x150] ss:$8 sps:$4 sm:$0xff]  }
  0x10   : > { %3682 = vmatprep.subr.bf16.mxu1 %v5808_v5  ;;  %v5818_v12 = vld [vmem:[%s8583_s1 + $0x44] ss:$8 sps:$4 sm:$0xff]   ;;  %v5822_v14 = vld [vmem:[%s8583_s1 + $0x40] ss:$8 sps:$4 sm:$0xff]   ;;  %v5824_v16 = vld [vmem:[%s8583_s1 + $0x34] ss:$8 sps:$4 sm:$0xff]  }
  0x11   : > { %v5820_v13 = vld [vmem:[%s8583_s1 + $0x144] ss:$8 sps:$4 sm:$0xff]   ;;  %v5823_v15 = vld [vmem:[%s8583_s1 + $0x140] ss:$8 sps:$4 sm:$0xff]   ;;  %v5826_v17 = vld [vmem:[%s8583_s1 + $0x134] ss:$8 sps:$4 sm:$0xff]  }
  0x12   : > { %3570 = vmatpush1.bf16.msra.mxu0 %v5810_v6  ;;  %v5828_v18 = vld [vmem:[%s8583_s1 + $0x30] ss:$8 sps:$4 sm:$0xff]   ;;  %v5830_v20 = vld [vmem:[%s8583_s1 + $0x24] ss:$8 sps:$4 sm:$0xff]   ;;  %v5834_v22 = vld [vmem:[%s8583_s1 + $0x20] ss:$8 sps:$4 sm:$0xff]  }
  0x13   : > { %3683 = vmatpush1.bf16.msra.mxu1 %v5811_v7  ;;  %3571 = vmatprep.subr.bf16.mxu0 %v5812_v8  ;;  %v5829_v19 = vld [vmem:[%s8583_s1 + $0x130] ss:$8 sps:$4 sm:$0xff]   ;;  %v5832_v21 = vld [vmem:[%s8583_s1 + $0x124] ss:$8 sps:$4 sm:$0xff]   ;;  %v5835_v23 = vld [vmem:[%s8583_s1 + $0x120] ss:$8 sps:$4 sm:$0xff]  }
  0x14   : > { %3684 = vmatprep.subr.bf16.mxu1 %v5814_v9  ;;  %v5836_v24 = vld [vmem:[%s8583_s1 + $0x14] ss:$8 sps:$4 sm:$0xff]   ;;  %v5840_v26 = vld [vmem:[%s8583_s1 + $0x10] ss:$8 sps:$4 sm:$0xff]   ;;  %v5842_v28 = vld [vmem:[%s8583_s1 + $0x4] ss:$8 sps:$4 sm:$0xff]  }
  0x15   : > { %v5838_v25 = vld [vmem:[%s8583_s1 + $0x114] ss:$8 sps:$4 sm:$0xff]   ;;  %v5841_v27 = vld [vmem:[%s8583_s1 + $0x110] ss:$8 sps:$4 sm:$0xff]   ;;  %v5844_v29 = vld [vmem:[%s8583_s1 + $0x104] ss:$8 sps:$4 sm:$0xff]  }
  0x16   : > { %3572 = vmatpush1.bf16.msra.mxu0 %v5816_v10  ;;  %s5207_s9 = sshll.u32 %s6606_s15, 4  ;;  %v5846_v30 = vld [vmem:[%s8583_s1] ss:$8 sps:$4 sm:$0xff]   ;;  %v5848_v32 = vld [vmem:[%s8583_s1 + $0xf4] ss:$8 sps:$4 sm:$0xff]  }
  0x17   : > { %3685 = vmatpush1.bf16.msra.mxu1 %v5817_v11  ;;  %3573 = vmatprep.subr.bf16.mxu0 %v5818_v12  ;;  %v5847_v31 = vld [vmem:[%s8583_s1 + $0x100] ss:$8 sps:$4 sm:$0xff]   ;;  %p287_p4 = scmp.lt.s32.totalorder %s5207_s9, 63  ;;  %v5850_v33 = vld [vmem:[%s8583_s1 + $0x1f4] ss:$8 sps:$4 sm:$0xff]  }
  0x18   : > { %3686 = vmatprep.subr.bf16.mxu1 %v5820_v13  ;;  %v5852_v34 = vld [vmem:[%s8583_s1 + $0xf0] ss:$8 sps:$4 sm:$0xff]   ;;  %v5854_v36 = vld [vmem:[%s8583_s1 + $0xe4] ss:$8 sps:$4 sm:$0xff]   ;;  %v5858_v38 = vld [vmem:[%s8583_s1 + $0xe0] ss:$8 sps:$4 sm:$0xff]  }
  0x19   : > { %v5853_v35 = vld [vmem:[%s8583_s1 + $0x1f0] ss:$8 sps:$4 sm:$0xff]   ;;  %s8660_s9 = smov (!%p287_p4, %s5207_s9), 63  ;;  %v5856_v37 = vld [vmem:[%s8583_s1 + $0x1e4] ss:$8 sps:$4 sm:$0xff]  }
  0x1a   : > { %3574 = vmatpush1.bf16.msra.mxu0 %v5822_v14  ;;  %v5859_v39 = vld [vmem:[%s8583_s1 + $0x1e0] ss:$8 sps:$4 sm:$0xff]   ;;  %v5860_v40 = vld [vmem:[%s8583_s1 + $0xd4] ss:$8 sps:$4 sm:$0xff]   ;;  %s5775_s10 = smul.u32 88, %s8660_s9  ;;  %s5742_s7 = sshll.u32 %s8660_s9, 4 }
  0x1b   : > { %3687 = vmatpush1.bf16.msra.mxu1 %v5823_v15  ;;  %3575 = vmatprep.subr.bf16.mxu0 %v5824_v16  ;;  %v5862_v41 = vld [vmem:[%s8583_s1 + $0x1d4] ss:$8 sps:$4 sm:$0xff]   ;;  %v5864_v42 = vld [vmem:[%s8583_s1 + $0xd0] ss:$8 sps:$4 sm:$0xff]   ;;  %v5866_v44 = vld [vmem:[%s8583_s1 + $0xc4] ss:$8 sps:$4 sm:$0xff]  }
  0x1c   : > { %3688 = vmatprep.subr.bf16.mxu1 %v5826_v17  ;;  %v5865_v43 = vld [vmem:[%s8583_s1 + $0x1d0] ss:$8 sps:$4 sm:$0xff]   ;;  %s6803_s24 = scalar_lea.vmem %s8582_s0, %s5775_s10  ;;  %v5868_v45 = vld [vmem:[%s8583_s1 + $0x1c4] ss:$8 sps:$4 sm:$0xff]   ;;  %v5870_v46 = vld [vmem:[%s8583_s1 + $0xc0] ss:$8 sps:$4 sm:$0xff]   ;;  %s8456_s10 = scalar_lea.vmem %s8586_s4, %s5742_s7 }
  0x1d   : > { %v5871_v47 = vld [vmem:[%s8583_s1 + $0x1c0] ss:$8 sps:$4 sm:$0xff]   ;;  %v5872_v48 = vld [vmem:[%s8583_s1 + $0xb4] ss:$8 sps:$4 sm:$0xff]   ;;  %v5901_v51 = vld [vmem:[%s6803_s24 + $0xc] ss:$88 sps:$4 sm:$0xff]  }
  0x1e   : > { %3576 = vmatpush1.bf16.msra.mxu0 %v5828_v18  ;;  %v5898_v49 = vld [vmem:[%s6803_s24 + $0x4] ss:$88 sps:$4 sm:$0xff]   ;;  %v5876_v52 = vld [vmem:[%s8583_s1 + $0xb0] ss:$8 sps:$4 sm:$0xff]   ;;  %3712 = vmatprep.mubr.bf16.mxu1 %v5901_v51  ;;  %v5882_v56 = vld [vmem:[%s8583_s1 + $0xa0] ss:$8 sps:$4 sm:$0xff]  }
  0x1f   : > { %3689 = vmatpush1.bf16.msra.mxu1 %v5829_v19  ;;  %3577 = vmatprep.subr.bf16.mxu0 %v5830_v20  ;;  %v5874_v50 = vld [vmem:[%s8583_s1 + $0x1b4] ss:$8 sps:$4 sm:$0xff]   ;;  %v5877_v53 = vld [vmem:[%s8583_s1 + $0x1b0] ss:$8 sps:$4 sm:$0xff]   ;;  %v5878_v54 = vld [vmem:[%s8583_s1 + $0xa4] ss:$8 sps:$4 sm:$0xff]  }
  0x20   : > { %3690 = vmatprep.subr.bf16.mxu1 %v5832_v21  ;;  %3599 = vmatprep.mubr.bf16.mxu0 %v5898_v49  ;;  %v5880_v55 = vld [vmem:[%s8583_s1 + $0x1a4] ss:$8 sps:$4 sm:$0xff]   ;;  %v5883_v57 = vld [vmem:[%s8583_s1 + $0x1a0] ss:$8 sps:$4 sm:$0xff]   ;;  %v5884_v58 = vld [vmem:[%s8583_s1 + $0x94] ss:$8 sps:$4 sm:$0xff]  }
  0x21   : > { %v5886_v59 = vld [vmem:[%s8583_s1 + $0x194] ss:$8 sps:$4 sm:$0xff]   ;;  %v5888_v60 = vld [vmem:[%s8583_s1 + $0x90] ss:$8 sps:$4 sm:$0xff]   ;;  %v5890_v62 = vld [vmem:[%s8583_s1 + $0x84] ss:$8 sps:$4 sm:$0xff]  }
  0x22   : > { %3578 = vmatpush1.bf16.msra.mxu0 %v5834_v22  ;;  %v5889_v61 = vld [vmem:[%s8583_s1 + $0x190] ss:$8 sps:$4 sm:$0xff]   ;;  %v5892_v63 = vld [vmem:[%s8583_s1 + $0x184] ss:$8 sps:$4 sm:$0xff]   ;;  %v5894_v0 = vld [vmem:[%s8583_s1 + $0x80] ss:$8 sps:$4 sm:$0xff]  }
  0x23   : > { %3691 = vmatpush1.bf16.msra.mxu1 %v5835_v23  ;;  %3579 = vmatprep.subr.bf16.mxu0 %v5836_v24  ;;  %v5895_v1 = vld [vmem:[%s8583_s1 + $0x180] ss:$8 sps:$4 sm:$0xff]   ;;  %v5904_v2 = vld [vmem:[%s8583_s1 + $0x274] ss:$8 sps:$4 sm:$0xff]   ;;  %v5902_v6 = vld [vmem:[%s8583_s1 + $0x270] ss:$8 sps:$4 sm:$0xff]  }
  0x24   : > { %3692 = vmatprep.subr.bf16.mxu1 %v5838_v25  ;;  %v5907_v3 = vld [vmem:[%s8583_s1 + $0x374] ss:$8 sps:$4 sm:$0xff]   ;;  %v5896_v4 = vld [vmem:[%s6803_s24] ss:$88 sps:$4 sm:$0xff]   ;;  %v5910_v8 = vld [vmem:[%s8583_s1 + $0x264] ss:$8 sps:$4 sm:$0xff]  }
  0x25   : > { %v5899_v5 = vld [vmem:[%s6803_s24 + $0x8] ss:$88 sps:$4 sm:$0xff]   ;;  %v5905_v7 = vld [vmem:[%s8583_s1 + $0x370] ss:$8 sps:$4 sm:$0xff]   ;;  %v5913_v9 = vld [vmem:[%s8583_s1 + $0x364] ss:$8 sps:$4 sm:$0xff]  }
  0x26   : > { %3580 = vmatpush1.bf16.msra.mxu0 %v5840_v26  ;;  %v5914_v10 = vld [vmem:[%s6803_s24 + $0xb4] ss:$88 sps:$4 sm:$0xff]   ;;  %v5908_v12 = vld [vmem:[%s8583_s1 + $0x260] ss:$8 sps:$4 sm:$0xff]   ;;  %v5919_v17 = vld [vmem:[%s6803_s24 + $0xb8] ss:$88 sps:$4 sm:$0xff]  }
  0x27   : > { %3693 = vmatpush1.bf16.msra.mxu1 %v5841_v27  ;;  %3581 = vmatprep.subr.bf16.mxu0 %v5842_v28  ;;  %v5916_v11 = vld [vmem:[%s6803_s24 + $0xbc] ss:$88 sps:$4 sm:$0xff]   ;;  %v5911_v13 = vld [vmem:[%s8583_s1 + $0x360] ss:$8 sps:$4 sm:$0xff]   ;;  %v5920_v18 = vld [vmem:[%s8583_s1 + $0x250] ss:$8 sps:$4 sm:$0xff]  }
  0x28   : > { %3694 = vmatprep.subr.bf16.mxu1 %v5844_v29  ;;  %v5922_v14 = vld [vmem:[%s8583_s1 + $0x254] ss:$8 sps:$4 sm:$0xff]   ;;  %v5918_v16 = vld [vmem:[%s6803_s24 + $0xb0] ss:$88 sps:$4 sm:$0xff]   ;;  %v5928_v20 = vld [vmem:[%s8583_s1 + $0x244] ss:$8 sps:$4 sm:$0xff]  }
  0x29   : > { %v5925_v15 = vld [vmem:[%s8583_s1 + $0x354] ss:$8 sps:$4 sm:$0xff]   ;;  %v5923_v19 = vld [vmem:[%s8583_s1 + $0x350] ss:$8 sps:$4 sm:$0xff]   ;;  %v5931_v21 = vld [vmem:[%s8583_s1 + $0x344] ss:$8 sps:$4 sm:$0xff]  }
  0x2a   : > { %3582 = vmatpush1.bf16.msra.mxu0 %v5846_v30  ;;  %v5932_v22 = vld [vmem:[%s6803_s24 + $0x164] ss:$88 sps:$4 sm:$0xff]   ;;  %v5926_v24 = vld [vmem:[%s8583_s1 + $0x240] ss:$8 sps:$4 sm:$0xff]   ;;  %v5938_v30 = vld [vmem:[%s8583_s1 + $0x230] ss:$8 sps:$4 sm:$0xff]  }
  0x2b   : > { %3695 = vmatpush1.bf16.msra.mxu1 %v5847_v31  ;;  %3583 = vmatprep.subr.bf16.mxu0 %v5848_v32  ;;  %v5934_v23 = vld [vmem:[%s6803_s24 + $0x16c] ss:$88 sps:$4 sm:$0xff]   ;;  %v5929_v25 = vld [vmem:[%s8583_s1 + $0x340] ss:$8 sps:$4 sm:$0xff]   ;;  %v5940_v26 = vld [vmem:[%s8583_s1 + $0x234] ss:$8 sps:$4 sm:$0xff]  }
  0x2c   : > { %3696 = vmatprep.subr.bf16.mxu1 %v5850_v33  ;;  %v5943_v27 = vld [vmem:[%s8583_s1 + $0x334] ss:$8 sps:$4 sm:$0xff]   ;;  %v5936_v28 = vld [vmem:[%s6803_s24 + $0x160] ss:$88 sps:$4 sm:$0xff]   ;;  %v5946_v32 = vld [vmem:[%s8583_s1 + $0x224] ss:$8 sps:$4 sm:$0xff]  }
  0x2d   : > { %v5937_v29 = vld [vmem:[%s6803_s24 + $0x168] ss:$88 sps:$4 sm:$0xff]   ;;  %v5941_v31 = vld [vmem:[%s8583_s1 + $0x330] ss:$8 sps:$4 sm:$0xff]   ;;  %v5949_v33 = vld [vmem:[%s8583_s1 + $0x324] ss:$8 sps:$4 sm:$0xff]  }
  0x2e   : > { %3584 = vmatpush2.bf16.msra.mxu0 %v5852_v34  ;;  %v5950_v34 = vld [vmem:[%s6803_s24 + $0x214] ss:$88 sps:$4 sm:$0xff]   ;;  %v5965_v49 = vld [vmem:[%s8583_s1 + $0x300] ss:$8 sps:$4 sm:$0xff]  }
  0x2f   : > { %3697 = vmatpush2.bf16.msra.mxu1 %v5853_v35  ;;  %3585 = vmatprep.subr.bf16.mxu0 %v5854_v36  ;;  %v5952_v35 = vld [vmem:[%s6803_s24 + $0x21c] ss:$88 sps:$4 sm:$0xff]   ;;  %v5944_v36 = vld [vmem:[%s8583_s1 + $0x220] ss:$8 sps:$4 sm:$0xff]  }
  0x30   : > { %3698 = vmatprep.subr.bf16.mxu1 %v5856_v37  ;;  %v5947_v37 = vld [vmem:[%s8583_s1 + $0x320] ss:$8 sps:$4 sm:$0xff]   ;;  %v5979_v51 = vld [vmem:[%s8583_s1 + $0x3f4] ss:$8 sps:$4 sm:$0xff]  }
  0x32   : > { %3586 = vmatpush2.bf16.msra.mxu0 %v5858_v38  ;;  %v5958_v38 = vld [vmem:[%s8583_s1 + $0x214] ss:$8 sps:$4 sm:$0xff]  }
  0x33   : > { %3699 = vmatpush2.bf16.msra.mxu1 %v5859_v39  ;;  %3587 = vmatprep.subr.bf16.mxu0 %v5860_v40  ;;  %v5961_v39 = vld [vmem:[%s8583_s1 + $0x314] ss:$8 sps:$4 sm:$0xff]   ;;  %v5954_v40 = vld [vmem:[%s6803_s24 + $0x210] ss:$88 sps:$4 sm:$0xff]  }
  0x34   : > { %3700 = vmatprep.subr.bf16.mxu1 %v5862_v41  ;;  %v5955_v41 = vld [vmem:[%s6803_s24 + $0x218] ss:$88 sps:$4 sm:$0xff]  }
  0x36   : > { %3588 = vmatpush2.bf16.msra.mxu0 %v5864_v42  ;;  %v5956_v42 = vld [vmem:[%s8583_s1 + $0x210] ss:$8 sps:$4 sm:$0xff]  }
  0x37   : > { %3701 = vmatpush2.bf16.msra.mxu1 %v5865_v43  ;;  %3589 = vmatprep.subr.bf16.mxu0 %v5866_v44  ;;  %v5959_v43 = vld [vmem:[%s8583_s1 + $0x310] ss:$8 sps:$4 sm:$0xff]   ;;  %v5964_v44 = vld [vmem:[%s8583_s1 + $0x204] ss:$8 sps:$4 sm:$0xff]  }
  0x38   : > { %3702 = vmatprep.subr.bf16.mxu1 %v5868_v45  ;;  %v5967_v45 = vld [vmem:[%s8583_s1 + $0x304] ss:$8 sps:$4 sm:$0xff]  }
  0x3a   : > { %3590 = vmatpush2.bf16.msra.mxu0 %v5870_v46  ;;  %v5968_v46 = vld [vmem:[%s6803_s24 + $0x2c4] ss:$88 sps:$4 sm:$0xff]  }
  0x3b   : > { %3703 = vmatpush2.bf16.msra.mxu1 %v5871_v47  ;;  %3591 = vmatprep.subr.bf16.mxu0 %v5872_v48  ;;  %v5970_v47 = vld [vmem:[%s6803_s24 + $0x2cc] ss:$88 sps:$4 sm:$0xff]   ;;  %v5962_v48 = vld [vmem:[%s8583_s1 + $0x200] ss:$8 sps:$4 sm:$0xff]  }
  0x3c   : > { %3704 = vmatprep.subr.bf16.mxu1 %v5874_v50  ;;  %v5976_v50 = vld [vmem:[%s8583_s1 + $0x2f4] ss:$8 sps:$4 sm:$0xff]  }
  0x3e   : > { %3592 = vmatpush2.bf16.msra.mxu0 %v5876_v52  ;;  %v5972_v52 = vld [vmem:[%s6803_s24 + $0x2c0] ss:$88 sps:$4 sm:$0xff]  }
  0x3f   : > { %3705 = vmatpush2.bf16.msra.mxu1 %v5877_v53  ;;  %3593 = vmatprep.subr.bf16.mxu0 %v5878_v54  ;;  %v5973_v53 = vld [vmem:[%s6803_s24 + $0x2c8] ss:$88 sps:$4 sm:$0xff]   ;;  %v5974_v54 = vld [vmem:[%s8583_s1 + $0x2f0] ss:$8 sps:$4 sm:$0xff]  }
  0x40   : > { %3706 = vmatprep.subr.bf16.mxu1 %v5880_v55  ;;  %v5977_v55 = vld [vmem:[%s8583_s1 + $0x3f0] ss:$8 sps:$4 sm:$0xff]  }
  0x42   : > { %3594 = vmatpush2.bf16.msra.mxu0 %v5882_v56  ;;  %v5982_v56 = vld [vmem:[%s8583_s1 + $0x2e4] ss:$8 sps:$4 sm:$0xff]  }
  0x43   : > { %3707 = vmatpush2.bf16.msra.mxu1 %v5883_v57  ;;  %3595 = vmatprep.subr.bf16.mxu0 %v5884_v58  ;;  %v5985_v57 = vld [vmem:[%s8583_s1 + $0x3e4] ss:$8 sps:$4 sm:$0xff]  }
  0x44   : > { %3708 = vmatprep.subr.bf16.mxu1 %v5886_v59  ;;  %v5986_v58 = vld [vmem:[%s6803_s24 + $0x374] ss:$88 sps:$4 sm:$0xff]  }
  0x45   : > { %v5988_v59 = vld [vmem:[%s6803_s24 + $0x37c] ss:$88 sps:$4 sm:$0xff]  }
  0x46   : > { %3596 = vmatpush2.bf16.msra.mxu0 %v5888_v60  ;;  %v5980_v60 = vld [vmem:[%s8583_s1 + $0x2e0] ss:$8 sps:$4 sm:$0xff]  }
  0x47   : > { %3709 = vmatpush2.bf16.msra.mxu1 %v5889_v61  ;;  %3597 = vmatprep.subr.bf16.mxu0 %v5890_v62  ;;  %v5983_v61 = vld [vmem:[%s8583_s1 + $0x3e0] ss:$8 sps:$4 sm:$0xff]   ;;  %v5994_v62 = vld [vmem:[%s8583_s1 + $0x2d4] ss:$8 sps:$4 sm:$0xff]  }
  0x48   : > { %3710 = vmatprep.subr.bf16.mxu1 %v5892_v63  ;;  %v5997_v63 = vld [vmem:[%s8583_s1 + $0x3d4] ss:$8 sps:$4 sm:$0xff]  }
  0x4a   : > { %3598 = vmatpush2.bf16.msra.mxu0 %v5894_v0  ;;  %v5990_v0 = vld [vmem:[%s6803_s24 + $0x370] ss:$88 sps:$4 sm:$0xff]  }
  0x4b   : > { %3711 = vmatpush2.bf16.msra.mxu1 %v5895_v1  ;;  %3793 = vmatprep.subr.bf16.mxu0 %v5904_v2  ;;  %v5991_v1 = vld [vmem:[%s6803_s24 + $0x378] ss:$88 sps:$4 sm:$0xff]  }
  0x4c   : > { %3906 = vmatprep.subr.bf16.mxu1 %v5907_v3  ;;  %v5992_v2 = vld [vmem:[%s8583_s1 + $0x2d0] ss:$8 sps:$4 sm:$0xff]  }
  0x4d   : > { %3600 = vmatmul.mubr.bf16.vlgmr.msra.gmra.mxu0 %v5896_v4  ;;  %v5995_v3 = vld [vmem:[%s8583_s1 + $0x3d0] ss:$8 sps:$4 sm:$0xff]   ;;  %v6000_v4 = vld [vmem:[%s8583_s1 + $0x2c4] ss:$8 sps:$4 sm:$0xff]  }
  0x4e   : > { %3713 = vmatmul.mubr.bf16.vlgmr.msra.gmra.mxu1 %v5899_v5  ;;  %3794 = vmatpush1.bf16.msra.mxu0 %v5902_v6  ;;  %v6003_v5 = vld [vmem:[%s8583_s1 + $0x3c4] ss:$8 sps:$4 sm:$0xff]  }
  0x4f   : > { %3907 = vmatpush1.bf16.msra.mxu1 %v5905_v7  ;;  %3795 = vmatprep.subr.bf16.mxu0 %v5910_v8  ;;  %v6004_v6 = vld [vmem:[%s6803_s24 + $0x424] ss:$88 sps:$4 sm:$0xff]   ;;  %v5998_v8 = vld [vmem:[%s8583_s1 + $0x2c0] ss:$8 sps:$4 sm:$0xff]  }
  0x50   : > { %3908 = vmatprep.subr.bf16.mxu1 %v5913_v9  ;;  %3609 = vmatprep.mubr.bf16.mxu0 %v5914_v10  ;;  %v6006_v7 = vld [vmem:[%s6803_s24 + $0x42c] ss:$88 sps:$4 sm:$0xff]   ;;  %v6001_v9 = vld [vmem:[%s8583_s1 + $0x3c0] ss:$8 sps:$4 sm:$0xff]   ;;  %v6012_v10 = vld [vmem:[%s8583_s1 + $0x2b4] ss:$8 sps:$4 sm:$0xff]  }
  0x51   : > { %3722 = vmatprep.mubr.bf16.mxu1 %v5916_v11  ;;  %v6015_v11 = vld [vmem:[%s8583_s1 + $0x3b4] ss:$8 sps:$4 sm:$0xff]  }
  0x52   : > { %3796 = vmatpush1.bf16.msra.mxu0 %v5908_v12  ;;  %v6008_v12 = vld [vmem:[%s6803_s24 + $0x420] ss:$88 sps:$4 sm:$0xff]  }
  0x53   : > { %3909 = vmatpush1.bf16.msra.mxu1 %v5911_v13  ;;  %3797 = vmatprep.subr.bf16.mxu0 %v5922_v14  ;;  %v6009_v13 = vld [vmem:[%s6803_s24 + $0x428] ss:$88 sps:$4 sm:$0xff]   ;;  %v6010_v14 = vld [vmem:[%s8583_s1 + $0x2b0] ss:$8 sps:$4 sm:$0xff]  }
  0x54   : > { %3910 = vmatprep.subr.bf16.mxu1 %v5925_v15  ;;  %v6013_v15 = vld [vmem:[%s8583_s1 + $0x3b0] ss:$8 sps:$4 sm:$0xff]  }
  0x55   : > { %3610 = vmatmul.mubr.bf16.gmra.mxu0 %v5918_v16  ;;  %v6018_v16 = vld [vmem:[%s8583_s1 + $0x2a4] ss:$8 sps:$4 sm:$0xff]  }
  0x56   : > { %3723 = vmatmul.mubr.bf16.gmra.mxu1 %v5919_v17  ;;  %3798 = vmatpush1.bf16.msra.mxu0 %v5920_v18  ;;  %v6021_v17 = vld [vmem:[%s8583_s1 + $0x3a4] ss:$8 sps:$4 sm:$0xff]  }
  0x57   : > { %3911 = vmatpush1.bf16.msra.mxu1 %v5923_v19  ;;  %3799 = vmatprep.subr.bf16.mxu0 %v5928_v20  ;;  %v6022_v18 = vld [vmem:[%s6803_s24 + $0x4d4] ss:$88 sps:$4 sm:$0xff]   ;;  %v6016_v20 = vld [vmem:[%s8583_s1 + $0x2a0] ss:$8 sps:$4 sm:$0xff]  }
  0x58   : > { %3912 = vmatprep.subr.bf16.mxu1 %v5931_v21  ;;  %3619 = vmatprep.mubr.bf16.mxu0 %v5932_v22  ;;  %v6024_v19 = vld [vmem:[%s6803_s24 + $0x4dc] ss:$88 sps:$4 sm:$0xff]   ;;  %v6019_v21 = vld [vmem:[%s8583_s1 + $0x3a0] ss:$8 sps:$4 sm:$0xff]  }
  0x59   : > { %3732 = vmatprep.mubr.bf16.mxu1 %v5934_v23  ;;  %v6030_v22 = vld [vmem:[%s8583_s1 + $0x294] ss:$8 sps:$4 sm:$0xff]  }
  0x5a   : > { %3800 = vmatpush1.bf16.msra.mxu0 %v5926_v24  ;;  %v6033_v23 = vld [vmem:[%s8583_s1 + $0x394] ss:$8 sps:$4 sm:$0xff]   ;;  %v6026_v24 = vld [vmem:[%s6803_s24 + $0x4d0] ss:$88 sps:$4 sm:$0xff]  }
  0x5b   : > { %3913 = vmatpush1.bf16.msra.mxu1 %v5929_v25  ;;  %3801 = vmatprep.subr.bf16.mxu0 %v5940_v26  ;;  %v6027_v25 = vld [vmem:[%s6803_s24 + $0x4d8] ss:$88 sps:$4 sm:$0xff]  }
  0x5c   : > { %3914 = vmatprep.subr.bf16.mxu1 %v5943_v27  ;;  %v6028_v26 = vld [vmem:[%s8583_s1 + $0x290] ss:$8 sps:$4 sm:$0xff]  }
  0x5d   : > { %3620 = vmatmul.mubr.bf16.gmra.mxu0 %v5936_v28  ;;  %v6031_v27 = vld [vmem:[%s8583_s1 + $0x390] ss:$8 sps:$4 sm:$0xff]   ;;  %v6036_v28 = vld [vmem:[%s8583_s1 + $0x284] ss:$8 sps:$4 sm:$0xff]  }
  0x5e   : > { %3733 = vmatmul.mubr.bf16.gmra.mxu1 %v5937_v29  ;;  %3802 = vmatpush1.bf16.msra.mxu0 %v5938_v30  ;;  %v6039_v29 = vld [vmem:[%s8583_s1 + $0x384] ss:$8 sps:$4 sm:$0xff]  }
  0x5f   : > { %3915 = vmatpush1.bf16.msra.mxu1 %v5941_v31  ;;  %3803 = vmatprep.subr.bf16.mxu0 %v5946_v32  ;;  %v6042_v30 = vld [vmem:[%s6803_s24 + $0x14] ss:$88 sps:$4 sm:$0xff]   ;;  %v6034_v32 = vld [vmem:[%s8583_s1 + $0x280] ss:$8 sps:$4 sm:$0xff]  }
  0x60   : > { %3916 = vmatprep.subr.bf16.mxu1 %v5949_v33  ;;  %3629 = vmatprep.mubr.bf16.mxu0 %v5950_v34  ;;  %v6045_v31 = vld [vmem:[%s6803_s24 + $0x1c] ss:$88 sps:$4 sm:$0xff]   ;;  %v6037_v33 = vld [vmem:[%s8583_s1 + $0x380] ss:$8 sps:$4 sm:$0xff]  }
  0x61   : > { %3742 = vmatprep.mubr.bf16.mxu1 %v5952_v35  ;;  %v6048_v34 = vld [vmem:[%s8583_s1 + $0x474] ss:$8 sps:$4 sm:$0xff]  }
  0x62   : > { %3804 = vmatpush1.bf16.msra.mxu0 %v5944_v36  ;;  %v6051_v35 = vld [vmem:[%s8583_s1 + $0x574] ss:$8 sps:$4 sm:$0xff]   ;;  %v6040_v36 = vld [vmem:[%s6803_s24 + $0x10] ss:$88 sps:$4 sm:$0xff]  }
  0x63   : > { %3917 = vmatpush1.bf16.msra.mxu1 %v5947_v37  ;;  %3805 = vmatprep.subr.bf16.mxu0 %v5958_v38  ;;  %v6043_v37 = vld [vmem:[%s6803_s24 + $0x18] ss:$88 sps:$4 sm:$0xff]  }
  0x64   : > { %3918 = vmatprep.subr.bf16.mxu1 %v5961_v39  ;;  %v6046_v38 = vld [vmem:[%s8583_s1 + $0x470] ss:$8 sps:$4 sm:$0xff]  }
  0x65   : > { %3630 = vmatmul.mubr.bf16.gmra.mxu0 %v5954_v40  ;;  %v6049_v39 = vld [vmem:[%s8583_s1 + $0x570] ss:$8 sps:$4 sm:$0xff]   ;;  %v6054_v40 = vld [vmem:[%s8583_s1 + $0x464] ss:$8 sps:$4 sm:$0xff]  }
  0x66   : > { %3743 = vmatmul.mubr.bf16.gmra.mxu1 %v5955_v41  ;;  %3806 = vmatpush1.bf16.msra.mxu0 %v5956_v42  ;;  %v6057_v41 = vld [vmem:[%s8583_s1 + $0x564] ss:$8 sps:$4 sm:$0xff]  }
  0x67   : > { %3919 = vmatpush1.bf16.msra.mxu1 %v5959_v43  ;;  %3807 = vmatprep.subr.bf16.mxu0 %v5964_v44  ;;  %v6058_v42 = vld [vmem:[%s6803_s24 + $0xc4] ss:$88 sps:$4 sm:$0xff]   ;;  %v6052_v44 = vld [vmem:[%s8583_s1 + $0x460] ss:$8 sps:$4 sm:$0xff]  }
  0x68   : > { %3920 = vmatprep.subr.bf16.mxu1 %v5967_v45  ;;  %3639 = vmatprep.mubr.bf16.mxu0 %v5968_v46  ;;  %v6060_v43 = vld [vmem:[%s6803_s24 + $0xcc] ss:$88 sps:$4 sm:$0xff]   ;;  %v6055_v45 = vld [vmem:[%s8583_s1 + $0x560] ss:$8 sps:$4 sm:$0xff]   ;;  %v6066_v46 = vld [vmem:[%s8583_s1 + $0x454] ss:$8 sps:$4 sm:$0xff]  }
  0x69   : > { %3752 = vmatprep.mubr.bf16.mxu1 %v5970_v47  ;;  %v6069_v47 = vld [vmem:[%s8583_s1 + $0x554] ss:$8 sps:$4 sm:$0xff]  }
  0x6a   : > { %3808 = vmatpush1.bf16.msra.mxu0 %v5962_v48  ;;  %v6062_v48 = vld [vmem:[%s6803_s24 + $0xc0] ss:$88 sps:$4 sm:$0xff]  }
  0x6b   : > { %3921 = vmatpush1.bf16.msra.mxu1 %v5965_v49  ;;  %3809 = vmatprep.subr.bf16.mxu0 %v5976_v50  ;;  %v6063_v49 = vld [vmem:[%s6803_s24 + $0xc8] ss:$88 sps:$4 sm:$0xff]   ;;  %v6064_v50 = vld [vmem:[%s8583_s1 + $0x450] ss:$8 sps:$4 sm:$0xff]  }
  0x6c   : > { %3922 = vmatprep.subr.bf16.mxu1 %v5979_v51  ;;  %v6067_v51 = vld [vmem:[%s8583_s1 + $0x550] ss:$8 sps:$4 sm:$0xff]  }
  0x6d   : > { %3640 = vmatmul.mubr.bf16.gmra.mxu0 %v5972_v52  ;;  %v6072_v52 = vld [vmem:[%s8583_s1 + $0x444] ss:$8 sps:$4 sm:$0xff]  }
  0x6e   : > { %3753 = vmatmul.mubr.bf16.gmra.mxu1 %v5973_v53  ;;  %3810 = vmatpush2.bf16.msra.mxu0 %v5974_v54  ;;  %v6075_v53 = vld [vmem:[%s8583_s1 + $0x544] ss:$8 sps:$4 sm:$0xff]  }
  0x6f   : > { %3923 = vmatpush2.bf16.msra.mxu1 %v5977_v55  ;;  %3811 = vmatprep.subr.bf16.mxu0 %v5982_v56  ;;  %v6076_v54 = vld [vmem:[%s6803_s24 + $0x174] ss:$88 sps:$4 sm:$0xff]   ;;  %v6070_v56 = vld [vmem:[%s8583_s1 + $0x440] ss:$8 sps:$4 sm:$0xff]  }
  0x70   : > { %3924 = vmatprep.subr.bf16.mxu1 %v5985_v57  ;;  %3649 = vmatprep.mubr.bf16.mxu0 %v5986_v58  ;;  %v6078_v55 = vld [vmem:[%s6803_s24 + $0x17c] ss:$88 sps:$4 sm:$0xff]   ;;  %v6073_v57 = vld [vmem:[%s8583_s1 + $0x540] ss:$8 sps:$4 sm:$0xff]  }
  0x71   : > { %3762 = vmatprep.mubr.bf16.mxu1 %v5988_v59  ;;  %v6084_v58 = vld [vmem:[%s8583_s1 + $0x434] ss:$8 sps:$4 sm:$0xff]  }
  0x72   : > { %3812 = vmatpush2.bf16.msra.mxu0 %v5980_v60  ;;  %v6087_v59 = vld [vmem:[%s8583_s1 + $0x534] ss:$8 sps:$4 sm:$0xff]   ;;  %v6080_v60 = vld [vmem:[%s6803_s24 + $0x170] ss:$88 sps:$4 sm:$0xff]  }
  0x73   : > { %3925 = vmatpush2.bf16.msra.mxu1 %v5983_v61  ;;  %3813 = vmatprep.subr.bf16.mxu0 %v5994_v62  ;;  %v6081_v61 = vld [vmem:[%s6803_s24 + $0x178] ss:$88 sps:$4 sm:$0xff]  }
  0x74   : > { %3926 = vmatprep.subr.bf16.mxu1 %v5997_v63  ;;  %v6082_v62 = vld [vmem:[%s8583_s1 + $0x430] ss:$8 sps:$4 sm:$0xff]  }
  0x75   : > { %3650 = vmatmul.mubr.bf16.gmra.mxu0 %v5990_v0  ;;  %v6085_v63 = vld [vmem:[%s8583_s1 + $0x530] ss:$8 sps:$4 sm:$0xff]   ;;  %v6090_v0 = vld [vmem:[%s8583_s1 + $0x424] ss:$8 sps:$4 sm:$0xff]  }
  0x76   : > { %3763 = vmatmul.mubr.bf16.gmra.mxu1 %v5991_v1  ;;  %3814 = vmatpush2.bf16.msra.mxu0 %v5992_v2  ;;  %v6093_v1 = vld [vmem:[%s8583_s1 + $0x524] ss:$8 sps:$4 sm:$0xff]  }
  0x77   : > { %3927 = vmatpush2.bf16.msra.mxu1 %v5995_v3  ;;  %3815 = vmatprep.subr.bf16.mxu0 %v6000_v4  ;;  %v6094_v2 = vld [vmem:[%s6803_s24 + $0x224] ss:$88 sps:$4 sm:$0xff]   ;;  %v6088_v4 = vld [vmem:[%s8583_s1 + $0x420] ss:$8 sps:$4 sm:$0xff]  }
  0x78   : > { %3928 = vmatprep.subr.bf16.mxu1 %v6003_v5  ;;  %3659 = vmatprep.mubr.bf16.mxu0 %v6004_v6  ;;  %v6096_v3 = vld [vmem:[%s6803_s24 + $0x22c] ss:$88 sps:$4 sm:$0xff]   ;;  %v6091_v5 = vld [vmem:[%s8583_s1 + $0x520] ss:$8 sps:$4 sm:$0xff]   ;;  %v6102_v6 = vld [vmem:[%s8583_s1 + $0x414] ss:$8 sps:$4 sm:$0xff]  }
  0x79   : > { %3772 = vmatprep.mubr.bf16.mxu1 %v6006_v7  ;;  %v6105_v7 = vld [vmem:[%s8583_s1 + $0x514] ss:$8 sps:$4 sm:$0xff]  }
  0x7a   : > { %3816 = vmatpush2.bf16.msra.mxu0 %v5998_v8  ;;  %v6098_v8 = vld [vmem:[%s6803_s24 + $0x220] ss:$88 sps:$4 sm:$0xff]  }
  0x7b   : > { %3929 = vmatpush2.bf16.msra.mxu1 %v6001_v9  ;;  %3817 = vmatprep.subr.bf16.mxu0 %v6012_v10  ;;  %v6099_v9 = vld [vmem:[%s6803_s24 + $0x228] ss:$88 sps:$4 sm:$0xff]   ;;  %v6100_v10 = vld [vmem:[%s8583_s1 + $0x410] ss:$8 sps:$4 sm:$0xff]  }
  0x7c   : > { %3930 = vmatprep.subr.bf16.mxu1 %v6015_v11  ;;  %v6103_v11 = vld [vmem:[%s8583_s1 + $0x510] ss:$8 sps:$4 sm:$0xff]  }
  0x7d   : > { %3660 = vmatmul.mubr.bf16.gmra.mxu0 %v6008_v12  ;;  %v6108_v12 = vld [vmem:[%s8583_s1 + $0x404] ss:$8 sps:$4 sm:$0xff]  }
  0x7e   : > { %3773 = vmatmul.mubr.bf16.gmra.mxu1 %v6009_v13  ;;  %3818 = vmatpush2.bf16.msra.mxu0 %v6010_v14  ;;  %v6111_v13 = vld [vmem:[%s8583_s1 + $0x504] ss:$8 sps:$4 sm:$0xff]  }
  0x7f   : > { %3931 = vmatpush2.bf16.msra.mxu1 %v6013_v15  ;;  %3819 = vmatprep.subr.bf16.mxu0 %v6018_v16  ;;  %v6112_v14 = vld [vmem:[%s6803_s24 + $0x2d4] ss:$88 sps:$4 sm:$0xff]   ;;  %v6106_v16 = vld [vmem:[%s8583_s1 + $0x400] ss:$8 sps:$4 sm:$0xff]  }
  0x80   : > { %3932 = vmatprep.subr.bf16.mxu1 %v6021_v17  ;;  %3669 = vmatprep.mubr.bf16.mxu0 %v6022_v18  ;;  %v6114_v15 = vld [vmem:[%s6803_s24 + $0x2dc] ss:$88 sps:$4 sm:$0xff]   ;;  %v6109_v17 = vld [vmem:[%s8583_s1 + $0x500] ss:$8 sps:$4 sm:$0xff]  }
  0x81   : > { %3782 = vmatprep.mubr.bf16.mxu1 %v6024_v19  ;;  %v6120_v18 = vld [vmem:[%s8583_s1 + $0x4f4] ss:$8 sps:$4 sm:$0xff]  }
  0x82   : > { %3820 = vmatpush2.bf16.msra.mxu0 %v6016_v20  ;;  %v6123_v19 = vld [vmem:[%s8583_s1 + $0x5f4] ss:$8 sps:$4 sm:$0xff]   ;;  %v6116_v20 = vld [vmem:[%s6803_s24 + $0x2d0] ss:$88 sps:$4 sm:$0xff]  }
  0x83   : > { %3933 = vmatpush2.bf16.msra.mxu1 %v6019_v21  ;;  %3821 = vmatprep.subr.bf16.mxu0 %v6030_v22  ;;  %v6117_v21 = vld [vmem:[%s6803_s24 + $0x2d8] ss:$88 sps:$4 sm:$0xff]  }
  0x84   : > { %3934 = vmatprep.subr.bf16.mxu1 %v6033_v23  ;;  %v6118_v22 = vld [vmem:[%s8583_s1 + $0x4f0] ss:$8 sps:$4 sm:$0xff]  }
  0x85   : > { %3670 = vmatmul.mubr.bf16.gmra.mxu0 %v6026_v24  ;;  %v6121_v23 = vld [vmem:[%s8583_s1 + $0x5f0] ss:$8 sps:$4 sm:$0xff]   ;;  %v6126_v24 = vld [vmem:[%s8583_s1 + $0x4e4] ss:$8 sps:$4 sm:$0xff]  }
  0x86   : > { %3783 = vmatmul.mubr.bf16.gmra.mxu1 %v6027_v25  ;;  %3822 = vmatpush2.bf16.msra.mxu0 %v6028_v26  ;;  %v6129_v25 = vld [vmem:[%s8583_s1 + $0x5e4] ss:$8 sps:$4 sm:$0xff]  }
  0x87   : > { %3935 = vmatpush2.bf16.msra.mxu1 %v6031_v27  ;;  %3823 = vmatprep.subr.bf16.mxu0 %v6036_v28  ;;  %v6130_v26 = vld [vmem:[%s6803_s24 + $0x384] ss:$88 sps:$4 sm:$0xff]   ;;  %v6124_v28 = vld [vmem:[%s8583_s1 + $0x4e0] ss:$8 sps:$4 sm:$0xff]  }
  0x88   : > { %3936 = vmatprep.subr.bf16.mxu1 %v6039_v29  ;;  %3825 = vmatprep.mubr.bf16.mxu0 %v6042_v30  ;;  %v6132_v27 = vld [vmem:[%s6803_s24 + $0x38c] ss:$88 sps:$4 sm:$0xff]   ;;  %v6127_v29 = vld [vmem:[%s8583_s1 + $0x5e0] ss:$8 sps:$4 sm:$0xff]   ;;  %v6138_v30 = vld [vmem:[%s8583_s1 + $0x4d4] ss:$8 sps:$4 sm:$0xff]  }
  0x89   : > { %3938 = vmatprep.mubr.bf16.mxu1 %v6045_v31  ;;  %v6141_v31 = vld [vmem:[%s8583_s1 + $0x5d4] ss:$8 sps:$4 sm:$0xff]  }
  0x8a   : > { %3824 = vmatpush2.bf16.msra.mxu0 %v6034_v32  ;;  %v6134_v32 = vld [vmem:[%s6803_s24 + $0x380] ss:$88 sps:$4 sm:$0xff]  }
  0x8b   : > { %3937 = vmatpush2.bf16.msra.mxu1 %v6037_v33  ;;  %4019 = vmatprep.subr.bf16.mxu0 %v6048_v34  ;;  %v6135_v33 = vld [vmem:[%s6803_s24 + $0x388] ss:$88 sps:$4 sm:$0xff]   ;;  %v6136_v34 = vld [vmem:[%s8583_s1 + $0x4d0] ss:$8 sps:$4 sm:$0xff]  }
  0x8c   : > { %4132 = vmatprep.subr.bf16.mxu1 %v6051_v35  ;;  %v6139_v35 = vld [vmem:[%s8583_s1 + $0x5d0] ss:$8 sps:$4 sm:$0xff]  }
  0x8d   : > { %3826 = vmatmul.mubr.bf16.vlgmr.msra.gmra.mxu0 %v6040_v36  ;;  %v6144_v36 = vld [vmem:[%s8583_s1 + $0x4c4] ss:$8 sps:$4 sm:$0xff]  }
  0x8e   : > { %3939 = vmatmul.mubr.bf16.vlgmr.msra.gmra.mxu1 %v6043_v37  ;;  %4020 = vmatpush1.bf16.msra.mxu0 %v6046_v38  ;;  %v6147_v37 = vld [vmem:[%s8583_s1 + $0x5c4] ss:$8 sps:$4 sm:$0xff]  }
  0x8f   : > { %4133 = vmatpush1.bf16.msra.mxu1 %v6049_v39  ;;  %4021 = vmatprep.subr.bf16.mxu0 %v6054_v40  ;;  %v6148_v38 = vld [vmem:[%s6803_s24 + $0x434] ss:$88 sps:$4 sm:$0xff]   ;;  %v6142_v40 = vld [vmem:[%s8583_s1 + $0x4c0] ss:$8 sps:$4 sm:$0xff]  }
  0x90   : > { %4134 = vmatprep.subr.bf16.mxu1 %v6057_v41  ;;  %3835 = vmatprep.mubr.bf16.mxu0 %v6058_v42  ;;  %v6150_v39 = vld [vmem:[%s6803_s24 + $0x43c] ss:$88 sps:$4 sm:$0xff]   ;;  %v6145_v41 = vld [vmem:[%s8583_s1 + $0x5c0] ss:$8 sps:$4 sm:$0xff]  }
  0x91   : > { %3948 = vmatprep.mubr.bf16.mxu1 %v6060_v43  ;;  %v6156_v42 = vld [vmem:[%s8583_s1 + $0x4b4] ss:$8 sps:$4 sm:$0xff]  }
  0x92   : > { %4022 = vmatpush1.bf16.msra.mxu0 %v6052_v44  ;;  %v6159_v43 = vld [vmem:[%s8583_s1 + $0x5b4] ss:$8 sps:$4 sm:$0xff]   ;;  %v6152_v44 = vld [vmem:[%s6803_s24 + $0x430] ss:$88 sps:$4 sm:$0xff]  }
  0x93   : > { %4135 = vmatpush1.bf16.msra.mxu1 %v6055_v45  ;;  %4023 = vmatprep.subr.bf16.mxu0 %v6066_v46  ;;  %v6153_v45 = vld [vmem:[%s6803_s24 + $0x438] ss:$88 sps:$4 sm:$0xff]  }
  0x94   : > { %4136 = vmatprep.subr.bf16.mxu1 %v6069_v47  ;;  %v6154_v46 = vld [vmem:[%s8583_s1 + $0x4b0] ss:$8 sps:$4 sm:$0xff]  }
  0x95   : > { %3836 = vmatmul.mubr.bf16.gmra.mxu0 %v6062_v48  ;;  %v6157_v47 = vld [vmem:[%s8583_s1 + $0x5b0] ss:$8 sps:$4 sm:$0xff]   ;;  %v6162_v48 = vld [vmem:[%s8583_s1 + $0x4a4] ss:$8 sps:$4 sm:$0xff]  }
  0x96   : > { %3949 = vmatmul.mubr.bf16.gmra.mxu1 %v6063_v49  ;;  %4024 = vmatpush1.bf16.msra.mxu0 %v6064_v50  ;;  %v6165_v49 = vld [vmem:[%s8583_s1 + $0x5a4] ss:$8 sps:$4 sm:$0xff]  }
  0x97   : > { %4137 = vmatpush1.bf16.msra.mxu1 %v6067_v51  ;;  %4025 = vmatprep.subr.bf16.mxu0 %v6072_v52  ;;  %v6166_v50 = vld [vmem:[%s6803_s24 + $0x4e4] ss:$88 sps:$4 sm:$0xff]   ;;  %v6160_v52 = vld [vmem:[%s8583_s1 + $0x4a0] ss:$8 sps:$4 sm:$0xff]  }
  0x98   : > { %4138 = vmatprep.subr.bf16.mxu1 %v6075_v53  ;;  %3845 = vmatprep.mubr.bf16.mxu0 %v6076_v54  ;;  %v6168_v51 = vld [vmem:[%s6803_s24 + $0x4ec] ss:$88 sps:$4 sm:$0xff]   ;;  %v6163_v53 = vld [vmem:[%s8583_s1 + $0x5a0] ss:$8 sps:$4 sm:$0xff]   ;;  %v6174_v54 = vld [vmem:[%s8583_s1 + $0x494] ss:$8 sps:$4 sm:$0xff]  }
  0x99   : > { %3958 = vmatprep.mubr.bf16.mxu1 %v6078_v55  ;;  %v6177_v55 = vld [vmem:[%s8583_s1 + $0x594] ss:$8 sps:$4 sm:$0xff]  }
  0x9a   : > { %4026 = vmatpush1.bf16.msra.mxu0 %v6070_v56  ;;  %v6170_v56 = vld [vmem:[%s6803_s24 + $0x4e0] ss:$88 sps:$4 sm:$0xff]  }
  0x9b   : > { %4139 = vmatpush1.bf16.msra.mxu1 %v6073_v57  ;;  %4027 = vmatprep.subr.bf16.mxu0 %v6084_v58  ;;  %v6171_v57 = vld [vmem:[%s6803_s24 + $0x4e8] ss:$88 sps:$4 sm:$0xff]   ;;  %v6172_v58 = vld [vmem:[%s8583_s1 + $0x490] ss:$8 sps:$4 sm:$0xff]  }
  0x9c   : > { %4140 = vmatprep.subr.bf16.mxu1 %v6087_v59  ;;  %v6175_v59 = vld [vmem:[%s8583_s1 + $0x590] ss:$8 sps:$4 sm:$0xff]  }
  0x9d   : > { %3846 = vmatmul.mubr.bf16.gmra.mxu0 %v6080_v60  ;;  %v6180_v60 = vld [vmem:[%s8583_s1 + $0x484] ss:$8 sps:$4 sm:$0xff]  }
  0x9e   : > { %3959 = vmatmul.mubr.bf16.gmra.mxu1 %v6081_v61  ;;  %4028 = vmatpush1.bf16.msra.mxu0 %v6082_v62  ;;  %v6183_v61 = vld [vmem:[%s8583_s1 + $0x584] ss:$8 sps:$4 sm:$0xff]  }
  0x9f   : > { %4141 = vmatpush1.bf16.msra.mxu1 %v6085_v63  ;;  %4029 = vmatprep.subr.bf16.mxu0 %v6090_v0  ;;  %v6186_v62 = vld [vmem:[%s6803_s24 + $0x24] ss:$88 sps:$4 sm:$0xff]   ;;  %v6178_v0 = vld [vmem:[%s8583_s1 + $0x480] ss:$8 sps:$4 sm:$0xff]  }
  0xa0   : > { %4142 = vmatprep.subr.bf16.mxu1 %v6093_v1  ;;  %3855 = vmatprep.mubr.bf16.mxu0 %v6094_v2  ;;  %v6189_v63 = vld [vmem:[%s6803_s24 + $0x2c] ss:$88 sps:$4 sm:$0xff]   ;;  %v6181_v1 = vld [vmem:[%s8583_s1 + $0x580] ss:$8 sps:$4 sm:$0xff]   ;;  %v6192_v2 = vld [vmem:[%s8583_s1 + $0x674] ss:$8 sps:$4 sm:$0xff]  }
  0xa1   : > { %3968 = vmatprep.mubr.bf16.mxu1 %v6096_v3  ;;  %v6195_v3 = vld [vmem:[%s8583_s1 + $0x774] ss:$8 sps:$4 sm:$0xff]  }
  0xa2   : > { %4030 = vmatpush1.bf16.msra.mxu0 %v6088_v4  ;;  %v6184_v4 = vld [vmem:[%s6803_s24 + $0x20] ss:$88 sps:$4 sm:$0xff]  }
  0xa3   : > { %4143 = vmatpush1.bf16.msra.mxu1 %v6091_v5  ;;  %4031 = vmatprep.subr.bf16.mxu0 %v6102_v6  ;;  %v6187_v5 = vld [vmem:[%s6803_s24 + $0x28] ss:$88 sps:$4 sm:$0xff]   ;;  %v6190_v6 = vld [vmem:[%s8583_s1 + $0x670] ss:$8 sps:$4 sm:$0xff]  }
  0xa4   : > { %4144 = vmatprep.subr.bf16.mxu1 %v6105_v7  ;;  %v6193_v7 = vld [vmem:[%s8583_s1 + $0x770] ss:$8 sps:$4 sm:$0xff]  }
  0xa5   : > { %3856 = vmatmul.mubr.bf16.gmra.mxu0 %v6098_v8  ;;  %v6198_v8 = vld [vmem:[%s8583_s1 + $0x664] ss:$8 sps:$4 sm:$0xff]  }
  0xa6   : > { %3969 = vmatmul.mubr.bf16.gmra.mxu1 %v6099_v9  ;;  %4032 = vmatpush1.bf16.msra.mxu0 %v6100_v10  ;;  %v6201_v9 = vld [vmem:[%s8583_s1 + $0x764] ss:$8 sps:$4 sm:$0xff]  }
  0xa7   : > { %4145 = vmatpush1.bf16.msra.mxu1 %v6103_v11  ;;  %4033 = vmatprep.subr.bf16.mxu0 %v6108_v12  ;;  %v6202_v10 = vld [vmem:[%s6803_s24 + $0xd4] ss:$88 sps:$4 sm:$0xff]   ;;  %v6196_v12 = vld [vmem:[%s8583_s1 + $0x660] ss:$8 sps:$4 sm:$0xff]  }
  0xa8   : > { %4146 = vmatprep.subr.bf16.mxu1 %v6111_v13  ;;  %3865 = vmatprep.mubr.bf16.mxu0 %v6112_v14  ;;  %v6204_v11 = vld [vmem:[%s6803_s24 + $0xdc] ss:$88 sps:$4 sm:$0xff]   ;;  %v6199_v13 = vld [vmem:[%s8583_s1 + $0x760] ss:$8 sps:$4 sm:$0xff]  }
  0xa9   : > { %3978 = vmatprep.mubr.bf16.mxu1 %v6114_v15  ;;  %v6210_v14 = vld [vmem:[%s8583_s1 + $0x654] ss:$8 sps:$4 sm:$0xff]  }
  0xaa   : > { %4034 = vmatpush1.bf16.msra.mxu0 %v6106_v16  ;;  %v6213_v15 = vld [vmem:[%s8583_s1 + $0x754] ss:$8 sps:$4 sm:$0xff]   ;;  %v6206_v16 = vld [vmem:[%s6803_s24 + $0xd0] ss:$88 sps:$4 sm:$0xff]  }
  0xab   : > { %4147 = vmatpush1.bf16.msra.mxu1 %v6109_v17  ;;  %4035 = vmatprep.subr.bf16.mxu0 %v6120_v18  ;;  %v6207_v17 = vld [vmem:[%s6803_s24 + $0xd8] ss:$88 sps:$4 sm:$0xff]  }
  0xac   : > { %4148 = vmatprep.subr.bf16.mxu1 %v6123_v19  ;;  %v6208_v18 = vld [vmem:[%s8583_s1 + $0x650] ss:$8 sps:$4 sm:$0xff]  }
  0xad   : > { %3866 = vmatmul.mubr.bf16.gmra.mxu0 %v6116_v20  ;;  %v6211_v19 = vld [vmem:[%s8583_s1 + $0x750] ss:$8 sps:$4 sm:$0xff]   ;;  %v6216_v20 = vld [vmem:[%s8583_s1 + $0x644] ss:$8 sps:$4 sm:$0xff]  }
  0xae   : > { %3979 = vmatmul.mubr.bf16.gmra.mxu1 %v6117_v21  ;;  %4036 = vmatpush2.bf16.msra.mxu0 %v6118_v22  ;;  %v6219_v21 = vld [vmem:[%s8583_s1 + $0x744] ss:$8 sps:$4 sm:$0xff]  }
  0xaf   : > { %4149 = vmatpush2.bf16.msra.mxu1 %v6121_v23  ;;  %4037 = vmatprep.subr.bf16.mxu0 %v6126_v24  ;;  %v6220_v22 = vld [vmem:[%s6803_s24 + $0x184] ss:$88 sps:$4 sm:$0xff]   ;;  %v6214_v24 = vld [vmem:[%s8583_s1 + $0x640] ss:$8 sps:$4 sm:$0xff]  }
  0xb0   : > { %4150 = vmatprep.subr.bf16.mxu1 %v6129_v25  ;;  %3875 = vmatprep.mubr.bf16.mxu0 %v6130_v26  ;;  %v6222_v23 = vld [vmem:[%s6803_s24 + $0x18c] ss:$88 sps:$4 sm:$0xff]   ;;  %v6217_v25 = vld [vmem:[%s8583_s1 + $0x740] ss:$8 sps:$4 sm:$0xff]   ;;  %v6228_v26 = vld [vmem:[%s8583_s1 + $0x634] ss:$8 sps:$4 sm:$0xff]  }
  0xb1   : > { %3988 = vmatprep.mubr.bf16.mxu1 %v6132_v27  ;;  %v6231_v27 = vld [vmem:[%s8583_s1 + $0x734] ss:$8 sps:$4 sm:$0xff]  }
  0xb2   : > { %4038 = vmatpush2.bf16.msra.mxu0 %v6124_v28  ;;  %v6224_v28 = vld [vmem:[%s6803_s24 + $0x180] ss:$88 sps:$4 sm:$0xff]  }
  0xb3   : > { %4151 = vmatpush2.bf16.msra.mxu1 %v6127_v29  ;;  %4039 = vmatprep.subr.bf16.mxu0 %v6138_v30  ;;  %v6225_v29 = vld [vmem:[%s6803_s24 + $0x188] ss:$88 sps:$4 sm:$0xff]   ;;  %v6226_v30 = vld [vmem:[%s8583_s1 + $0x630] ss:$8 sps:$4 sm:$0xff]  }
  0xb4   : > { %4152 = vmatprep.subr.bf16.mxu1 %v6141_v31  ;;  %v6229_v31 = vld [vmem:[%s8583_s1 + $0x730] ss:$8 sps:$4 sm:$0xff]  }
  0xb5   : > { %3876 = vmatmul.mubr.bf16.gmra.mxu0 %v6134_v32  ;;  %v6234_v32 = vld [vmem:[%s8583_s1 + $0x624] ss:$8 sps:$4 sm:$0xff]  }
  0xb6   : > { %3989 = vmatmul.mubr.bf16.gmra.mxu1 %v6135_v33  ;;  %4040 = vmatpush2.bf16.msra.mxu0 %v6136_v34  ;;  %v6237_v33 = vld [vmem:[%s8583_s1 + $0x724] ss:$8 sps:$4 sm:$0xff]  }
  0xb7   : > { %4153 = vmatpush2.bf16.msra.mxu1 %v6139_v35  ;;  %4041 = vmatprep.subr.bf16.mxu0 %v6144_v36  ;;  %v6238_v34 = vld [vmem:[%s6803_s24 + $0x234] ss:$88 sps:$4 sm:$0xff]   ;;  %v6232_v36 = vld [vmem:[%s8583_s1 + $0x620] ss:$8 sps:$4 sm:$0xff]  }
  0xb8   : > { %4154 = vmatprep.subr.bf16.mxu1 %v6147_v37  ;;  %3885 = vmatprep.mubr.bf16.mxu0 %v6148_v38  ;;  %v6240_v35 = vld [vmem:[%s6803_s24 + $0x23c] ss:$88 sps:$4 sm:$0xff]   ;;  %v6235_v37 = vld [vmem:[%s8583_s1 + $0x720] ss:$8 sps:$4 sm:$0xff]  }
  0xb9   : > { %3998 = vmatprep.mubr.bf16.mxu1 %v6150_v39  ;;  %v6246_v38 = vld [vmem:[%s8583_s1 + $0x614] ss:$8 sps:$4 sm:$0xff]  }
  0xba   : > { %4042 = vmatpush2.bf16.msra.mxu0 %v6142_v40  ;;  %v6249_v39 = vld [vmem:[%s8583_s1 + $0x714] ss:$8 sps:$4 sm:$0xff]   ;;  %v6242_v40 = vld [vmem:[%s6803_s24 + $0x230] ss:$88 sps:$4 sm:$0xff]  }
  0xbb   : > { %4155 = vmatpush2.bf16.msra.mxu1 %v6145_v41  ;;  %4043 = vmatprep.subr.bf16.mxu0 %v6156_v42  ;;  %v6243_v41 = vld [vmem:[%s6803_s24 + $0x238] ss:$88 sps:$4 sm:$0xff]  }
  0xbc   : > { %4156 = vmatprep.subr.bf16.mxu1 %v6159_v43  ;;  %v6244_v42 = vld [vmem:[%s8583_s1 + $0x610] ss:$8 sps:$4 sm:$0xff]  }
  0xbd   : > { %3886 = vmatmul.mubr.bf16.gmra.mxu0 %v6152_v44  ;;  %v6247_v43 = vld [vmem:[%s8583_s1 + $0x710] ss:$8 sps:$4 sm:$0xff]   ;;  %v6252_v44 = vld [vmem:[%s8583_s1 + $0x604] ss:$8 sps:$4 sm:$0xff]  }
  0xbe   : > { %3999 = vmatmul.mubr.bf16.gmra.mxu1 %v6153_v45  ;;  %4044 = vmatpush2.bf16.msra.mxu0 %v6154_v46  ;;  %v6255_v45 = vld [vmem:[%s8583_s1 + $0x704] ss:$8 sps:$4 sm:$0xff]  }
  0xbf   : > { %4157 = vmatpush2.bf16.msra.mxu1 %v6157_v47  ;;  %4045 = vmatprep.subr.bf16.mxu0 %v6162_v48  ;;  %v6256_v46 = vld [vmem:[%s6803_s24 + $0x2e4] ss:$88 sps:$4 sm:$0xff]   ;;  %v6250_v48 = vld [vmem:[%s8583_s1 + $0x600] ss:$8 sps:$4 sm:$0xff]  }
  0xc0   : > { %4158 = vmatprep.subr.bf16.mxu1 %v6165_v49  ;;  %3895 = vmatprep.mubr.bf16.mxu0 %v6166_v50  ;;  %v6258_v47 = vld [vmem:[%s6803_s24 + $0x2ec] ss:$88 sps:$4 sm:$0xff]   ;;  %v6253_v49 = vld [vmem:[%s8583_s1 + $0x700] ss:$8 sps:$4 sm:$0xff]   ;;  %v6264_v50 = vld [vmem:[%s8583_s1 + $0x6f4] ss:$8 sps:$4 sm:$0xff]  }
  0xc1   : > { %4008 = vmatprep.mubr.bf16.mxu1 %v6168_v51  ;;  %v6267_v51 = vld [vmem:[%s8583_s1 + $0x7f4] ss:$8 sps:$4 sm:$0xff]  }
  0xc2   : > { %4046 = vmatpush2.bf16.msra.mxu0 %v6160_v52  ;;  %v6260_v52 = vld [vmem:[%s6803_s24 + $0x2e0] ss:$88 sps:$4 sm:$0xff]  }
  0xc3   : > { %4159 = vmatpush2.bf16.msra.mxu1 %v6163_v53  ;;  %4047 = vmatprep.subr.bf16.mxu0 %v6174_v54  ;;  %v6261_v53 = vld [vmem:[%s6803_s24 + $0x2e8] ss:$88 sps:$4 sm:$0xff]   ;;  %v6262_v54 = vld [vmem:[%s8583_s1 + $0x6f0] ss:$8 sps:$4 sm:$0xff]  }
  0xc4   : > { %4160 = vmatprep.subr.bf16.mxu1 %v6177_v55  ;;  %v6265_v55 = vld [vmem:[%s8583_s1 + $0x7f0] ss:$8 sps:$4 sm:$0xff]  }
  0xc5   : > { %3896 = vmatmul.mubr.bf16.gmra.mxu0 %v6170_v56  ;;  %v6270_v56 = vld [vmem:[%s8583_s1 + $0x6e4] ss:$8 sps:$4 sm:$0xff]  }
  0xc6   : > { %4009 = vmatmul.mubr.bf16.gmra.mxu1 %v6171_v57  ;;  %4048 = vmatpush2.bf16.msra.mxu0 %v6172_v58  ;;  %v6273_v57 = vld [vmem:[%s8583_s1 + $0x7e4] ss:$8 sps:$4 sm:$0xff]  }
  0xc7   : > { %4161 = vmatpush2.bf16.msra.mxu1 %v6175_v59  ;;  %4049 = vmatprep.subr.bf16.mxu0 %v6180_v60  ;;  %v6274_v58 = vld [vmem:[%s6803_s24 + $0x394] ss:$88 sps:$4 sm:$0xff]   ;;  %v6268_v60 = vld [vmem:[%s8583_s1 + $0x6e0] ss:$8 sps:$4 sm:$0xff]  }
  0xc8   : > { %4162 = vmatprep.subr.bf16.mxu1 %v6183_v61  ;;  %4051 = vmatprep.mubr.bf16.mxu0 %v6186_v62  ;;  %v6276_v59 = vld [vmem:[%s6803_s24 + $0x39c] ss:$88 sps:$4 sm:$0xff]   ;;  %v6271_v61 = vld [vmem:[%s8583_s1 + $0x7e0] ss:$8 sps:$4 sm:$0xff]  }
  0xc9   : > { %4164 = vmatprep.mubr.bf16.mxu1 %v6189_v63  ;;  %v6282_v62 = vld [vmem:[%s8583_s1 + $0x6d4] ss:$8 sps:$4 sm:$0xff]  }
  0xca   : > { %4050 = vmatpush2.bf16.msra.mxu0 %v6178_v0  ;;  %v6285_v63 = vld [vmem:[%s8583_s1 + $0x7d4] ss:$8 sps:$4 sm:$0xff]   ;;  %v6278_v0 = vld [vmem:[%s6803_s24 + $0x390] ss:$88 sps:$4 sm:$0xff]  }
  0xcb   : > { %4163 = vmatpush2.bf16.msra.mxu1 %v6181_v1  ;;  %4245 = vmatprep.subr.bf16.mxu0 %v6192_v2  ;;  %v6279_v1 = vld [vmem:[%s6803_s24 + $0x398] ss:$88 sps:$4 sm:$0xff]  }
  0xcc   : > { %4358 = vmatprep.subr.bf16.mxu1 %v6195_v3  ;;  %v6280_v2 = vld [vmem:[%s8583_s1 + $0x6d0] ss:$8 sps:$4 sm:$0xff]  }
  0xcd   : > { %4052 = vmatmul.mubr.bf16.vlgmr.msra.gmra.mxu0 %v6184_v4  ;;  %v6283_v3 = vld [vmem:[%s8583_s1 + $0x7d0] ss:$8 sps:$4 sm:$0xff]   ;;  %v6288_v4 = vld [vmem:[%s8583_s1 + $0x6c4] ss:$8 sps:$4 sm:$0xff]  }
  0xce   : > { %4165 = vmatmul.mubr.bf16.vlgmr.msra.gmra.mxu1 %v6187_v5  ;;  %4246 = vmatpush1.bf16.msra.mxu0 %v6190_v6  ;;  %v6291_v5 = vld [vmem:[%s8583_s1 + $0x7c4] ss:$8 sps:$4 sm:$0xff]  }
  0xcf   : > { %4359 = vmatpush1.bf16.msra.mxu1 %v6193_v7  ;;  %4247 = vmatprep.subr.bf16.mxu0 %v6198_v8  ;;  %v6292_v6 = vld [vmem:[%s6803_s24 + $0x444] ss:$88 sps:$4 sm:$0xff]   ;;  %v6286_v8 = vld [vmem:[%s8583_s1 + $0x6c0] ss:$8 sps:$4 sm:$0xff]  }
  0xd0   : > { %4360 = vmatprep.subr.bf16.mxu1 %v6201_v9  ;;  %4061 = vmatprep.mubr.bf16.mxu0 %v6202_v10  ;;  %v6294_v7 = vld [vmem:[%s6803_s24 + $0x44c] ss:$88 sps:$4 sm:$0xff]   ;;  %v6289_v9 = vld [vmem:[%s8583_s1 + $0x7c0] ss:$8 sps:$4 sm:$0xff]   ;;  %v6300_v10 = vld [vmem:[%s8583_s1 + $0x6b4] ss:$8 sps:$4 sm:$0xff]  }
  0xd1   : > { %4174 = vmatprep.mubr.bf16.mxu1 %v6204_v11  ;;  %v6303_v11 = vld [vmem:[%s8583_s1 + $0x7b4] ss:$8 sps:$4 sm:$0xff]  }
  0xd2   : > { %4248 = vmatpush1.bf16.msra.mxu0 %v6196_v12  ;;  %v6296_v12 = vld [vmem:[%s6803_s24 + $0x440] ss:$88 sps:$4 sm:$0xff]  }
  0xd3   : > { %4361 = vmatpush1.bf16.msra.mxu1 %v6199_v13  ;;  %4249 = vmatprep.subr.bf16.mxu0 %v6210_v14  ;;  %v6297_v13 = vld [vmem:[%s6803_s24 + $0x448] ss:$88 sps:$4 sm:$0xff]   ;;  %v6298_v14 = vld [vmem:[%s8583_s1 + $0x6b0] ss:$8 sps:$4 sm:$0xff]  }
  0xd4   : > { %4362 = vmatprep.subr.bf16.mxu1 %v6213_v15  ;;  %v6301_v15 = vld [vmem:[%s8583_s1 + $0x7b0] ss:$8 sps:$4 sm:$0xff]  }
  0xd5   : > { %4062 = vmatmul.mubr.bf16.gmra.mxu0 %v6206_v16  ;;  %v6306_v16 = vld [vmem:[%s8583_s1 + $0x6a4] ss:$8 sps:$4 sm:$0xff]  }
  0xd6   : > { %4175 = vmatmul.mubr.bf16.gmra.mxu1 %v6207_v17  ;;  %4250 = vmatpush1.bf16.msra.mxu0 %v6208_v18  ;;  %v6309_v17 = vld [vmem:[%s8583_s1 + $0x7a4] ss:$8 sps:$4 sm:$0xff]  }
  0xd7   : > { %4363 = vmatpush1.bf16.msra.mxu1 %v6211_v19  ;;  %4251 = vmatprep.subr.bf16.mxu0 %v6216_v20  ;;  %v6310_v18 = vld [vmem:[%s6803_s24 + $0x4f4] ss:$88 sps:$4 sm:$0xff]   ;;  %v6304_v20 = vld [vmem:[%s8583_s1 + $0x6a0] ss:$8 sps:$4 sm:$0xff]  }
  0xd8   : > { %4364 = vmatprep.subr.bf16.mxu1 %v6219_v21  ;;  %4071 = vmatprep.mubr.bf16.mxu0 %v6220_v22  ;;  %v6312_v19 = vld [vmem:[%s6803_s24 + $0x4fc] ss:$88 sps:$4 sm:$0xff]   ;;  %v6307_v21 = vld [vmem:[%s8583_s1 + $0x7a0] ss:$8 sps:$4 sm:$0xff]  }
  0xd9   : > { %4184 = vmatprep.mubr.bf16.mxu1 %v6222_v23  ;;  %v6318_v22 = vld [vmem:[%s8583_s1 + $0x694] ss:$8 sps:$4 sm:$0xff]  }
  0xda   : > { %4252 = vmatpush1.bf16.msra.mxu0 %v6214_v24  ;;  %v6321_v23 = vld [vmem:[%s8583_s1 + $0x794] ss:$8 sps:$4 sm:$0xff]   ;;  %v6314_v24 = vld [vmem:[%s6803_s24 + $0x4f0] ss:$88 sps:$4 sm:$0xff]  }
  0xdb   : > { %4365 = vmatpush1.bf16.msra.mxu1 %v6217_v25  ;;  %4253 = vmatprep.subr.bf16.mxu0 %v6228_v26  ;;  %v6315_v25 = vld [vmem:[%s6803_s24 + $0x4f8] ss:$88 sps:$4 sm:$0xff]  }
  0xdc   : > { %4366 = vmatprep.subr.bf16.mxu1 %v6231_v27  ;;  %v6316_v26 = vld [vmem:[%s8583_s1 + $0x690] ss:$8 sps:$4 sm:$0xff]  }
  0xdd   : > { %4072 = vmatmul.mubr.bf16.gmra.mxu0 %v6224_v28  ;;  %v6319_v27 = vld [vmem:[%s8583_s1 + $0x790] ss:$8 sps:$4 sm:$0xff]   ;;  %v6324_v28 = vld [vmem:[%s8583_s1 + $0x684] ss:$8 sps:$4 sm:$0xff]  }
  0xde   : > { %4185 = vmatmul.mubr.bf16.gmra.mxu1 %v6225_v29  ;;  %4254 = vmatpush1.bf16.msra.mxu0 %v6226_v30  ;;  %v6327_v29 = vld [vmem:[%s8583_s1 + $0x784] ss:$8 sps:$4 sm:$0xff]  }
  0xdf   : > { %4367 = vmatpush1.bf16.msra.mxu1 %v6229_v31  ;;  %4255 = vmatprep.subr.bf16.mxu0 %v6234_v32  ;;  %v6330_v30 = vld [vmem:[%s6803_s24 + $0x34] ss:$88 sps:$4 sm:$0xff]   ;;  %v6322_v32 = vld [vmem:[%s8583_s1 + $0x680] ss:$8 sps:$4 sm:$0xff]  }
  0xe0   : > { %4368 = vmatprep.subr.bf16.mxu1 %v6237_v33  ;;  %4081 = vmatprep.mubr.bf16.mxu0 %v6238_v34  ;;  %v6333_v31 = vld [vmem:[%s6803_s24 + $0x3c] ss:$88 sps:$4 sm:$0xff]   ;;  %v6325_v33 = vld [vmem:[%s8583_s1 + $0x780] ss:$8 sps:$4 sm:$0xff]  }
  0xe1   : > { %4194 = vmatprep.mubr.bf16.mxu1 %v6240_v35  ;;  %v6336_v34 = vld [vmem:[%s8583_s1 + $0x874] ss:$8 sps:$4 sm:$0xff]  }
  0xe2   : > { %4256 = vmatpush1.bf16.msra.mxu0 %v6232_v36  ;;  %v6339_v35 = vld [vmem:[%s8583_s1 + $0x974] ss:$8 sps:$4 sm:$0xff]   ;;  %v6328_v36 = vld [vmem:[%s6803_s24 + $0x30] ss:$88 sps:$4 sm:$0xff]  }
  0xe3   : > { %4369 = vmatpush1.bf16.msra.mxu1 %v6235_v37  ;;  %4257 = vmatprep.subr.bf16.mxu0 %v6246_v38  ;;  %v6331_v37 = vld [vmem:[%s6803_s24 + $0x38] ss:$88 sps:$4 sm:$0xff]  }
  0xe4   : > { %4370 = vmatprep.subr.bf16.mxu1 %v6249_v39  ;;  %v6334_v38 = vld [vmem:[%s8583_s1 + $0x870] ss:$8 sps:$4 sm:$0xff]  }
  0xe5   : > { %4082 = vmatmul.mubr.bf16.gmra.mxu0 %v6242_v40  ;;  %v6337_v39 = vld [vmem:[%s8583_s1 + $0x970] ss:$8 sps:$4 sm:$0xff]   ;;  %v6342_v40 = vld [vmem:[%s8583_s1 + $0x864] ss:$8 sps:$4 sm:$0xff]  }
  0xe6   : > { %4195 = vmatmul.mubr.bf16.gmra.mxu1 %v6243_v41  ;;  %4258 = vmatpush1.bf16.msra.mxu0 %v6244_v42  ;;  %v6345_v41 = vld [vmem:[%s8583_s1 + $0x964] ss:$8 sps:$4 sm:$0xff]  }
  0xe7   : > { %4371 = vmatpush1.bf16.msra.mxu1 %v6247_v43  ;;  %4259 = vmatprep.subr.bf16.mxu0 %v6252_v44  ;;  %v6346_v42 = vld [vmem:[%s6803_s24 + $0xe4] ss:$88 sps:$4 sm:$0xff]  }
  0xe8   : > { %4372 = vmatprep.subr.bf16.mxu1 %v6255_v45  ;;  %4091 = vmatprep.mubr.bf16.mxu0 %v6256_v46  ;;  %v6348_v43 = vld [vmem:[%s6803_s24 + $0xec] ss:$88 sps:$4 sm:$0xff]   ;;  %v6340_v46 = vld [vmem:[%s8583_s1 + $0x860] ss:$8 sps:$4 sm:$0xff]  }
  0xe9   : > { %4204 = vmatprep.mubr.bf16.mxu1 %v6258_v47 }
  0xea   : > { %4260 = vmatpush1.bf16.msra.mxu0 %v6250_v48  ;;  %v6343_v48 = vld [vmem:[%s8583_s1 + $0x960] ss:$8 sps:$4 sm:$0xff]  }
  0xeb   : > { %4373 = vmatpush1.bf16.msra.mxu1 %v6253_v49  ;;  %4261 = vmatprep.subr.bf16.mxu0 %v6264_v50  ;;  %v6354_v49 = vld [vmem:[%s8583_s1 + $0x854] ss:$8 sps:$4 sm:$0xff]  }
  0xec   : > { %4374 = vmatprep.subr.bf16.mxu1 %v6267_v51 }
  0xed   : > { %4092 = vmatmul.mubr.bf16.gmra.mxu0 %v6260_v52  ;;  %v6357_v52 = vld [vmem:[%s8583_s1 + $0x954] ss:$8 sps:$4 sm:$0xff]  }
  0xee   : > { %4205 = vmatmul.mubr.bf16.gmra.mxu1 %v6261_v53  ;;  %4262 = vmatpush2.bf16.msra.mxu0 %v6262_v54  ;;  %v6350_v54 = vld [vmem:[%s6803_s24 + $0xe0] ss:$88 sps:$4 sm:$0xff]  }
  0xef   : > { %4375 = vmatpush2.bf16.msra.mxu1 %v6265_v55  ;;  %4263 = vmatprep.subr.bf16.mxu0 %v6270_v56  ;;  %v6351_v55 = vld [vmem:[%s6803_s24 + $0xe8] ss:$88 sps:$4 sm:$0xff]  }
  0xf0   : > { %4376 = vmatprep.subr.bf16.mxu1 %v6273_v57  ;;  %4101 = vmatprep.mubr.bf16.mxu0 %v6274_v58  ;;  %v6352_v58 = vld [vmem:[%s8583_s1 + $0x850] ss:$8 sps:$4 sm:$0xff]  }
  0xf1   : > { %4214 = vmatprep.mubr.bf16.mxu1 %v6276_v59  ;;  %v6355_v59 = vld [vmem:[%s8583_s1 + $0x950] ss:$8 sps:$4 sm:$0xff]  }
  0xf2   : > { %4264 = vmatpush2.bf16.msra.mxu0 %v6268_v60 }
  0xf3   : > { %4377 = vmatpush2.bf16.msra.mxu1 %v6271_v61  ;;  %4265 = vmatprep.subr.bf16.mxu0 %v6282_v62  ;;  %v6360_v61 = vld [vmem:[%s8583_s1 + $0x844] ss:$8 sps:$4 sm:$0xff]  }
  0xf4   : > { %4378 = vmatprep.subr.bf16.mxu1 %v6285_v63 }
  0xf5   : > { %4102 = vmatmul.mubr.bf16.gmra.mxu0 %v6278_v0  ;;  %v6363_v0 = vld [vmem:[%s8583_s1 + $0x944] ss:$8 sps:$4 sm:$0xff]  }
  0xf6   : > { %4215 = vmatmul.mubr.bf16.gmra.mxu1 %v6279_v1  ;;  %4266 = vmatpush2.bf16.msra.mxu0 %v6280_v2  ;;  %v6364_v2 = vld [vmem:[%s6803_s24 + $0x194] ss:$88 sps:$4 sm:$0xff]  }
  0xf7   : > { %4379 = vmatpush2.bf16.msra.mxu1 %v6283_v3  ;;  %4267 = vmatprep.subr.bf16.mxu0 %v6288_v4  ;;  %v6366_v3 = vld [vmem:[%s6803_s24 + $0x19c] ss:$88 sps:$4 sm:$0xff]  }
  0xf8   : > { %4380 = vmatprep.subr.bf16.mxu1 %v6291_v5  ;;  %4111 = vmatprep.mubr.bf16.mxu0 %v6292_v6  ;;  %v6358_v6 = vld [vmem:[%s8583_s1 + $0x840] ss:$8 sps:$4 sm:$0xff]  }
  0xf9   : > { %4224 = vmatprep.mubr.bf16.mxu1 %v6294_v7  ;;  %v6361_v7 = vld [vmem:[%s8583_s1 + $0x940] ss:$8 sps:$4 sm:$0xff]  }
  0xfa   : > { %4268 = vmatpush2.bf16.msra.mxu0 %v6286_v8 }
  0xfb   : > { %4381 = vmatpush2.bf16.msra.mxu1 %v6289_v9  ;;  %4269 = vmatprep.subr.bf16.mxu0 %v6300_v10  ;;  %v6372_v9 = vld [vmem:[%s8583_s1 + $0x834] ss:$8 sps:$4 sm:$0xff]  }
  0xfc   : > { %4382 = vmatprep.subr.bf16.mxu1 %v6303_v11 }
  0xfd   : > { %4112 = vmatmul.mubr.bf16.gmra.mxu0 %v6296_v12  ;;  %v6375_v12 = vld [vmem:[%s8583_s1 + $0x934] ss:$8 sps:$4 sm:$0xff]  }
  0xfe   : > { %4225 = vmatmul.mubr.bf16.gmra.mxu1 %v6297_v13  ;;  %4270 = vmatpush2.bf16.msra.mxu0 %v6298_v14  ;;  %v6368_v14 = vld [vmem:[%s6803_s24 + $0x190] ss:$88 sps:$4 sm:$0xff]  }
  0xff   : > { %4383 = vmatpush2.bf16.msra.mxu1 %v6301_v15  ;;  %4271 = vmatprep.subr.bf16.mxu0 %v6306_v16  ;;  %v6369_v15 = vld [vmem:[%s6803_s24 + $0x198] ss:$88 sps:$4 sm:$0xff]  }
 0x100   : > { %4384 = vmatprep.subr.bf16.mxu1 %v6309_v17  ;;  %4121 = vmatprep.mubr.bf16.mxu0 %v6310_v18  ;;  %v6370_v18 = vld [vmem:[%s8583_s1 + $0x830] ss:$8 sps:$4 sm:$0xff]  }
 0x101   : > { %4234 = vmatprep.mubr.bf16.mxu1 %v6312_v19  ;;  %v6373_v19 = vld [vmem:[%s8583_s1 + $0x930] ss:$8 sps:$4 sm:$0xff]  }
 0x102   : > { %4272 = vmatpush2.bf16.msra.mxu0 %v6304_v20 }
 0x103   : > { %4385 = vmatpush2.bf16.msra.mxu1 %v6307_v21  ;;  %4273 = vmatprep.subr.bf16.mxu0 %v6318_v22  ;;  %v6378_v21 = vld [vmem:[%s8583_s1 + $0x824] ss:$8 sps:$4 sm:$0xff]  }
 0x104   : > { %4386 = vmatprep.subr.bf16.mxu1 %v6321_v23 }
 0x105   : > { %4122 = vmatmul.mubr.bf16.gmra.mxu0 %v6314_v24  ;;  %v6381_v24 = vld [vmem:[%s8583_s1 + $0x924] ss:$8 sps:$4 sm:$0xff]  }
 0x106   : > { %4235 = vmatmul.mubr.bf16.gmra.mxu1 %v6315_v25  ;;  %4274 = vmatpush2.bf16.msra.mxu0 %v6316_v26  ;;  %v6382_v26 = vld [vmem:[%s6803_s24 + $0x244] ss:$88 sps:$4 sm:$0xff]  }
 0x107   : > { %4387 = vmatpush2.bf16.msra.mxu1 %v6319_v27  ;;  %4275 = vmatprep.subr.bf16.mxu0 %v6324_v28  ;;  %v6384_v27 = vld [vmem:[%s6803_s24 + $0x24c] ss:$88 sps:$4 sm:$0xff]  }
 0x108   : > { %4388 = vmatprep.subr.bf16.mxu1 %v6327_v29  ;;  %4277 = vmatprep.mubr.bf16.mxu0 %v6330_v30  ;;  %v6376_v30 = vld [vmem:[%s8583_s1 + $0x820] ss:$8 sps:$4 sm:$0xff]  }
 0x109   : > { %4390 = vmatprep.mubr.bf16.mxu1 %v6333_v31  ;;  %v6379_v31 = vld [vmem:[%s8583_s1 + $0x920] ss:$8 sps:$4 sm:$0xff]  }
 0x10a   : > { %4276 = vmatpush2.bf16.msra.mxu0 %v6322_v32 }
 0x10b   : > { %4389 = vmatpush2.bf16.msra.mxu1 %v6325_v33  ;;  %4471 = vmatprep.subr.bf16.mxu0 %v6336_v34  ;;  %v6390_v33 = vld [vmem:[%s8583_s1 + $0x814] ss:$8 sps:$4 sm:$0xff]  }
 0x10c   : > { %4584 = vmatprep.subr.bf16.mxu1 %v6339_v35 }
 0x10d   : > { %v3601_v44 = vpop.f32.mrf.mxu0  ;;  %4278 = vmatmul.mubr.bf16.vlgmr.msra.gmra.mxu0 %v6328_v36  ;;  %v6393_v36 = vld [vmem:[%s8583_s1 + $0x914] ss:$8 sps:$4 sm:$0xff]  }
 0x10e   : > { %v3714_v45 = vpop.f32.mrf.mxu1  ;;  %4391 = vmatmul.mubr.bf16.vlgmr.msra.gmra.mxu1 %v6331_v37  ;;  %4472 = vmatpush1.bf16.msra.mxu0 %v6334_v38  ;;  %v6386_v38 = vld [vmem:[%s6803_s24 + $0x240] ss:$88 sps:$4 sm:$0xff]  }
 0x10f   : > { %v7561_v47 = vadd.f32 %v3714_v45, %v3601_v44  ;;  %4585 = vmatpush1.bf16.msra.mxu1 %v6337_v39  ;;  %v3603_v50 = vpop.f32.mrf.mxu0  ;;  %4473 = vmatprep.subr.bf16.mxu0 %v6342_v40  ;;  %v6387_v39 = vld [vmem:[%s6803_s24 + $0x248] ss:$88 sps:$4 sm:$0xff]   ;;  %v6396_v45 = vld [vmem:[%s8583_s1 + $0x804] ss:$8 sps:$4 sm:$0xff]  }
 0x110   : > { %v3716_v51 = vpop.f32.mrf.mxu1  ;;  %4586 = vmatprep.subr.bf16.mxu1 %v6345_v41  ;;  %4287 = vmatprep.mubr.bf16.mxu0 %v6346_v42  ;;  %v6388_v42 = vld [vmem:[%s8583_s1 + $0x810] ss:$8 sps:$4 sm:$0xff]  }
 0x111   : > { %v7572_v53 = vadd.f32 %v3716_v51, %v3603_v50  ;;  %4400 = vmatprep.mubr.bf16.mxu1 %v6348_v43  ;;  %v3605_v56 = vpop.f32.mrf.mxu0  ;;  %v6391_v43 = vld [vmem:[%s8583_s1 + $0x910] ss:$8 sps:$4 sm:$0xff]   ;;  %v6402_v51 = vld [vmem:[%s6803_s24 + $0x2f4] ss:$88 sps:$4 sm:$0xff]  }
 0x112   : > { %v3718_v57 = vpop.f32.mrf.mxu1  ;;  %4474 = vmatpush1.bf16.msra.mxu0 %v6340_v46 }
 0x113   : > { %v7582_v60 = vadd.f32 %v3718_v57, %v3605_v56  ;;  %4587 = vmatpush1.bf16.msra.mxu1 %v6343_v48  ;;  %v3607_v62 = vpop.f32.mrf.mxu0  ;;  %4475 = vmatprep.subr.bf16.mxu0 %v6354_v49  ;;  %v6399_v49 = vld [vmem:[%s8583_s1 + $0x904] ss:$8 sps:$4 sm:$0xff]   ;;  %v6394_v56 = vld [vmem:[%s8583_s1 + $0x800] ss:$8 sps:$4 sm:$0xff]  }
 0x114   : > { %v3720_v63 = vpop.f32.mrf.mxu1  ;;  %4588 = vmatprep.subr.bf16.mxu1 %v6357_v52  ;;  %v6405_v52 = vld [vmem:[%s6803_s24 + $0x2fc] ss:$88 sps:$4 sm:$0xff]   ;;  %v6397_v57 = vld [vmem:[%s8583_s1 + $0x900] ss:$8 sps:$4 sm:$0xff]  }
 0x115   : > { %v7590_v1 = vadd.f32 %v3720_v63, %v3607_v62  ;;  %v3611_v4 = vpop.f32.mrf.mxu0  ;;  %4288 = vmatmul.mubr.bf16.gmra.mxu0 %v6350_v54  ;;  %v6411_v63 = vld [vmem:[%s8583_s1 + $0x9f4] ss:$8 sps:$4 sm:$0xff]  }
 0x116   : > { %v3724_v5 = vpop.f32.mrf.mxu1  ;;  %4401 = vmatmul.mubr.bf16.gmra.mxu1 %v6351_v55  ;;  %4476 = vmatpush1.bf16.msra.mxu0 %v6352_v58 }
 0x117   : > { %v7600_v8 = vadd.f32 %v3724_v5, %v3611_v4  ;;  %4589 = vmatpush1.bf16.msra.mxu1 %v6355_v59  ;;  %v3613_v10 = vpop.f32.mrf.mxu0  ;;  %4477 = vmatprep.subr.bf16.mxu0 %v6360_v61  ;;  %v6408_v59 = vld [vmem:[%s8583_s1 + $0x8f4] ss:$8 sps:$4 sm:$0xff]  }
 0x118   : > { %v3726_v11 = vpop.f32.mrf.mxu1  ;;  %4590 = vmatprep.subr.bf16.mxu1 %v6363_v0  ;;  %4297 = vmatprep.mubr.bf16.mxu0 %v6364_v2  ;;  %v6400_v2 = vld [vmem:[%s6803_s24 + $0x2f0] ss:$88 sps:$4 sm:$0xff]  }
 0x119   : > { %v7608_v13 = vadd.f32 %v3726_v11, %v3613_v10  ;;  %4410 = vmatprep.mubr.bf16.mxu1 %v6366_v3  ;;  %v3615_v16 = vpop.f32.mrf.mxu0  ;;  %v6403_v3 = vld [vmem:[%s6803_s24 + $0x2f8] ss:$88 sps:$4 sm:$0xff]   ;;  %v6414_v10 = vld [vmem:[%s8583_s1 + $0x8e4] ss:$8 sps:$4 sm:$0xff]  }
 0x11a   : > { %v3728_v17 = vpop.f32.mrf.mxu1  ;;  %4478 = vmatpush1.bf16.msra.mxu0 %v6358_v6  ;;  %v6406_v6 = vld [vmem:[%s8583_s1 + $0x8f0] ss:$8 sps:$4 sm:$0xff]  }
 0x11b   : > { %v7618_v20 = vadd.f32 %v3728_v17, %v3615_v16  ;;  %4591 = vmatpush1.bf16.msra.mxu1 %v6361_v7  ;;  %v3617_v22 = vpop.f32.mrf.mxu0  ;;  %4479 = vmatprep.subr.bf16.mxu0 %v6372_v9  ;;  %v6409_v7 = vld [vmem:[%s8583_s1 + $0x9f0] ss:$8 sps:$4 sm:$0xff]   ;;  %v6420_v16 = vld [vmem:[%s6803_s24 + $0x3a4] ss:$88 sps:$4 sm:$0xff]  }
 0x11c   : > { %v3730_v23 = vpop.f32.mrf.mxu1  ;;  %4592 = vmatprep.subr.bf16.mxu1 %v6375_v12  ;;  %v6423_v17 = vld [vmem:[%s6803_s24 + $0x3ac] ss:$88 sps:$4 sm:$0xff]  }
 0x11d   : > { %v7626_v25 = vadd.f32 %v3730_v23, %v3617_v22  ;;  %v3621_v28 = vpop.f32.mrf.mxu0  ;;  %4298 = vmatmul.mubr.bf16.gmra.mxu0 %v6368_v14  ;;  %v6417_v14 = vld [vmem:[%s8583_s1 + $0x9e4] ss:$8 sps:$4 sm:$0xff]   ;;  %v6415_v22 = vld [vmem:[%s8583_s1 + $0x9e0] ss:$8 sps:$4 sm:$0xff]  }
 0x11e   : > { %v3734_v29 = vpop.f32.mrf.mxu1  ;;  %4411 = vmatmul.mubr.bf16.gmra.mxu1 %v6369_v15  ;;  %4480 = vmatpush1.bf16.msra.mxu0 %v6370_v18 }
 0x11f   : > { %v7636_v32 = vadd.f32 %v3734_v29, %v3621_v28  ;;  %4593 = vmatpush1.bf16.msra.mxu1 %v6373_v19  ;;  %v3623_v34 = vpop.f32.mrf.mxu0  ;;  %4481 = vmatprep.subr.bf16.mxu0 %v6378_v21  ;;  %v6412_v21 = vld [vmem:[%s8583_s1 + $0x8e0] ss:$8 sps:$4 sm:$0xff]   ;;  %v6429_v28 = vld [vmem:[%s8583_s1 + $0x9d4] ss:$8 sps:$4 sm:$0xff]  }
 0x120   : > { %v3736_v35 = vpop.f32.mrf.mxu1  ;;  %4594 = vmatprep.subr.bf16.mxu1 %v6381_v24  ;;  %4307 = vmatprep.mubr.bf16.mxu0 %v6382_v26  ;;  %v6426_v24 = vld [vmem:[%s8583_s1 + $0x8d4] ss:$8 sps:$4 sm:$0xff]  }
 0x121   : > { %v7644_v37 = vadd.f32 %v3736_v35, %v3623_v34  ;;  %4420 = vmatprep.mubr.bf16.mxu1 %v6384_v27  ;;  %v3625_v40 = vpop.f32.mrf.mxu0  ;;  %v6424_v35 = vld [vmem:[%s8583_s1 + $0x8d0] ss:$8 sps:$4 sm:$0xff]  }
 0x122   : > { %v3738_v41 = vpop.f32.mrf.mxu1  ;;  %4482 = vmatpush1.bf16.msra.mxu0 %v6376_v30  ;;  %v6418_v30 = vld [vmem:[%s6803_s24 + $0x3a0] ss:$88 sps:$4 sm:$0xff]  }
 0x123   : > { %v7654_v44 = vadd.f32 %v3738_v41, %v3625_v40  ;;  %4595 = vmatpush1.bf16.msra.mxu1 %v6379_v31  ;;  %v3627_v46 = vpop.f32.mrf.mxu0  ;;  %4483 = vmatprep.subr.bf16.mxu0 %v6390_v33  ;;  %v6421_v31 = vld [vmem:[%s6803_s24 + $0x3a8] ss:$88 sps:$4 sm:$0xff]  }
 0x124   : > { %v3740_v48 = vpop.f32.mrf.mxu1  ;;  %4596 = vmatprep.subr.bf16.mxu1 %v6393_v36  ;;  %v6427_v36 = vld [vmem:[%s8583_s1 + $0x9d0] ss:$8 sps:$4 sm:$0xff]  }
 0x125   : > { %v7662_v50 = vadd.f32 %v3740_v48, %v3627_v46  ;;  %v3631_v54 = vpop.f32.mrf.mxu0  ;;  %4308 = vmatmul.mubr.bf16.gmra.mxu0 %v6386_v38  ;;  %v6441_v46 = vld [vmem:[%s6803_s24 + $0x45c] ss:$88 sps:$4 sm:$0xff]  }
 0x126   : > { %v3744_v55 = vpop.f32.mrf.mxu1  ;;  %4421 = vmatmul.mubr.bf16.gmra.mxu1 %v6387_v39  ;;  %4484 = vmatpush1.bf16.msra.mxu0 %v6388_v42  ;;  %v6432_v39 = vld [vmem:[%s8583_s1 + $0x8c4] ss:$8 sps:$4 sm:$0xff]  }
 0x127   : > { %v7672_v58 = vadd.f32 %v3744_v55, %v3631_v54  ;;  %4597 = vmatpush1.bf16.msra.mxu1 %v6391_v43  ;;  %v3633_v61 = vpop.f32.mrf.mxu0  ;;  %4485 = vmatprep.subr.bf16.mxu0 %v6396_v45  ;;  %v6435_v42 = vld [vmem:[%s8583_s1 + $0x9c4] ss:$8 sps:$4 sm:$0xff]   ;;  %v6444_v55 = vld [vmem:[%s8583_s1 + $0x8b4] ss:$8 sps:$4 sm:$0xff]  }
 0x128   : > { %v3746_v62 = vpop.f32.mrf.mxu1  ;;  %4598 = vmatprep.subr.bf16.mxu1 %v6399_v49  ;;  %4317 = vmatprep.mubr.bf16.mxu0 %v6402_v51  ;;  %v6438_v45 = vld [vmem:[%s6803_s24 + $0x454] ss:$88 sps:$4 sm:$0xff]   ;;  %v6430_v51 = vld [vmem:[%s8583_s1 + $0x8c0] ss:$8 sps:$4 sm:$0xff]  }
 0x129   : > { %v7680_v0 = vadd.f32 %v3746_v62, %v3633_v61  ;;  %4430 = vmatprep.mubr.bf16.mxu1 %v6405_v52  ;;  %v3635_v4 = vpop.f32.mrf.mxu0  ;;  %v6433_v52 = vld [vmem:[%s8583_s1 + $0x9c0] ss:$8 sps:$4 sm:$0xff]  }
 0x12a   : > { %v3748_v5 = vpop.f32.mrf.mxu1  ;;  %4486 = vmatpush1.bf16.msra.mxu0 %v6394_v56  ;;  %v6436_v62 = vld [vmem:[%s6803_s24 + $0x450] ss:$88 sps:$4 sm:$0xff]  }
 0x12b   : > { %v7690_v9 = vadd.f32 %v3748_v5, %v3635_v4  ;;  %4599 = vmatpush1.bf16.msra.mxu1 %v6397_v57  ;;  %v3637_v11 = vpop.f32.mrf.mxu0  ;;  %4487 = vmatprep.subr.bf16.mxu0 %v6408_v59  ;;  %v6447_v59 = vld [vmem:[%s8583_s1 + $0x9b4] ss:$8 sps:$4 sm:$0xff]   ;;  %v6442_v4 = vld [vmem:[%s8583_s1 + $0x8b0] ss:$8 sps:$4 sm:$0xff]  }
 0x12c   : > { %v3750_v12 = vpop.f32.mrf.mxu1  ;;  %4600 = vmatprep.subr.bf16.mxu1 %v6411_v63  ;;  %v6439_v63 = vld [vmem:[%s6803_s24 + $0x458] ss:$88 sps:$4 sm:$0xff]  }
 0x12d   : > { %v7698_v15 = vadd.f32 %v3750_v12, %v3637_v11  ;;  %v3641_v18 = vpop.f32.mrf.mxu0  ;;  %4318 = vmatmul.mubr.bf16.gmra.mxu0 %v6400_v2  ;;  %v6445_v5 = vld [vmem:[%s8583_s1 + $0x9b0] ss:$8 sps:$4 sm:$0xff]   ;;  %v6453_v12 = vld [vmem:[%s8583_s1 + $0x9a4] ss:$8 sps:$4 sm:$0xff]  }
 0x12e   : > { %v3754_v19 = vpop.f32.mrf.mxu1  ;;  %4431 = vmatmul.mubr.bf16.gmra.mxu1 %v6403_v3  ;;  %4488 = vmatpush2.bf16.msra.mxu0 %v6406_v6 }
 0x12f   : > { %v7708_v23 = vadd.f32 %v3754_v19, %v3641_v18  ;;  %4601 = vmatpush2.bf16.msra.mxu1 %v6409_v7  ;;  %v3643_v26 = vpop.f32.mrf.mxu0  ;;  %4489 = vmatprep.subr.bf16.mxu0 %v6414_v10  ;;  %v6450_v7 = vld [vmem:[%s8583_s1 + $0x8a4] ss:$8 sps:$4 sm:$0xff]  }
 0x130   : > { %v3756_v27 = vpop.f32.mrf.mxu1  ;;  %4602 = vmatprep.subr.bf16.mxu1 %v6417_v14  ;;  %4327 = vmatprep.mubr.bf16.mxu0 %v6420_v16  ;;  %v6456_v16 = vld [vmem:[%s6803_s24 + $0x504] ss:$88 sps:$4 sm:$0xff]  }
 0x131   : > { %v7716_v29 = vadd.f32 %v3756_v27, %v3643_v26  ;;  %4440 = vmatprep.mubr.bf16.mxu1 %v6423_v17  ;;  %v3645_v33 = vpop.f32.mrf.mxu0  ;;  %v6459_v17 = vld [vmem:[%s6803_s24 + $0x50c] ss:$88 sps:$4 sm:$0xff]   ;;  %v6462_v26 = vld [vmem:[%s8583_s1 + $0x894] ss:$8 sps:$4 sm:$0xff]  }
 0x132   : > { %v3758_v34 = vpop.f32.mrf.mxu1  ;;  %4490 = vmatpush2.bf16.msra.mxu0 %v6412_v21  ;;  %v6448_v21 = vld [vmem:[%s8583_s1 + $0x8a0] ss:$8 sps:$4 sm:$0xff]  }
 0x133   : > { %v7726_v38 = vadd.f32 %v3758_v34, %v3645_v33  ;;  %4603 = vmatpush2.bf16.msra.mxu1 %v6415_v22  ;;  %v3647_v40 = vpop.f32.mrf.mxu0  ;;  %4491 = vmatprep.subr.bf16.mxu0 %v6426_v24  ;;  %v6451_v22 = vld [vmem:[%s8583_s1 + $0x9a0] ss:$8 sps:$4 sm:$0xff]  }
 0x134   : > { %v3760_v41 = vpop.f32.mrf.mxu1  ;;  %4604 = vmatprep.subr.bf16.mxu1 %v6429_v28  ;;  %v6454_v33 = vld [vmem:[%s6803_s24 + $0x500] ss:$88 sps:$4 sm:$0xff]  }
 0x135   : > { %v7734_v43 = vadd.f32 %v3760_v41, %v3647_v40  ;;  %v3651_v48 = vpop.f32.mrf.mxu0  ;;  %4328 = vmatmul.mubr.bf16.gmra.mxu0 %v6418_v30  ;;  %v6465_v30 = vld [vmem:[%s8583_s1 + $0x994] ss:$8 sps:$4 sm:$0xff]   ;;  %v6457_v34 = vld [vmem:[%s6803_s24 + $0x508] ss:$88 sps:$4 sm:$0xff]   ;;  %v6463_v40 = vld [vmem:[%s8583_s1 + $0x990] ss:$8 sps:$4 sm:$0xff]  }
 0x136   : > { %v3764_v49 = vpop.f32.mrf.mxu1  ;;  %4441 = vmatmul.mubr.bf16.gmra.mxu1 %v6421_v31  ;;  %4492 = vmatpush2.bf16.msra.mxu0 %v6424_v35 }
 0x137   : > { %v7744_v54 = vadd.f32 %v3764_v49, %v3651_v48  ;;  %4605 = vmatpush2.bf16.msra.mxu1 %v6427_v36  ;;  %v3653_v56 = vpop.f32.mrf.mxu0  ;;  %4493 = vmatprep.subr.bf16.mxu0 %v6432_v39  ;;  %v6460_v39 = vld [vmem:[%s8583_s1 + $0x890] ss:$8 sps:$4 sm:$0xff]   ;;  %v6471_v48 = vld [vmem:[%s8583_s1 + $0x984] ss:$8 sps:$4 sm:$0xff]  }
 0x138   : > { %v3766_v57 = vpop.f32.mrf.mxu1  ;;  %4606 = vmatprep.subr.bf16.mxu1 %v6435_v42  ;;  %4337 = vmatprep.mubr.bf16.mxu0 %v6438_v45  ;;  %v6468_v42 = vld [vmem:[%s8583_s1 + $0x884] ss:$8 sps:$4 sm:$0xff]  }
 0x139   : > { %v7752_v61 = vadd.f32 %v3766_v57, %v3653_v56  ;;  %4450 = vmatprep.mubr.bf16.mxu1 %v6441_v46  ;;  %v3655_v2 = vpop.f32.mrf.mxu0  ;;  %v6466_v57 = vld [vmem:[%s8583_s1 + $0x880] ss:$8 sps:$4 sm:$0xff]  }
 0x13a   : > { %v3768_v3 = vpop.f32.mrf.mxu1  ;;  %4494 = vmatpush2.bf16.msra.mxu0 %v6430_v51  ;;  %v6474_v51 = vld [vmem:[%s6803_s24 + $0x44] ss:$88 sps:$4 sm:$0xff]  }
 0x13b   : > { %v7762_v6 = vadd.f32 %v3768_v3, %v3655_v2  ;;  %4607 = vmatpush2.bf16.msra.mxu1 %v6433_v52  ;;  %v3657_v10 = vpop.f32.mrf.mxu0  ;;  %4495 = vmatprep.subr.bf16.mxu0 %v6444_v55  ;;  %v6477_v52 = vld [vmem:[%s6803_s24 + $0x4c] ss:$88 sps:$4 sm:$0xff]   ;;  %v6480_v3 = vld [vmem:[%s8583_s1 + $0xa74] ss:$8 sps:$4 sm:$0xff]  }
 0x13c   : > { %v3770_v11 = vpop.f32.mrf.mxu1  ;;  %4608 = vmatprep.subr.bf16.mxu1 %v6447_v59 }
 0x13d   : > { %v7770_v14 = vadd.f32 %v3770_v11, %v3657_v10  ;;  %v3661_v18 = vpop.f32.mrf.mxu0  ;;  %4338 = vmatmul.mubr.bf16.gmra.mxu0 %v6436_v62  ;;  %v6469_v62 = vld [vmem:[%s8583_s1 + $0x980] ss:$8 sps:$4 sm:$0xff]  }
 0x13e   : > { %v3774_v19 = vpop.f32.mrf.mxu1  ;;  %4451 = vmatmul.mubr.bf16.gmra.mxu1 %v6439_v63  ;;  %4496 = vmatpush2.bf16.msra.mxu0 %v6442_v4  ;;  %v6472_v10 = vld [vmem:[%s6803_s24 + $0x40] ss:$88 sps:$4 sm:$0xff]  }
 0x13f   : > { %v7780_v24 = vadd.f32 %v3774_v19, %v3661_v18  ;;  %4609 = vmatpush2.bf16.msra.mxu1 %v6445_v5  ;;  %v3663_v27 = vpop.f32.mrf.mxu0  ;;  %4497 = vmatprep.subr.bf16.mxu0 %v6450_v7  ;;  %v6475_v11 = vld [vmem:[%s6803_s24 + $0x48] ss:$88 sps:$4 sm:$0xff]   ;;  %v6483_v19 = vld [vmem:[%s8583_s1 + $0xa64] ss:$8 sps:$4 sm:$0xff]  }
 0x140   : > { %v3776_v28 = vpop.f32.mrf.mxu1  ;;  %4610 = vmatprep.subr.bf16.mxu1 %v6453_v12  ;;  %4347 = vmatprep.mubr.bf16.mxu0 %v6456_v16  ;;  %v6478_v16 = vld [vmem:[%s8583_s1 + $0xa70] ss:$8 sps:$4 sm:$0xff]  }
 0x141   : > { %v7788_v31 = vadd.f32 %v3776_v28, %v3663_v27  ;;  %4460 = vmatprep.mubr.bf16.mxu1 %v6459_v17  ;;  %v3665_v35 = vpop.f32.mrf.mxu0 }
 0x142   : > { %v3778_v36 = vpop.f32.mrf.mxu1  ;;  %4498 = vmatpush2.bf16.msra.mxu0 %v6448_v21 }
 0x143   : > { %v7798_v41 = vadd.f32 %v3778_v36, %v3665_v35  ;;  %4611 = vmatpush2.bf16.msra.mxu1 %v6451_v22  ;;  %v3667_v45 = vpop.f32.mrf.mxu0  ;;  %4499 = vmatprep.subr.bf16.mxu0 %v6462_v26  ;;  %v6486_v22 = vld [vmem:[%s6803_s24 + $0xf4] ss:$88 sps:$4 sm:$0xff]  }
 0x144   : > { %v3780_v46 = vpop.f32.mrf.mxu1  ;;  %4612 = vmatprep.subr.bf16.mxu1 %v6465_v30  ;;  %v6489_v26 = vld [vmem:[%s6803_s24 + $0xfc] ss:$88 sps:$4 sm:$0xff]  }
 0x145   : > { %v7806_v49 = vadd.f32 %v3780_v46, %v3667_v45  ;;  %v3671_v55 = vpop.f32.mrf.mxu0  ;;  %4348 = vmatmul.mubr.bf16.gmra.mxu0 %v6454_v33  ;;  %v6481_v33 = vld [vmem:[%s8583_s1 + $0xa60] ss:$8 sps:$4 sm:$0xff]   ;;  %v6492_v36 = vld [vmem:[%s8583_s1 + $0xa54] ss:$8 sps:$4 sm:$0xff]   ;;  %v6487_v46 = vld [vmem:[%s6803_s24 + $0xf8] ss:$88 sps:$4 sm:$0xff]  }
 0x146   : > { %v3784_v56 = vpop.f32.mrf.mxu1  ;;  %4461 = vmatmul.mubr.bf16.gmra.mxu1 %v6457_v34  ;;  %4500 = vmatpush2.bf16.msra.mxu0 %v6460_v39  ;;  %v6484_v45 = vld [vmem:[%s6803_s24 + $0xf0] ss:$88 sps:$4 sm:$0xff]  }
 0x147   : > { %v7813_v59 = vadd.f32 %v3784_v56, %v3671_v55  ;;  %4613 = vmatpush2.bf16.msra.mxu1 %v6463_v40  ;;  %v3673_v63 = vpop.f32.mrf.mxu0  ;;  %4501 = vmatprep.subr.bf16.mxu0 %v6468_v42  ;;  %v6495_v56 = vld [vmem:[%s8583_s1 + $0xa44] ss:$8 sps:$4 sm:$0xff]  }
 0x148   : > { %v3786_v2 = vpop.f32.mrf.mxu1  ;;  %4614 = vmatprep.subr.bf16.mxu1 %v6471_v48  ;;  %4503 = vmatprep.mubr.bf16.mxu0 %v6474_v51 }
 0x149   : > { %v7821_v4 = vadd.f32 %v3786_v2, %v3673_v63  ;;  %4616 = vmatprep.mubr.bf16.mxu1 %v6477_v52  ;;  %v3675_v5 = vpop.f32.mrf.mxu0  ;;  %v6490_v52 = vld [vmem:[%s8583_s1 + $0xa50] ss:$8 sps:$4 sm:$0xff]   ;;  %v6498_v63 = vld [vmem:[%s6803_s24 + $0x1a4] ss:$88 sps:$4 sm:$0xff]  }
 0x14a   : > { %v3788_v7 = vpop.f32.mrf.mxu1  ;;  %4502 = vmatpush2.bf16.msra.mxu0 %v6466_v57 }
 0x14b   : > { %v7825_v12 = vadd.f32 %v3788_v7, %v3675_v5  ;;  %4615 = vmatpush2.bf16.msra.mxu1 %v6469_v62  ;;  %v3677_v17 = vpop.f32.mrf.mxu0  ;;  %4697 = vmatprep.subr.bf16.mxu0 %v6480_v3 }
 0x14c   : > { %v3790_v18 = vpop.f32.mrf.mxu1  ;;  %5743 = vmatprep.subr.bf16.mxu1 %v6480_v3 }
 0x14d   : > { %v7833_v21 = vadd.f32 %v3790_v18, %v3677_v17  ;;  %v3827_v27 = vpop.f32.mrf.mxu0  ;;  %4504 = vmatmul.mubr.bf16.vlgmr.msra.gmra.mxu0 %v6472_v10  ;;  %v6493_v10 = vld [vmem:[%s8583_s1 + $0xa40] ss:$8 sps:$4 sm:$0xff]  }
 0x14e   : > { %v3940_v28 = vpop.f32.mrf.mxu1  ;;  %4617 = vmatmul.mubr.bf16.vlgmr.msra.gmra.mxu1 %v6475_v11  ;;  %v3828_v30 = vadd.f32 %v3827_v27, %v7561_v47  ;;  %4698 = vmatpush1.bf16.msra.mxu0 %v6478_v16 }
 0x14f   : > { %5759 = vmatpush1.bf16.msra.mxu1 %v6478_v16  ;;  %v3829_v34 = vpop.f32.mrf.mxu0  ;;  %4699 = vmatprep.subr.bf16.mxu0 %v6483_v19  ;;  %v6504_v16 = vld [vmem:[%s8583_s1 + $0xa34] ss:$8 sps:$4 sm:$0xff]  }
 0x150   : > { %v3942_v35 = vpop.f32.mrf.mxu1  ;;  %5744 = vmatprep.subr.bf16.mxu1 %v6483_v19  ;;  %v7844_v39 = vadd.f32 %v3940_v28, %v3828_v30  ;;  %v3830_v40 = vadd.f32 %v3829_v34, %v7572_v53  ;;  %4513 = vmatprep.mubr.bf16.mxu0 %v6486_v22  ;;  %v6496_v22 = vld [vmem:[%s6803_s24 + $0x1a0] ss:$88 sps:$4 sm:$0xff]   ;;  %v6507_v34 = vld [vmem:[%s8583_s1 + $0xa24] ss:$8 sps:$4 sm:$0xff]  }
 0x151   : > { %4626 = vmatprep.mubr.bf16.mxu1 %v6489_v26  ;;  %v3831_v47 = vpop.f32.mrf.mxu0  ;;  %v6499_v26 = vld [vmem:[%s6803_s24 + $0x1a8] ss:$88 sps:$4 sm:$0xff]   ;;  %v6502_v30 = vld [vmem:[%s8583_s1 + $0xa30] ss:$8 sps:$4 sm:$0xff]  }
 0x152   : > { %v3944_v42 = vpop.f32.mrf.mxu1  ;;  %v7849_v48 = vadd.f32 %v3942_v35, %v3830_v40  ;;  %v3832_v51 = vadd.f32 %v3831_v47, %v7582_v60  ;;  %4700 = vmatpush1.bf16.msra.mxu0 %v6481_v33  ;;  %v6501_v60 = vld [vmem:[%s6803_s24 + $0x1ac] ss:$88 sps:$4 sm:$0xff]  }
 0x153   : > { %5760 = vmatpush1.bf16.msra.mxu1 %v6481_v33  ;;  %v3833_v55 = vpop.f32.mrf.mxu0  ;;  %4701 = vmatprep.subr.bf16.mxu0 %v6492_v36  ;;  %v6510_v40 = vld [vmem:[%s6803_s24 + $0x254] ss:$88 sps:$4 sm:$0xff]  }
 0x154   : > { %v3946_v53 = vpop.f32.mrf.mxu1  ;;  %5745 = vmatprep.subr.bf16.mxu1 %v6492_v36  ;;  %v7858_v57 = vadd.f32 %v3944_v42, %v3832_v51  ;;  %v3834_v62 = vadd.f32 %v3833_v55, %v7590_v1  ;;  %v6505_v51 = vld [vmem:[%s8583_s1 + $0xa20] ss:$8 sps:$4 sm:$0xff]   ;;  %v6516_v55 = vld [vmem:[%s8583_s1 + $0xa14] ss:$8 sps:$4 sm:$0xff]  }
 0x155   : > { %v3837_v2 = vpop.f32.mrf.mxu0  ;;  %4514 = vmatmul.mubr.bf16.gmra.mxu0 %v6484_v45 }
 0x156   : > { %v3950_v3 = vpop.f32.mrf.mxu1  ;;  %4627 = vmatmul.mubr.bf16.gmra.mxu1 %v6487_v46  ;;  %v7863_v5 = vadd.f32 %v3946_v53, %v3834_v62  ;;  %v3838_v7 = vadd.f32 %v3837_v2, %v7600_v8  ;;  %4702 = vmatpush1.bf16.msra.mxu0 %v6490_v52 }
 0x157   : > { %5761 = vmatpush1.bf16.msra.mxu1 %v6490_v52  ;;  %v3839_v11 = vpop.f32.mrf.mxu0  ;;  %4703 = vmatprep.subr.bf16.mxu0 %v6495_v56 }
 0x158   : > { %v3952_v1 = vpop.f32.mrf.mxu1  ;;  %5746 = vmatprep.subr.bf16.mxu1 %v6495_v56  ;;  %v7872_v17 = vadd.f32 %v3950_v3, %v3838_v7  ;;  %v3840_v18 = vadd.f32 %v3839_v11, %v7608_v13  ;;  %4523 = vmatprep.mubr.bf16.mxu0 %v6498_v63  ;;  %v6508_v63 = vld [vmem:[%s6803_s24 + $0x250] ss:$88 sps:$4 sm:$0xff]   ;;  %v6519_v11 = vld [vmem:[%s8583_s1 + $0xa04] ss:$8 sps:$4 sm:$0xff]  }
 0x159   : > { %4636 = vmatprep.mubr.bf16.mxu1 %v6501_v60  ;;  %v3841_v8 = vpop.f32.mrf.mxu0  ;;  %v6511_v60 = vld [vmem:[%s6803_s24 + $0x258] ss:$88 sps:$4 sm:$0xff]  }
 0x15a   : > { %v3954_v19 = vpop.f32.mrf.mxu1  ;;  %v7877_v27 = vadd.f32 %v3952_v1, %v3840_v18  ;;  %v3842_v28 = vadd.f32 %v3841_v8, %v7618_v20  ;;  %4704 = vmatpush1.bf16.msra.mxu0 %v6493_v10  ;;  %v6513_v20 = vld [vmem:[%s6803_s24 + $0x25c] ss:$88 sps:$4 sm:$0xff]   ;;  %v6514_v7 = vld [vmem:[%s8583_s1 + $0xa10] ss:$8 sps:$4 sm:$0xff]  }
 0x15b   : > { %5762 = vmatpush1.bf16.msra.mxu1 %v6493_v10  ;;  %v3843_v33 = vpop.f32.mrf.mxu0  ;;  %4705 = vmatprep.subr.bf16.mxu0 %v6504_v16  ;;  %v6522_v18 = vld [vmem:[%s6803_s24 + $0x304] ss:$88 sps:$4 sm:$0xff]  }
 0x15c   : > { %v3956_v13 = vpop.f32.mrf.mxu1  ;;  %5747 = vmatprep.subr.bf16.mxu1 %v6504_v16  ;;  %v7886_v35 = vadd.f32 %v3954_v19, %v3842_v28  ;;  %v3844_v36 = vadd.f32 %v3843_v33, %v7626_v25  ;;  %v6517_v28 = vld [vmem:[%s8583_s1 + $0xa00] ss:$8 sps:$4 sm:$0xff]   ;;  %v6528_v33 = vld [vmem:[%s8583_s1 + $0xaf4] ss:$8 sps:$4 sm:$0xff]  }
 0x15d   : > { %v3847_v47 = vpop.f32.mrf.mxu0  ;;  %4524 = vmatmul.mubr.bf16.gmra.mxu0 %v6496_v22 }
 0x15e   : > { %v3960_v42 = vpop.f32.mrf.mxu1  ;;  %4637 = vmatmul.mubr.bf16.gmra.mxu1 %v6499_v26  ;;  %v7891_v45 = vadd.f32 %v3956_v13, %v3844_v36  ;;  %v3848_v46 = vadd.f32 %v3847_v47, %v7636_v32  ;;  %4706 = vmatpush1.bf16.msra.mxu0 %v6502_v30 }
 0x15f   : > { %5763 = vmatpush1.bf16.msra.mxu1 %v6502_v30  ;;  %v3849_v52 = vpop.f32.mrf.mxu0  ;;  %4707 = vmatprep.subr.bf16.mxu0 %v6507_v34 }
 0x160   : > { %v3962_v25 = vpop.f32.mrf.mxu1  ;;  %5748 = vmatprep.subr.bf16.mxu1 %v6507_v34  ;;  %v7900_v53 = vadd.f32 %v3960_v42, %v3848_v46  ;;  %v3850_v56 = vadd.f32 %v3849_v52, %v7644_v37  ;;  %4533 = vmatprep.mubr.bf16.mxu0 %v6510_v40  ;;  %v6520_v40 = vld [vmem:[%s6803_s24 + $0x300] ss:$88 sps:$4 sm:$0xff]   ;;  %v6531_v52 = vld [vmem:[%s8583_s1 + $0xae4] ss:$8 sps:$4 sm:$0xff]  }
 0x161   : > { %4646 = vmatprep.mubr.bf16.mxu1 %v6513_v20  ;;  %v3851_v32 = vpop.f32.mrf.mxu0  ;;  %v6523_v20 = vld [vmem:[%s6803_s24 + $0x308] ss:$88 sps:$4 sm:$0xff]   ;;  %v6526_v46 = vld [vmem:[%s8583_s1 + $0xaf0] ss:$8 sps:$4 sm:$0xff]  }
 0x162   : > { %v3964_v62 = vpop.f32.mrf.mxu1  ;;  %v7905_v2 = vadd.f32 %v3962_v25, %v3850_v56  ;;  %v3852_v3 = vadd.f32 %v3851_v32, %v7654_v44  ;;  %4708 = vmatpush1.bf16.msra.mxu0 %v6505_v51  ;;  %v6525_v44 = vld [vmem:[%s6803_s24 + $0x30c] ss:$88 sps:$4 sm:$0xff]  }
 0x163   : > { %5764 = vmatpush1.bf16.msra.mxu1 %v6505_v51  ;;  %v3853_v10 = vpop.f32.mrf.mxu0  ;;  %4709 = vmatprep.subr.bf16.mxu0 %v6516_v55  ;;  %v6534_v56 = vld [vmem:[%s6803_s24 + $0x3b4] ss:$88 sps:$4 sm:$0xff]  }
 0x164   : > { %v3966_v37 = vpop.f32.mrf.mxu1  ;;  %5749 = vmatprep.subr.bf16.mxu1 %v6516_v55  ;;  %v7914_v1 = vadd.f32 %v3964_v62, %v3852_v3  ;;  %v3854_v16 = vadd.f32 %v3853_v10, %v7662_v50  ;;  %v6529_v3 = vld [vmem:[%s8583_s1 + $0xae0] ss:$8 sps:$4 sm:$0xff]   ;;  %v6540_v10 = vld [vmem:[%s8583_s1 + $0xad4] ss:$8 sps:$4 sm:$0xff]  }
 0x165   : > { %v3857_v8 = vpop.f32.mrf.mxu0  ;;  %4534 = vmatmul.mubr.bf16.gmra.mxu0 %v6508_v63 }
 0x166   : > { %v3970_v19 = vpop.f32.mrf.mxu1  ;;  %4647 = vmatmul.mubr.bf16.gmra.mxu1 %v6511_v60  ;;  %v7919_v22 = vadd.f32 %v3966_v37, %v3854_v16  ;;  %v3858_v26 = vadd.f32 %v3857_v8, %v7672_v58  ;;  %4710 = vmatpush1.bf16.msra.mxu0 %v6514_v7 }
 0x167   : > { %5765 = vmatpush1.bf16.msra.mxu1 %v6514_v7  ;;  %v3859_v30 = vpop.f32.mrf.mxu0  ;;  %4711 = vmatprep.subr.bf16.mxu0 %v6519_v11 }
 0x168   : > { %v3972_v50 = vpop.f32.mrf.mxu1  ;;  %5750 = vmatprep.subr.bf16.mxu1 %v6519_v11  ;;  %v7928_v13 = vadd.f32 %v3970_v19, %v3858_v26  ;;  %v3860_v34 = vadd.f32 %v3859_v30, %v7680_v0  ;;  %4543 = vmatprep.mubr.bf16.mxu0 %v6522_v18  ;;  %v6532_v18 = vld [vmem:[%s6803_s24 + $0x3b0] ss:$88 sps:$4 sm:$0xff]   ;;  %v6543_v30 = vld [vmem:[%s8583_s1 + $0xac4] ss:$8 sps:$4 sm:$0xff]  }
 0x169   : > { %4656 = vmatprep.mubr.bf16.mxu1 %v6525_v44  ;;  %v3861_v58 = vpop.f32.mrf.mxu0  ;;  %v6535_v44 = vld [vmem:[%s6803_s24 + $0x3b8] ss:$88 sps:$4 sm:$0xff]  }
 0x16a   : > { %v3974_v36 = vpop.f32.mrf.mxu1  ;;  %v7933_v47 = vadd.f32 %v3972_v50, %v3860_v34  ;;  %v3862_v42 = vadd.f32 %v3861_v58, %v7690_v9  ;;  %4712 = vmatpush1.bf16.msra.mxu0 %v6517_v28  ;;  %v6537_v9 = vld [vmem:[%s6803_s24 + $0x3bc] ss:$88 sps:$4 sm:$0xff]   ;;  %v6538_v26 = vld [vmem:[%s8583_s1 + $0xad0] ss:$8 sps:$4 sm:$0xff]  }
 0x16b   : > { %5766 = vmatpush1.bf16.msra.mxu1 %v6517_v28  ;;  %v3863_v51 = vpop.f32.mrf.mxu0  ;;  %4713 = vmatprep.subr.bf16.mxu0 %v6528_v33  ;;  %v6546_v34 = vld [vmem:[%s6803_s24 + $0x464] ss:$88 sps:$4 sm:$0xff]  }
 0x16c   : > { %v3976_v0 = vpop.f32.mrf.mxu1  ;;  %5751 = vmatprep.subr.bf16.mxu1 %v6528_v33  ;;  %v7942_v25 = vadd.f32 %v3974_v36, %v3862_v42  ;;  %v3864_v55 = vadd.f32 %v3863_v51, %v7698_v15  ;;  %v6541_v42 = vld [vmem:[%s8583_s1 + $0xac0] ss:$8 sps:$4 sm:$0xff]   ;;  %v6552_v51 = vld [vmem:[%s8583_s1 + $0xab4] ss:$8 sps:$4 sm:$0xff]  }
 0x16d   : > { %v3867_v32 = vpop.f32.mrf.mxu0  ;;  %4544 = vmatmul.mubr.bf16.gmra.mxu0 %v6520_v40 }
 0x16e   : > { %v3980_v62 = vpop.f32.mrf.mxu1  ;;  %4657 = vmatmul.mubr.bf16.gmra.mxu1 %v6523_v20  ;;  %v7947_v63 = vadd.f32 %v3976_v0, %v3864_v55  ;;  %v3868_v60 = vadd.f32 %v3867_v32, %v7708_v23  ;;  %4714 = vmatpush2.bf16.msra.mxu0 %v6526_v46 }
 0x16f   : > { %5767 = vmatpush2.bf16.msra.mxu1 %v6526_v46  ;;  %v3869_v7 = vpop.f32.mrf.mxu0  ;;  %4715 = vmatprep.subr.bf16.mxu0 %v6531_v52 }
 0x170   : > { %v3982_v15 = vpop.f32.mrf.mxu1  ;;  %5752 = vmatprep.subr.bf16.mxu1 %v6531_v52  ;;  %v7956_v37 = vadd.f32 %v3980_v62, %v3868_v60  ;;  %v3870_v11 = vadd.f32 %v3869_v7, %v7716_v29  ;;  %4553 = vmatprep.mubr.bf16.mxu0 %v6534_v56  ;;  %v6544_v56 = vld [vmem:[%s6803_s24 + $0x460] ss:$88 sps:$4 sm:$0xff]   ;;  %v6555_v7 = vld [vmem:[%s8583_s1 + $0xaa4] ss:$8 sps:$4 sm:$0xff]  }
 0x171   : > { %4666 = vmatprep.mubr.bf16.mxu1 %v6537_v9  ;;  %v3871_v23 = vpop.f32.mrf.mxu0  ;;  %v6547_v9 = vld [vmem:[%s6803_s24 + $0x468] ss:$88 sps:$4 sm:$0xff]   ;;  %v6550_v60 = vld [vmem:[%s8583_s1 + $0xab0] ss:$8 sps:$4 sm:$0xff]  }
 0x172   : > { %v3984_v16 = vpop.f32.mrf.mxu1  ;;  %v7961_v8 = vadd.f32 %v3982_v15, %v3870_v11  ;;  %v3872_v19 = vadd.f32 %v3871_v23, %v7726_v38  ;;  %4716 = vmatpush2.bf16.msra.mxu0 %v6529_v3  ;;  %v6549_v38 = vld [vmem:[%s6803_s24 + $0x46c] ss:$88 sps:$4 sm:$0xff]  }
 0x173   : > { %5768 = vmatpush2.bf16.msra.mxu1 %v6529_v3  ;;  %v3873_v28 = vpop.f32.mrf.mxu0  ;;  %4717 = vmatprep.subr.bf16.mxu0 %v6540_v10  ;;  %v6558_v11 = vld [vmem:[%s6803_s24 + $0x514] ss:$88 sps:$4 sm:$0xff]  }
 0x174   : > { %v3986_v29 = vpop.f32.mrf.mxu1  ;;  %5753 = vmatprep.subr.bf16.mxu1 %v6540_v10  ;;  %v7970_v50 = vadd.f32 %v3984_v16, %v3872_v19  ;;  %v3874_v33 = vadd.f32 %v3873_v28, %v7734_v43  ;;  %v6553_v19 = vld [vmem:[%s8583_s1 + $0xaa0] ss:$8 sps:$4 sm:$0xff]   ;;  %v6564_v28 = vld [vmem:[%s8583_s1 + $0xa94] ss:$8 sps:$4 sm:$0xff]  }
 0x175   : > { %v3877_v58 = vpop.f32.mrf.mxu0  ;;  %4554 = vmatmul.mubr.bf16.gmra.mxu0 %v6532_v18 }
 0x176   : > { %v3990_v36 = vpop.f32.mrf.mxu1  ;;  %4667 = vmatmul.mubr.bf16.gmra.mxu1 %v6535_v44  ;;  %v7975_v40 = vadd.f32 %v3986_v29, %v3874_v33  ;;  %v3878_v20 = vadd.f32 %v3877_v58, %v7744_v54  ;;  %4718 = vmatpush2.bf16.msra.mxu0 %v6538_v26 }
 0x177   : > { %5769 = vmatpush2.bf16.msra.mxu1 %v6538_v26  ;;  %v3879_v46 = vpop.f32.mrf.mxu0  ;;  %4719 = vmatprep.subr.bf16.mxu0 %v6543_v30 }
 0x178   : > { %v3992_v43 = vpop.f32.mrf.mxu1  ;;  %5754 = vmatprep.subr.bf16.mxu1 %v6543_v30  ;;  %v7984_v0 = vadd.f32 %v3990_v36, %v3878_v20  ;;  %v3880_v52 = vadd.f32 %v3879_v46, %v7752_v61  ;;  %4563 = vmatprep.mubr.bf16.mxu0 %v6546_v34  ;;  %v6556_v34 = vld [vmem:[%s6803_s24 + $0x510] ss:$88 sps:$4 sm:$0xff]   ;;  %v6567_v46 = vld [vmem:[%s8583_s1 + $0xa84] ss:$8 sps:$4 sm:$0xff]  }
 0x179   : > { %4676 = vmatprep.mubr.bf16.mxu1 %v6549_v38  ;;  %v3881_v54 = vpop.f32.mrf.mxu0  ;;  %v6559_v38 = vld [vmem:[%s6803_s24 + $0x518] ss:$88 sps:$4 sm:$0xff]  }
 0x17a   : > { %v3994_v55 = vpop.f32.mrf.mxu1  ;;  %v7989_v32 = vadd.f32 %v3992_v43, %v3880_v52  ;;  %v3882_v62 = vadd.f32 %v3881_v54, %v7762_v6  ;;  %4720 = vmatpush2.bf16.msra.mxu0 %v6541_v42  ;;  %v6561_v6 = vld [vmem:[%s6803_s24 + $0x51c] ss:$88 sps:$4 sm:$0xff]   ;;  %v6562_v20 = vld [vmem:[%s8583_s1 + $0xa90] ss:$8 sps:$4 sm:$0xff]  }
 0x17b   : > { %5770 = vmatpush2.bf16.msra.mxu1 %v6541_v42  ;;  %v3883_v3 = vpop.f32.mrf.mxu0  ;;  %4721 = vmatprep.subr.bf16.mxu0 %v6552_v51  ;;  %v6570_v52 = vld [vmem:[%s6803_s24 + $0x54] ss:$88 sps:$4 sm:$0xff]  }
 0x17c   : > { %v3996_v61 = vpop.f32.mrf.mxu1  ;;  %5755 = vmatprep.subr.bf16.mxu1 %v6552_v51  ;;  %v7998_v15 = vadd.f32 %v3994_v55, %v3882_v62  ;;  %v3884_v10 = vadd.f32 %v3883_v3, %v7770_v14  ;;  %v6565_v62 = vld [vmem:[%s8583_s1 + $0xa80] ss:$8 sps:$4 sm:$0xff]  }
 0x17d   : > { %v3887_v23 = vpop.f32.mrf.mxu0  ;;  %4564 = vmatmul.mubr.bf16.gmra.mxu0 %v6544_v56 }
 0x17e   : > { %v4000_v16 = vpop.f32.mrf.mxu1  ;;  %4677 = vmatmul.mubr.bf16.gmra.mxu1 %v6547_v9  ;;  %v8003_v18 = vadd.f32 %v3996_v61, %v3884_v10  ;;  %v3888_v44 = vadd.f32 %v3887_v23, %v7780_v24  ;;  %4722 = vmatpush2.bf16.msra.mxu0 %v6550_v60  ;;  %v6568_v10 = vld [vmem:[%s6803_s24 + $0x50] ss:$88 sps:$4 sm:$0xff]  }
 0x17f   : > { %5771 = vmatpush2.bf16.msra.mxu1 %v6550_v60  ;;  %v3889_v26 = vpop.f32.mrf.mxu0  ;;  %4723 = vmatprep.subr.bf16.mxu0 %v6555_v7 }
 0x180   : > { %v4002_v14 = vpop.f32.mrf.mxu1  ;;  %5756 = vmatprep.subr.bf16.mxu1 %v6555_v7  ;;  %v8012_v29 = vadd.f32 %v4000_v16, %v3888_v44  ;;  %v3890_v30 = vadd.f32 %v3889_v26, %v7788_v31  ;;  %4573 = vmatprep.mubr.bf16.mxu0 %v6558_v11  ;;  %v6571_v11 = vld [vmem:[%s6803_s24 + $0x310] ss:$88 sps:$4 sm:$0xff]   ;;  %v6576_v16 = vld [vmem:[%s6803_s24 + $0x104] ss:$88 sps:$4 sm:$0xff]  }
 0x181   : > { %4686 = vmatprep.mubr.bf16.mxu1 %v6561_v6  ;;  %v3891_v24 = vpop.f32.mrf.mxu0  ;;  %v6579_v44 = vld [vmem:[%s6803_s24 + $0x3c4] ss:$88 sps:$4 sm:$0xff]  }
 0x182   : > { %v4004_v33 = vpop.f32.mrf.mxu1  ;;  %v8017_v58 = vadd.f32 %v4002_v14, %v3890_v30  ;;  %v3892_v36 = vadd.f32 %v3891_v24, %v7798_v41  ;;  %4724 = vmatpush2.bf16.msra.mxu0 %v6553_v19  ;;  %v6573_v41 = vld [vmem:[%s6803_s24 + $0x314] ss:$88 sps:$4 sm:$0xff]  }
 0x183   : > { %5772 = vmatpush2.bf16.msra.mxu1 %v6553_v19  ;;  %v3893_v42 = vpop.f32.mrf.mxu0  ;;  %4725 = vmatprep.subr.bf16.mxu0 %v6564_v28 }
 0x184   : > { %v4006_v31 = vpop.f32.mrf.mxu1  ;;  %5757 = vmatprep.subr.bf16.mxu1 %v6564_v28  ;;  %v8026_v43 = vadd.f32 %v4004_v33, %v3892_v36  ;;  %v3894_v51 = vadd.f32 %v3893_v42, %v7806_v49  ;;  %v6574_v42 = vld [vmem:[%s6803_s24 + $0x100] ss:$88 sps:$4 sm:$0xff]  }
 0x185   : > { %v3897_v54 = vpop.f32.mrf.mxu0  ;;  %4574 = vmatmul.mubr.bf16.gmra.mxu0 %v6556_v34 }
 0x186   : > { %v4010_v55 = vpop.f32.mrf.mxu1  ;;  %4687 = vmatmul.mubr.bf16.gmra.mxu1 %v6559_v38  ;;  %v8031_v56 = vadd.f32 %v4006_v31, %v3894_v51  ;;  %v3898_v9 = vadd.f32 %v3897_v54, %v7813_v59  ;;  %4726 = vmatpush2.bf16.msra.mxu0 %v6562_v20  ;;  %v6577_v31 = vld [vmem:[%s6803_s24 + $0x3c0] ss:$88 sps:$4 sm:$0xff]  }
 0x187   : > { %5773 = vmatpush2.bf16.msra.mxu1 %v6562_v20  ;;  %v3899_v60 = vpop.f32.mrf.mxu0  ;;  %4727 = vmatprep.subr.bf16.mxu0 %v6567_v46 }
 0x188   : > { %v4012_v49 = vpop.f32.mrf.mxu1  ;;  %5758 = vmatprep.subr.bf16.mxu1 %v6567_v46  ;;  %v8037_v3 = vadd.f32 %v4010_v55, %v3898_v9  ;;  %v3900_v61 = vadd.f32 %v3899_v60, %v7821_v4  ;;  %4729 = vmatprep.mubr.bf16.mxu0 %v6570_v52  ;;  %v6582_v52 = vld [vmem:[%s6803_s24 + $0x1b4] ss:$88 sps:$4 sm:$0xff]  }
 0x189   : > { %4769 = vmatprep.mubr.bf16.mxu1 %v6573_v41  ;;  %v3901_v7 = vpop.f32.mrf.mxu0  ;;  %v6585_v41 = vld [vmem:[%s6803_s24 + $0x474] ss:$88 sps:$4 sm:$0xff]  }
 0x18a   : > { %v4014_v59 = vpop.f32.mrf.mxu1  ;;  %v8042_v6 = vadd.f32 %v4012_v49, %v3900_v61  ;;  %v3902_v23 = vadd.f32 %v3901_v7, %v7825_v12  ;;  %4728 = vmatpush2.bf16.msra.mxu0 %v6565_v62 }
 0x18b   : > { %5774 = vmatpush2.bf16.msra.mxu1 %v6565_v62  ;;  %v3903_v19 = vpop.f32.mrf.mxu0 }
 0x18c   : > { %v4016_v26 = vpop.f32.mrf.mxu1  ;;  %v8047_v14 = vadd.f32 %v4014_v59, %v3902_v23  ;;  %v3904_v4 = vadd.f32 %v3903_v19, %v7833_v21  ;;  %v6583_v23 = vld [vmem:[%s6803_s24 + $0x470] ss:$88 sps:$4 sm:$0xff]   ;;  %v6588_v19 = vld [vmem:[%s6803_s24 + $0x264] ss:$88 sps:$4 sm:$0xff]  }
 0x18d   : > { %v4053_v28 = vpop.f32.mrf.mxu0  ;;  %4730 = vmatmul.mubr.bf16.vlgmr.msra.gmra.mxu0 %v6568_v10 }
 0x18e   : > { %v4166_v30 = vpop.f32.mrf.mxu1  ;;  %4770 = vmatmul.mubr.bf16.vlgmr.msra.gmra.mxu1 %v6571_v11  ;;  %v8050_v24 = vadd.f32 %v4016_v26, %v3904_v4  ;;  %v4054_v12 = vadd.f32 %v4053_v28, %v7844_v39  ;;  %4739 = vmatprep.mubr.bf16.mxu0 %v6576_v16  ;;  %v6580_v11 = vld [vmem:[%s6803_s24 + $0x1b0] ss:$88 sps:$4 sm:$0xff]   ;;  %v6591_v26 = vld [vmem:[%s6803_s24 + $0x524] ss:$88 sps:$4 sm:$0xff]  }
 0x18f   : > { %4779 = vmatprep.mubr.bf16.mxu1 %v6579_v44  ;;  %v4055_v33 = vpop.f32.mrf.mxu0 }
 0x190   : > { %v4168_v34 = vpop.f32.mrf.mxu1  ;;  %v8053_v38 = vadd.f32 %v4166_v30, %v4054_v12  ;;  %v4056_v36 = vadd.f32 %v4055_v33, %v7849_v48 }
 0x191   : > { %v4057_v21 = vpop.f32.mrf.mxu0 }
 0x192   : > { %v4170_v20 = vpop.f32.mrf.mxu1  ;;  %v8058_v46 = vadd.f32 %v4168_v34, %v4056_v36  ;;  %v4058_v51 = vadd.f32 %v4057_v21, %v7858_v57 }
 0x193   : > { %v4059_v54 = vpop.f32.mrf.mxu0 }
 0x194   : > { %v4172_v39 = vpop.f32.mrf.mxu1  ;;  %v8063_v55 = vadd.f32 %v4170_v20, %v4058_v51  ;;  %v4060_v9 = vadd.f32 %v4059_v54, %v7863_v5  ;;  %v6589_v51 = vld [vmem:[%s6803_s24 + $0x520] ss:$88 sps:$4 sm:$0xff]  }
 0x195   : > { %v4063_v62 = vpop.f32.mrf.mxu0  ;;  %4740 = vmatmul.mubr.bf16.gmra.mxu0 %v6574_v42 }
 0x196   : > { %v4176_v48 = vpop.f32.mrf.mxu1  ;;  %4780 = vmatmul.mubr.bf16.gmra.mxu1 %v6577_v31  ;;  %v8066_v60 = vadd.f32 %v4172_v39, %v4060_v9  ;;  %v4064_v57 = vadd.f32 %v4063_v62, %v7872_v17  ;;  %4749 = vmatprep.mubr.bf16.mxu0 %v6582_v52 }
 0x197   : > { %4789 = vmatprep.mubr.bf16.mxu1 %v6585_v41  ;;  %v4065_v49 = vpop.f32.mrf.mxu0 }
 0x198   : > { %v4178_v61 = vpop.f32.mrf.mxu1  ;;  %v8069_v7 = vadd.f32 %v4176_v48, %v4064_v57  ;;  %v4066_v59 = vadd.f32 %v4065_v49, %v7877_v27 }
 0x199   : > { %v4067_v5 = vpop.f32.mrf.mxu0 }
 0x19a   : > { %v4180_v10 = vpop.f32.mrf.mxu1  ;;  %v8074_v16 = vadd.f32 %v4178_v61, %v4066_v59  ;;  %v4068_v44 = vadd.f32 %v4067_v5, %v7886_v35 }
 0x19b   : > { %v4069_v4 = vpop.f32.mrf.mxu0 }
 0x19c   : > { %v4182_v17 = vpop.f32.mrf.mxu1  ;;  %v8079_v28 = vadd.f32 %v4180_v10, %v4068_v44  ;;  %v4070_v30 = vadd.f32 %v4069_v4, %v7891_v45  ;;  %v6586_v45 = vld [vmem:[%s6803_s24 + $0x260] ss:$88 sps:$4 sm:$0xff]  }
 0x19d   : > { %v4073_v12 = vpop.f32.mrf.mxu0  ;;  %4750 = vmatmul.mubr.bf16.gmra.mxu0 %v6580_v11 }
 0x19e   : > { %v4186_v27 = vpop.f32.mrf.mxu1  ;;  %4790 = vmatmul.mubr.bf16.gmra.mxu1 %v6583_v23  ;;  %v8082_v33 = vadd.f32 %v4182_v17, %v4070_v30  ;;  %v4074_v34 = vadd.f32 %v4073_v12, %v7900_v53  ;;  %4759 = vmatprep.mubr.bf16.mxu0 %v6588_v19 }
 0x19f   : > { %4799 = vmatprep.mubr.bf16.mxu1 %v6591_v26  ;;  %v4075_v35 = vpop.f32.mrf.mxu0 }
 0x1a0   : > { %v4188_v36 = vpop.f32.mrf.mxu1  ;;  %v8085_v21 = vadd.f32 %v4186_v27, %v4074_v34  ;;  %v4076_v20 = vadd.f32 %v4075_v35, %v7905_v2 }
 0x1a1   : > { %v4077_v42 = vpop.f32.mrf.mxu0 }
 0x1a2   : > { %v4190_v31 = vpop.f32.mrf.mxu1  ;;  %v8090_v52 = vadd.f32 %v4188_v36, %v4076_v20  ;;  %v4078_v41 = vadd.f32 %v4077_v42, %v7914_v1 }
 0x1a3   : > { %v4079_v54 = vpop.f32.mrf.mxu0 }
 0x1a4   : > { %v4192_v39 = vpop.f32.mrf.mxu1  ;;  %v8093_v9 = vadd.f32 %v4190_v31, %v4078_v41  ;;  %v4080_v53 = vadd.f32 %v4079_v54, %v7919_v22 }
 0x1a5   : > { %v4083_v62 = vpop.f32.mrf.mxu0  ;;  %4760 = vmatmul.mubr.bf16.gmra.mxu0 %v6586_v45 }
 0x1a6   : > { %v4196_v48 = vpop.f32.mrf.mxu1  ;;  %4800 = vmatmul.mubr.bf16.gmra.mxu1 %v6589_v51  ;;  %v8096_v57 = vadd.f32 %v4192_v39, %v4080_v53  ;;  %v4084_v2 = vadd.f32 %v4083_v62, %v7928_v13 }
 0x1a7   : > { %v4085_v49 = vpop.f32.mrf.mxu0 }
 0x1a8   : > { %v4198_v61 = vpop.f32.mrf.mxu1  ;;  %v8099_v59 = vadd.f32 %v4196_v48, %v4084_v2  ;;  %v4086_v1 = vadd.f32 %v4085_v49, %v7933_v47 }
 0x1a9   : > { %v4087_v5 = vpop.f32.mrf.mxu0 }
 0x1aa   : > { %v4200_v10 = vpop.f32.mrf.mxu1  ;;  %v8102_v11 = vadd.f32 %v4198_v61, %v4086_v1  ;;  %v4088_v22 = vadd.f32 %v4087_v5, %v7942_v25 }
 0x1ab   : > { %v4089_v23 = vpop.f32.mrf.mxu0 }
 0x1ac   : > { %v4202_v44 = vpop.f32.mrf.mxu1  ;;  %v8105_v19 = vadd.f32 %v4200_v10, %v4088_v22  ;;  %v4090_v26 = vadd.f32 %v4089_v23, %v7947_v63 }
 0x1ad   : > { %v4093_v4 = vpop.f32.mrf.mxu0 }
 0x1ae   : > { %v4206_v13 = vpop.f32.mrf.mxu1  ;;  %v8108_v17 = vadd.f32 %v4202_v44, %v4090_v26  ;;  %v4094_v30 = vadd.f32 %v4093_v4, %v7956_v37 }
 0x1af   : > { %v4095_v12 = vpop.f32.mrf.mxu0 }
 0x1b0   : > { %v4208_v47 = vpop.f32.mrf.mxu1  ;;  %v8111_v27 = vadd.f32 %v4206_v13, %v4094_v30  ;;  %v4096_v34 = vadd.f32 %v4095_v12, %v7961_v8 }
 0x1b1   : > { %v4097_v35 = vpop.f32.mrf.mxu0 }
 0x1b2   : > { %v4210_v25 = vpop.f32.mrf.mxu1  ;;  %v8114_v36 = vadd.f32 %v4208_v47, %v4096_v34  ;;  %v4098_v20 = vadd.f32 %v4097_v35, %v7970_v50 }
 0x1b3   : > { %v4099_v42 = vpop.f32.mrf.mxu0 }
 0x1b4   : > { %v4212_v63 = vpop.f32.mrf.mxu1  ;;  %v8117_v31 = vadd.f32 %v4210_v25, %v4098_v20  ;;  %v4100_v45 = vadd.f32 %v4099_v42, %v7975_v40 }
 0x1b5   : > { %v4103_v51 = vpop.f32.mrf.mxu0 }
 0x1b6   : > { %v4216_v37 = vpop.f32.mrf.mxu1  ;;  %v8120_v41 = vadd.f32 %v4212_v63, %v4100_v45  ;;  %v4104_v54 = vadd.f32 %v4103_v51, %v7984_v0 }
 0x1b7   : > { %v4105_v39 = vpop.f32.mrf.mxu0 }
 0x1b8   : > { %v4218_v8 = vpop.f32.mrf.mxu1  ;;  %v8123_v53 = vadd.f32 %v4216_v37, %v4104_v54  ;;  %v4106_v62 = vadd.f32 %v4105_v39, %v7989_v32 }
 0x1b9   : > { %v4107_v48 = vpop.f32.mrf.mxu0 }
 0x1ba   : > { %v4220_v50 = vpop.f32.mrf.mxu1  ;;  %v8126_v2 = vadd.f32 %v4218_v8, %v4106_v62  ;;  %v4108_v49 = vadd.f32 %v4107_v48, %v7998_v15 }
 0x1bb   : > { %v4109_v61 = vpop.f32.mrf.mxu0 }
 0x1bc   : > { %v4222_v40 = vpop.f32.mrf.mxu1  ;;  %v8129_v1 = vadd.f32 %v4220_v50, %v4108_v49  ;;  %v4110_v5 = vadd.f32 %v4109_v61, %v8003_v18 }
 0x1bd   : > { %v4113_v10 = vpop.f32.mrf.mxu0 }
 0x1be   : > { %v4226_v0 = vpop.f32.mrf.mxu1  ;;  %v8132_v22 = vadd.f32 %v4222_v40, %v4110_v5  ;;  %v4114_v23 = vadd.f32 %v4113_v10, %v8012_v29 }
 0x1bf   : > { %v4115_v44 = vpop.f32.mrf.mxu0 }
 0x1c0   : > { %v4228_v32 = vpop.f32.mrf.mxu1  ;;  %v8135_v26 = vadd.f32 %v4226_v0, %v4114_v23  ;;  %v4116_v4 = vadd.f32 %v4115_v44, %v8017_v58 }
 0x1c1   : > { %v4117_v13 = vpop.f32.mrf.mxu0 }
 0x1c2   : > { %v4230_v15 = vpop.f32.mrf.mxu1  ;;  %v8138_v30 = vadd.f32 %v4228_v32, %v4116_v4  ;;  %v4118_v12 = vadd.f32 %v4117_v13, %v8026_v43 }
 0x1c3   : > { %v4119_v47 = vpop.f32.mrf.mxu0 }
 0x1c4   : > { %v4232_v18 = vpop.f32.mrf.mxu1  ;;  %v8141_v34 = vadd.f32 %v4230_v15, %v4118_v12  ;;  %v4120_v35 = vadd.f32 %v4119_v47, %v8031_v56 }
 0x1c5   : > { %v4123_v25 = vpop.f32.mrf.mxu0 }
 0x1c6   : > { %v4236_v29 = vpop.f32.mrf.mxu1  ;;  %v8144_v20 = vadd.f32 %v4232_v18, %v4120_v35  ;;  %v4124_v42 = vadd.f32 %v4123_v25, %v8037_v3 }
 0x1c7   : > { %v4125_v63 = vpop.f32.mrf.mxu0 }
 0x1c8   : > { %v4238_v58 = vpop.f32.mrf.mxu1  ;;  %v8147_v45 = vadd.f32 %v4236_v29, %v4124_v42  ;;  %v4126_v51 = vadd.f32 %v4125_v63, %v8042_v6 }
 0x1c9   : > { %v4127_v37 = vpop.f32.mrf.mxu0 }
 0x1ca   : > { %v4240_v43 = vpop.f32.mrf.mxu1  ;;  %v8150_v54 = vadd.f32 %v4238_v58, %v4126_v51  ;;  %v4128_v39 = vadd.f32 %v4127_v37, %v8047_v14 }
 0x1cb   : > { %v4129_v8 = vpop.f32.mrf.mxu0 }
 0x1cc   : > { %v4242_v56 = vpop.f32.mrf.mxu1  ;;  %v8153_v62 = vadd.f32 %v4240_v43, %v4128_v39  ;;  %v4130_v48 = vadd.f32 %v4129_v8, %v8050_v24 }
 0x1cd   : > { %v4279_v50 = vpop.f32.mrf.mxu0 }
 0x1ce   : > { %v4392_v3 = vpop.f32.mrf.mxu1  ;;  %v8156_v49 = vadd.f32 %v4242_v56, %v4130_v48  ;;  %v4280_v61 = vadd.f32 %v4279_v50, %v8053_v38 }
 0x1cf   : > { %v4281_v40 = vpop.f32.mrf.mxu0 }
 0x1d0   : > { %v4394_v6 = vpop.f32.mrf.mxu1  ;;  %v8159_v5 = vadd.f32 %v4392_v3, %v4280_v61  ;;  %v4282_v10 = vadd.f32 %v4281_v40, %v8058_v46 }
 0x1d1   : > { %v4283_v0 = vpop.f32.mrf.mxu0 }
 0x1d2   : > { %v4396_v14 = vpop.f32.mrf.mxu1  ;;  %v8162_v23 = vadd.f32 %v4394_v6, %v4282_v10  ;;  %v4284_v44 = vadd.f32 %v4283_v0, %v8063_v55 }
 0x1d3   : > { %v4285_v32 = vpop.f32.mrf.mxu0 }
 0x1d4   : > { %v4398_v24 = vpop.f32.mrf.mxu1  ;;  %v8165_v4 = vadd.f32 %v4396_v14, %v4284_v44  ;;  %v4286_v13 = vadd.f32 %v4285_v32, %v8066_v60 }
 0x1d5   : > { %v4289_v15 = vpop.f32.mrf.mxu0 }
 0x1d6   : > { %v4402_v38 = vpop.f32.mrf.mxu1  ;;  %v8168_v12 = vadd.f32 %v4398_v24, %v4286_v13  ;;  %v4290_v47 = vadd.f32 %v4289_v15, %v8069_v7 }
 0x1d7   : > { %v4291_v18 = vpop.f32.mrf.mxu0 }
 0x1d8   : > { %v4404_v46 = vpop.f32.mrf.mxu1  ;;  %v8171_v35 = vadd.f32 %v4402_v38, %v4290_v47  ;;  %v4292_v25 = vadd.f32 %v4291_v18, %v8074_v16 }
 0x1d9   : > { %v4293_v29 = vpop.f32.mrf.mxu0 }
 0x1da   : > { %v4406_v55 = vpop.f32.mrf.mxu1  ;;  %v8174_v42 = vadd.f32 %v4404_v46, %v4292_v25  ;;  %v4294_v63 = vadd.f32 %v4293_v29, %v8079_v28 }
 0x1db   : > { %v4295_v58 = vpop.f32.mrf.mxu0 }
 0x1dc   : > { %v4408_v60 = vpop.f32.mrf.mxu1  ;;  %v8177_v51 = vadd.f32 %v4406_v55, %v4294_v63  ;;  %v4296_v37 = vadd.f32 %v4295_v58, %v8082_v33 }
 0x1dd   : > { %v4299_v43 = vpop.f32.mrf.mxu0 }
 0x1de   : > { %v4412_v7 = vpop.f32.mrf.mxu1  ;;  %v8180_v39 = vadd.f32 %v4408_v60, %v4296_v37  ;;  %v4300_v8 = vadd.f32 %v4299_v43, %v8085_v21 }
 0x1df   : > { %v4301_v56 = vpop.f32.mrf.mxu0 }
 0x1e0   : > { %v4414_v16 = vpop.f32.mrf.mxu1  ;;  %v8183_v48 = vadd.f32 %v4412_v7, %v4300_v8  ;;  %v4302_v50 = vadd.f32 %v4301_v56, %v8090_v52 }
 0x1e1   : > { %v4303_v3 = vpop.f32.mrf.mxu0 }
 0x1e2   : > { %v4416_v28 = vpop.f32.mrf.mxu1  ;;  %v8186_v61 = vadd.f32 %v4414_v16, %v4302_v50  ;;  %v4304_v40 = vadd.f32 %v4303_v3, %v8093_v9 }
 0x1e3   : > { %v4305_v6 = vpop.f32.mrf.mxu0 }
 0x1e4   : > { %v4418_v33 = vpop.f32.mrf.mxu1  ;;  %v8189_v10 = vadd.f32 %v4416_v28, %v4304_v40  ;;  %v4306_v0 = vadd.f32 %v4305_v6, %v8096_v57 }
 0x1e5   : > { %v4309_v14 = vpop.f32.mrf.mxu0 }
 0x1e6   : > { %v4422_v21 = vpop.f32.mrf.mxu1  ;;  %v8192_v44 = vadd.f32 %v4418_v33, %v4306_v0  ;;  %v4310_v32 = vadd.f32 %v4309_v14, %v8099_v59 }
 0x1e7   : > { %v4311_v24 = vpop.f32.mrf.mxu0 }
 0x1e8   : > { %v4424_v52 = vpop.f32.mrf.mxu1  ;;  %v8195_v13 = vadd.f32 %v4422_v21, %v4310_v32  ;;  %v4312_v15 = vadd.f32 %v4311_v24, %v8102_v11 }
 0x1e9   : > { %v4313_v38 = vpop.f32.mrf.mxu0 }
 0x1ea   : > { %v4426_v9 = vpop.f32.mrf.mxu1  ;;  %v8198_v47 = vadd.f32 %v4424_v52, %v4312_v15  ;;  %v4314_v18 = vadd.f32 %v4313_v38, %v8105_v19 }
 0x1eb   : > { %v4315_v46 = vpop.f32.mrf.mxu0 }
 0x1ec   : > { %v4428_v57 = vpop.f32.mrf.mxu1  ;;  %v8201_v25 = vadd.f32 %v4426_v9, %v4314_v18  ;;  %v4316_v29 = vadd.f32 %v4315_v46, %v8108_v17 }
 0x1ed   : > { %v4319_v55 = vpop.f32.mrf.mxu0 }
 0x1ee   : > { %v4432_v59 = vpop.f32.mrf.mxu1  ;;  %v8204_v63 = vadd.f32 %v4428_v57, %v4316_v29  ;;  %v4320_v58 = vadd.f32 %v4319_v55, %v8111_v27 }
 0x1ef   : > { %v4321_v60 = vpop.f32.mrf.mxu0 }
 0x1f0   : > { %v4434_v11 = vpop.f32.mrf.mxu1  ;;  %v8207_v37 = vadd.f32 %v4432_v59, %v4320_v58  ;;  %v4322_v43 = vadd.f32 %v4321_v60, %v8114_v36 }
 0x1f1   : > { %v4323_v7 = vpop.f32.mrf.mxu0 }
 0x1f2   : > { %8587 = vst [vmem:[#allocation3_spill] sm:$0xff] %v8207_v37  ;;  %v4436_v19 = vpop.f32.mrf.mxu1  ;;  %v8210_v8 = vadd.f32 %v4434_v11, %v4322_v43  ;;  %v4324_v56 = vadd.f32 %v4323_v7, %v8117_v31 }
 0x1f3   : > { %v4325_v16 = vpop.f32.mrf.mxu0 }
 0x1f4   : > { %8588 = vst [vmem:[#allocation4_spill] sm:$0xff] %v8210_v8  ;;  %v4438_v17 = vpop.f32.mrf.mxu1  ;;  %v8213_v50 = vadd.f32 %v4436_v19, %v4324_v56  ;;  %v4326_v3 = vadd.f32 %v4325_v16, %v8120_v41 }
 0x1f5   : > { %v4329_v28 = vpop.f32.mrf.mxu0 }
 0x1f6   : > { %8589 = vst [vmem:[#allocation5_spill] sm:$0xff] %v8213_v50  ;;  %v4442_v27 = vpop.f32.mrf.mxu1  ;;  %v8216_v40 = vadd.f32 %v4438_v17, %v4326_v3  ;;  %v4330_v6 = vadd.f32 %v4329_v28, %v8123_v53 }
 0x1f7   : > { %v4331_v33 = vpop.f32.mrf.mxu0 }
 0x1f8   : > { %8590 = vst [vmem:[#allocation6_spill] sm:$0xff] %v8216_v40  ;;  %v4444_v36 = vpop.f32.mrf.mxu1  ;;  %v8219_v0 = vadd.f32 %v4442_v27, %v4330_v6  ;;  %v4332_v14 = vadd.f32 %v4331_v33, %v8126_v2 }
 0x1f9   : > { %v4333_v21 = vpop.f32.mrf.mxu0 }
 0x1fa   : > { %8591 = vst [vmem:[#allocation7_spill] sm:$0xff] %v8219_v0  ;;  %v4446_v31 = vpop.f32.mrf.mxu1  ;;  %v8222_v32 = vadd.f32 %v4444_v36, %v4332_v14  ;;  %v4334_v24 = vadd.f32 %v4333_v21, %v8129_v1 }
 0x1fb   : > { %v4335_v52 = vpop.f32.mrf.mxu0 }
 0x1fc   : > { %8592 = vst [vmem:[#allocation8_spill] sm:$0xff] %v8222_v32  ;;  %v4448_v41 = vpop.f32.mrf.mxu1  ;;  %v8225_v15 = vadd.f32 %v4446_v31, %v4334_v24  ;;  %v4336_v38 = vadd.f32 %v4335_v52, %v8132_v22 }
 0x1fd   : > { %v4339_v9 = vpop.f32.mrf.mxu0 }
 0x1fe   : > { %8593 = vst [vmem:[#allocation9_spill] sm:$0xff] %v8225_v15  ;;  %v4452_v53 = vpop.f32.mrf.mxu1  ;;  %v8228_v18 = vadd.f32 %v4448_v41, %v4336_v38  ;;  %v4340_v46 = vadd.f32 %v4339_v9, %v8135_v26 }
 0x1ff   : > { %v4341_v57 = vpop.f32.mrf.mxu0 }
 0x200   : > { %8594 = vst [vmem:[#allocation10_spill] sm:$0xff] %v8228_v18  ;;  %v4454_v2 = vpop.f32.mrf.mxu1  ;;  %v8231_v29 = vadd.f32 %v4452_v53, %v4340_v46  ;;  %v4342_v55 = vadd.f32 %v4341_v57, %v8138_v30 }
 0x201   : > { %v4343_v59 = vpop.f32.mrf.mxu0 }
 0x202   : > { %8595 = vst [vmem:[#allocation11_spill] sm:$0xff] %v8231_v29  ;;  %v4456_v1 = vpop.f32.mrf.mxu1  ;;  %v8234_v58 = vadd.f32 %v4454_v2, %v4342_v55  ;;  %v4344_v60 = vadd.f32 %v4343_v59, %v8141_v34 }
 0x203   : > { %v4345_v11 = vpop.f32.mrf.mxu0 }
 0x204   : > { %8596 = vst [vmem:[#allocation12_spill] sm:$0xff] %v8234_v58  ;;  %v4458_v22 = vpop.f32.mrf.mxu1  ;;  %v8237_v43 = vadd.f32 %v4456_v1, %v4344_v60  ;;  %v4346_v7 = vadd.f32 %v4345_v11, %v8144_v20 }
 0x205   : > { %v4349_v19 = vpop.f32.mrf.mxu0 }
 0x206   : > { %8597 = vst [vmem:[#allocation13_spill] sm:$0xff] %v8237_v43  ;;  %v4462_v26 = vpop.f32.mrf.mxu1  ;;  %v8240_v56 = vadd.f32 %v4458_v22, %v4346_v7  ;;  %v4350_v16 = vadd.f32 %v4349_v19, %v8147_v45 }
 0x207   : > { %v4351_v17 = vpop.f32.mrf.mxu0 }
 0x208   : > { %8598 = vst [vmem:[#allocation14_spill] sm:$0xff] %v8240_v56  ;;  %v4464_v30 = vpop.f32.mrf.mxu1  ;;  %v8243_v3 = vadd.f32 %v4462_v26, %v4350_v16  ;;  %v4352_v28 = vadd.f32 %v4351_v17, %v8150_v54 }
 0x209   : > { %v4353_v27 = vpop.f32.mrf.mxu0 }
 0x20a   : > { %8599 = vst [vmem:[#allocation15_spill] sm:$0xff] %v8243_v3  ;;  %v4466_v34 = vpop.f32.mrf.mxu1  ;;  %v8246_v6 = vadd.f32 %v4464_v30, %v4352_v28  ;;  %v4354_v33 = vadd.f32 %v4353_v27, %v8153_v62 }
 0x20b   : > { %v4355_v36 = vpop.f32.mrf.mxu0 }
 0x20c   : > { %8600 = vst [vmem:[#allocation16_spill] sm:$0xff] %v8246_v6  ;;  %v4468_v20 = vpop.f32.mrf.mxu1  ;;  %v8249_v14 = vadd.f32 %v4466_v34, %v4354_v33  ;;  %v4356_v21 = vadd.f32 %v4355_v36, %v8156_v49 }
 0x20d   : > { %v4505_v31 = vpop.f32.mrf.mxu0 }
 0x20e   : > { %8601 = vst [vmem:[#allocation17_spill] sm:$0xff] %v8249_v14  ;;  %v8252_v45 = vpop.f32.mrf.mxu1  ;;  %v8254_v24 = vadd.f32 %v4468_v20, %v4356_v21 }
 0x20f   : > { %v4507_v52 = vpop.f32.mrf.mxu0 }
 0x210   : > { %8602 = vst [vmem:[#allocation18_spill] sm:$0xff] %v8254_v24  ;;  %v8256_v41 = vpop.f32.mrf.mxu1 }
 0x211   : > { %v4509_v54 = vpop.f32.mrf.mxu0 }
 0x212   : > { %v8258_v38 = vpop.f32.mrf.mxu1 }
 0x213   : > { %v4511_v9 = vpop.f32.mrf.mxu0 }
 0x214   : > { %v8260_v53 = vpop.f32.mrf.mxu1 }
 0x215   : > { %v4515_v62 = vpop.f32.mrf.mxu0 }
 0x216   : > { %v8262_v46 = vpop.f32.mrf.mxu1  ;;  %v4516_v0 = vadd.f32 %v4515_v62, %v8171_v35 }
 0x217   : > { %v4517_v57 = vpop.f32.mrf.mxu0 }
 0x218   : > { %v8264_v2 = vpop.f32.mrf.mxu1  ;;  %v4518_v40 = vadd.f32 %v4517_v57, %v8174_v42 }
 0x219   : > { %v4519_v49 = vpop.f32.mrf.mxu0 }
 0x21a   : > { %v8266_v55 = vpop.f32.mrf.mxu1 }
 0x21b   : > { %v4521_v59 = vpop.f32.mrf.mxu0 }
 0x21c   : > { %v8268_v1 = vpop.f32.mrf.mxu1 }
 0x21d   : > { %v4525_v60 = vpop.f32.mrf.mxu0 }
 0x21e   : > { %v8270_v11 = vpop.f32.mrf.mxu1  ;;  %v4526_v42 = vadd.f32 %v4525_v60, %v8183_v48  ;;  %v8625_v60 = vld [vmem:[#allocation7_spill] sm:$0xff] }
 0x21f   : > { %v4527_v22 = vpop.f32.mrf.mxu0 }
 0x220   : > { %v8272_v7 = vpop.f32.mrf.mxu1 }
 0x221   : > { %v4529_v19 = vpop.f32.mrf.mxu0 }
 0x222   : > { %v8274_v26 = vpop.f32.mrf.mxu1 }
 0x223   : > { %8603 = vst [vmem:[#allocation19_spill] sm:$0xff] %v8274_v26  ;;  %v4531_v16 = vpop.f32.mrf.mxu0 }
 0x224   : > { %v8276_v17 = vpop.f32.mrf.mxu1  ;;  %v4532_v48 = vadd.f32 %v4531_v16, %v8192_v44 }
 0x225   : > { %8604 = vst [vmem:[#allocation20_spill] sm:$0xff] %v8276_v17  ;;  %v4535_v30 = vpop.f32.mrf.mxu0 }
 0x226   : > { %v8278_v28 = vpop.f32.mrf.mxu1 }
 0x227   : > { %8605 = vst [vmem:[#allocation21_spill] sm:$0xff] %v8278_v28  ;;  %v4537_v27 = vpop.f32.mrf.mxu0 }
 0x228   : > { %v8280_v34 = vpop.f32.mrf.mxu1 }
 0x229   : > { %8606 = vst [vmem:[#allocation22_spill] sm:$0xff] %v8280_v34  ;;  %v4539_v33 = vpop.f32.mrf.mxu0  ;;  %v4911_v34 = vlaneseq }
 0x22a   : > { %v8282_v36 = vpop.f32.mrf.mxu1 }
 0x22b   : > { %8607 = vst [vmem:[#allocation23_spill] sm:$0xff] %v8282_v36  ;;  %v4541_v20 = vpop.f32.mrf.mxu0 }
 0x22c   : > { %v8284_v21 = vpop.f32.mrf.mxu1  ;;  %v8628_v16 = vld [vmem:[#allocation20_spill] sm:$0xff] }
 0x22d   : > { %8608 = vst [vmem:[#allocation24_spill] sm:$0xff] %v8284_v21  ;;  %v4545_v24 = vpop.f32.mrf.mxu0 }
 0x22e   : > { %v8286_v14 = vpop.f32.mrf.mxu1 }
 0x22f   : > { %8609 = vst [vmem:[#allocation25_spill] sm:$0xff] %v8286_v14  ;;  %v4547_v6 = vpop.f32.mrf.mxu0  ;;  %v4912_v14 = vshrl.u32 %v4911_v34, 7  ;;  %v4506_v34 = vadd.f32 %v4505_v31, %v8159_v5  ;;  %v4520_v5 = vadd.f32 %v4519_v49, %v8177_v51  ;;  %v8623_v49 = vld [vmem:[#allocation5_spill] sm:$0xff] }
 0x230   : > { %v8288_v3 = vpop.f32.mrf.mxu1 }
 0x231   : > { %8610 = vst [vmem:[#allocation26_spill] sm:$0xff] %v8288_v3  ;;  %v4549_v56 = vpop.f32.mrf.mxu0 }
 0x232   : > { %v8290_v43 = vpop.f32.mrf.mxu1 }
 0x233   : > { %8611 = vst [vmem:[#allocation27_spill] sm:$0xff] %v8290_v43  ;;  %v4551_v58 = vpop.f32.mrf.mxu0 }
 0x234   : > { %v8292_v29 = vpop.f32.mrf.mxu1 }
 0x235   : > { %8612 = vst [vmem:[#allocation28_spill] sm:$0xff] %v8292_v29  ;;  %v4555_v18 = vpop.f32.mrf.mxu0  ;;  %v4913_v29 = vsub.s32 0, %v4912_v14 }
 0x236   : > { %v8294_v15 = vpop.f32.mrf.mxu1 }
 0x237   : > { %8613 = vst [vmem:[#allocation29_spill] sm:$0xff] %v8294_v15  ;;  %v4557_v36 = vpop.f32.mrf.mxu0  ;;  %v4909_v15 = vld [vmem:[%s8584_s2] sm:$0x3] }
 0x238   : > { %v8296_v28 = vpop.f32.mrf.mxu1  ;;  %v8326_v37 = vrot.slane %v4909_v15, %v4913_v29 }
 0x239   : > { %8614 = vst [vmem:[#allocation30_spill] sm:$0xff] %v8296_v28  ;;  %v8298_v21 = vpop.f32.mrf.mxu0  ;;  %v4953_v28 = vld [vmem:[%s8585_s3] sm:$0x3] }
 0x23a   : > { %8615 = vst [vmem:[#allocation31_spill] sm:$0xff] %v8298_v21  ;;  %v8300_v17 = vpop.f32.mrf.mxu1  ;;  %v4917_v21 = vsub.s32 1, %v4912_v14  ;;  %v8328_v14 = vrot.slane %v4953_v28, %v4913_v29 }
 0x23b   : > { %8616 = vst [vmem:[#allocation32_spill] sm:$0xff] %v8300_v17  ;;  %v8302_v26 = vpop.f32.mrf.mxu0  ;;  %v4508_v17 = vadd.f32 %v4507_v52, %v8162_v23  ;;  %v4522_v23 = vadd.f32 %v4521_v59, %v8180_v39  ;;  %v4528_v52 = vadd.f32 %v4527_v22, %v8186_v61  ;;  %v4536_v61 = vadd.f32 %v4535_v30, %v8195_v13  ;;  %v8621_v13 = vld [vmem:[#allocation3_spill] sm:$0xff]  ;;  %v8624_v59 = vld [vmem:[#allocation6_spill] sm:$0xff]  ;;  %v8626_v22 = vld [vmem:[#allocation8_spill] sm:$0xff] }
 0x23c   : > { %8617 = vst [vmem:[#allocation33_spill] sm:$0xff] %v8302_v26  ;;  %v8304_v3 = vpop.f32.mrf.mxu1  ;;  %v8332_v31 = vrot.slane %v4909_v15, %v4917_v21  ;;  %v8351_v15 = vadd.f32 %v8262_v46, %v4516_v0  ;;  %v4540_v0 = vadd.f32 %v4539_v33, %v8201_v25  ;;  %v4556_v25 = vadd.f32 %v4555_v18, %v8625_v60  ;;  %v8632_v18 = vld [vmem:[#allocation24_spill] sm:$0xff]  ;;  %v8642_v60 = vld [vmem:[#allocation27_spill] sm:$0xff] }
 0x23d   : > { %8618 = vst [vmem:[#allocation34_spill] sm:$0xff] %v8304_v3  ;;  %v8306_v43 = vpop.f32.mrf.mxu0  ;;  %v8338_v35 = vadd.f32 %v8256_v41, %v4508_v17  ;;  %v4530_v41 = vadd.f32 %v4529_v19, %v8189_v10  ;;  %v8369_v10 = vadd.f32 %v8270_v11, %v4526_v42  ;;  %v8372_v44 = vadd.f32 %v8272_v7, %v4528_v52  ;;  %v8627_v19 = vld [vmem:[#allocation19_spill] sm:$0xff]  ;;  %v8629_v17 = vld [vmem:[#allocation21_spill] sm:$0xff] }
 0x23e   : > { %8619 = vst [vmem:[#allocation35_spill] sm:$0xff] %v8306_v43  ;;  %v8308_v32 = vpop.f32.mrf.mxu1  ;;  %v4510_v43 = vadd.f32 %v4509_v54, %v8165_v4  ;;  %v8334_v4 = vrot.slane %v4953_v28, %v4917_v21  ;;  %v8384_v7 = vadd.f32 %v8628_v16, %v4532_v48  ;;  %v8637_v42 = vld [vmem:[#allocation25_spill] sm:$0xff] }
 0x23f   : > { %8620 = vst [vmem:[#allocation36_spill] sm:$0xff] %v8308_v32  ;;  %v4567_v26 = vpop.f32.mrf.mxu0  ;;  %v4512_v32 = vadd.f32 %v4511_v9, %v8168_v12  ;;  %v4619_v12 = vadd.f32 %v8252_v45, %v4506_v34  ;;  %v8354_v45 = vadd.f32 %v8264_v2, %v4518_v40  ;;  %v4538_v9 = vadd.f32 %v4537_v27, %v8198_v47  ;;  %v8631_v27 = vld [vmem:[#allocation23_spill] sm:$0xff]  ;;  %v8635_v34 = vld [vmem:[#allocation10_spill] sm:$0xff]  ;;  %v8644_v16 = vld [vmem:[#allocation29_spill] sm:$0xff] }
 0x240   : > { %v8318_v3 = vpop.f32.mrf.mxu1  ;;  %v8345_v51 = vadd.f32 %v8258_v38, %v4510_v43  ;;  %v8361_v38 = vadd.f32 %v8266_v55, %v4520_v5  ;;  %v4542_v40 = vadd.f32 %v4541_v20, %v8204_v63  ;;  %v4546_v47 = vadd.f32 %v4545_v24, %v8621_v13 }
 0x241   : > { %v4569_v50 = vpop.f32.mrf.mxu0  ;;  %v8348_v39 = vadd.f32 %v8260_v53, %v4512_v32  ;;  %v8364_v32 = vadd.f32 %v8268_v1, %v4522_v23  ;;  %v8622_v53 = vld [vmem:[#allocation4_spill] sm:$0xff]  ;;  %v4550_v55 = vadd.f32 %v4549_v56, %v8623_v49  ;;  %v4552_v1 = vadd.f32 %v4551_v58, %v8624_v59  ;;  %v8634_v20 = vld [vmem:[#allocation31_spill] sm:$0xff] }
 0x242   : > { %v8324_v8 = vpop.f32.mrf.mxu1  ;;  %v4548_v46 = vadd.f32 %v4547_v6, %v8622_v53  ;;  %v4558_v63 = vadd.f32 %v4557_v36, %v8626_v22  ;;  %v8381_v11 = vadd.f32 %v8627_v19, %v4530_v41  ;;  %v8387_v24 = vadd.f32 %v8629_v17, %v4536_v61  ;;  %v8630_v6 = vld [vmem:[#allocation22_spill] sm:$0xff]  ;;  %v8633_v36 = vld [vmem:[#allocation9_spill] sm:$0xff]  ;;  %v8639_v61 = vld [vmem:[#allocation11_spill] sm:$0xff] }
 0x243   : > { %v4571_v54 = vpop.f32.mrf.mxu0  ;;  %v8390_v30 = vadd.f32 %v8630_v6, %v4538_v9  ;;  %v8393_v58 = vadd.f32 %v8631_v27, %v4540_v0  ;;  %v8396_v33 = vadd.f32 %v8632_v18, %v4542_v40  ;;  %v4560_v21 = vadd.f32 %v8634_v20, %v8633_v36  ;;  %v8636_v5 = vld [vmem:[#allocation33_spill] sm:$0xff]  ;;  %v8638_v41 = vld [vmem:[#allocation26_spill] sm:$0xff]  ;;  %v8641_v53 = vld [vmem:[#allocation12_spill] sm:$0xff] }
 0x244   : > { %v8342_v29 = vpop.f32.mrf.mxu1  ;;  %v4562_v23 = vadd.f32 %v8636_v5, %v8635_v34  ;;  %v4659_v52 = vadd.f32 %v8637_v42, %v4546_v47  ;;  %v4661_v48 = vadd.f32 %v8638_v41, %v4548_v46  ;;  %v4568_v49 = vadd.f32 %v4567_v26, %v8641_v53  ;;  %v8643_v22 = vld [vmem:[#allocation28_spill] sm:$0xff]  ;;  %v8645_v6 = vld [vmem:[#allocation30_spill] sm:$0xff]  ;;  %v8646_v18 = vld [vmem:[#allocation13_spill] sm:$0xff] }
 0x245   : > { %v4575_v62 = vpop.f32.mrf.mxu0  ;;  %v8640_v9 = vld [vmem:[#allocation35_spill] sm:$0xff]  ;;  %v4663_v40 = vadd.f32 %v8642_v60, %v4550_v55  ;;  %v4665_v19 = vadd.f32 %v8643_v22, %v4552_v1  ;;  %v4669_v17 = vadd.f32 %v8644_v16, %v4556_v25  ;;  %v8411_v27 = vadd.f32 %v8645_v6, %v4558_v63  ;;  %v8647_v36 = vld [vmem:[#allocation14_spill] sm:$0xff]  ;;  %v8649_v5 = vld [vmem:[#allocation16_spill] sm:$0xff] }
 0x246   : > { %v4688_v43 = vpop.f32.mrf.mxu1  ;;  %v4566_v13 = vadd.f32 %v8640_v9, %v8639_v61  ;;  %v4570_v47 = vadd.f32 %v4569_v50, %v8646_v18  ;;  %v4572_v46 = vadd.f32 %v4571_v54, %v8647_v36  ;;  %v8648_v20 = vld [vmem:[#allocation15_spill] sm:$0xff]  ;;  %v8650_v61 = vld [vmem:[#allocation32_spill] sm:$0xff]  ;;  %v8651_v1 = vld [vmem:[#allocation34_spill] sm:$0xff]  ;;  %v8427_v50 = vadd.f32 %v8318_v3, %v4568_v49 }
 0x247   : > { %v4577_v57 = vpop.f32.mrf.mxu0  ;;  %v4576_v34 = vadd.f32 %v4575_v62, %v8648_v20  ;;  %v8418_v55 = vadd.f32 %v8650_v61, %v4560_v21  ;;  %v8421_v9 = vadd.f32 %v8651_v1, %v4562_v23  ;;  %v8652_v53 = vld [vmem:[#allocation36_spill] sm:$0xff]  ;;  %v8653_v54 = vld [vmem:[#allocation17_spill] sm:$0xff]  ;;  %v8654_v22 = vld [vmem:[#allocation18_spill] sm:$0xff] }
 0x248   : > { %v4690_v2 = vpop.f32.mrf.mxu1  ;;  %v4578_v26 = vadd.f32 %v4577_v57, %v8649_v5  ;;  %v8424_v60 = vadd.f32 %v8652_v53, %v4566_v13  ;;  %v8436_v13 = vadd.f32 %v8324_v8, %v4570_v47  ;;  %v8439_v3 = vadd.f32 %v8342_v29, %v4572_v46 }
 0x249   : > { %v4579_v28 = vpop.f32.mrf.mxu0  ;;  %v8441_v49 = vadd.f32 %v4688_v43, %v4576_v34 }
 0x24a   : > { %v4692_v56 = vpop.f32.mrf.mxu1  ;;  %v4580_v62 = vadd.f32 %v4579_v28, %v8653_v54  ;;  %v8443_v28 = vadd.f32 %v4690_v2, %v4578_v26 }
 0x24b   : > { %v4581_v0 = vpop.f32.mrf.mxu0 }
 0x24c   : > { %v4694_v59 = vpop.f32.mrf.mxu1  ;;  %v4582_v57 = vadd.f32 %v4581_v0, %v8654_v22 }
 0x24d   : > { %v4731_v42 = vpop.f32.mrf.mxu0 }
 0x24e   : > { %v4771_v41 = vpop.f32.mrf.mxu1  ;;  %v4732_v25 = vadd.f32 %v4731_v42, %v4619_v12  ;;  %v8451_v8 = vadd.f32 %v4694_v59, %v4582_v57 }
 0x24f   : > { %v4772_v63 = vadd.f32 %v4771_v41, %v4659_v52  ;;  %v4733_v16 = vpop.f32.mrf.mxu0 }
 0x250   : > { %v4773_v6 = vpop.f32.mrf.mxu1  ;;  %v4921_v21 = vmul.f32 %v8326_v37, %v4732_v25  ;;  %v4734_v12 = vadd.f32 %v4733_v16, %v8338_v35 }
 0x251   : > { %v4937_v23 = vmul.f32 %v8326_v37, %v4772_v63  ;;  %v4774_v52 = vadd.f32 %v4773_v6, %v4661_v48  ;;  %v4735_v0 = vpop.f32.mrf.mxu0  ;;  %v8449_v48 = vadd.f32 %v4692_v56, %v4580_v62 }
 0x252   : > { %v4775_v18 = vpop.f32.mrf.mxu1  ;;  %v4965_v36 = vadd.f32 %v8328_v14, %v4921_v21  ;;  %v4922_v5 = vmul.f32 %v8332_v31, %v4734_v12  ;;  %v4736_v29 = vadd.f32 %v4735_v0, %v8345_v51 }
 0x253   : > { %v4981_v20 = vadd.f32 %v8328_v14, %v4937_v23  ;;  %v4938_v35 = vmul.f32 %v8332_v31, %v4774_v52  ;;  %v4776_v43 = vadd.f32 %v4775_v18, %v4663_v40  ;;  %v4737_v2 = vpop.f32.mrf.mxu0 }
 0x254   : > { %v4777_v47 = vpop.f32.mrf.mxu1  ;;  %v4997_v46 = vmax.f32 %v4965_v36, 0.0  ;;  %v4966_v26 = vadd.f32 %v8334_v4, %v4922_v5  ;;  %v4923_v59 = vmul.f32 %v8326_v37, %v4736_v29  ;;  %v4738_v41 = vadd.f32 %v4737_v2, %v8348_v39 }
 0x255   : > { %v5013_v34 = vmax.f32 %v4981_v20, 0.0  ;;  %v4982_v56 = vadd.f32 %v8334_v4, %v4938_v35  ;;  %v4939_v42 = vmul.f32 %v8326_v37, %v4776_v43  ;;  %v4778_v61 = vadd.f32 %v4777_v47, %v4665_v19  ;;  %v4741_v1 = vpop.f32.mrf.mxu0 }
 0x256   : > { %v4781_v51 = vpop.f32.mrf.mxu1  ;;  %5029 = vst [vmem:[%s8456_s10] sm:$0xff] %v4997_v46  ;;  %v4998_v40 = vmax.f32 %v4966_v26, 0.0  ;;  %v4742_v63 = vadd.f32 %v4741_v1, %v8351_v15  ;;  %v4967_v54 = vadd.f32 %v8328_v14, %v4923_v59  ;;  %v4924_v22 = vmul.f32 %v8332_v31, %v4738_v41 }
 0x257   : > { %5045 = vst [vmem:[%s8456_s10 + $0x80] sm:$0xff] %v5013_v34  ;;  %v5014_v25 = vmax.f32 %v4982_v56, 0.0  ;;  %v4782_v53 = vadd.f32 %v4781_v51, %v4669_v17  ;;  %v4983_v62 = vadd.f32 %v8328_v14, %v4939_v42  ;;  %v4940_v39 = vmul.f32 %v8332_v31, %v4778_v61  ;;  %v4743_v57 = vpop.f32.mrf.mxu0 }
 0x258   : > { %v4783_v19 = vpop.f32.mrf.mxu1  ;;  %5030 = vst [vmem:[%s8456_s10 + $0x8] sm:$0xff] %v4998_v40  ;;  %v4925_v16 = vmul.f32 %v8326_v37, %v4742_v63  ;;  %v4744_v15 = vadd.f32 %v4743_v57, %v8354_v45  ;;  %v4999_v21 = vmax.f32 %v4967_v54, 0.0  ;;  %v4968_v12 = vadd.f32 %v8334_v4, %v4924_v22 }
 0x259   : > { %5046 = vst [vmem:[%s8456_s10 + $0x88] sm:$0xff] %v5014_v25  ;;  %v4941_v6 = vmul.f32 %v8326_v37, %v4782_v53  ;;  %v4784_v17 = vadd.f32 %v4783_v19, %v8411_v27  ;;  %v5015_v23 = vmax.f32 %v4983_v62, 0.0  ;;  %v4984_v52 = vadd.f32 %v8334_v4, %v4940_v39  ;;  %v4745_v0 = vpop.f32.mrf.mxu0 }
 0x25a   : > { %v4785_v18 = vpop.f32.mrf.mxu1  ;;  %v4969_v36 = vadd.f32 %v8328_v14, %v4925_v16  ;;  %v4926_v5 = vmul.f32 %v8332_v31, %v4744_v15  ;;  %5031 = vst [vmem:[%s8456_s10 + $0x10] sm:$0xff] %v4999_v21  ;;  %v5000_v27 = vmax.f32 %v4968_v12, 0.0  ;;  %v4746_v29 = vadd.f32 %v4745_v0, %v8361_v38 }
 0x25b   : > { %v4985_v20 = vadd.f32 %v8328_v14, %v4941_v6  ;;  %v4942_v45 = vmul.f32 %v8332_v31, %v4784_v17  ;;  %5047 = vst [vmem:[%s8456_s10 + $0x90] sm:$0xff] %v5015_v23  ;;  %v5016_v35 = vmax.f32 %v4984_v52, 0.0  ;;  %v4786_v43 = vadd.f32 %v4785_v18, %v8418_v55  ;;  %v4747_v2 = vpop.f32.mrf.mxu0 }
 0x25c   : > { %v4787_v47 = vpop.f32.mrf.mxu1  ;;  %v5001_v46 = vmax.f32 %v4969_v36, 0.0  ;;  %v4970_v26 = vadd.f32 %v8334_v4, %v4926_v5  ;;  %5032 = vst [vmem:[%s8456_s10 + $0x18] sm:$0xff] %v5000_v27  ;;  %v4927_v59 = vmul.f32 %v8326_v37, %v4746_v29  ;;  %v4748_v38 = vadd.f32 %v4747_v2, %v8364_v32 }
 0x25d   : > { %v5017_v34 = vmax.f32 %v4985_v20, 0.0  ;;  %v4986_v56 = vadd.f32 %v8334_v4, %v4942_v45  ;;  %5048 = vst [vmem:[%s8456_s10 + $0x98] sm:$0xff] %v5016_v35  ;;  %v4943_v42 = vmul.f32 %v8326_v37, %v4786_v43  ;;  %v4788_v55 = vadd.f32 %v4787_v47, %v8421_v9  ;;  %v4751_v41 = vpop.f32.mrf.mxu0 }
 0x25e   : > { %v4791_v61 = vpop.f32.mrf.mxu1  ;;  %5033 = vst [vmem:[%s8456_s10 + $0x20] sm:$0xff] %v5001_v46  ;;  %v5002_v1 = vmax.f32 %v4970_v26, 0.0  ;;  %v4752_v40 = vadd.f32 %v4751_v41, %v8369_v10  ;;  %v4971_v63 = vadd.f32 %v8328_v14, %v4927_v59  ;;  %v4928_v32 = vmul.f32 %v8332_v31, %v4748_v38 }
 0x25f   : > { %5049 = vst [vmem:[%s8456_s10 + $0xa0] sm:$0xff] %v5017_v34  ;;  %v5018_v51 = vmax.f32 %v4986_v56, 0.0  ;;  %v4792_v25 = vadd.f32 %v4791_v61, %v8424_v60  ;;  %v4987_v53 = vadd.f32 %v8328_v14, %v4943_v42  ;;  %v4944_v54 = vmul.f32 %v8332_v31, %v4788_v55  ;;  %v4753_v9 = vpop.f32.mrf.mxu0 }
 0x260   : > { %v4793_v62 = vpop.f32.mrf.mxu1  ;;  %5034 = vst [vmem:[%s8456_s10 + $0x28] sm:$0xff] %v5002_v1  ;;  %v4929_v22 = vmul.f32 %v8326_v37, %v4752_v40  ;;  %v4754_v60 = vadd.f32 %v4753_v9, %v8372_v44  ;;  %v5003_v57 = vmax.f32 %v4971_v63, 0.0  ;;  %v4972_v16 = vadd.f32 %v8334_v4, %v4928_v32 }
 0x261   : > { %5050 = vst [vmem:[%s8456_s10 + $0xa8] sm:$0xff] %v5018_v51  ;;  %v4945_v10 = vmul.f32 %v8326_v37, %v4792_v25  ;;  %v4794_v39 = vadd.f32 %v4793_v62, %v8427_v50  ;;  %v5019_v19 = vmax.f32 %v4987_v53, 0.0  ;;  %v4988_v6 = vadd.f32 %v8334_v4, %v4944_v54  ;;  %v4755_v15 = vpop.f32.mrf.mxu0 }
 0x262   : > { %v4795_v17 = vpop.f32.mrf.mxu1  ;;  %v4973_v21 = vadd.f32 %v8328_v14, %v4929_v22  ;;  %v4930_v12 = vmul.f32 %v8332_v31, %v4754_v60  ;;  %5035 = vst [vmem:[%s8456_s10 + $0x30] sm:$0xff] %v5003_v57  ;;  %v5004_v50 = vmax.f32 %v4972_v16, 0.0  ;;  %v4756_v0 = vadd.f32 %v4755_v15, %v8381_v11 }
 0x263   : > { %v4989_v23 = vadd.f32 %v8328_v14, %v4945_v10  ;;  %v4946_v44 = vmul.f32 %v8332_v31, %v4794_v39  ;;  %5051 = vst [vmem:[%s8456_s10 + $0xb0] sm:$0xff] %v5019_v19  ;;  %v5020_v52 = vmax.f32 %v4988_v6, 0.0  ;;  %v4796_v18 = vadd.f32 %v4795_v17, %v8436_v13  ;;  %v4757_v36 = vpop.f32.mrf.mxu0 }
 0x264   : > { %v4797_v20 = vpop.f32.mrf.mxu1  ;;  %v5005_v5 = vmax.f32 %v4973_v21, 0.0  ;;  %v4974_v27 = vadd.f32 %v8334_v4, %v4930_v12  ;;  %5036 = vst [vmem:[%s8456_s10 + $0x38] sm:$0xff] %v5004_v50  ;;  %v4931_v29 = vmul.f32 %v8326_v37, %v4756_v0  ;;  %v4758_v11 = vadd.f32 %v4757_v36, %v8384_v7 }
 0x265   : > { %v5021_v45 = vmax.f32 %v4989_v23, 0.0  ;;  %v4990_v35 = vadd.f32 %v8334_v4, %v4946_v44  ;;  %5052 = vst [vmem:[%s8456_s10 + $0xb8] sm:$0xff] %v5020_v52  ;;  %v4947_v43 = vmul.f32 %v8326_v37, %v4796_v18  ;;  %v4798_v13 = vadd.f32 %v4797_v20, %v8439_v3  ;;  %v4761_v2 = vpop.f32.mrf.mxu0 }
 0x266   : > { %v4801_v47 = vpop.f32.mrf.mxu1  ;;  %5037 = vst [vmem:[%s8456_s10 + $0x40] sm:$0xff] %v5005_v5  ;;  %v5006_v46 = vmax.f32 %v4974_v27, 0.0  ;;  %v4762_v26 = vadd.f32 %v4761_v2, %v8387_v24  ;;  %v4975_v59 = vadd.f32 %v8328_v14, %v4931_v29  ;;  %v4932_v7 = vmul.f32 %v8332_v31, %v4758_v11 }
 0x267   : > { %5053 = vst [vmem:[%s8456_s10 + $0xc0] sm:$0xff] %v5021_v45  ;;  %v5022_v34 = vmax.f32 %v4990_v35, 0.0  ;;  %v4802_v56 = vadd.f32 %v4801_v47, %v8441_v49  ;;  %v4991_v42 = vadd.f32 %v8328_v14, %v4947_v43  ;;  %v4948_v38 = vmul.f32 %v8332_v31, %v4798_v13  ;;  %v4763_v3 = vpop.f32.mrf.mxu0 }
 0x268   : > { %v4803_v55 = vpop.f32.mrf.mxu1  ;;  %5038 = vst [vmem:[%s8456_s10 + $0x48] sm:$0xff] %v5006_v46  ;;  %v4933_v41 = vmul.f32 %v8326_v37, %v4762_v26  ;;  %v4764_v49 = vadd.f32 %v4763_v3, %v8390_v30  ;;  %v5007_v1 = vmax.f32 %v4975_v59, 0.0  ;;  %v4976_v40 = vadd.f32 %v8334_v4, %v4932_v7 }
 0x269   : > { %5054 = vst [vmem:[%s8456_s10 + $0xc8] sm:$0xff] %v5022_v34  ;;  %v4949_v24 = vmul.f32 %v8326_v37, %v4802_v56  ;;  %v4804_v61 = vadd.f32 %v4803_v55, %v8443_v28  ;;  %v5023_v51 = vmax.f32 %v4991_v42, 0.0  ;;  %v4992_v25 = vadd.f32 %v8334_v4, %v4948_v38  ;;  %v4765_v63 = vpop.f32.mrf.mxu0 }
 0x26a   : > { %v4805_v53 = vpop.f32.mrf.mxu1  ;;  %v4977_v32 = vadd.f32 %v8328_v14, %v4933_v41  ;;  %v4934_v9 = vmul.f32 %v8332_v31, %v4764_v49  ;;  %5039 = vst [vmem:[%s8456_s10 + $0x50] sm:$0xff] %v5007_v1  ;;  %v5008_v28 = vmax.f32 %v4976_v40, 0.0  ;;  %v4766_v22 = vadd.f32 %v4765_v63, %v8393_v58 }
 0x26b   : > { %v4993_v54 = vadd.f32 %v8328_v14, %v4949_v24  ;;  %v4950_v30 = vmul.f32 %v8332_v31, %v4804_v61  ;;  %5055 = vst [vmem:[%s8456_s10 + $0xd0] sm:$0xff] %v5023_v51  ;;  %v5024_v62 = vmax.f32 %v4992_v25, 0.0  ;;  %v4806_v10 = vadd.f32 %v4805_v53, %v8449_v48  ;;  %v4767_v60 = vpop.f32.mrf.mxu0 }
 0x26c   : > { %v4807_v39 = vpop.f32.mrf.mxu1  ;;  %v5009_v57 = vmax.f32 %v4977_v32, 0.0  ;;  %v4978_v16 = vadd.f32 %v8334_v4, %v4934_v9  ;;  %5040 = vst [vmem:[%s8456_s10 + $0x58] sm:$0xff] %v5008_v28  ;;  %v4935_v15 = vmul.f32 %v8326_v37, %v4766_v22  ;;  %v4768_v58 = vadd.f32 %v4767_v60, %v8396_v33 }
 0x26d   : > { %v5025_v19 = vmax.f32 %v4993_v54, 0.0  ;;  %v4994_v6 = vadd.f32 %v8334_v4, %v4950_v30  ;;  %5056 = vst [vmem:[%s8456_s10 + $0xd8] sm:$0xff] %v5024_v62  ;;  %v4951_v17 = vmul.f32 %v8326_v37, %v4806_v10  ;;  %v4808_v48 = vadd.f32 %v4807_v39, %v8451_v8 }
 0x26e   : > { %5041 = vst [vmem:[%s8456_s10 + $0x60] sm:$0xff] %v5009_v57  ;;  %v5010_v21 = vmax.f32 %v4978_v16, 0.0  ;;  %v4979_v12 = vadd.f32 %v8328_v14, %v4935_v15  ;;  %v4936_v50 = vmul.f32 %v8332_v31, %v4768_v58 }
 0x26f   : > { %5057 = vst [vmem:[%s8456_s10 + $0xe0] sm:$0xff] %v5025_v19  ;;  %v5026_v23 = vmax.f32 %v4994_v6, 0.0  ;;  %v4995_v44 = vadd.f32 %v8328_v14, %v4951_v17  ;;  %v4952_v37 = vmul.f32 %v8332_v31, %v4808_v48 }
 0x270   : > { %5042 = vst [vmem:[%s8456_s10 + $0x68] sm:$0xff] %v5010_v21  ;;  %v5011_v33 = vmax.f32 %v4979_v12, 0.0  ;;  %v4980_v8 = vadd.f32 %v8334_v4, %v4936_v50 }
 0x271   : > { %5058 = vst [vmem:[%s8456_s10 + $0xe8] sm:$0xff] %v5026_v23  ;;  %v5027_v52 = vmax.f32 %v4995_v44, 0.0  ;;  %v4996_v0 = vadd.f32 %v8334_v4, %v4952_v37 }
 0x272   : > { %5043 = vst [vmem:[%s8456_s10 + $0x70] sm:$0xff] %v5011_v33  ;;  %v5012_v18 = vmax.f32 %v4980_v8, 0.0 }
 0x273   : > { %5059 = vst [vmem:[%s8456_s10 + $0xf0] sm:$0xff] %v5027_v52  ;;  %v5028_v36 = vmax.f32 %v4996_v0, 0.0 }
 0x274   : > { %5044 = vst [vmem:[%s8456_s10 + $0x78] sm:$0xff] %v5012_v18 }
 0x275   : > { %5060 = vst [vmem:[%s8456_s10 + $0xf8] sm:$0xff] %v5028_v36 }
 0x276 PF: > { %s14_s17 = sadd.s32 1, %s6614_s17   ;;  %s8655_s15 = smov %s6610_s16 }
 0x277   : > { %p11_p5 = scmp.ge.s32.totalorder %s14_s17, 6   ;;  %s8656_s16 = smov %s8658_s18 }
 0x279   :  { %13 = sbr.rel (!%p11_p5) target bundleno = 2 (0x2), region = 83 }

// kernel: deeplabv3plus_forward.11
= control target key start
LH: loop header
LB: loop body
LE: loop exit
PB: predicated region body
PF: predicated region fallthrough
CT: control target
= control target key end

     0   :  { %s1148_s15 = smov 0   ;;  %s1150_s16 = smov 0   ;;  %s1314_s0 = inlined_call_operand.vmem [shape: bf16[512,256], index: 0, kind: input, shape index: {}]   ;;  %s1315_s1 = inlined_call_operand.vmem [shape: bf16[256,128], index: 1, kind: input, shape index: {}]   ;;  %s1316_s2 = inlined_call_operand.vmem [shape: f32[1,128], index: 2, kind: input, shape index: {}]   ;;  %s1317_s3 = inlined_call_operand.vmem [shape: f32[1,128], index: 3, kind: input, shape index: {}]   ;;  %s1318_s4 = inlined_call_operand.vmem [shape: f32[512,128], index: 4, kind: output, shape index: {}]  }
   0x1   :  { %s1152_s17 = smov 0  }
   0x2 LB: > { %s33_s18 = sadd.s32 1, %s1117_s16  ;;  %p912_p0 = scmp.ge.s32.totalorder %s1121_s17, 1  ;;  %s1121_s17 = sphi %s1152_s17, %s14_s17   ;;  %s1117_s16 = sphi %s1150_s16, %s1320_s16   ;;  %s1113_s15 = sphi %s1148_s15, %s1319_s15  }
   0x3   : > { %p35_p1 = scmp.ge.s32.totalorder %s33_s18, 4  ;;  %p224_p2 = scmp.lt.s32.totalorder %s1121_s17, 5 }
   0x5   : > { %s1322_s18 = smov (%p35_p1, %s33_s18), 0  ;;  %p225_p3 = pnand %p912_p0, %p224_p2 }
   0x6   : > { %s913_s21 = sshll.u32 (!%p225_p3), %s1113_s15, 4 }
   0x7   : > { %228 = sbr.rel (%p225_p3) target bundleno = 275 (0x113), region = 36  ;;  %p274_p4 = scmp.lt.s32.totalorder (!%p225_p3), %s913_s21, 63 }
   0xc   : > { %v1059_v0 = vld [vmem:[%s1315_s1 + $0x78] sm:$0xff]   ;;  %v1061_v2 = vld [vmem:[%s1315_s1 + $0x70] sm:$0xff]   ;;  %v1063_v4 = vld [vmem:[%s1315_s1 + $0x68] sm:$0xff]   ;;  %s1324_s21 = smov (!%p274_p4, %s913_s21), 63 }
   0xd   : > { %v1060_v1 = vld [vmem:[%s1315_s1 + $0x38] sm:$0xff]   ;;  %955 = vmatprep.subr.bf16.mxu0 %v1059_v0  ;;  %1019 = vmatprep.subr.bf16.mxu1 %v1059_v0  ;;  %v1062_v3 = vld [vmem:[%s1315_s1 + $0x30] sm:$0xff]   ;;  %v1064_v5 = vld [vmem:[%s1315_s1 + $0x28] sm:$0xff]   ;;  %s954_s10 = sshll.u32 %s1324_s21, 3 }
   0xe   : > { %956 = vmatpush3.bf16.msra.mxu0 %v1060_v1  ;;  %1027 = vmatpush3.bf16.msra.mxu1 %v1060_v1  ;;  %v1065_v6 = vld [vmem:[%s1315_s1 + $0x60] sm:$0xff]   ;;  %v1067_v8 = vld [vmem:[%s1315_s1 + $0x58] sm:$0xff]   ;;  %s1201_s15 = scalar_lea.vmem %s1314_s0, %s954_s10  ;;  %v1069_v10 = vld [vmem:[%s1315_s1 + $0x50] sm:$0xff]  }
   0xf   : > { %957 = vmatprep.subr.bf16.mxu0 %v1061_v2  ;;  %1020 = vmatprep.subr.bf16.mxu1 %v1061_v2  ;;  %v1066_v7 = vld [vmem:[%s1315_s1 + $0x20] sm:$0xff]   ;;  %v1068_v9 = vld [vmem:[%s1315_s1 + $0x18] sm:$0xff]   ;;  %v1070_v13 = vld [vmem:[%s1315_s1 + $0x10] sm:$0xff]  }
  0x10   : > { %v1077_v11 = vld [vmem:[%s1201_s15 + $0x4] ss:$8 sps:$4 sm:$0xff]   ;;  %v1075_v18 = vld [vmem:[%s1201_s15] ss:$8 sps:$4 sm:$0xff]   ;;  %v1081_v20 = vld [vmem:[%s1201_s15 + $0x14] ss:$8 sps:$4 sm:$0xff]  }
  0x11   : > { %v1080_v12 = vld [vmem:[%s1201_s15 + $0x44] ss:$8 sps:$4 sm:$0xff]   ;;  %601 = vmatprep.mubr.bf16.mxu0 %v1077_v11  ;;  %v1078_v19 = vld [vmem:[%s1201_s15 + $0x40] ss:$8 sps:$4 sm:$0xff]   ;;  %v1083_v21 = vld [vmem:[%s1201_s15 + $0x54] ss:$8 sps:$4 sm:$0xff]  }
  0x12   : > { %958 = vmatpush3.bf16.msra.mxu0 %v1062_v3  ;;  %1028 = vmatpush3.bf16.msra.mxu1 %v1062_v3  ;;  %v1071_v14 = vld [vmem:[%s1315_s1 + $0x48] sm:$0xff]   ;;  %v1073_v16 = vld [vmem:[%s1315_s1 + $0x40] sm:$0xff]   ;;  %v1085_v22 = vld [vmem:[%s1201_s15 + $0x10] ss:$8 sps:$4 sm:$0xff]  }
  0x13   : > { %959 = vmatprep.subr.bf16.mxu0 %v1063_v4  ;;  %1021 = vmatprep.subr.bf16.mxu1 %v1063_v4  ;;  %v1072_v15 = vld [vmem:[%s1315_s1 + $0x8] sm:$0xff]   ;;  %v1074_v17 = vld [vmem:[%s1315_s1] sm:$0xff]   ;;  %v1086_v23 = vld [vmem:[%s1201_s15 + $0x50] ss:$8 sps:$4 sm:$0xff]  }
  0x14   : > { %633 = vmatprep.mubr.bf16.mxu1 %v1080_v12  ;;  %v1087_v24 = vld [vmem:[%s1201_s15 + $0x24] ss:$8 sps:$4 sm:$0xff]   ;;  %v1091_v26 = vld [vmem:[%s1201_s15 + $0x20] ss:$8 sps:$4 sm:$0xff]   ;;  %v1093_v28 = vld [vmem:[%s1201_s15 + $0x34] ss:$8 sps:$4 sm:$0xff]  }
  0x15   : > { %v1089_v25 = vld [vmem:[%s1201_s15 + $0x64] ss:$8 sps:$4 sm:$0xff]   ;;  %v1092_v27 = vld [vmem:[%s1201_s15 + $0x60] ss:$8 sps:$4 sm:$0xff]   ;;  %v1095_v29 = vld [vmem:[%s1201_s15 + $0x74] ss:$8 sps:$4 sm:$0xff]  }
  0x16   : > { %960 = vmatpush3.bf16.msra.mxu0 %v1064_v5  ;;  %1029 = vmatpush3.bf16.msra.mxu1 %v1064_v5  ;;  %v1097_v30 = vld [vmem:[%s1201_s15 + $0x30] ss:$8 sps:$4 sm:$0xff]   ;;  %v1243_v35 = vld [vmem:[%s1316_s2] ss:$0 sm:$0xff] }
  0x17   : > { %961 = vmatprep.subr.bf16.mxu0 %v1065_v6  ;;  %1022 = vmatprep.subr.bf16.mxu1 %v1065_v6  ;;  %v1098_v31 = vld [vmem:[%s1201_s15 + $0x70] ss:$8 sps:$4 sm:$0xff]   ;;  %v1248_v39 = vld [vmem:[%s1317_s3] ss:$0 sm:$0xff]  ;;  %s1257_s15 = scalar_lea.vmem %s1318_s4, %s954_s10 }
  0x1a   : > { %962 = vmatpush3.bf16.msra.mxu0 %v1066_v7  ;;  %1030 = vmatpush3.bf16.msra.mxu1 %v1066_v7 }
  0x1b   : > { %963 = vmatprep.subr.bf16.mxu0 %v1067_v8  ;;  %1023 = vmatprep.subr.bf16.mxu1 %v1067_v8 }
  0x1e   : > { %964 = vmatpush3.bf16.msra.mxu0 %v1068_v9  ;;  %1031 = vmatpush3.bf16.msra.mxu1 %v1068_v9 }
  0x1f   : > { %965 = vmatprep.subr.bf16.mxu0 %v1069_v10  ;;  %1024 = vmatprep.subr.bf16.mxu1 %v1069_v10 }
  0x22   : > { %966 = vmatpush3.bf16.msra.mxu0 %v1070_v13  ;;  %1032 = vmatpush3.bf16.msra.mxu1 %v1070_v13 }
  0x23   : > { %967 = vmatprep.subr.bf16.mxu0 %v1071_v14  ;;  %1025 = vmatprep.subr.bf16.mxu1 %v1071_v14 }
  0x26   : > { %968 = vmatpush3.bf16.msra.mxu0 %v1072_v15  ;;  %1033 = vmatpush3.bf16.msra.mxu1 %v1072_v15 }
  0x27   : > { %969 = vmatprep.subr.bf16.mxu0 %v1073_v16  ;;  %1026 = vmatprep.subr.bf16.mxu1 %v1073_v16 }
  0x2a   : > { %970 = vmatpush3.bf16.msra.mxu0 %v1074_v17  ;;  %1034 = vmatpush3.bf16.msra.mxu1 %v1074_v17 }
  0x2d   : > { %602 = vmatmul.mubr.bf16.vlgmr.msra.gmra.mxu0 %v1075_v18  ;;  %634 = vmatmul.mubr.bf16.vlgmr.msra.gmra.mxu1 %v1078_v19 }
  0x2e   : > { %609 = vmatprep.mubr.bf16.mxu0 %v1081_v20  ;;  %641 = vmatprep.mubr.bf16.mxu1 %v1083_v21 }
  0x35   : > { %610 = vmatmul.mubr.bf16.gmra.mxu0 %v1085_v22  ;;  %642 = vmatmul.mubr.bf16.gmra.mxu1 %v1086_v23 }
  0x36   : > { %617 = vmatprep.mubr.bf16.mxu0 %v1087_v24  ;;  %649 = vmatprep.mubr.bf16.mxu1 %v1089_v25 }
  0x3d   : > { %618 = vmatmul.mubr.bf16.gmra.mxu0 %v1091_v26  ;;  %650 = vmatmul.mubr.bf16.gmra.mxu1 %v1092_v27 }
  0x3e   : > { %625 = vmatprep.mubr.bf16.mxu0 %v1093_v28  ;;  %657 = vmatprep.mubr.bf16.mxu1 %v1095_v29 }
  0x45   : > { %626 = vmatmul.mubr.bf16.gmra.mxu0 %v1097_v30  ;;  %658 = vmatmul.mubr.bf16.gmra.mxu1 %v1098_v31 }
  0xed   : > { %v971_v32 = vpop.f32.mrf.mxu0  ;;  %v995_v33 = vpop.f32.mrf.mxu1 }
  0xef   : > { %v972_v34 = vpop.f32.mrf.mxu0  ;;  %v996_v36 = vpop.f32.mrf.mxu1 }
  0xf0   : > { %v973_v37 = vadd.f32 %v972_v34, %v971_v32  ;;  %v997_v38 = vadd.f32 %v996_v36, %v995_v33 }
  0xf1   : > { %v974_v40 = vpop.f32.mrf.mxu0  ;;  %v998_v41 = vpop.f32.mrf.mxu1 }
  0xf2   : > { %v724_v42 = vmul.f32 %v973_v37, %v1243_v35  ;;  %v732_v43 = vmul.f32 %v997_v38, %v1243_v35 }
  0xf3   : > { %v975_v44 = vpop.f32.mrf.mxu0  ;;  %v999_v45 = vpop.f32.mrf.mxu1 }
  0xf4   : > { %v747_v46 = vadd.f32 %v1248_v39, %v724_v42  ;;  %v755_v47 = vadd.f32 %v1248_v39, %v732_v43  ;;  %v976_v48 = vadd.f32 %v975_v44, %v974_v40  ;;  %v1000_v49 = vadd.f32 %v999_v45, %v998_v41 }
  0xf5   : > { %v977_v50 = vpop.f32.mrf.mxu0  ;;  %v1001_v51 = vpop.f32.mrf.mxu1 }
  0xf6   : > { %763 = vst [vmem:[%s1257_s15] sm:$0xff] %v747_v46  ;;  %771 = vst [vmem:[%s1257_s15 + $0x40] sm:$0xff] %v755_v47  ;;  %v725_v52 = vmul.f32 %v976_v48, %v1243_v35  ;;  %v733_v53 = vmul.f32 %v1000_v49, %v1243_v35 }
  0xf7   : > { %v978_v54 = vpop.f32.mrf.mxu0  ;;  %v1002_v55 = vpop.f32.mrf.mxu1 }
  0xf8   : > { %v748_v56 = vadd.f32 %v1248_v39, %v725_v52  ;;  %v756_v57 = vadd.f32 %v1248_v39, %v733_v53  ;;  %v979_v58 = vadd.f32 %v978_v54, %v977_v50  ;;  %v1003_v59 = vadd.f32 %v1002_v55, %v1001_v51 }
  0xf9   : > { %v980_v60 = vpop.f32.mrf.mxu0  ;;  %v1004_v61 = vpop.f32.mrf.mxu1 }
  0xfa   : > { %764 = vst [vmem:[%s1257_s15 + $0x8] sm:$0xff] %v748_v56  ;;  %772 = vst [vmem:[%s1257_s15 + $0x48] sm:$0xff] %v756_v57  ;;  %v726_v62 = vmul.f32 %v979_v58, %v1243_v35  ;;  %v734_v63 = vmul.f32 %v1003_v59, %v1243_v35 }
  0xfb   : > { %v981_v0 = vpop.f32.mrf.mxu0  ;;  %v1005_v1 = vpop.f32.mrf.mxu1 }
  0xfc   : > { %v749_v2 = vadd.f32 %v1248_v39, %v726_v62  ;;  %v757_v3 = vadd.f32 %v1248_v39, %v734_v63  ;;  %v982_v4 = vadd.f32 %v981_v0, %v980_v60  ;;  %v1006_v5 = vadd.f32 %v1005_v1, %v1004_v61 }
  0xfd   : > { %v983_v6 = vpop.f32.mrf.mxu0  ;;  %v1007_v7 = vpop.f32.mrf.mxu1 }
  0xfe   : > { %765 = vst [vmem:[%s1257_s15 + $0x10] sm:$0xff] %v749_v2  ;;  %773 = vst [vmem:[%s1257_s15 + $0x50] sm:$0xff] %v757_v3  ;;  %v727_v8 = vmul.f32 %v982_v4, %v1243_v35  ;;  %v735_v9 = vmul.f32 %v1006_v5, %v1243_v35 }
  0xff   : > { %v984_v10 = vpop.f32.mrf.mxu0  ;;  %v1008_v11 = vpop.f32.mrf.mxu1 }
 0x100   : > { %v750_v12 = vadd.f32 %v1248_v39, %v727_v8  ;;  %v758_v13 = vadd.f32 %v1248_v39, %v735_v9  ;;  %v985_v14 = vadd.f32 %v984_v10, %v983_v6  ;;  %v1009_v15 = vadd.f32 %v1008_v11, %v1007_v7 }
 0x101   : > { %v986_v16 = vpop.f32.mrf.mxu0  ;;  %v1010_v17 = vpop.f32.mrf.mxu1 }
 0x102   : > { %766 = vst [vmem:[%s1257_s15 + $0x18] sm:$0xff] %v750_v12  ;;  %774 = vst [vmem:[%s1257_s15 + $0x58] sm:$0xff] %v758_v13  ;;  %v728_v18 = vmul.f32 %v985_v14, %v1243_v35  ;;  %v736_v19 = vmul.f32 %v1009_v15, %v1243_v35 }
 0x103   : > { %v987_v20 = vpop.f32.mrf.mxu0  ;;  %v1011_v21 = vpop.f32.mrf.mxu1 }
 0x104   : > { %v751_v22 = vadd.f32 %v1248_v39, %v728_v18  ;;  %v759_v23 = vadd.f32 %v1248_v39, %v736_v19  ;;  %v988_v24 = vadd.f32 %v987_v20, %v986_v16  ;;  %v1012_v25 = vadd.f32 %v1011_v21, %v1010_v17 }
 0x105   : > { %v989_v26 = vpop.f32.mrf.mxu0  ;;  %v1013_v27 = vpop.f32.mrf.mxu1 }
 0x106   : > { %767 = vst [vmem:[%s1257_s15 + $0x20] sm:$0xff] %v751_v22  ;;  %775 = vst [vmem:[%s1257_s15 + $0x60] sm:$0xff] %v759_v23  ;;  %v729_v28 = vmul.f32 %v988_v24, %v1243_v35  ;;  %v737_v29 = vmul.f32 %v1012_v25, %v1243_v35 }
 0x107   : > { %v990_v30 = vpop.f32.mrf.mxu0  ;;  %v1014_v31 = vpop.f32.mrf.mxu1 }
 0x108   : > { %v752_v32 = vadd.f32 %v1248_v39, %v729_v28  ;;  %v760_v33 = vadd.f32 %v1248_v39, %v737_v29  ;;  %v991_v34 = vadd.f32 %v990_v30, %v989_v26  ;;  %v1015_v36 = vadd.f32 %v1014_v31, %v1013_v27 }
 0x109   : > { %v992_v37 = vpop.f32.mrf.mxu0  ;;  %v1016_v38 = vpop.f32.mrf.mxu1 }
 0x10a   : > { %768 = vst [vmem:[%s1257_s15 + $0x28] sm:$0xff] %v752_v32  ;;  %776 = vst [vmem:[%s1257_s15 + $0x68] sm:$0xff] %v760_v33  ;;  %v730_v40 = vmul.f32 %v991_v34, %v1243_v35  ;;  %v738_v41 = vmul.f32 %v1015_v36, %v1243_v35 }
 0x10b   : > { %v993_v42 = vpop.f32.mrf.mxu0  ;;  %v1017_v43 = vpop.f32.mrf.mxu1 }
 0x10c   : > { %v753_v44 = vadd.f32 %v1248_v39, %v730_v40  ;;  %v761_v45 = vadd.f32 %v1248_v39, %v738_v41  ;;  %v994_v46 = vadd.f32 %v993_v42, %v992_v37  ;;  %v1018_v47 = vadd.f32 %v1017_v43, %v1016_v38 }
 0x10e   : > { %769 = vst [vmem:[%s1257_s15 + $0x30] sm:$0xff] %v753_v44  ;;  %777 = vst [vmem:[%s1257_s15 + $0x70] sm:$0xff] %v761_v45  ;;  %v731_v48 = vmul.f32 %v994_v46, %v1243_v35  ;;  %v739_v49 = vmul.f32 %v1018_v47, %v1243_v35 }
 0x110   : > { %v754_v50 = vadd.f32 %v1248_v39, %v731_v48  ;;  %v762_v51 = vadd.f32 %v1248_v39, %v739_v49 }
 0x112   : > { %770 = vst [vmem:[%s1257_s15 + $0x38] sm:$0xff] %v754_v50  ;;  %778 = vst [vmem:[%s1257_s15 + $0x78] sm:$0xff] %v762_v51 }
 0x113 PF: > { %s14_s17 = sadd.s32 1, %s1121_s17   ;;  %s1319_s15 = smov %s1117_s16 }
 0x114   : > { %p11_p5 = scmp.ge.s32.totalorder %s14_s17, 6   ;;  %s1320_s16 = smov %s1322_s18 }
 0x116   :  { %13 = sbr.rel (!%p11_p5) target bundleno = 2 (0x2), region = 83 }

// kernel: deeplabv3plus_forward.10
= control target key start
LH: loop header
LB: loop body
LE: loop exit
PB: predicated region body
PF: predicated region fallthrough
CT: control target
= control target key end

     0   :  { %s5599_s15 = smov 0   ;;  %s5601_s16 = smov 0   ;;  %s7220_s0 = inlined_call_operand.vmem [shape: bf16[512,2304], index: 0, kind: input, shape index: {}]   ;;  %s7221_s1 = inlined_call_operand.vmem [shape: bf16[2304,256], index: 1, kind: input, shape index: {}]   ;;  %s7222_s2 = inlined_call_operand.vmem [shape: f32[1,256], index: 2, kind: input, shape index: {}]   ;;  %s7223_s3 = inlined_call_operand.vmem [shape: f32[1,256], index: 3, kind: input, shape index: {}]   ;;  %s7224_s4 = inlined_call_operand.vmem [shape: f32[512,256], index: 4, kind: output, shape index: {}]  }
   0x1   :  { %s5603_s17 = smov 0  }
   0x2 LB: > { %s33_s18 = sadd.s32 1, %s5568_s16  ;;  %p4404_p0 = scmp.ge.s32.totalorder %s5572_s17, 1  ;;  %s5572_s17 = sphi %s5603_s17, %s14_s17   ;;  %s5568_s16 = sphi %s5601_s16, %s7294_s16   ;;  %s5564_s15 = sphi %s5599_s15, %s7293_s15  }
   0x3   : > { %p35_p1 = scmp.ge.s32.totalorder %s33_s18, 4  ;;  %p231_p2 = scmp.lt.s32.totalorder %s5572_s17, 5 }
   0x5   : > { %s7296_s18 = smov (%p35_p1, %s33_s18), 0  ;;  %p232_p3 = pnand %p4404_p0, %p231_p2 }
   0x7   : > { %235 = sbr.rel (%p232_p3) target bundleno = 566 (0x236), region = 36 }
   0xc   : > { %v4902_v0 = vld [vmem:[%s7221_s1 + $0x74] ss:$8 sps:$4 sm:$0xff]   ;;  %v4906_v2 = vld [vmem:[%s7221_s1 + $0x70] ss:$8 sps:$4 sm:$0xff]   ;;  %v4908_v4 = vld [vmem:[%s7221_s1 + $0x64] ss:$8 sps:$4 sm:$0xff]  }
   0xd   : > { %v4904_v1 = vld [vmem:[%s7221_s1 + $0x174] ss:$8 sps:$4 sm:$0xff]   ;;  %2991 = vmatprep.subr.bf16.mxu0 %v4902_v0  ;;  %v4907_v3 = vld [vmem:[%s7221_s1 + $0x170] ss:$8 sps:$4 sm:$0xff]   ;;  %v4910_v5 = vld [vmem:[%s7221_s1 + $0x164] ss:$8 sps:$4 sm:$0xff]  }
   0xe   : > { %3104 = vmatprep.subr.bf16.mxu1 %v4904_v1  ;;  %2992 = vmatpush1.bf16.msra.mxu0 %v4906_v2  ;;  %v4912_v6 = vld [vmem:[%s7221_s1 + $0x60] ss:$8 sps:$4 sm:$0xff]   ;;  %v4914_v8 = vld [vmem:[%s7221_s1 + $0x54] ss:$8 sps:$4 sm:$0xff]   ;;  %v4918_v10 = vld [vmem:[%s7221_s1 + $0x50] ss:$8 sps:$4 sm:$0xff]  }
   0xf   : > { %3105 = vmatpush1.bf16.msra.mxu1 %v4907_v3  ;;  %2993 = vmatprep.subr.bf16.mxu0 %v4908_v4  ;;  %v4913_v7 = vld [vmem:[%s7221_s1 + $0x160] ss:$8 sps:$4 sm:$0xff]   ;;  %v4916_v9 = vld [vmem:[%s7221_s1 + $0x154] ss:$8 sps:$4 sm:$0xff]   ;;  %v4919_v11 = vld [vmem:[%s7221_s1 + $0x150] ss:$8 sps:$4 sm:$0xff]  }
  0x10   : > { %3106 = vmatprep.subr.bf16.mxu1 %v4910_v5  ;;  %v4920_v12 = vld [vmem:[%s7221_s1 + $0x44] ss:$8 sps:$4 sm:$0xff]   ;;  %v4924_v14 = vld [vmem:[%s7221_s1 + $0x40] ss:$8 sps:$4 sm:$0xff]   ;;  %v4926_v16 = vld [vmem:[%s7221_s1 + $0x34] ss:$8 sps:$4 sm:$0xff]  }
  0x11   : > { %v4922_v13 = vld [vmem:[%s7221_s1 + $0x144] ss:$8 sps:$4 sm:$0xff]   ;;  %v4925_v15 = vld [vmem:[%s7221_s1 + $0x140] ss:$8 sps:$4 sm:$0xff]   ;;  %v4928_v17 = vld [vmem:[%s7221_s1 + $0x134] ss:$8 sps:$4 sm:$0xff]  }
  0x12   : > { %2994 = vmatpush1.bf16.msra.mxu0 %v4912_v6  ;;  %v4930_v18 = vld [vmem:[%s7221_s1 + $0x30] ss:$8 sps:$4 sm:$0xff]   ;;  %v4932_v20 = vld [vmem:[%s7221_s1 + $0x24] ss:$8 sps:$4 sm:$0xff]   ;;  %v4936_v22 = vld [vmem:[%s7221_s1 + $0x20] ss:$8 sps:$4 sm:$0xff]  }
  0x13   : > { %3107 = vmatpush1.bf16.msra.mxu1 %v4913_v7  ;;  %2995 = vmatprep.subr.bf16.mxu0 %v4914_v8  ;;  %v4931_v19 = vld [vmem:[%s7221_s1 + $0x130] ss:$8 sps:$4 sm:$0xff]   ;;  %v4934_v21 = vld [vmem:[%s7221_s1 + $0x124] ss:$8 sps:$4 sm:$0xff]   ;;  %v4937_v23 = vld [vmem:[%s7221_s1 + $0x120] ss:$8 sps:$4 sm:$0xff]  }
  0x14   : > { %3108 = vmatprep.subr.bf16.mxu1 %v4916_v9  ;;  %v4938_v24 = vld [vmem:[%s7221_s1 + $0x14] ss:$8 sps:$4 sm:$0xff]   ;;  %v4942_v26 = vld [vmem:[%s7221_s1 + $0x10] ss:$8 sps:$4 sm:$0xff]   ;;  %v4944_v28 = vld [vmem:[%s7221_s1 + $0x4] ss:$8 sps:$4 sm:$0xff]  }
  0x15   : > { %v4940_v25 = vld [vmem:[%s7221_s1 + $0x114] ss:$8 sps:$4 sm:$0xff]   ;;  %v4943_v27 = vld [vmem:[%s7221_s1 + $0x110] ss:$8 sps:$4 sm:$0xff]   ;;  %v4946_v29 = vld [vmem:[%s7221_s1 + $0x104] ss:$8 sps:$4 sm:$0xff]  }
  0x16   : > { %2996 = vmatpush1.bf16.msra.mxu0 %v4918_v10  ;;  %s4405_s9 = sshll.u32 %s5564_s15, 4  ;;  %v4948_v30 = vld [vmem:[%s7221_s1] ss:$8 sps:$4 sm:$0xff]   ;;  %v4950_v32 = vld [vmem:[%s7221_s1 + $0xf4] ss:$8 sps:$4 sm:$0xff]  }
  0x17   : > { %3109 = vmatpush1.bf16.msra.mxu1 %v4919_v11  ;;  %2997 = vmatprep.subr.bf16.mxu0 %v4920_v12  ;;  %v4949_v31 = vld [vmem:[%s7221_s1 + $0x100] ss:$8 sps:$4 sm:$0xff]   ;;  %p287_p4 = scmp.lt.s32.totalorder %s4405_s9, 63  ;;  %v4952_v33 = vld [vmem:[%s7221_s1 + $0x1f4] ss:$8 sps:$4 sm:$0xff]  }
  0x18   : > { %3110 = vmatprep.subr.bf16.mxu1 %v4922_v13  ;;  %v4954_v34 = vld [vmem:[%s7221_s1 + $0xf0] ss:$8 sps:$4 sm:$0xff]   ;;  %v4956_v36 = vld [vmem:[%s7221_s1 + $0xe4] ss:$8 sps:$4 sm:$0xff]   ;;  %v4960_v38 = vld [vmem:[%s7221_s1 + $0xe0] ss:$8 sps:$4 sm:$0xff]  }
  0x19   : > { %v4955_v35 = vld [vmem:[%s7221_s1 + $0x1f0] ss:$8 sps:$4 sm:$0xff]   ;;  %s7298_s9 = smov (!%p287_p4, %s4405_s9), 63  ;;  %v4958_v37 = vld [vmem:[%s7221_s1 + $0x1e4] ss:$8 sps:$4 sm:$0xff]  }
  0x1a   : > { %2998 = vmatpush1.bf16.msra.mxu0 %v4924_v14  ;;  %v4961_v39 = vld [vmem:[%s7221_s1 + $0x1e0] ss:$8 sps:$4 sm:$0xff]   ;;  %v4962_v40 = vld [vmem:[%s7221_s1 + $0xd4] ss:$8 sps:$4 sm:$0xff]   ;;  %s4877_s10 = smul.u32 72, %s7298_s9  ;;  %s4844_s5 = sshll.u32 %s7298_s9, 4 }
  0x1b   : > { %3111 = vmatpush1.bf16.msra.mxu1 %v4925_v15  ;;  %2999 = vmatprep.subr.bf16.mxu0 %v4926_v16  ;;  %v4964_v41 = vld [vmem:[%s7221_s1 + $0x1d4] ss:$8 sps:$4 sm:$0xff]   ;;  %v4966_v42 = vld [vmem:[%s7221_s1 + $0xd0] ss:$8 sps:$4 sm:$0xff]   ;;  %v4968_v44 = vld [vmem:[%s7221_s1 + $0xc4] ss:$8 sps:$4 sm:$0xff]   ;;  %s7094_s7 = scalar_lea.vmem %s7224_s4, %s4844_s5 }
  0x1c   : > { %3112 = vmatprep.subr.bf16.mxu1 %v4928_v17  ;;  %v4967_v43 = vld [vmem:[%s7221_s1 + $0x1d0] ss:$8 sps:$4 sm:$0xff]   ;;  %s5761_s24 = scalar_lea.vmem %s7220_s0, %s4877_s10  ;;  %v4970_v45 = vld [vmem:[%s7221_s1 + $0x1c4] ss:$8 sps:$4 sm:$0xff]   ;;  %v4972_v46 = vld [vmem:[%s7221_s1 + $0xc0] ss:$8 sps:$4 sm:$0xff]  }
  0x1d   : > { %v4973_v47 = vld [vmem:[%s7221_s1 + $0x1c0] ss:$8 sps:$4 sm:$0xff]   ;;  %v4974_v48 = vld [vmem:[%s7221_s1 + $0xb4] ss:$8 sps:$4 sm:$0xff]   ;;  %v5000_v49 = vld [vmem:[%s5761_s24 + $0x4] ss:$72 sps:$4 sm:$0xff]  }
  0x1e   : > { %3000 = vmatpush1.bf16.msra.mxu0 %v4930_v18  ;;  %v4976_v50 = vld [vmem:[%s7221_s1 + $0x1b4] ss:$8 sps:$4 sm:$0xff]   ;;  %3023 = vmatprep.mubr.bf16.mxu0 %v5000_v49  ;;  %v4978_v52 = vld [vmem:[%s7221_s1 + $0xb0] ss:$8 sps:$4 sm:$0xff]   ;;  %v4980_v54 = vld [vmem:[%s7221_s1 + $0xa4] ss:$8 sps:$4 sm:$0xff]  }
  0x1f   : > { %3113 = vmatpush1.bf16.msra.mxu1 %v4931_v19  ;;  %3001 = vmatprep.subr.bf16.mxu0 %v4932_v20  ;;  %v5003_v51 = vld [vmem:[%s5761_s24 + $0xc] ss:$72 sps:$4 sm:$0xff]   ;;  %v4979_v53 = vld [vmem:[%s7221_s1 + $0x1b0] ss:$8 sps:$4 sm:$0xff]   ;;  %v4984_v56 = vld [vmem:[%s7221_s1 + $0xa0] ss:$8 sps:$4 sm:$0xff]  }
  0x20   : > { %3114 = vmatprep.subr.bf16.mxu1 %v4934_v21  ;;  %3136 = vmatprep.mubr.bf16.mxu1 %v5003_v51  ;;  %v4982_v55 = vld [vmem:[%s7221_s1 + $0x1a4] ss:$8 sps:$4 sm:$0xff]   ;;  %v4985_v57 = vld [vmem:[%s7221_s1 + $0x1a0] ss:$8 sps:$4 sm:$0xff]   ;;  %v4986_v58 = vld [vmem:[%s7221_s1 + $0x94] ss:$8 sps:$4 sm:$0xff]  }
  0x21   : > { %v4988_v59 = vld [vmem:[%s7221_s1 + $0x194] ss:$8 sps:$4 sm:$0xff]   ;;  %v4990_v60 = vld [vmem:[%s7221_s1 + $0x90] ss:$8 sps:$4 sm:$0xff]   ;;  %v4992_v62 = vld [vmem:[%s7221_s1 + $0x84] ss:$8 sps:$4 sm:$0xff]  }
  0x22   : > { %3002 = vmatpush1.bf16.msra.mxu0 %v4936_v22  ;;  %v4991_v61 = vld [vmem:[%s7221_s1 + $0x190] ss:$8 sps:$4 sm:$0xff]   ;;  %v4994_v63 = vld [vmem:[%s7221_s1 + $0x184] ss:$8 sps:$4 sm:$0xff]   ;;  %v4996_v0 = vld [vmem:[%s7221_s1 + $0x80] ss:$8 sps:$4 sm:$0xff]  }
  0x23   : > { %3115 = vmatpush1.bf16.msra.mxu1 %v4937_v23  ;;  %3003 = vmatprep.subr.bf16.mxu0 %v4938_v24  ;;  %v4997_v1 = vld [vmem:[%s7221_s1 + $0x180] ss:$8 sps:$4 sm:$0xff]   ;;  %v5006_v2 = vld [vmem:[%s7221_s1 + $0x274] ss:$8 sps:$4 sm:$0xff]   ;;  %v5004_v6 = vld [vmem:[%s7221_s1 + $0x270] ss:$8 sps:$4 sm:$0xff]  }
  0x24   : > { %3116 = vmatprep.subr.bf16.mxu1 %v4940_v25  ;;  %v5009_v3 = vld [vmem:[%s7221_s1 + $0x374] ss:$8 sps:$4 sm:$0xff]   ;;  %v4998_v4 = vld [vmem:[%s5761_s24] ss:$72 sps:$4 sm:$0xff]   ;;  %v5007_v7 = vld [vmem:[%s7221_s1 + $0x370] ss:$8 sps:$4 sm:$0xff]  }
  0x25   : > { %v5001_v5 = vld [vmem:[%s5761_s24 + $0x8] ss:$72 sps:$4 sm:$0xff]   ;;  %v5012_v8 = vld [vmem:[%s7221_s1 + $0x264] ss:$8 sps:$4 sm:$0xff]   ;;  %v5016_v10 = vld [vmem:[%s5761_s24 + $0x94] ss:$72 sps:$4 sm:$0xff]  }
  0x26   : > { %3004 = vmatpush1.bf16.msra.mxu0 %v4942_v26  ;;  %v5015_v9 = vld [vmem:[%s7221_s1 + $0x364] ss:$8 sps:$4 sm:$0xff]   ;;  %v5010_v12 = vld [vmem:[%s7221_s1 + $0x260] ss:$8 sps:$4 sm:$0xff]   ;;  %v5024_v14 = vld [vmem:[%s7221_s1 + $0x254] ss:$8 sps:$4 sm:$0xff]  }
  0x27   : > { %3117 = vmatpush1.bf16.msra.mxu1 %v4943_v27  ;;  %3005 = vmatprep.subr.bf16.mxu0 %v4944_v28  ;;  %v5018_v11 = vld [vmem:[%s5761_s24 + $0x9c] ss:$72 sps:$4 sm:$0xff]   ;;  %v5013_v13 = vld [vmem:[%s7221_s1 + $0x360] ss:$8 sps:$4 sm:$0xff]   ;;  %v5020_v16 = vld [vmem:[%s5761_s24 + $0x90] ss:$72 sps:$4 sm:$0xff]  }
  0x28   : > { %3118 = vmatprep.subr.bf16.mxu1 %v4946_v29  ;;  %v5027_v15 = vld [vmem:[%s7221_s1 + $0x354] ss:$8 sps:$4 sm:$0xff]   ;;  %v5021_v17 = vld [vmem:[%s5761_s24 + $0x98] ss:$72 sps:$4 sm:$0xff]   ;;  %v5030_v20 = vld [vmem:[%s7221_s1 + $0x244] ss:$8 sps:$4 sm:$0xff]  }
  0x29   : > { %v5022_v18 = vld [vmem:[%s7221_s1 + $0x250] ss:$8 sps:$4 sm:$0xff]   ;;  %v5033_v21 = vld [vmem:[%s7221_s1 + $0x344] ss:$8 sps:$4 sm:$0xff]   ;;  %v5028_v24 = vld [vmem:[%s7221_s1 + $0x240] ss:$8 sps:$4 sm:$0xff]  }
  0x2a   : > { %3006 = vmatpush1.bf16.msra.mxu0 %v4948_v30  ;;  %v5025_v19 = vld [vmem:[%s7221_s1 + $0x350] ss:$8 sps:$4 sm:$0xff]   ;;  %v5034_v22 = vld [vmem:[%s5761_s24 + $0x124] ss:$72 sps:$4 sm:$0xff]   ;;  %v5031_v25 = vld [vmem:[%s7221_s1 + $0x340] ss:$8 sps:$4 sm:$0xff]  }
  0x2b   : > { %3119 = vmatpush1.bf16.msra.mxu1 %v4949_v31  ;;  %3007 = vmatprep.subr.bf16.mxu0 %v4950_v32  ;;  %v5036_v23 = vld [vmem:[%s5761_s24 + $0x12c] ss:$72 sps:$4 sm:$0xff]   ;;  %v5038_v28 = vld [vmem:[%s5761_s24 + $0x120] ss:$72 sps:$4 sm:$0xff]   ;;  %v5040_v30 = vld [vmem:[%s7221_s1 + $0x230] ss:$8 sps:$4 sm:$0xff]  }
  0x2c   : > { %3120 = vmatprep.subr.bf16.mxu1 %v4952_v33  ;;  %v5042_v26 = vld [vmem:[%s7221_s1 + $0x234] ss:$8 sps:$4 sm:$0xff]   ;;  %v5039_v29 = vld [vmem:[%s5761_s24 + $0x128] ss:$72 sps:$4 sm:$0xff]   ;;  %v5048_v32 = vld [vmem:[%s7221_s1 + $0x224] ss:$8 sps:$4 sm:$0xff]  }
  0x2d   : > { %v5045_v27 = vld [vmem:[%s7221_s1 + $0x334] ss:$8 sps:$4 sm:$0xff]   ;;  %v5043_v31 = vld [vmem:[%s7221_s1 + $0x330] ss:$8 sps:$4 sm:$0xff]   ;;  %v5051_v33 = vld [vmem:[%s7221_s1 + $0x324] ss:$8 sps:$4 sm:$0xff]  }
  0x2e   : > { %3008 = vmatpush2.bf16.msra.mxu0 %v4954_v34  ;;  %v5052_v34 = vld [vmem:[%s5761_s24 + $0x1b4] ss:$72 sps:$4 sm:$0xff]   ;;  %v5067_v49 = vld [vmem:[%s7221_s1 + $0x300] ss:$8 sps:$4 sm:$0xff]  }
  0x2f   : > { %3121 = vmatpush2.bf16.msra.mxu1 %v4955_v35  ;;  %3009 = vmatprep.subr.bf16.mxu0 %v4956_v36  ;;  %v5054_v35 = vld [vmem:[%s5761_s24 + $0x1bc] ss:$72 sps:$4 sm:$0xff]   ;;  %v5046_v36 = vld [vmem:[%s7221_s1 + $0x220] ss:$8 sps:$4 sm:$0xff]  }
  0x30   : > { %3122 = vmatprep.subr.bf16.mxu1 %v4958_v37  ;;  %v5049_v37 = vld [vmem:[%s7221_s1 + $0x320] ss:$8 sps:$4 sm:$0xff]   ;;  %v5081_v51 = vld [vmem:[%s7221_s1 + $0x3f4] ss:$8 sps:$4 sm:$0xff]  }
  0x32   : > { %3010 = vmatpush2.bf16.msra.mxu0 %v4960_v38  ;;  %v5060_v38 = vld [vmem:[%s7221_s1 + $0x214] ss:$8 sps:$4 sm:$0xff]  }
  0x33   : > { %3123 = vmatpush2.bf16.msra.mxu1 %v4961_v39  ;;  %3011 = vmatprep.subr.bf16.mxu0 %v4962_v40  ;;  %v5063_v39 = vld [vmem:[%s7221_s1 + $0x314] ss:$8 sps:$4 sm:$0xff]   ;;  %v5056_v40 = vld [vmem:[%s5761_s24 + $0x1b0] ss:$72 sps:$4 sm:$0xff]  }
  0x34   : > { %3124 = vmatprep.subr.bf16.mxu1 %v4964_v41  ;;  %v5057_v41 = vld [vmem:[%s5761_s24 + $0x1b8] ss:$72 sps:$4 sm:$0xff]  }
  0x36   : > { %3012 = vmatpush2.bf16.msra.mxu0 %v4966_v42  ;;  %v5058_v42 = vld [vmem:[%s7221_s1 + $0x210] ss:$8 sps:$4 sm:$0xff]  }
  0x37   : > { %3125 = vmatpush2.bf16.msra.mxu1 %v4967_v43  ;;  %3013 = vmatprep.subr.bf16.mxu0 %v4968_v44  ;;  %v5061_v43 = vld [vmem:[%s7221_s1 + $0x310] ss:$8 sps:$4 sm:$0xff]   ;;  %v5066_v44 = vld [vmem:[%s7221_s1 + $0x204] ss:$8 sps:$4 sm:$0xff]  }
  0x38   : > { %3126 = vmatprep.subr.bf16.mxu1 %v4970_v45  ;;  %v5069_v45 = vld [vmem:[%s7221_s1 + $0x304] ss:$8 sps:$4 sm:$0xff]  }
  0x3a   : > { %3014 = vmatpush2.bf16.msra.mxu0 %v4972_v46  ;;  %v5070_v46 = vld [vmem:[%s5761_s24 + $0x244] ss:$72 sps:$4 sm:$0xff]  }
  0x3b   : > { %3127 = vmatpush2.bf16.msra.mxu1 %v4973_v47  ;;  %3015 = vmatprep.subr.bf16.mxu0 %v4974_v48  ;;  %v5072_v47 = vld [vmem:[%s5761_s24 + $0x24c] ss:$72 sps:$4 sm:$0xff]   ;;  %v5064_v48 = vld [vmem:[%s7221_s1 + $0x200] ss:$8 sps:$4 sm:$0xff]  }
  0x3c   : > { %3128 = vmatprep.subr.bf16.mxu1 %v4976_v50  ;;  %v5078_v50 = vld [vmem:[%s7221_s1 + $0x2f4] ss:$8 sps:$4 sm:$0xff]  }
  0x3e   : > { %3016 = vmatpush2.bf16.msra.mxu0 %v4978_v52  ;;  %v5074_v52 = vld [vmem:[%s5761_s24 + $0x240] ss:$72 sps:$4 sm:$0xff]  }
  0x3f   : > { %3129 = vmatpush2.bf16.msra.mxu1 %v4979_v53  ;;  %3017 = vmatprep.subr.bf16.mxu0 %v4980_v54  ;;  %v5075_v53 = vld [vmem:[%s5761_s24 + $0x248] ss:$72 sps:$4 sm:$0xff]  }
  0x40   : > { %3130 = vmatprep.subr.bf16.mxu1 %v4982_v55  ;;  %v5076_v54 = vld [vmem:[%s7221_s1 + $0x2f0] ss:$8 sps:$4 sm:$0xff]  }
  0x41   : > { %v5079_v55 = vld [vmem:[%s7221_s1 + $0x3f0] ss:$8 sps:$4 sm:$0xff]  }
  0x42   : > { %3018 = vmatpush2.bf16.msra.mxu0 %v4984_v56  ;;  %v5084_v56 = vld [vmem:[%s7221_s1 + $0x2e4] ss:$8 sps:$4 sm:$0xff]  }
  0x43   : > { %3131 = vmatpush2.bf16.msra.mxu1 %v4985_v57  ;;  %3019 = vmatprep.subr.bf16.mxu0 %v4986_v58  ;;  %v5087_v57 = vld [vmem:[%s7221_s1 + $0x3e4] ss:$8 sps:$4 sm:$0xff]   ;;  %v5088_v58 = vld [vmem:[%s5761_s24 + $0x2d4] ss:$72 sps:$4 sm:$0xff]  }
  0x44   : > { %3132 = vmatprep.subr.bf16.mxu1 %v4988_v59  ;;  %v5090_v59 = vld [vmem:[%s5761_s24 + $0x2dc] ss:$72 sps:$4 sm:$0xff]  }
  0x46   : > { %3020 = vmatpush2.bf16.msra.mxu0 %v4990_v60  ;;  %v5082_v60 = vld [vmem:[%s7221_s1 + $0x2e0] ss:$8 sps:$4 sm:$0xff]  }
  0x47   : > { %3133 = vmatpush2.bf16.msra.mxu1 %v4991_v61  ;;  %3021 = vmatprep.subr.bf16.mxu0 %v4992_v62  ;;  %v5085_v61 = vld [vmem:[%s7221_s1 + $0x3e0] ss:$8 sps:$4 sm:$0xff]   ;;  %v5096_v62 = vld [vmem:[%s7221_s1 + $0x2d4] ss:$8 sps:$4 sm:$0xff]  }
  0x48   : > { %3134 = vmatprep.subr.bf16.mxu1 %v4994_v63  ;;  %v5099_v63 = vld [vmem:[%s7221_s1 + $0x3d4] ss:$8 sps:$4 sm:$0xff]  }
  0x4a   : > { %3022 = vmatpush2.bf16.msra.mxu0 %v4996_v0  ;;  %v5092_v0 = vld [vmem:[%s5761_s24 + $0x2d0] ss:$72 sps:$4 sm:$0xff]  }
  0x4b   : > { %3135 = vmatpush2.bf16.msra.mxu1 %v4997_v1  ;;  %3217 = vmatprep.subr.bf16.mxu0 %v5006_v2  ;;  %v5093_v1 = vld [vmem:[%s5761_s24 + $0x2d8] ss:$72 sps:$4 sm:$0xff]  }
  0x4c   : > { %3330 = vmatprep.subr.bf16.mxu1 %v5009_v3  ;;  %v5094_v2 = vld [vmem:[%s7221_s1 + $0x2d0] ss:$8 sps:$4 sm:$0xff]  }
  0x4d   : > { %3024 = vmatmul.mubr.bf16.vlgmr.msra.gmra.mxu0 %v4998_v4  ;;  %v5097_v3 = vld [vmem:[%s7221_s1 + $0x3d0] ss:$8 sps:$4 sm:$0xff]   ;;  %v5102_v4 = vld [vmem:[%s7221_s1 + $0x2c4] ss:$8 sps:$4 sm:$0xff]  }
  0x4e   : > { %3137 = vmatmul.mubr.bf16.vlgmr.msra.gmra.mxu1 %v5001_v5  ;;  %3218 = vmatpush1.bf16.msra.mxu0 %v5004_v6  ;;  %v5105_v5 = vld [vmem:[%s7221_s1 + $0x3c4] ss:$8 sps:$4 sm:$0xff]  }
  0x4f   : > { %3331 = vmatpush1.bf16.msra.mxu1 %v5007_v7  ;;  %3219 = vmatprep.subr.bf16.mxu0 %v5012_v8  ;;  %v5106_v6 = vld [vmem:[%s5761_s24 + $0x364] ss:$72 sps:$4 sm:$0xff]   ;;  %v5100_v8 = vld [vmem:[%s7221_s1 + $0x2c0] ss:$8 sps:$4 sm:$0xff]  }
  0x50   : > { %3332 = vmatprep.subr.bf16.mxu1 %v5015_v9  ;;  %3033 = vmatprep.mubr.bf16.mxu0 %v5016_v10  ;;  %v5108_v7 = vld [vmem:[%s5761_s24 + $0x36c] ss:$72 sps:$4 sm:$0xff]   ;;  %v5103_v9 = vld [vmem:[%s7221_s1 + $0x3c0] ss:$8 sps:$4 sm:$0xff]  }
  0x51   : > { %3146 = vmatprep.mubr.bf16.mxu1 %v5018_v11  ;;  %v5114_v10 = vld [vmem:[%s7221_s1 + $0x2b4] ss:$8 sps:$4 sm:$0xff]  }
  0x52   : > { %3220 = vmatpush1.bf16.msra.mxu0 %v5010_v12  ;;  %v5117_v11 = vld [vmem:[%s7221_s1 + $0x3b4] ss:$8 sps:$4 sm:$0xff]   ;;  %v5110_v12 = vld [vmem:[%s5761_s24 + $0x360] ss:$72 sps:$4 sm:$0xff]  }
  0x53   : > { %3333 = vmatpush1.bf16.msra.mxu1 %v5013_v13  ;;  %3221 = vmatprep.subr.bf16.mxu0 %v5024_v14  ;;  %v5111_v13 = vld [vmem:[%s5761_s24 + $0x368] ss:$72 sps:$4 sm:$0xff]  }
  0x54   : > { %3334 = vmatprep.subr.bf16.mxu1 %v5027_v15  ;;  %v5112_v14 = vld [vmem:[%s7221_s1 + $0x2b0] ss:$8 sps:$4 sm:$0xff]  }
  0x55   : > { %3034 = vmatmul.mubr.bf16.gmra.mxu0 %v5020_v16  ;;  %v5115_v15 = vld [vmem:[%s7221_s1 + $0x3b0] ss:$8 sps:$4 sm:$0xff]   ;;  %v5120_v16 = vld [vmem:[%s7221_s1 + $0x2a4] ss:$8 sps:$4 sm:$0xff]  }
  0x56   : > { %3147 = vmatmul.mubr.bf16.gmra.mxu1 %v5021_v17  ;;  %3222 = vmatpush1.bf16.msra.mxu0 %v5022_v18  ;;  %v5123_v17 = vld [vmem:[%s7221_s1 + $0x3a4] ss:$8 sps:$4 sm:$0xff]   ;;  %v5124_v18 = vld [vmem:[%s5761_s24 + $0x3f4] ss:$72 sps:$4 sm:$0xff]  }
  0x57   : > { %3335 = vmatpush1.bf16.msra.mxu1 %v5025_v19  ;;  %3223 = vmatprep.subr.bf16.mxu0 %v5030_v20  ;;  %v5126_v19 = vld [vmem:[%s5761_s24 + $0x3fc] ss:$72 sps:$4 sm:$0xff]   ;;  %v5118_v20 = vld [vmem:[%s7221_s1 + $0x2a0] ss:$8 sps:$4 sm:$0xff]  }
  0x58   : > { %3336 = vmatprep.subr.bf16.mxu1 %v5033_v21  ;;  %3043 = vmatprep.mubr.bf16.mxu0 %v5034_v22  ;;  %v5121_v21 = vld [vmem:[%s7221_s1 + $0x3a0] ss:$8 sps:$4 sm:$0xff]   ;;  %v5132_v22 = vld [vmem:[%s7221_s1 + $0x294] ss:$8 sps:$4 sm:$0xff]  }
  0x59   : > { %3156 = vmatprep.mubr.bf16.mxu1 %v5036_v23  ;;  %v5135_v23 = vld [vmem:[%s7221_s1 + $0x394] ss:$8 sps:$4 sm:$0xff]  }
  0x5a   : > { %3224 = vmatpush1.bf16.msra.mxu0 %v5028_v24  ;;  %v5128_v24 = vld [vmem:[%s5761_s24 + $0x3f0] ss:$72 sps:$4 sm:$0xff]  }
  0x5b   : > { %3337 = vmatpush1.bf16.msra.mxu1 %v5031_v25  ;;  %3225 = vmatprep.subr.bf16.mxu0 %v5042_v26  ;;  %v5129_v25 = vld [vmem:[%s5761_s24 + $0x3f8] ss:$72 sps:$4 sm:$0xff]  }
  0x5c   : > { %3338 = vmatprep.subr.bf16.mxu1 %v5045_v27  ;;  %v5130_v26 = vld [vmem:[%s7221_s1 + $0x290] ss:$8 sps:$4 sm:$0xff]  }
  0x5d   : > { %3044 = vmatmul.mubr.bf16.gmra.mxu0 %v5038_v28  ;;  %v5133_v27 = vld [vmem:[%s7221_s1 + $0x390] ss:$8 sps:$4 sm:$0xff]   ;;  %v5138_v28 = vld [vmem:[%s7221_s1 + $0x284] ss:$8 sps:$4 sm:$0xff]  }
  0x5e   : > { %3157 = vmatmul.mubr.bf16.gmra.mxu1 %v5039_v29  ;;  %3226 = vmatpush1.bf16.msra.mxu0 %v5040_v30  ;;  %v5141_v29 = vld [vmem:[%s7221_s1 + $0x384] ss:$8 sps:$4 sm:$0xff]   ;;  %v5144_v30 = vld [vmem:[%s5761_s24 + $0x14] ss:$72 sps:$4 sm:$0xff]  }
  0x5f   : > { %3339 = vmatpush1.bf16.msra.mxu1 %v5043_v31  ;;  %3227 = vmatprep.subr.bf16.mxu0 %v5048_v32  ;;  %v5147_v31 = vld [vmem:[%s5761_s24 + $0x1c] ss:$72 sps:$4 sm:$0xff]   ;;  %v5136_v32 = vld [vmem:[%s7221_s1 + $0x280] ss:$8 sps:$4 sm:$0xff]  }
  0x60   : > { %3340 = vmatprep.subr.bf16.mxu1 %v5051_v33  ;;  %3053 = vmatprep.mubr.bf16.mxu0 %v5052_v34  ;;  %v5139_v33 = vld [vmem:[%s7221_s1 + $0x380] ss:$8 sps:$4 sm:$0xff]   ;;  %v5150_v34 = vld [vmem:[%s7221_s1 + $0x474] ss:$8 sps:$4 sm:$0xff]  }
  0x61   : > { %3166 = vmatprep.mubr.bf16.mxu1 %v5054_v35  ;;  %v5153_v35 = vld [vmem:[%s7221_s1 + $0x574] ss:$8 sps:$4 sm:$0xff]  }
  0x62   : > { %3228 = vmatpush1.bf16.msra.mxu0 %v5046_v36  ;;  %v5142_v36 = vld [vmem:[%s5761_s24 + $0x10] ss:$72 sps:$4 sm:$0xff]  }
  0x63   : > { %3341 = vmatpush1.bf16.msra.mxu1 %v5049_v37  ;;  %3229 = vmatprep.subr.bf16.mxu0 %v5060_v38  ;;  %v5145_v37 = vld [vmem:[%s5761_s24 + $0x18] ss:$72 sps:$4 sm:$0xff]  }
  0x64   : > { %3342 = vmatprep.subr.bf16.mxu1 %v5063_v39  ;;  %v5148_v38 = vld [vmem:[%s7221_s1 + $0x470] ss:$8 sps:$4 sm:$0xff]  }
  0x65   : > { %3054 = vmatmul.mubr.bf16.gmra.mxu0 %v5056_v40  ;;  %v5151_v39 = vld [vmem:[%s7221_s1 + $0x570] ss:$8 sps:$4 sm:$0xff]   ;;  %v5156_v40 = vld [vmem:[%s7221_s1 + $0x464] ss:$8 sps:$4 sm:$0xff]  }
  0x66   : > { %3167 = vmatmul.mubr.bf16.gmra.mxu1 %v5057_v41  ;;  %3230 = vmatpush1.bf16.msra.mxu0 %v5058_v42  ;;  %v5159_v41 = vld [vmem:[%s7221_s1 + $0x564] ss:$8 sps:$4 sm:$0xff]  }
  0x67   : > { %3343 = vmatpush1.bf16.msra.mxu1 %v5061_v43  ;;  %3231 = vmatprep.subr.bf16.mxu0 %v5066_v44  ;;  %v5160_v42 = vld [vmem:[%s5761_s24 + $0xa4] ss:$72 sps:$4 sm:$0xff]   ;;  %v5154_v44 = vld [vmem:[%s7221_s1 + $0x460] ss:$8 sps:$4 sm:$0xff]  }
  0x68   : > { %3344 = vmatprep.subr.bf16.mxu1 %v5069_v45  ;;  %3063 = vmatprep.mubr.bf16.mxu0 %v5070_v46  ;;  %v5162_v43 = vld [vmem:[%s5761_s24 + $0xac] ss:$72 sps:$4 sm:$0xff]   ;;  %v5157_v45 = vld [vmem:[%s7221_s1 + $0x560] ss:$8 sps:$4 sm:$0xff]  }
  0x69   : > { %3176 = vmatprep.mubr.bf16.mxu1 %v5072_v47  ;;  %v5168_v46 = vld [vmem:[%s7221_s1 + $0x454] ss:$8 sps:$4 sm:$0xff]  }
  0x6a   : > { %3232 = vmatpush1.bf16.msra.mxu0 %v5064_v48  ;;  %v5171_v47 = vld [vmem:[%s7221_s1 + $0x554] ss:$8 sps:$4 sm:$0xff]   ;;  %v5164_v48 = vld [vmem:[%s5761_s24 + $0xa0] ss:$72 sps:$4 sm:$0xff]  }
  0x6b   : > { %3345 = vmatpush1.bf16.msra.mxu1 %v5067_v49  ;;  %3233 = vmatprep.subr.bf16.mxu0 %v5078_v50  ;;  %v5165_v49 = vld [vmem:[%s5761_s24 + $0xa8] ss:$72 sps:$4 sm:$0xff]  }
  0x6c   : > { %3346 = vmatprep.subr.bf16.mxu1 %v5081_v51  ;;  %v5166_v50 = vld [vmem:[%s7221_s1 + $0x450] ss:$8 sps:$4 sm:$0xff]  }
  0x6d   : > { %3064 = vmatmul.mubr.bf16.gmra.mxu0 %v5074_v52  ;;  %v5169_v51 = vld [vmem:[%s7221_s1 + $0x550] ss:$8 sps:$4 sm:$0xff]   ;;  %v5174_v52 = vld [vmem:[%s7221_s1 + $0x444] ss:$8 sps:$4 sm:$0xff]  }
  0x6e   : > { %3177 = vmatmul.mubr.bf16.gmra.mxu1 %v5075_v53  ;;  %3234 = vmatpush2.bf16.msra.mxu0 %v5076_v54  ;;  %v5177_v53 = vld [vmem:[%s7221_s1 + $0x544] ss:$8 sps:$4 sm:$0xff]   ;;  %v5178_v54 = vld [vmem:[%s5761_s24 + $0x134] ss:$72 sps:$4 sm:$0xff]  }
  0x6f   : > { %3347 = vmatpush2.bf16.msra.mxu1 %v5079_v55  ;;  %3235 = vmatprep.subr.bf16.mxu0 %v5084_v56  ;;  %v5180_v55 = vld [vmem:[%s5761_s24 + $0x13c] ss:$72 sps:$4 sm:$0xff]   ;;  %v5172_v56 = vld [vmem:[%s7221_s1 + $0x440] ss:$8 sps:$4 sm:$0xff]  }
  0x70   : > { %3348 = vmatprep.subr.bf16.mxu1 %v5087_v57  ;;  %3073 = vmatprep.mubr.bf16.mxu0 %v5088_v58  ;;  %v5175_v57 = vld [vmem:[%s7221_s1 + $0x540] ss:$8 sps:$4 sm:$0xff]   ;;  %v5186_v58 = vld [vmem:[%s7221_s1 + $0x434] ss:$8 sps:$4 sm:$0xff]  }
  0x71   : > { %3186 = vmatprep.mubr.bf16.mxu1 %v5090_v59  ;;  %v5189_v59 = vld [vmem:[%s7221_s1 + $0x534] ss:$8 sps:$4 sm:$0xff]  }
  0x72   : > { %3236 = vmatpush2.bf16.msra.mxu0 %v5082_v60  ;;  %v5182_v60 = vld [vmem:[%s5761_s24 + $0x130] ss:$72 sps:$4 sm:$0xff]  }
  0x73   : > { %3349 = vmatpush2.bf16.msra.mxu1 %v5085_v61  ;;  %3237 = vmatprep.subr.bf16.mxu0 %v5096_v62  ;;  %v5183_v61 = vld [vmem:[%s5761_s24 + $0x138] ss:$72 sps:$4 sm:$0xff]  }
  0x74   : > { %3350 = vmatprep.subr.bf16.mxu1 %v5099_v63  ;;  %v5184_v62 = vld [vmem:[%s7221_s1 + $0x430] ss:$8 sps:$4 sm:$0xff]  }
  0x75   : > { %3074 = vmatmul.mubr.bf16.gmra.mxu0 %v5092_v0  ;;  %v5187_v63 = vld [vmem:[%s7221_s1 + $0x530] ss:$8 sps:$4 sm:$0xff]   ;;  %v5192_v0 = vld [vmem:[%s7221_s1 + $0x424] ss:$8 sps:$4 sm:$0xff]  }
  0x76   : > { %3187 = vmatmul.mubr.bf16.gmra.mxu1 %v5093_v1  ;;  %3238 = vmatpush2.bf16.msra.mxu0 %v5094_v2  ;;  %v5195_v1 = vld [vmem:[%s7221_s1 + $0x524] ss:$8 sps:$4 sm:$0xff]  }
  0x77   : > { %3351 = vmatpush2.bf16.msra.mxu1 %v5097_v3  ;;  %3239 = vmatprep.subr.bf16.mxu0 %v5102_v4  ;;  %v5196_v2 = vld [vmem:[%s5761_s24 + $0x1c4] ss:$72 sps:$4 sm:$0xff]   ;;  %v5190_v4 = vld [vmem:[%s7221_s1 + $0x420] ss:$8 sps:$4 sm:$0xff]  }
  0x78   : > { %3352 = vmatprep.subr.bf16.mxu1 %v5105_v5  ;;  %3083 = vmatprep.mubr.bf16.mxu0 %v5106_v6  ;;  %v5198_v3 = vld [vmem:[%s5761_s24 + $0x1cc] ss:$72 sps:$4 sm:$0xff]   ;;  %v5193_v5 = vld [vmem:[%s7221_s1 + $0x520] ss:$8 sps:$4 sm:$0xff]  }
  0x79   : > { %3196 = vmatprep.mubr.bf16.mxu1 %v5108_v7  ;;  %v5204_v6 = vld [vmem:[%s7221_s1 + $0x414] ss:$8 sps:$4 sm:$0xff]  }
  0x7a   : > { %3240 = vmatpush2.bf16.msra.mxu0 %v5100_v8  ;;  %v5207_v7 = vld [vmem:[%s7221_s1 + $0x514] ss:$8 sps:$4 sm:$0xff]   ;;  %v5200_v8 = vld [vmem:[%s5761_s24 + $0x1c0] ss:$72 sps:$4 sm:$0xff]  }
  0x7b   : > { %3353 = vmatpush2.bf16.msra.mxu1 %v5103_v9  ;;  %3241 = vmatprep.subr.bf16.mxu0 %v5114_v10  ;;  %v5201_v9 = vld [vmem:[%s5761_s24 + $0x1c8] ss:$72 sps:$4 sm:$0xff]  }
  0x7c   : > { %3354 = vmatprep.subr.bf16.mxu1 %v5117_v11  ;;  %v5202_v10 = vld [vmem:[%s7221_s1 + $0x410] ss:$8 sps:$4 sm:$0xff]  }
  0x7d   : > { %3084 = vmatmul.mubr.bf16.gmra.mxu0 %v5110_v12  ;;  %v5205_v11 = vld [vmem:[%s7221_s1 + $0x510] ss:$8 sps:$4 sm:$0xff]   ;;  %v5210_v12 = vld [vmem:[%s7221_s1 + $0x404] ss:$8 sps:$4 sm:$0xff]  }
  0x7e   : > { %3197 = vmatmul.mubr.bf16.gmra.mxu1 %v5111_v13  ;;  %3242 = vmatpush2.bf16.msra.mxu0 %v5112_v14  ;;  %v5213_v13 = vld [vmem:[%s7221_s1 + $0x504] ss:$8 sps:$4 sm:$0xff]   ;;  %v5214_v14 = vld [vmem:[%s5761_s24 + $0x254] ss:$72 sps:$4 sm:$0xff]  }
  0x7f   : > { %3355 = vmatpush2.bf16.msra.mxu1 %v5115_v15  ;;  %3243 = vmatprep.subr.bf16.mxu0 %v5120_v16  ;;  %v5216_v15 = vld [vmem:[%s5761_s24 + $0x25c] ss:$72 sps:$4 sm:$0xff]   ;;  %v5208_v16 = vld [vmem:[%s7221_s1 + $0x400] ss:$8 sps:$4 sm:$0xff]  }
  0x80   : > { %3356 = vmatprep.subr.bf16.mxu1 %v5123_v17  ;;  %3093 = vmatprep.mubr.bf16.mxu0 %v5124_v18  ;;  %v5211_v17 = vld [vmem:[%s7221_s1 + $0x500] ss:$8 sps:$4 sm:$0xff]   ;;  %v5222_v18 = vld [vmem:[%s7221_s1 + $0x4f4] ss:$8 sps:$4 sm:$0xff]  }
  0x81   : > { %3206 = vmatprep.mubr.bf16.mxu1 %v5126_v19  ;;  %v5225_v19 = vld [vmem:[%s7221_s1 + $0x5f4] ss:$8 sps:$4 sm:$0xff]  }
  0x82   : > { %3244 = vmatpush2.bf16.msra.mxu0 %v5118_v20  ;;  %v5218_v20 = vld [vmem:[%s5761_s24 + $0x250] ss:$72 sps:$4 sm:$0xff]  }
  0x83   : > { %3357 = vmatpush2.bf16.msra.mxu1 %v5121_v21  ;;  %3245 = vmatprep.subr.bf16.mxu0 %v5132_v22  ;;  %v5219_v21 = vld [vmem:[%s5761_s24 + $0x258] ss:$72 sps:$4 sm:$0xff]  }
  0x84   : > { %3358 = vmatprep.subr.bf16.mxu1 %v5135_v23  ;;  %v5220_v22 = vld [vmem:[%s7221_s1 + $0x4f0] ss:$8 sps:$4 sm:$0xff]  }
  0x85   : > { %3094 = vmatmul.mubr.bf16.gmra.mxu0 %v5128_v24  ;;  %v5223_v23 = vld [vmem:[%s7221_s1 + $0x5f0] ss:$8 sps:$4 sm:$0xff]   ;;  %v5228_v24 = vld [vmem:[%s7221_s1 + $0x4e4] ss:$8 sps:$4 sm:$0xff]  }
  0x86   : > { %3207 = vmatmul.mubr.bf16.gmra.mxu1 %v5129_v25  ;;  %3246 = vmatpush2.bf16.msra.mxu0 %v5130_v26  ;;  %v5231_v25 = vld [vmem:[%s7221_s1 + $0x5e4] ss:$8 sps:$4 sm:$0xff]  }
  0x87   : > { %3359 = vmatpush2.bf16.msra.mxu1 %v5133_v27  ;;  %3247 = vmatprep.subr.bf16.mxu0 %v5138_v28  ;;  %v5232_v26 = vld [vmem:[%s5761_s24 + $0x2e4] ss:$72 sps:$4 sm:$0xff]   ;;  %v5226_v28 = vld [vmem:[%s7221_s1 + $0x4e0] ss:$8 sps:$4 sm:$0xff]  }
  0x88   : > { %3360 = vmatprep.subr.bf16.mxu1 %v5141_v29  ;;  %3249 = vmatprep.mubr.bf16.mxu0 %v5144_v30  ;;  %v5234_v27 = vld [vmem:[%s5761_s24 + $0x2ec] ss:$72 sps:$4 sm:$0xff]   ;;  %v5229_v29 = vld [vmem:[%s7221_s1 + $0x5e0] ss:$8 sps:$4 sm:$0xff]  }
  0x89   : > { %3362 = vmatprep.mubr.bf16.mxu1 %v5147_v31  ;;  %v5240_v30 = vld [vmem:[%s7221_s1 + $0x4d4] ss:$8 sps:$4 sm:$0xff]  }
  0x8a   : > { %3248 = vmatpush2.bf16.msra.mxu0 %v5136_v32  ;;  %v5243_v31 = vld [vmem:[%s7221_s1 + $0x5d4] ss:$8 sps:$4 sm:$0xff]   ;;  %v5236_v32 = vld [vmem:[%s5761_s24 + $0x2e0] ss:$72 sps:$4 sm:$0xff]  }
  0x8b   : > { %3361 = vmatpush2.bf16.msra.mxu1 %v5139_v33  ;;  %3443 = vmatprep.subr.bf16.mxu0 %v5150_v34  ;;  %v5237_v33 = vld [vmem:[%s5761_s24 + $0x2e8] ss:$72 sps:$4 sm:$0xff]  }
  0x8c   : > { %3556 = vmatprep.subr.bf16.mxu1 %v5153_v35  ;;  %v5238_v34 = vld [vmem:[%s7221_s1 + $0x4d0] ss:$8 sps:$4 sm:$0xff]  }
  0x8d   : > { %3250 = vmatmul.mubr.bf16.vlgmr.msra.gmra.mxu0 %v5142_v36  ;;  %v5241_v35 = vld [vmem:[%s7221_s1 + $0x5d0] ss:$8 sps:$4 sm:$0xff]   ;;  %v5246_v36 = vld [vmem:[%s7221_s1 + $0x4c4] ss:$8 sps:$4 sm:$0xff]  }
  0x8e   : > { %3363 = vmatmul.mubr.bf16.vlgmr.msra.gmra.mxu1 %v5145_v37  ;;  %3444 = vmatpush1.bf16.msra.mxu0 %v5148_v38  ;;  %v5249_v37 = vld [vmem:[%s7221_s1 + $0x5c4] ss:$8 sps:$4 sm:$0xff]   ;;  %v5250_v38 = vld [vmem:[%s5761_s24 + $0x374] ss:$72 sps:$4 sm:$0xff]  }
  0x8f   : > { %3557 = vmatpush1.bf16.msra.mxu1 %v5151_v39  ;;  %3445 = vmatprep.subr.bf16.mxu0 %v5156_v40  ;;  %v5252_v39 = vld [vmem:[%s5761_s24 + $0x37c] ss:$72 sps:$4 sm:$0xff]   ;;  %v5244_v40 = vld [vmem:[%s7221_s1 + $0x4c0] ss:$8 sps:$4 sm:$0xff]  }
  0x90   : > { %3558 = vmatprep.subr.bf16.mxu1 %v5159_v41  ;;  %3259 = vmatprep.mubr.bf16.mxu0 %v5160_v42  ;;  %v5247_v41 = vld [vmem:[%s7221_s1 + $0x5c0] ss:$8 sps:$4 sm:$0xff]   ;;  %v5258_v42 = vld [vmem:[%s7221_s1 + $0x4b4] ss:$8 sps:$4 sm:$0xff]  }
  0x91   : > { %3372 = vmatprep.mubr.bf16.mxu1 %v5162_v43  ;;  %v5261_v43 = vld [vmem:[%s7221_s1 + $0x5b4] ss:$8 sps:$4 sm:$0xff]  }
  0x92   : > { %3446 = vmatpush1.bf16.msra.mxu0 %v5154_v44  ;;  %v5254_v44 = vld [vmem:[%s5761_s24 + $0x370] ss:$72 sps:$4 sm:$0xff]  }
  0x93   : > { %3559 = vmatpush1.bf16.msra.mxu1 %v5157_v45  ;;  %3447 = vmatprep.subr.bf16.mxu0 %v5168_v46  ;;  %v5255_v45 = vld [vmem:[%s5761_s24 + $0x378] ss:$72 sps:$4 sm:$0xff]  }
  0x94   : > { %3560 = vmatprep.subr.bf16.mxu1 %v5171_v47  ;;  %v5256_v46 = vld [vmem:[%s7221_s1 + $0x4b0] ss:$8 sps:$4 sm:$0xff]  }
  0x95   : > { %3260 = vmatmul.mubr.bf16.gmra.mxu0 %v5164_v48  ;;  %v5259_v47 = vld [vmem:[%s7221_s1 + $0x5b0] ss:$8 sps:$4 sm:$0xff]   ;;  %v5264_v48 = vld [vmem:[%s7221_s1 + $0x4a4] ss:$8 sps:$4 sm:$0xff]  }
  0x96   : > { %3373 = vmatmul.mubr.bf16.gmra.mxu1 %v5165_v49  ;;  %3448 = vmatpush1.bf16.msra.mxu0 %v5166_v50  ;;  %v5267_v49 = vld [vmem:[%s7221_s1 + $0x5a4] ss:$8 sps:$4 sm:$0xff]  }
  0x97   : > { %3561 = vmatpush1.bf16.msra.mxu1 %v5169_v51  ;;  %3449 = vmatprep.subr.bf16.mxu0 %v5174_v52  ;;  %v5268_v50 = vld [vmem:[%s5761_s24 + $0x404] ss:$72 sps:$4 sm:$0xff]   ;;  %v5262_v52 = vld [vmem:[%s7221_s1 + $0x4a0] ss:$8 sps:$4 sm:$0xff]  }
  0x98   : > { %3562 = vmatprep.subr.bf16.mxu1 %v5177_v53  ;;  %3269 = vmatprep.mubr.bf16.mxu0 %v5178_v54  ;;  %v5270_v51 = vld [vmem:[%s5761_s24 + $0x40c] ss:$72 sps:$4 sm:$0xff]   ;;  %v5265_v53 = vld [vmem:[%s7221_s1 + $0x5a0] ss:$8 sps:$4 sm:$0xff]  }
  0x99   : > { %3382 = vmatprep.mubr.bf16.mxu1 %v5180_v55  ;;  %v5276_v54 = vld [vmem:[%s7221_s1 + $0x494] ss:$8 sps:$4 sm:$0xff]  }
  0x9a   : > { %3450 = vmatpush1.bf16.msra.mxu0 %v5172_v56  ;;  %v5279_v55 = vld [vmem:[%s7221_s1 + $0x594] ss:$8 sps:$4 sm:$0xff]   ;;  %v5272_v56 = vld [vmem:[%s5761_s24 + $0x400] ss:$72 sps:$4 sm:$0xff]  }
  0x9b   : > { %3563 = vmatpush1.bf16.msra.mxu1 %v5175_v57  ;;  %3451 = vmatprep.subr.bf16.mxu0 %v5186_v58  ;;  %v5273_v57 = vld [vmem:[%s5761_s24 + $0x408] ss:$72 sps:$4 sm:$0xff]  }
  0x9c   : > { %3564 = vmatprep.subr.bf16.mxu1 %v5189_v59  ;;  %v5274_v58 = vld [vmem:[%s7221_s1 + $0x490] ss:$8 sps:$4 sm:$0xff]  }
  0x9d   : > { %3270 = vmatmul.mubr.bf16.gmra.mxu0 %v5182_v60  ;;  %v5277_v59 = vld [vmem:[%s7221_s1 + $0x590] ss:$8 sps:$4 sm:$0xff]   ;;  %v5282_v60 = vld [vmem:[%s7221_s1 + $0x484] ss:$8 sps:$4 sm:$0xff]  }
  0x9e   : > { %3383 = vmatmul.mubr.bf16.gmra.mxu1 %v5183_v61  ;;  %3452 = vmatpush1.bf16.msra.mxu0 %v5184_v62  ;;  %v5285_v61 = vld [vmem:[%s7221_s1 + $0x584] ss:$8 sps:$4 sm:$0xff]  }
  0x9f   : > { %3565 = vmatpush1.bf16.msra.mxu1 %v5187_v63  ;;  %3453 = vmatprep.subr.bf16.mxu0 %v5192_v0  ;;  %v5288_v62 = vld [vmem:[%s5761_s24 + $0x24] ss:$72 sps:$4 sm:$0xff]   ;;  %v5280_v0 = vld [vmem:[%s7221_s1 + $0x480] ss:$8 sps:$4 sm:$0xff]  }
  0xa0   : > { %3566 = vmatprep.subr.bf16.mxu1 %v5195_v1  ;;  %3279 = vmatprep.mubr.bf16.mxu0 %v5196_v2  ;;  %v5291_v63 = vld [vmem:[%s5761_s24 + $0x2c] ss:$72 sps:$4 sm:$0xff]   ;;  %v5283_v1 = vld [vmem:[%s7221_s1 + $0x580] ss:$8 sps:$4 sm:$0xff]  }
  0xa1   : > { %3392 = vmatprep.mubr.bf16.mxu1 %v5198_v3  ;;  %v5294_v2 = vld [vmem:[%s7221_s1 + $0x674] ss:$8 sps:$4 sm:$0xff]  }
  0xa2   : > { %3454 = vmatpush1.bf16.msra.mxu0 %v5190_v4  ;;  %v5297_v3 = vld [vmem:[%s7221_s1 + $0x774] ss:$8 sps:$4 sm:$0xff]   ;;  %v5286_v4 = vld [vmem:[%s5761_s24 + $0x20] ss:$72 sps:$4 sm:$0xff]  }
  0xa3   : > { %3567 = vmatpush1.bf16.msra.mxu1 %v5193_v5  ;;  %3455 = vmatprep.subr.bf16.mxu0 %v5204_v6  ;;  %v5289_v5 = vld [vmem:[%s5761_s24 + $0x28] ss:$72 sps:$4 sm:$0xff]  }
  0xa4   : > { %3568 = vmatprep.subr.bf16.mxu1 %v5207_v7  ;;  %v5292_v6 = vld [vmem:[%s7221_s1 + $0x670] ss:$8 sps:$4 sm:$0xff]  }
  0xa5   : > { %3280 = vmatmul.mubr.bf16.gmra.mxu0 %v5200_v8  ;;  %v5295_v7 = vld [vmem:[%s7221_s1 + $0x770] ss:$8 sps:$4 sm:$0xff]   ;;  %v5300_v8 = vld [vmem:[%s7221_s1 + $0x664] ss:$8 sps:$4 sm:$0xff]  }
  0xa6   : > { %3393 = vmatmul.mubr.bf16.gmra.mxu1 %v5201_v9  ;;  %3456 = vmatpush1.bf16.msra.mxu0 %v5202_v10  ;;  %v5303_v9 = vld [vmem:[%s7221_s1 + $0x764] ss:$8 sps:$4 sm:$0xff]   ;;  %v5304_v10 = vld [vmem:[%s5761_s24 + $0xb4] ss:$72 sps:$4 sm:$0xff]  }
  0xa7   : > { %3569 = vmatpush1.bf16.msra.mxu1 %v5205_v11  ;;  %3457 = vmatprep.subr.bf16.mxu0 %v5210_v12  ;;  %v5306_v11 = vld [vmem:[%s5761_s24 + $0xbc] ss:$72 sps:$4 sm:$0xff]   ;;  %v5298_v12 = vld [vmem:[%s7221_s1 + $0x660] ss:$8 sps:$4 sm:$0xff]  }
  0xa8   : > { %3570 = vmatprep.subr.bf16.mxu1 %v5213_v13  ;;  %3289 = vmatprep.mubr.bf16.mxu0 %v5214_v14  ;;  %v5301_v13 = vld [vmem:[%s7221_s1 + $0x760] ss:$8 sps:$4 sm:$0xff]   ;;  %v5312_v14 = vld [vmem:[%s7221_s1 + $0x654] ss:$8 sps:$4 sm:$0xff]  }
  0xa9   : > { %3402 = vmatprep.mubr.bf16.mxu1 %v5216_v15  ;;  %v5315_v15 = vld [vmem:[%s7221_s1 + $0x754] ss:$8 sps:$4 sm:$0xff]  }
  0xaa   : > { %3458 = vmatpush1.bf16.msra.mxu0 %v5208_v16  ;;  %v5308_v16 = vld [vmem:[%s5761_s24 + $0xb0] ss:$72 sps:$4 sm:$0xff]  }
  0xab   : > { %3571 = vmatpush1.bf16.msra.mxu1 %v5211_v17  ;;  %3459 = vmatprep.subr.bf16.mxu0 %v5222_v18  ;;  %v5309_v17 = vld [vmem:[%s5761_s24 + $0xb8] ss:$72 sps:$4 sm:$0xff]  }
  0xac   : > { %3572 = vmatprep.subr.bf16.mxu1 %v5225_v19  ;;  %v5310_v18 = vld [vmem:[%s7221_s1 + $0x650] ss:$8 sps:$4 sm:$0xff]  }
  0xad   : > { %3290 = vmatmul.mubr.bf16.gmra.mxu0 %v5218_v20  ;;  %v5313_v19 = vld [vmem:[%s7221_s1 + $0x750] ss:$8 sps:$4 sm:$0xff]   ;;  %v5318_v20 = vld [vmem:[%s7221_s1 + $0x644] ss:$8 sps:$4 sm:$0xff]  }
  0xae   : > { %3403 = vmatmul.mubr.bf16.gmra.mxu1 %v5219_v21  ;;  %3460 = vmatpush2.bf16.msra.mxu0 %v5220_v22  ;;  %v5321_v21 = vld [vmem:[%s7221_s1 + $0x744] ss:$8 sps:$4 sm:$0xff]  }
  0xaf   : > { %3573 = vmatpush2.bf16.msra.mxu1 %v5223_v23  ;;  %3461 = vmatprep.subr.bf16.mxu0 %v5228_v24  ;;  %v5322_v22 = vld [vmem:[%s5761_s24 + $0x144] ss:$72 sps:$4 sm:$0xff]   ;;  %v5316_v24 = vld [vmem:[%s7221_s1 + $0x640] ss:$8 sps:$4 sm:$0xff]  }
  0xb0   : > { %3574 = vmatprep.subr.bf16.mxu1 %v5231_v25  ;;  %3299 = vmatprep.mubr.bf16.mxu0 %v5232_v26  ;;  %v5324_v23 = vld [vmem:[%s5761_s24 + $0x14c] ss:$72 sps:$4 sm:$0xff]   ;;  %v5319_v25 = vld [vmem:[%s7221_s1 + $0x740] ss:$8 sps:$4 sm:$0xff]  }
  0xb1   : > { %3412 = vmatprep.mubr.bf16.mxu1 %v5234_v27  ;;  %v5330_v26 = vld [vmem:[%s7221_s1 + $0x634] ss:$8 sps:$4 sm:$0xff]  }
  0xb2   : > { %3462 = vmatpush2.bf16.msra.mxu0 %v5226_v28  ;;  %v5333_v27 = vld [vmem:[%s7221_s1 + $0x734] ss:$8 sps:$4 sm:$0xff]   ;;  %v5326_v28 = vld [vmem:[%s5761_s24 + $0x140] ss:$72 sps:$4 sm:$0xff]  }
  0xb3   : > { %3575 = vmatpush2.bf16.msra.mxu1 %v5229_v29  ;;  %3463 = vmatprep.subr.bf16.mxu0 %v5240_v30  ;;  %v5327_v29 = vld [vmem:[%s5761_s24 + $0x148] ss:$72 sps:$4 sm:$0xff]  }
  0xb4   : > { %3576 = vmatprep.subr.bf16.mxu1 %v5243_v31  ;;  %v5328_v30 = vld [vmem:[%s7221_s1 + $0x630] ss:$8 sps:$4 sm:$0xff]  }
  0xb5   : > { %3300 = vmatmul.mubr.bf16.gmra.mxu0 %v5236_v32  ;;  %v5331_v31 = vld [vmem:[%s7221_s1 + $0x730] ss:$8 sps:$4 sm:$0xff]   ;;  %v5336_v32 = vld [vmem:[%s7221_s1 + $0x624] ss:$8 sps:$4 sm:$0xff]  }
  0xb6   : > { %3413 = vmatmul.mubr.bf16.gmra.mxu1 %v5237_v33  ;;  %3464 = vmatpush2.bf16.msra.mxu0 %v5238_v34  ;;  %v5339_v33 = vld [vmem:[%s7221_s1 + $0x724] ss:$8 sps:$4 sm:$0xff]   ;;  %v5340_v34 = vld [vmem:[%s5761_s24 + $0x1d4] ss:$72 sps:$4 sm:$0xff]  }
  0xb7   : > { %3577 = vmatpush2.bf16.msra.mxu1 %v5241_v35  ;;  %3465 = vmatprep.subr.bf16.mxu0 %v5246_v36  ;;  %v5342_v35 = vld [vmem:[%s5761_s24 + $0x1dc] ss:$72 sps:$4 sm:$0xff]   ;;  %v5334_v36 = vld [vmem:[%s7221_s1 + $0x620] ss:$8 sps:$4 sm:$0xff]  }
  0xb8   : > { %3578 = vmatprep.subr.bf16.mxu1 %v5249_v37  ;;  %3309 = vmatprep.mubr.bf16.mxu0 %v5250_v38  ;;  %v5337_v37 = vld [vmem:[%s7221_s1 + $0x720] ss:$8 sps:$4 sm:$0xff]   ;;  %v5348_v38 = vld [vmem:[%s7221_s1 + $0x614] ss:$8 sps:$4 sm:$0xff]  }
  0xb9   : > { %3422 = vmatprep.mubr.bf16.mxu1 %v5252_v39  ;;  %v5351_v39 = vld [vmem:[%s7221_s1 + $0x714] ss:$8 sps:$4 sm:$0xff]  }
  0xba   : > { %3466 = vmatpush2.bf16.msra.mxu0 %v5244_v40  ;;  %v5344_v40 = vld [vmem:[%s5761_s24 + $0x1d0] ss:$72 sps:$4 sm:$0xff]  }
  0xbb   : > { %3579 = vmatpush2.bf16.msra.mxu1 %v5247_v41  ;;  %3467 = vmatprep.subr.bf16.mxu0 %v5258_v42  ;;  %v5345_v41 = vld [vmem:[%s5761_s24 + $0x1d8] ss:$72 sps:$4 sm:$0xff]  }
  0xbc   : > { %3580 = vmatprep.subr.bf16.mxu1 %v5261_v43  ;;  %v5346_v42 = vld [vmem:[%s7221_s1 + $0x610] ss:$8 sps:$4 sm:$0xff]  }
  0xbd   : > { %3310 = vmatmul.mubr.bf16.gmra.mxu0 %v5254_v44  ;;  %v5349_v43 = vld [vmem:[%s7221_s1 + $0x710] ss:$8 sps:$4 sm:$0xff]   ;;  %v5354_v44 = vld [vmem:[%s7221_s1 + $0x604] ss:$8 sps:$4 sm:$0xff]  }
  0xbe   : > { %3423 = vmatmul.mubr.bf16.gmra.mxu1 %v5255_v45  ;;  %3468 = vmatpush2.bf16.msra.mxu0 %v5256_v46  ;;  %v5357_v45 = vld [vmem:[%s7221_s1 + $0x704] ss:$8 sps:$4 sm:$0xff]  }
  0xbf   : > { %3581 = vmatpush2.bf16.msra.mxu1 %v5259_v47  ;;  %3469 = vmatprep.subr.bf16.mxu0 %v5264_v48  ;;  %v5358_v46 = vld [vmem:[%s5761_s24 + $0x264] ss:$72 sps:$4 sm:$0xff]   ;;  %v5352_v48 = vld [vmem:[%s7221_s1 + $0x600] ss:$8 sps:$4 sm:$0xff]  }
  0xc0   : > { %3582 = vmatprep.subr.bf16.mxu1 %v5267_v49  ;;  %3319 = vmatprep.mubr.bf16.mxu0 %v5268_v50  ;;  %v5360_v47 = vld [vmem:[%s5761_s24 + $0x26c] ss:$72 sps:$4 sm:$0xff]   ;;  %v5355_v49 = vld [vmem:[%s7221_s1 + $0x700] ss:$8 sps:$4 sm:$0xff]  }
  0xc1   : > { %3432 = vmatprep.mubr.bf16.mxu1 %v5270_v51  ;;  %v5366_v50 = vld [vmem:[%s7221_s1 + $0x6f4] ss:$8 sps:$4 sm:$0xff]  }
  0xc2   : > { %3470 = vmatpush2.bf16.msra.mxu0 %v5262_v52  ;;  %v5369_v51 = vld [vmem:[%s7221_s1 + $0x7f4] ss:$8 sps:$4 sm:$0xff]   ;;  %v5362_v52 = vld [vmem:[%s5761_s24 + $0x260] ss:$72 sps:$4 sm:$0xff]  }
  0xc3   : > { %3583 = vmatpush2.bf16.msra.mxu1 %v5265_v53  ;;  %3471 = vmatprep.subr.bf16.mxu0 %v5276_v54  ;;  %v5363_v53 = vld [vmem:[%s5761_s24 + $0x268] ss:$72 sps:$4 sm:$0xff]  }
  0xc4   : > { %3584 = vmatprep.subr.bf16.mxu1 %v5279_v55  ;;  %v5364_v54 = vld [vmem:[%s7221_s1 + $0x6f0] ss:$8 sps:$4 sm:$0xff]  }
  0xc5   : > { %3320 = vmatmul.mubr.bf16.gmra.mxu0 %v5272_v56  ;;  %v5367_v55 = vld [vmem:[%s7221_s1 + $0x7f0] ss:$8 sps:$4 sm:$0xff]   ;;  %v5372_v56 = vld [vmem:[%s7221_s1 + $0x6e4] ss:$8 sps:$4 sm:$0xff]  }
  0xc6   : > { %3433 = vmatmul.mubr.bf16.gmra.mxu1 %v5273_v57  ;;  %3472 = vmatpush2.bf16.msra.mxu0 %v5274_v58  ;;  %v5375_v57 = vld [vmem:[%s7221_s1 + $0x7e4] ss:$8 sps:$4 sm:$0xff]   ;;  %v5376_v58 = vld [vmem:[%s5761_s24 + $0x2f4] ss:$72 sps:$4 sm:$0xff]  }
  0xc7   : > { %3585 = vmatpush2.bf16.msra.mxu1 %v5277_v59  ;;  %3473 = vmatprep.subr.bf16.mxu0 %v5282_v60  ;;  %v5378_v59 = vld [vmem:[%s5761_s24 + $0x2fc] ss:$72 sps:$4 sm:$0xff]   ;;  %v5370_v60 = vld [vmem:[%s7221_s1 + $0x6e0] ss:$8 sps:$4 sm:$0xff]  }
  0xc8   : > { %3586 = vmatprep.subr.bf16.mxu1 %v5285_v61  ;;  %3475 = vmatprep.mubr.bf16.mxu0 %v5288_v62  ;;  %v5373_v61 = vld [vmem:[%s7221_s1 + $0x7e0] ss:$8 sps:$4 sm:$0xff]   ;;  %v5384_v62 = vld [vmem:[%s7221_s1 + $0x6d4] ss:$8 sps:$4 sm:$0xff]  }
  0xc9   : > { %3588 = vmatprep.mubr.bf16.mxu1 %v5291_v63  ;;  %v5387_v63 = vld [vmem:[%s7221_s1 + $0x7d4] ss:$8 sps:$4 sm:$0xff]  }
  0xca   : > { %3474 = vmatpush2.bf16.msra.mxu0 %v5280_v0  ;;  %v5380_v0 = vld [vmem:[%s5761_s24 + $0x2f0] ss:$72 sps:$4 sm:$0xff]  }
  0xcb   : > { %3587 = vmatpush2.bf16.msra.mxu1 %v5283_v1  ;;  %3669 = vmatprep.subr.bf16.mxu0 %v5294_v2  ;;  %v5381_v1 = vld [vmem:[%s5761_s24 + $0x2f8] ss:$72 sps:$4 sm:$0xff]  }
  0xcc   : > { %3782 = vmatprep.subr.bf16.mxu1 %v5297_v3  ;;  %v5382_v2 = vld [vmem:[%s7221_s1 + $0x6d0] ss:$8 sps:$4 sm:$0xff]  }
  0xcd   : > { %3476 = vmatmul.mubr.bf16.vlgmr.msra.gmra.mxu0 %v5286_v4  ;;  %v5385_v3 = vld [vmem:[%s7221_s1 + $0x7d0] ss:$8 sps:$4 sm:$0xff]   ;;  %v5390_v4 = vld [vmem:[%s7221_s1 + $0x6c4] ss:$8 sps:$4 sm:$0xff]  }
  0xce   : > { %3589 = vmatmul.mubr.bf16.vlgmr.msra.gmra.mxu1 %v5289_v5  ;;  %3670 = vmatpush1.bf16.msra.mxu0 %v5292_v6  ;;  %v5393_v5 = vld [vmem:[%s7221_s1 + $0x7c4] ss:$8 sps:$4 sm:$0xff]  }
  0xcf   : > { %3783 = vmatpush1.bf16.msra.mxu1 %v5295_v7  ;;  %3671 = vmatprep.subr.bf16.mxu0 %v5300_v8  ;;  %v5394_v6 = vld [vmem:[%s5761_s24 + $0x384] ss:$72 sps:$4 sm:$0xff]   ;;  %v5388_v8 = vld [vmem:[%s7221_s1 + $0x6c0] ss:$8 sps:$4 sm:$0xff]  }
  0xd0   : > { %3784 = vmatprep.subr.bf16.mxu1 %v5303_v9  ;;  %3485 = vmatprep.mubr.bf16.mxu0 %v5304_v10  ;;  %v5396_v7 = vld [vmem:[%s5761_s24 + $0x38c] ss:$72 sps:$4 sm:$0xff]   ;;  %v5391_v9 = vld [vmem:[%s7221_s1 + $0x7c0] ss:$8 sps:$4 sm:$0xff]  }
  0xd1   : > { %3598 = vmatprep.mubr.bf16.mxu1 %v5306_v11  ;;  %v5402_v10 = vld [vmem:[%s7221_s1 + $0x6b4] ss:$8 sps:$4 sm:$0xff]  }
  0xd2   : > { %3672 = vmatpush1.bf16.msra.mxu0 %v5298_v12  ;;  %v5405_v11 = vld [vmem:[%s7221_s1 + $0x7b4] ss:$8 sps:$4 sm:$0xff]   ;;  %v5398_v12 = vld [vmem:[%s5761_s24 + $0x380] ss:$72 sps:$4 sm:$0xff]  }
  0xd3   : > { %3785 = vmatpush1.bf16.msra.mxu1 %v5301_v13  ;;  %3673 = vmatprep.subr.bf16.mxu0 %v5312_v14  ;;  %v5399_v13 = vld [vmem:[%s5761_s24 + $0x388] ss:$72 sps:$4 sm:$0xff]  }
  0xd4   : > { %3786 = vmatprep.subr.bf16.mxu1 %v5315_v15  ;;  %v5400_v14 = vld [vmem:[%s7221_s1 + $0x6b0] ss:$8 sps:$4 sm:$0xff]  }
  0xd5   : > { %3486 = vmatmul.mubr.bf16.gmra.mxu0 %v5308_v16  ;;  %v5403_v15 = vld [vmem:[%s7221_s1 + $0x7b0] ss:$8 sps:$4 sm:$0xff]   ;;  %v5408_v16 = vld [vmem:[%s7221_s1 + $0x6a4] ss:$8 sps:$4 sm:$0xff]  }
  0xd6   : > { %3599 = vmatmul.mubr.bf16.gmra.mxu1 %v5309_v17  ;;  %3674 = vmatpush1.bf16.msra.mxu0 %v5310_v18  ;;  %v5411_v17 = vld [vmem:[%s7221_s1 + $0x7a4] ss:$8 sps:$4 sm:$0xff]   ;;  %v5412_v18 = vld [vmem:[%s5761_s24 + $0x414] ss:$72 sps:$4 sm:$0xff]  }
  0xd7   : > { %3787 = vmatpush1.bf16.msra.mxu1 %v5313_v19  ;;  %3675 = vmatprep.subr.bf16.mxu0 %v5318_v20  ;;  %v5414_v19 = vld [vmem:[%s5761_s24 + $0x41c] ss:$72 sps:$4 sm:$0xff]   ;;  %v5406_v20 = vld [vmem:[%s7221_s1 + $0x6a0] ss:$8 sps:$4 sm:$0xff]  }
  0xd8   : > { %3788 = vmatprep.subr.bf16.mxu1 %v5321_v21  ;;  %3495 = vmatprep.mubr.bf16.mxu0 %v5322_v22  ;;  %v5409_v21 = vld [vmem:[%s7221_s1 + $0x7a0] ss:$8 sps:$4 sm:$0xff]   ;;  %v5420_v22 = vld [vmem:[%s7221_s1 + $0x694] ss:$8 sps:$4 sm:$0xff]  }
  0xd9   : > { %3608 = vmatprep.mubr.bf16.mxu1 %v5324_v23  ;;  %v5423_v23 = vld [vmem:[%s7221_s1 + $0x794] ss:$8 sps:$4 sm:$0xff]  }
  0xda   : > { %3676 = vmatpush1.bf16.msra.mxu0 %v5316_v24  ;;  %v5416_v24 = vld [vmem:[%s5761_s24 + $0x410] ss:$72 sps:$4 sm:$0xff]  }
  0xdb   : > { %3789 = vmatpush1.bf16.msra.mxu1 %v5319_v25  ;;  %3677 = vmatprep.subr.bf16.mxu0 %v5330_v26  ;;  %v5417_v25 = vld [vmem:[%s5761_s24 + $0x418] ss:$72 sps:$4 sm:$0xff]  }
  0xdc   : > { %3790 = vmatprep.subr.bf16.mxu1 %v5333_v27  ;;  %v5418_v26 = vld [vmem:[%s7221_s1 + $0x690] ss:$8 sps:$4 sm:$0xff]  }
  0xdd   : > { %3496 = vmatmul.mubr.bf16.gmra.mxu0 %v5326_v28  ;;  %v5421_v27 = vld [vmem:[%s7221_s1 + $0x790] ss:$8 sps:$4 sm:$0xff]   ;;  %v5426_v28 = vld [vmem:[%s7221_s1 + $0x684] ss:$8 sps:$4 sm:$0xff]  }
  0xde   : > { %3609 = vmatmul.mubr.bf16.gmra.mxu1 %v5327_v29  ;;  %3678 = vmatpush1.bf16.msra.mxu0 %v5328_v30  ;;  %v5429_v29 = vld [vmem:[%s7221_s1 + $0x784] ss:$8 sps:$4 sm:$0xff]   ;;  %v5432_v30 = vld [vmem:[%s5761_s24 + $0x34] ss:$72 sps:$4 sm:$0xff]  }
  0xdf   : > { %3791 = vmatpush1.bf16.msra.mxu1 %v5331_v31  ;;  %3679 = vmatprep.subr.bf16.mxu0 %v5336_v32  ;;  %v5435_v31 = vld [vmem:[%s5761_s24 + $0x3c] ss:$72 sps:$4 sm:$0xff]   ;;  %v5424_v32 = vld [vmem:[%s7221_s1 + $0x680] ss:$8 sps:$4 sm:$0xff]  }
  0xe0   : > { %3792 = vmatprep.subr.bf16.mxu1 %v5339_v33  ;;  %3505 = vmatprep.mubr.bf16.mxu0 %v5340_v34  ;;  %v5427_v33 = vld [vmem:[%s7221_s1 + $0x780] ss:$8 sps:$4 sm:$0xff]   ;;  %v5438_v34 = vld [vmem:[%s7221_s1 + $0x874] ss:$8 sps:$4 sm:$0xff]  }
  0xe1   : > { %3618 = vmatprep.mubr.bf16.mxu1 %v5342_v35  ;;  %v5430_v35 = vld [vmem:[%s5761_s24 + $0x30] ss:$72 sps:$4 sm:$0xff]  }
  0xe2   : > { %3680 = vmatpush1.bf16.msra.mxu0 %v5334_v36  ;;  %v5433_v36 = vld [vmem:[%s5761_s24 + $0x38] ss:$72 sps:$4 sm:$0xff]  }
  0xe3   : > { %3793 = vmatpush1.bf16.msra.mxu1 %v5337_v37  ;;  %3681 = vmatprep.subr.bf16.mxu0 %v5348_v38  ;;  %v5436_v37 = vld [vmem:[%s7221_s1 + $0x870] ss:$8 sps:$4 sm:$0xff]   ;;  %v5441_v38 = vld [vmem:[%s7221_s1 + $0x864] ss:$8 sps:$4 sm:$0xff]  }
  0xe4   : > { %3794 = vmatprep.subr.bf16.mxu1 %v5351_v39  ;;  %v5442_v39 = vld [vmem:[%s5761_s24 + $0xc4] ss:$72 sps:$4 sm:$0xff]  }
  0xe5   : > { %3506 = vmatmul.mubr.bf16.gmra.mxu0 %v5344_v40  ;;  %v5444_v40 = vld [vmem:[%s5761_s24 + $0xcc] ss:$72 sps:$4 sm:$0xff]  }
  0xe6   : > { %3619 = vmatmul.mubr.bf16.gmra.mxu1 %v5345_v41  ;;  %3682 = vmatpush1.bf16.msra.mxu0 %v5346_v42 }
  0xe7   : > { %3795 = vmatpush1.bf16.msra.mxu1 %v5349_v43  ;;  %3683 = vmatprep.subr.bf16.mxu0 %v5354_v44  ;;  %v5439_v44 = vld [vmem:[%s7221_s1 + $0x860] ss:$8 sps:$4 sm:$0xff]  }
  0xe8   : > { %3796 = vmatprep.subr.bf16.mxu1 %v5357_v45  ;;  %3515 = vmatprep.mubr.bf16.mxu0 %v5358_v46 }
  0xe9   : > { %3628 = vmatprep.mubr.bf16.mxu1 %v5360_v47  ;;  %v5450_v47 = vld [vmem:[%s7221_s1 + $0x854] ss:$8 sps:$4 sm:$0xff]  }
  0xea   : > { %3684 = vmatpush1.bf16.msra.mxu0 %v5352_v48 }
  0xeb   : > { %3797 = vmatpush1.bf16.msra.mxu1 %v5355_v49  ;;  %3685 = vmatprep.subr.bf16.mxu0 %v5366_v50 }
  0xec   : > { %3798 = vmatprep.subr.bf16.mxu1 %v5369_v51  ;;  %v5446_v51 = vld [vmem:[%s5761_s24 + $0xc0] ss:$72 sps:$4 sm:$0xff]  }
  0xed   : > { %3516 = vmatmul.mubr.bf16.gmra.mxu0 %v5362_v52  ;;  %v5447_v52 = vld [vmem:[%s5761_s24 + $0xc8] ss:$72 sps:$4 sm:$0xff]  }
  0xee   : > { %3629 = vmatmul.mubr.bf16.gmra.mxu1 %v5363_v53  ;;  %3686 = vmatpush2.bf16.msra.mxu0 %v5364_v54  ;;  %v5448_v54 = vld [vmem:[%s7221_s1 + $0x850] ss:$8 sps:$4 sm:$0xff]  }
  0xef   : > { %3799 = vmatpush2.bf16.msra.mxu1 %v5367_v55  ;;  %3687 = vmatprep.subr.bf16.mxu0 %v5372_v56 }
  0xf0   : > { %3800 = vmatprep.subr.bf16.mxu1 %v5375_v57  ;;  %3525 = vmatprep.mubr.bf16.mxu0 %v5376_v58  ;;  %v5453_v57 = vld [vmem:[%s7221_s1 + $0x844] ss:$8 sps:$4 sm:$0xff]  }
  0xf1   : > { %3638 = vmatprep.mubr.bf16.mxu1 %v5378_v59  ;;  %v5454_v59 = vld [vmem:[%s5761_s24 + $0x154] ss:$72 sps:$4 sm:$0xff]  }
  0xf2   : > { %3688 = vmatpush2.bf16.msra.mxu0 %v5370_v60  ;;  %v5456_v60 = vld [vmem:[%s5761_s24 + $0x15c] ss:$72 sps:$4 sm:$0xff]  }
  0xf3   : > { %3801 = vmatpush2.bf16.msra.mxu1 %v5373_v61  ;;  %3689 = vmatprep.subr.bf16.mxu0 %v5384_v62 }
  0xf4   : > { %3802 = vmatprep.subr.bf16.mxu1 %v5387_v63 }
  0xf5   : > { %3526 = vmatmul.mubr.bf16.gmra.mxu0 %v5380_v0  ;;  %v5451_v0 = vld [vmem:[%s7221_s1 + $0x840] ss:$8 sps:$4 sm:$0xff]  }
  0xf6   : > { %3639 = vmatmul.mubr.bf16.gmra.mxu1 %v5381_v1  ;;  %3690 = vmatpush2.bf16.msra.mxu0 %v5382_v2 }
  0xf7   : > { %3803 = vmatpush2.bf16.msra.mxu1 %v5385_v3  ;;  %3691 = vmatprep.subr.bf16.mxu0 %v5390_v4  ;;  %v5462_v3 = vld [vmem:[%s7221_s1 + $0x834] ss:$8 sps:$4 sm:$0xff]  }
  0xf8   : > { %3804 = vmatprep.subr.bf16.mxu1 %v5393_v5  ;;  %3535 = vmatprep.mubr.bf16.mxu0 %v5394_v6 }
  0xf9   : > { %3648 = vmatprep.mubr.bf16.mxu1 %v5396_v7  ;;  %v5458_v7 = vld [vmem:[%s5761_s24 + $0x150] ss:$72 sps:$4 sm:$0xff]  }
  0xfa   : > { %3692 = vmatpush2.bf16.msra.mxu0 %v5388_v8  ;;  %v5459_v8 = vld [vmem:[%s5761_s24 + $0x158] ss:$72 sps:$4 sm:$0xff]  }
  0xfb   : > { %3805 = vmatpush2.bf16.msra.mxu1 %v5391_v9  ;;  %3693 = vmatprep.subr.bf16.mxu0 %v5402_v10  ;;  %v5460_v10 = vld [vmem:[%s7221_s1 + $0x830] ss:$8 sps:$4 sm:$0xff]  }
  0xfc   : > { %3806 = vmatprep.subr.bf16.mxu1 %v5405_v11 }
  0xfd   : > { %3536 = vmatmul.mubr.bf16.gmra.mxu0 %v5398_v12 }
  0xfe   : > { %3649 = vmatmul.mubr.bf16.gmra.mxu1 %v5399_v13  ;;  %3694 = vmatpush2.bf16.msra.mxu0 %v5400_v14  ;;  %v5465_v13 = vld [vmem:[%s7221_s1 + $0x824] ss:$8 sps:$4 sm:$0xff]  }
  0xff   : > { %3807 = vmatpush2.bf16.msra.mxu1 %v5403_v15  ;;  %3695 = vmatprep.subr.bf16.mxu0 %v5408_v16  ;;  %v5466_v15 = vld [vmem:[%s5761_s24 + $0x1e4] ss:$72 sps:$4 sm:$0xff]  }
 0x100   : > { %3808 = vmatprep.subr.bf16.mxu1 %v5411_v17  ;;  %3545 = vmatprep.mubr.bf16.mxu0 %v5412_v18  ;;  %v5468_v16 = vld [vmem:[%s5761_s24 + $0x1ec] ss:$72 sps:$4 sm:$0xff]  }
 0x101   : > { %3658 = vmatprep.mubr.bf16.mxu1 %v5414_v19 }
 0x102   : > { %3696 = vmatpush2.bf16.msra.mxu0 %v5406_v20  ;;  %v5463_v20 = vld [vmem:[%s7221_s1 + $0x820] ss:$8 sps:$4 sm:$0xff]  }
 0x103   : > { %3809 = vmatpush2.bf16.msra.mxu1 %v5409_v21  ;;  %3697 = vmatprep.subr.bf16.mxu0 %v5420_v22 }
 0x104   : > { %3810 = vmatprep.subr.bf16.mxu1 %v5423_v23  ;;  %v5474_v23 = vld [vmem:[%s7221_s1 + $0x814] ss:$8 sps:$4 sm:$0xff]  }
 0x105   : > { %3546 = vmatmul.mubr.bf16.gmra.mxu0 %v5416_v24 }
 0x106   : > { %3659 = vmatmul.mubr.bf16.gmra.mxu1 %v5417_v25  ;;  %3698 = vmatpush2.bf16.msra.mxu0 %v5418_v26 }
 0x107   : > { %3811 = vmatpush2.bf16.msra.mxu1 %v5421_v27  ;;  %3699 = vmatprep.subr.bf16.mxu0 %v5426_v28  ;;  %v5470_v27 = vld [vmem:[%s5761_s24 + $0x1e0] ss:$72 sps:$4 sm:$0xff]  }
 0x108   : > { %3812 = vmatprep.subr.bf16.mxu1 %v5429_v29  ;;  %3701 = vmatprep.mubr.bf16.mxu0 %v5432_v30  ;;  %v5471_v28 = vld [vmem:[%s5761_s24 + $0x1e8] ss:$72 sps:$4 sm:$0xff]  }
 0x109   : > { %3814 = vmatprep.mubr.bf16.mxu1 %v5435_v31  ;;  %v5472_v30 = vld [vmem:[%s7221_s1 + $0x810] ss:$8 sps:$4 sm:$0xff]  }
 0x10a   : > { %3700 = vmatpush2.bf16.msra.mxu0 %v5424_v32 }
 0x10b   : > { %3813 = vmatpush2.bf16.msra.mxu1 %v5427_v33  ;;  %3895 = vmatprep.subr.bf16.mxu0 %v5438_v34  ;;  %v5477_v33 = vld [vmem:[%s7221_s1 + $0x804] ss:$8 sps:$4 sm:$0xff]  }
 0x10c   : > { %4845 = vmatprep.subr.bf16.mxu1 %v5438_v34 }
 0x10d   : > { %v3025_v41 = vpop.f32.mrf.mxu0  ;;  %3702 = vmatmul.mubr.bf16.vlgmr.msra.gmra.mxu0 %v5430_v35  ;;  %v5480_v35 = vld [vmem:[%s5761_s24 + $0x274] ss:$72 sps:$4 sm:$0xff]  }
 0x10e   : > { %v3138_v42 = vpop.f32.mrf.mxu1  ;;  %3815 = vmatmul.mubr.bf16.vlgmr.msra.gmra.mxu1 %v5433_v36  ;;  %3896 = vmatpush1.bf16.msra.mxu0 %v5436_v37  ;;  %v5483_v36 = vld [vmem:[%s5761_s24 + $0x27c] ss:$72 sps:$4 sm:$0xff]  }
 0x10f   : > { %v6507_v43 = vadd.f32 %v3138_v42, %v3025_v41  ;;  %4861 = vmatpush1.bf16.msra.mxu1 %v5436_v37  ;;  %v3027_v45 = vpop.f32.mrf.mxu0  ;;  %3897 = vmatprep.subr.bf16.mxu0 %v5441_v38 }
 0x110   : > { %v3140_v46 = vpop.f32.mrf.mxu1  ;;  %4846 = vmatprep.subr.bf16.mxu1 %v5441_v38  ;;  %3711 = vmatprep.mubr.bf16.mxu0 %v5442_v39 }
 0x111   : > { %v6515_v48 = vadd.f32 %v3140_v46, %v3027_v45  ;;  %3824 = vmatprep.mubr.bf16.mxu1 %v5444_v40  ;;  %v3029_v49 = vpop.f32.mrf.mxu0  ;;  %v5475_v40 = vld [vmem:[%s7221_s1 + $0x800] ss:$8 sps:$4 sm:$0xff]  }
 0x112   : > { %v3142_v50 = vpop.f32.mrf.mxu1  ;;  %3898 = vmatpush1.bf16.msra.mxu0 %v5439_v44 }
 0x113   : > { %v6519_v53 = vadd.f32 %v3142_v50, %v3029_v49  ;;  %4862 = vmatpush1.bf16.msra.mxu1 %v5439_v44  ;;  %v3031_v55 = vpop.f32.mrf.mxu0  ;;  %3899 = vmatprep.subr.bf16.mxu0 %v5450_v47  ;;  %v5486_v44 = vld [vmem:[%s7221_s1 + $0x8f4] ss:$8 sps:$4 sm:$0xff]   ;;  %v5478_v49 = vld [vmem:[%s5761_s24 + $0x270] ss:$72 sps:$4 sm:$0xff]  }
 0x114   : > { %v3144_v56 = vpop.f32.mrf.mxu1  ;;  %4847 = vmatprep.subr.bf16.mxu1 %v5450_v47  ;;  %v5481_v50 = vld [vmem:[%s5761_s24 + $0x278] ss:$72 sps:$4 sm:$0xff]  }
 0x115   : > { %v6527_v58 = vadd.f32 %v3144_v56, %v3031_v55  ;;  %v3035_v61 = vpop.f32.mrf.mxu0  ;;  %3712 = vmatmul.mubr.bf16.gmra.mxu0 %v5446_v51  ;;  %v5489_v56 = vld [vmem:[%s7221_s1 + $0x8e4] ss:$8 sps:$4 sm:$0xff]  }
 0x116   : > { %v3148_v62 = vpop.f32.mrf.mxu1  ;;  %3825 = vmatmul.mubr.bf16.gmra.mxu1 %v5447_v52  ;;  %3900 = vmatpush1.bf16.msra.mxu0 %v5448_v54  ;;  %v5484_v52 = vld [vmem:[%s7221_s1 + $0x8f0] ss:$8 sps:$4 sm:$0xff]  }
 0x117   : > { %v6531_v63 = vadd.f32 %v3148_v62, %v3035_v61  ;;  %4863 = vmatpush1.bf16.msra.mxu1 %v5448_v54  ;;  %v3037_v1 = vpop.f32.mrf.mxu0  ;;  %3901 = vmatprep.subr.bf16.mxu0 %v5453_v57 }
 0x118   : > { %v3150_v2 = vpop.f32.mrf.mxu1  ;;  %4848 = vmatprep.subr.bf16.mxu1 %v5453_v57  ;;  %3721 = vmatprep.mubr.bf16.mxu0 %v5454_v59  ;;  %v5492_v59 = vld [vmem:[%s5761_s24 + $0x304] ss:$72 sps:$4 sm:$0xff]  }
 0x119   : > { %v6539_v4 = vadd.f32 %v3150_v2, %v3037_v1  ;;  %3834 = vmatprep.mubr.bf16.mxu1 %v5456_v60  ;;  %v3039_v5 = vpop.f32.mrf.mxu0  ;;  %v5495_v60 = vld [vmem:[%s5761_s24 + $0x30c] ss:$72 sps:$4 sm:$0xff]   ;;  %v5487_v1 = vld [vmem:[%s7221_s1 + $0x8e0] ss:$8 sps:$4 sm:$0xff]  }
 0x11a   : > { %v3152_v6 = vpop.f32.mrf.mxu1  ;;  %3902 = vmatpush1.bf16.msra.mxu0 %v5451_v0 }
 0x11b   : > { %v6543_v9 = vadd.f32 %v3152_v6, %v3039_v5  ;;  %4864 = vmatpush1.bf16.msra.mxu1 %v5451_v0  ;;  %v3041_v11 = vpop.f32.mrf.mxu0  ;;  %3903 = vmatprep.subr.bf16.mxu0 %v5462_v3  ;;  %v5498_v5 = vld [vmem:[%s7221_s1 + $0x8d4] ss:$8 sps:$4 sm:$0xff]  }
 0x11c   : > { %v3154_v12 = vpop.f32.mrf.mxu1  ;;  %4849 = vmatprep.subr.bf16.mxu1 %v5462_v3 }
 0x11d   : > { %v6551_v14 = vadd.f32 %v3154_v12, %v3041_v11  ;;  %v3045_v17 = vpop.f32.mrf.mxu0  ;;  %3722 = vmatmul.mubr.bf16.gmra.mxu0 %v5458_v7  ;;  %v5493_v11 = vld [vmem:[%s5761_s24 + $0x308] ss:$72 sps:$4 sm:$0xff]  }
 0x11e   : > { %v3158_v18 = vpop.f32.mrf.mxu1  ;;  %3835 = vmatmul.mubr.bf16.gmra.mxu1 %v5459_v8  ;;  %3904 = vmatpush1.bf16.msra.mxu0 %v5460_v10 }
 0x11f   : > { %v6555_v19 = vadd.f32 %v3158_v18, %v3045_v17  ;;  %4865 = vmatpush1.bf16.msra.mxu1 %v5460_v10  ;;  %v3047_v21 = vpop.f32.mrf.mxu0  ;;  %3905 = vmatprep.subr.bf16.mxu0 %v5465_v13  ;;  %v5490_v10 = vld [vmem:[%s5761_s24 + $0x300] ss:$72 sps:$4 sm:$0xff]   ;;  %v5501_v17 = vld [vmem:[%s7221_s1 + $0x8c4] ss:$8 sps:$4 sm:$0xff]  }
 0x120   : > { %v3160_v22 = vpop.f32.mrf.mxu1  ;;  %4850 = vmatprep.subr.bf16.mxu1 %v5465_v13  ;;  %3731 = vmatprep.mubr.bf16.mxu0 %v5466_v15  ;;  %v5496_v13 = vld [vmem:[%s7221_s1 + $0x8d0] ss:$8 sps:$4 sm:$0xff]  }
 0x121   : > { %v6563_v24 = vadd.f32 %v3160_v22, %v3047_v21  ;;  %3844 = vmatprep.mubr.bf16.mxu1 %v5468_v16  ;;  %v3049_v25 = vpop.f32.mrf.mxu0  ;;  %v5507_v21 = vld [vmem:[%s5761_s24 + $0x39c] ss:$72 sps:$4 sm:$0xff]  }
 0x122   : > { %v3162_v26 = vpop.f32.mrf.mxu1  ;;  %3906 = vmatpush1.bf16.msra.mxu0 %v5463_v20 }
 0x123   : > { %v6567_v29 = vadd.f32 %v3162_v26, %v3049_v25  ;;  %4866 = vmatpush1.bf16.msra.mxu1 %v5463_v20  ;;  %v3051_v31 = vpop.f32.mrf.mxu0  ;;  %3907 = vmatprep.subr.bf16.mxu0 %v5474_v23  ;;  %v5504_v20 = vld [vmem:[%s5761_s24 + $0x394] ss:$72 sps:$4 sm:$0xff]   ;;  %v5499_v26 = vld [vmem:[%s7221_s1 + $0x8c0] ss:$8 sps:$4 sm:$0xff]  }
 0x124   : > { %v3164_v32 = vpop.f32.mrf.mxu1  ;;  %4851 = vmatprep.subr.bf16.mxu1 %v5474_v23 }
 0x125   : > { %v6575_v34 = vadd.f32 %v3164_v32, %v3051_v31  ;;  %v3055_v37 = vpop.f32.mrf.mxu0  ;;  %3732 = vmatmul.mubr.bf16.gmra.mxu0 %v5470_v27 }
 0x126   : > { %v3168_v38 = vpop.f32.mrf.mxu1  ;;  %3845 = vmatmul.mubr.bf16.gmra.mxu1 %v5471_v28  ;;  %3908 = vmatpush1.bf16.msra.mxu0 %v5472_v30 }
 0x127   : > { %v6579_v39 = vadd.f32 %v3168_v38, %v3055_v37  ;;  %4867 = vmatpush1.bf16.msra.mxu1 %v5472_v30  ;;  %v3057_v41 = vpop.f32.mrf.mxu0  ;;  %3909 = vmatprep.subr.bf16.mxu0 %v5477_v33  ;;  %v5510_v30 = vld [vmem:[%s7221_s1 + $0x8b4] ss:$8 sps:$4 sm:$0xff]   ;;  %v5508_v38 = vld [vmem:[%s7221_s1 + $0x8b0] ss:$8 sps:$4 sm:$0xff]  }
 0x128   : > { %v3170_v42 = vpop.f32.mrf.mxu1  ;;  %4852 = vmatprep.subr.bf16.mxu1 %v5477_v33  ;;  %3741 = vmatprep.mubr.bf16.mxu0 %v5480_v35  ;;  %v5502_v35 = vld [vmem:[%s5761_s24 + $0x390] ss:$72 sps:$4 sm:$0xff]  }
 0x129   : > { %v6587_v45 = vadd.f32 %v3170_v42, %v3057_v41  ;;  %3854 = vmatprep.mubr.bf16.mxu1 %v5483_v36  ;;  %v3059_v46 = vpop.f32.mrf.mxu0  ;;  %v5505_v36 = vld [vmem:[%s5761_s24 + $0x398] ss:$72 sps:$4 sm:$0xff]   ;;  %v5513_v42 = vld [vmem:[%s7221_s1 + $0x8a4] ss:$8 sps:$4 sm:$0xff]  }
 0x12a   : > { %v3172_v47 = vpop.f32.mrf.mxu1  ;;  %3910 = vmatpush1.bf16.msra.mxu0 %v5475_v40 }
 0x12b   : > { %v6591_v51 = vadd.f32 %v3172_v47, %v3059_v46  ;;  %4868 = vmatpush1.bf16.msra.mxu1 %v5475_v40  ;;  %v3061_v54 = vpop.f32.mrf.mxu0  ;;  %3911 = vmatprep.subr.bf16.mxu0 %v5486_v44  ;;  %v5516_v46 = vld [vmem:[%s5761_s24 + $0x424] ss:$72 sps:$4 sm:$0xff]  }
 0x12c   : > { %v3174_v55 = vpop.f32.mrf.mxu1  ;;  %4853 = vmatprep.subr.bf16.mxu1 %v5486_v44  ;;  %v5519_v47 = vld [vmem:[%s5761_s24 + $0x42c] ss:$72 sps:$4 sm:$0xff]  }
 0x12d   : > { %v6599_v57 = vadd.f32 %v3174_v55, %v3061_v54  ;;  %v3065_v61 = vpop.f32.mrf.mxu0  ;;  %3742 = vmatmul.mubr.bf16.gmra.mxu0 %v5478_v49  ;;  %v5511_v54 = vld [vmem:[%s7221_s1 + $0x8a0] ss:$8 sps:$4 sm:$0xff]  }
 0x12e   : > { %v3178_v62 = vpop.f32.mrf.mxu1  ;;  %3855 = vmatmul.mubr.bf16.gmra.mxu1 %v5481_v50  ;;  %3912 = vmatpush2.bf16.msra.mxu0 %v5484_v52 }
 0x12f   : > { %v6603_v0 = vadd.f32 %v3178_v62, %v3065_v61  ;;  %4869 = vmatpush2.bf16.msra.mxu1 %v5484_v52  ;;  %v3067_v2 = vpop.f32.mrf.mxu0  ;;  %3913 = vmatprep.subr.bf16.mxu0 %v5489_v56 }
 0x130   : > { %v3180_v3 = vpop.f32.mrf.mxu1  ;;  %4854 = vmatprep.subr.bf16.mxu1 %v5489_v56  ;;  %3751 = vmatprep.mubr.bf16.mxu0 %v5492_v59  ;;  %v5522_v59 = vld [vmem:[%s7221_s1 + $0x894] ss:$8 sps:$4 sm:$0xff]  }
 0x131   : > { %v6611_v6 = vadd.f32 %v3180_v3, %v3067_v2  ;;  %3864 = vmatprep.mubr.bf16.mxu1 %v5495_v60  ;;  %v3069_v7 = vpop.f32.mrf.mxu0  ;;  %v5517_v2 = vld [vmem:[%s5761_s24 + $0x428] ss:$72 sps:$4 sm:$0xff]  }
 0x132   : > { %v3182_v8 = vpop.f32.mrf.mxu1  ;;  %3914 = vmatpush2.bf16.msra.mxu0 %v5487_v1 }
 0x133   : > { %v6615_v12 = vadd.f32 %v3182_v8, %v3069_v7  ;;  %4870 = vmatpush2.bf16.msra.mxu1 %v5487_v1  ;;  %v3071_v15 = vpop.f32.mrf.mxu0  ;;  %3915 = vmatprep.subr.bf16.mxu0 %v5498_v5  ;;  %v5514_v1 = vld [vmem:[%s5761_s24 + $0x420] ss:$72 sps:$4 sm:$0xff]  }
 0x134   : > { %v3184_v16 = vpop.f32.mrf.mxu1  ;;  %4855 = vmatprep.subr.bf16.mxu1 %v5498_v5  ;;  %v5520_v5 = vld [vmem:[%s7221_s1 + $0x890] ss:$8 sps:$4 sm:$0xff]  }
 0x135   : > { %v6623_v18 = vadd.f32 %v3184_v16, %v3071_v15  ;;  %v3075_v22 = vpop.f32.mrf.mxu0  ;;  %3752 = vmatmul.mubr.bf16.gmra.mxu0 %v5490_v10  ;;  %v5525_v10 = vld [vmem:[%s7221_s1 + $0x884] ss:$8 sps:$4 sm:$0xff]  }
 0x136   : > { %v3188_v23 = vpop.f32.mrf.mxu1  ;;  %3865 = vmatmul.mubr.bf16.gmra.mxu1 %v5493_v11  ;;  %3916 = vmatpush2.bf16.msra.mxu0 %v5496_v13  ;;  %v5531_v15 = vld [vmem:[%s5761_s24 + $0x284] ss:$72 sps:$4 sm:$0xff]  }
 0x137   : > { %v6627_v25 = vadd.f32 %v3188_v23, %v3075_v22  ;;  %4871 = vmatpush2.bf16.msra.mxu1 %v5496_v13  ;;  %v3077_v27 = vpop.f32.mrf.mxu0  ;;  %3917 = vmatprep.subr.bf16.mxu0 %v5501_v17  ;;  %v5528_v13 = vld [vmem:[%s5761_s24 + $0x44] ss:$72 sps:$4 sm:$0xff]  }
 0x138   : > { %v3190_v28 = vpop.f32.mrf.mxu1  ;;  %4856 = vmatprep.subr.bf16.mxu1 %v5501_v17  ;;  %3761 = vmatprep.mubr.bf16.mxu0 %v5504_v20 }
 0x139   : > { %v6635_v31 = vadd.f32 %v3190_v28, %v3077_v27  ;;  %3874 = vmatprep.mubr.bf16.mxu1 %v5507_v21  ;;  %v3079_v32 = vpop.f32.mrf.mxu0  ;;  %v5523_v21 = vld [vmem:[%s7221_s1 + $0x880] ss:$8 sps:$4 sm:$0xff]  }
 0x13a   : > { %v3192_v33 = vpop.f32.mrf.mxu1  ;;  %3918 = vmatpush2.bf16.msra.mxu0 %v5499_v26 }
 0x13b   : > { %v6639_v37 = vadd.f32 %v3192_v33, %v3079_v32  ;;  %4872 = vmatpush2.bf16.msra.mxu1 %v5499_v26  ;;  %v3081_v40 = vpop.f32.mrf.mxu0  ;;  %3919 = vmatprep.subr.bf16.mxu0 %v5510_v30  ;;  %v5529_v32 = vld [vmem:[%s5761_s24 + $0x280] ss:$72 sps:$4 sm:$0xff]  }
 0x13c   : > { %v3194_v41 = vpop.f32.mrf.mxu1  ;;  %4857 = vmatprep.subr.bf16.mxu1 %v5510_v30  ;;  %v5526_v30 = vld [vmem:[%s5761_s24 + $0x40] ss:$72 sps:$4 sm:$0xff]  }
 0x13d   : > { %v6647_v44 = vadd.f32 %v3194_v41, %v3081_v40  ;;  %v3085_v49 = vpop.f32.mrf.mxu0  ;;  %3762 = vmatmul.mubr.bf16.gmra.mxu0 %v5502_v35  ;;  %v5534_v35 = vld [vmem:[%s5761_s24 + $0xd4] ss:$72 sps:$4 sm:$0xff]  }
 0x13e   : > { %v3198_v50 = vpop.f32.mrf.mxu1  ;;  %3875 = vmatmul.mubr.bf16.gmra.mxu1 %v5505_v36  ;;  %3920 = vmatpush2.bf16.msra.mxu0 %v5508_v38  ;;  %v5537_v36 = vld [vmem:[%s5761_s24 + $0x314] ss:$72 sps:$4 sm:$0xff]  }
 0x13f   : > { %v6651_v52 = vadd.f32 %v3198_v50, %v3085_v49  ;;  %4873 = vmatpush2.bf16.msra.mxu1 %v5508_v38  ;;  %v3087_v55 = vpop.f32.mrf.mxu0  ;;  %3921 = vmatprep.subr.bf16.mxu0 %v5513_v42 }
 0x140   : > { %v3200_v56 = vpop.f32.mrf.mxu1  ;;  %4858 = vmatprep.subr.bf16.mxu1 %v5513_v42  ;;  %3771 = vmatprep.mubr.bf16.mxu0 %v5516_v46 }
 0x141   : > { %v6659_v60 = vadd.f32 %v3200_v56, %v3087_v55  ;;  %3884 = vmatprep.mubr.bf16.mxu1 %v5519_v47  ;;  %v3089_v61 = vpop.f32.mrf.mxu0 }
 0x142   : > { %v3202_v62 = vpop.f32.mrf.mxu1  ;;  %3922 = vmatpush2.bf16.msra.mxu0 %v5511_v54 }
 0x143   : > { %v6663_v3 = vadd.f32 %v3202_v62, %v3089_v61  ;;  %4874 = vmatpush2.bf16.msra.mxu1 %v5511_v54  ;;  %v3091_v7 = vpop.f32.mrf.mxu0  ;;  %3923 = vmatprep.subr.bf16.mxu0 %v5522_v59  ;;  %v5532_v61 = vld [vmem:[%s5761_s24 + $0xd0] ss:$72 sps:$4 sm:$0xff]  }
 0x144   : > { %v3204_v8 = vpop.f32.mrf.mxu1  ;;  %4859 = vmatprep.subr.bf16.mxu1 %v5522_v59  ;;  %v5535_v62 = vld [vmem:[%s5761_s24 + $0x310] ss:$72 sps:$4 sm:$0xff]  }
 0x145   : > { %v6671_v11 = vadd.f32 %v3204_v8, %v3091_v7  ;;  %v3095_v16 = vpop.f32.mrf.mxu0  ;;  %3772 = vmatmul.mubr.bf16.gmra.mxu0 %v5514_v1  ;;  %v5543_v7 = vld [vmem:[%s5761_s24 + $0x3a4] ss:$72 sps:$4 sm:$0xff]  }
 0x146   : > { %v3208_v17 = vpop.f32.mrf.mxu1  ;;  %3885 = vmatmul.mubr.bf16.gmra.mxu1 %v5517_v2  ;;  %3924 = vmatpush2.bf16.msra.mxu0 %v5520_v5 }
 0x147   : > { %v6675_v20 = vadd.f32 %v3208_v17, %v3095_v16  ;;  %4875 = vmatpush2.bf16.msra.mxu1 %v5520_v5  ;;  %v3097_v22 = vpop.f32.mrf.mxu0  ;;  %3925 = vmatprep.subr.bf16.mxu0 %v5525_v10  ;;  %v5540_v5 = vld [vmem:[%s5761_s24 + $0x164] ss:$72 sps:$4 sm:$0xff]  }
 0x148   : > { %v3210_v23 = vpop.f32.mrf.mxu1  ;;  %4860 = vmatprep.subr.bf16.mxu1 %v5525_v10  ;;  %3927 = vmatprep.mubr.bf16.mxu0 %v5528_v13 }
 0x149   : > { %v6680_v26 = vadd.f32 %v3210_v23, %v3097_v22  ;;  %3967 = vmatprep.mubr.bf16.mxu1 %v5531_v15  ;;  %v3099_v27 = vpop.f32.mrf.mxu0 }
 0x14a   : > { %v3212_v28 = vpop.f32.mrf.mxu1  ;;  %3926 = vmatpush2.bf16.msra.mxu0 %v5523_v21 }
 0x14b   : > { %v6684_v33 = vadd.f32 %v3212_v28, %v3099_v27  ;;  %4876 = vmatpush2.bf16.msra.mxu1 %v5523_v21  ;;  %v3101_v38 = vpop.f32.mrf.mxu0  ;;  %v5538_v28 = vld [vmem:[%s5761_s24 + $0x160] ss:$72 sps:$4 sm:$0xff]  }
 0x14c   : > { %v3214_v40 = vpop.f32.mrf.mxu1 }
 0x14d   : > { %v6688_v41 = vadd.f32 %v3214_v40, %v3101_v38  ;;  %v3251_v42 = vpop.f32.mrf.mxu0  ;;  %3928 = vmatmul.mubr.bf16.vlgmr.msra.gmra.mxu0 %v5526_v30  ;;  %v5541_v30 = vld [vmem:[%s5761_s24 + $0x3a0] ss:$72 sps:$4 sm:$0xff]   ;;  %v5549_v38 = vld [vmem:[%s5761_s24 + $0x434] ss:$72 sps:$4 sm:$0xff]  }
 0x14e   : > { %v3364_v46 = vpop.f32.mrf.mxu1  ;;  %3968 = vmatmul.mubr.bf16.vlgmr.msra.gmra.mxu1 %v5529_v32  ;;  %v3252_v47 = vadd.f32 %v3251_v42, %v6507_v43  ;;  %3937 = vmatprep.mubr.bf16.mxu0 %v5534_v35 }
 0x14f   : > { %3977 = vmatprep.mubr.bf16.mxu1 %v5537_v36  ;;  %v3253_v49 = vpop.f32.mrf.mxu0  ;;  %v5546_v36 = vld [vmem:[%s5761_s24 + $0x1f4] ss:$72 sps:$4 sm:$0xff]  }
 0x150   : > { %v3366_v50 = vpop.f32.mrf.mxu1  ;;  %v6691_v54 = vadd.f32 %v3364_v46, %v3252_v47  ;;  %v3254_v55 = vadd.f32 %v3253_v49, %v6515_v48 }
 0x151   : > { %v3255_v56 = vpop.f32.mrf.mxu0 }
 0x152   : > { %v3368_v59 = vpop.f32.mrf.mxu1  ;;  %v6696_v1 = vadd.f32 %v3366_v50, %v3254_v55  ;;  %v3256_v2 = vadd.f32 %v3255_v56, %v6519_v53 }
 0x153   : > { %v3257_v8 = vpop.f32.mrf.mxu0 }
 0x154   : > { %v3370_v43 = vpop.f32.mrf.mxu1  ;;  %v6701_v10 = vadd.f32 %v3368_v59, %v3256_v2  ;;  %v3258_v13 = vadd.f32 %v3257_v8, %v6527_v58  ;;  %v5547_v2 = vld [vmem:[%s5761_s24 + $0x430] ss:$72 sps:$4 sm:$0xff]  }
 0x155   : > { %v3261_v15 = vpop.f32.mrf.mxu0  ;;  %3938 = vmatmul.mubr.bf16.gmra.mxu0 %v5532_v61 }
 0x156   : > { %v3374_v48 = vpop.f32.mrf.mxu1  ;;  %3978 = vmatmul.mubr.bf16.gmra.mxu1 %v5535_v62  ;;  %v6704_v16 = vadd.f32 %v3370_v43, %v3258_v13  ;;  %v3262_v53 = vadd.f32 %v3261_v15, %v6531_v63  ;;  %3947 = vmatprep.mubr.bf16.mxu0 %v5540_v5 }
 0x157   : > { %3987 = vmatprep.mubr.bf16.mxu1 %v5543_v7  ;;  %v3263_v17 = vpop.f32.mrf.mxu0 }
 0x158   : > { %v3376_v21 = vpop.f32.mrf.mxu1  ;;  %v6707_v22 = vadd.f32 %v3374_v48, %v3262_v53  ;;  %v3264_v23 = vadd.f32 %v3263_v17, %v6539_v4 }
 0x159   : > { %v3265_v58 = vpop.f32.mrf.mxu0 }
 0x15a   : > { %v3378_v27 = vpop.f32.mrf.mxu1  ;;  %v6712_v32 = vadd.f32 %v3376_v21, %v3264_v23  ;;  %v3266_v35 = vadd.f32 %v3265_v58, %v6543_v9 }
 0x15b   : > { %v3267_v40 = vpop.f32.mrf.mxu0 }
 0x15c   : > { %v3380_v63 = vpop.f32.mrf.mxu1  ;;  %v6717_v42 = vadd.f32 %v3378_v27, %v3266_v35  ;;  %v3268_v46 = vadd.f32 %v3267_v40, %v6551_v14  ;;  %v5544_v14 = vld [vmem:[%s5761_s24 + $0x1f0] ss:$72 sps:$4 sm:$0xff]  }
 0x15d   : > { %v3271_v47 = vpop.f32.mrf.mxu0  ;;  %3948 = vmatmul.mubr.bf16.gmra.mxu0 %v5538_v28 }
 0x15e   : > { %v3384_v4 = vpop.f32.mrf.mxu1  ;;  %3988 = vmatmul.mubr.bf16.gmra.mxu1 %v5541_v30  ;;  %v6720_v49 = vadd.f32 %v3380_v63, %v3268_v46  ;;  %v3272_v50 = vadd.f32 %v3271_v47, %v6555_v19  ;;  %3957 = vmatprep.mubr.bf16.mxu0 %v5546_v36 }
 0x15f   : > { %3997 = vmatprep.mubr.bf16.mxu1 %v5549_v38  ;;  %v3273_v9 = vpop.f32.mrf.mxu0 }
 0x160   : > { %v3386_v55 = vpop.f32.mrf.mxu1  ;;  %v6723_v56 = vadd.f32 %v3384_v4, %v3272_v50  ;;  %v3274_v59 = vadd.f32 %v3273_v9, %v6563_v24 }
 0x161   : > { %v3275_v61 = vpop.f32.mrf.mxu0 }
 0x162   : > { %v3388_v62 = vpop.f32.mrf.mxu1  ;;  %v6728_v5 = vadd.f32 %v3386_v55, %v3274_v59  ;;  %v3276_v7 = vadd.f32 %v3275_v61, %v6567_v29 }
 0x163   : > { %v3277_v8 = vpop.f32.mrf.mxu0 }
 0x164   : > { %v3390_v43 = vpop.f32.mrf.mxu1  ;;  %v6731_v13 = vadd.f32 %v3388_v62, %v3276_v7  ;;  %v3278_v19 = vadd.f32 %v3277_v8, %v6575_v34 }
 0x165   : > { %v3281_v15 = vpop.f32.mrf.mxu0  ;;  %3958 = vmatmul.mubr.bf16.gmra.mxu0 %v5544_v14 }
 0x166   : > { %v3394_v48 = vpop.f32.mrf.mxu1  ;;  %3998 = vmatmul.mubr.bf16.gmra.mxu1 %v5547_v2  ;;  %v6734_v53 = vadd.f32 %v3390_v43, %v3278_v19  ;;  %v3282_v24 = vadd.f32 %v3281_v15, %v6579_v39 }
 0x167   : > { %v3283_v17 = vpop.f32.mrf.mxu0 }
 0x168   : > { %v3396_v21 = vpop.f32.mrf.mxu1  ;;  %v6737_v23 = vadd.f32 %v3394_v48, %v3282_v24  ;;  %v3284_v29 = vadd.f32 %v3283_v17, %v6587_v45 }
 0x169   : > { %v3285_v58 = vpop.f32.mrf.mxu0 }
 0x16a   : > { %v3398_v27 = vpop.f32.mrf.mxu1  ;;  %v6740_v28 = vadd.f32 %v3396_v21, %v3284_v29  ;;  %v3286_v34 = vadd.f32 %v3285_v58, %v6591_v51 }
 0x16b   : > { %v3287_v30 = vpop.f32.mrf.mxu0 }
 0x16c   : > { %v3400_v35 = vpop.f32.mrf.mxu1  ;;  %v6743_v36 = vadd.f32 %v3398_v27, %v3286_v34  ;;  %v3288_v38 = vadd.f32 %v3287_v30, %v6599_v57 }
 0x16d   : > { %v3291_v40 = vpop.f32.mrf.mxu0 }
 0x16e   : > { %v3404_v39 = vpop.f32.mrf.mxu1  ;;  %v6746_v63 = vadd.f32 %v3400_v35, %v3288_v38  ;;  %v3292_v46 = vadd.f32 %v3291_v40, %v6603_v0 }
 0x16f   : > { %v3293_v47 = vpop.f32.mrf.mxu0 }
 0x170   : > { %v3406_v45 = vpop.f32.mrf.mxu1  ;;  %v6749_v4 = vadd.f32 %v3404_v39, %v3292_v46  ;;  %v3294_v50 = vadd.f32 %v3293_v47, %v6611_v6 }
 0x171   : > { %v3295_v9 = vpop.f32.mrf.mxu0 }
 0x172   : > { %v3408_v51 = vpop.f32.mrf.mxu1  ;;  %v6752_v55 = vadd.f32 %v3406_v45, %v3294_v50  ;;  %v3296_v59 = vadd.f32 %v3295_v9, %v6615_v12 }
 0x173   : > { %v3297_v61 = vpop.f32.mrf.mxu0 }
 0x174   : > { %v3410_v57 = vpop.f32.mrf.mxu1  ;;  %v6755_v62 = vadd.f32 %v3408_v51, %v3296_v59  ;;  %v3298_v14 = vadd.f32 %v3297_v61, %v6623_v18 }
 0x175   : > { %v3301_v2 = vpop.f32.mrf.mxu0 }
 0x176   : > { %v3414_v0 = vpop.f32.mrf.mxu1  ;;  %v6758_v7 = vadd.f32 %v3410_v57, %v3298_v14  ;;  %v3302_v8 = vadd.f32 %v3301_v2, %v6627_v25 }
 0x177   : > { %v3303_v43 = vpop.f32.mrf.mxu0 }
 0x178   : > { %v3416_v6 = vpop.f32.mrf.mxu1  ;;  %v6761_v19 = vadd.f32 %v3414_v0, %v3302_v8  ;;  %v3304_v15 = vadd.f32 %v3303_v43, %v6635_v31 }
 0x179   : > { %v3305_v48 = vpop.f32.mrf.mxu0 }
 0x17a   : > { %v3418_v12 = vpop.f32.mrf.mxu1  ;;  %v6764_v24 = vadd.f32 %v3416_v6, %v3304_v15  ;;  %v3306_v17 = vadd.f32 %v3305_v48, %v6639_v37 }
 0x17b   : > { %v3307_v21 = vpop.f32.mrf.mxu0 }
 0x17c   : > { %v3420_v18 = vpop.f32.mrf.mxu1  ;;  %v6767_v29 = vadd.f32 %v3418_v12, %v3306_v17  ;;  %v3308_v58 = vadd.f32 %v3307_v21, %v6647_v44 }
 0x17d   : > { %v3311_v27 = vpop.f32.mrf.mxu0 }
 0x17e   : > { %v3424_v25 = vpop.f32.mrf.mxu1  ;;  %v6770_v34 = vadd.f32 %v3420_v18, %v3308_v58  ;;  %v3312_v30 = vadd.f32 %v3311_v27, %v6651_v52 }
 0x17f   : > { %v3313_v35 = vpop.f32.mrf.mxu0 }
 0x180   : > { %v3426_v31 = vpop.f32.mrf.mxu1  ;;  %v6773_v38 = vadd.f32 %v3424_v25, %v3312_v30  ;;  %v3314_v40 = vadd.f32 %v3313_v35, %v6659_v60 }
 0x181   : > { %v3315_v39 = vpop.f32.mrf.mxu0 }
 0x182   : > { %v3428_v37 = vpop.f32.mrf.mxu1  ;;  %v6776_v46 = vadd.f32 %v3426_v31, %v3314_v40  ;;  %v3316_v47 = vadd.f32 %v3315_v39, %v6663_v3 }
 0x183   : > { %v3317_v45 = vpop.f32.mrf.mxu0 }
 0x184   : > { %v3430_v44 = vpop.f32.mrf.mxu1  ;;  %v6779_v50 = vadd.f32 %v3428_v37, %v3316_v47  ;;  %v3318_v9 = vadd.f32 %v3317_v45, %v6671_v11 }
 0x185   : > { %v3321_v51 = vpop.f32.mrf.mxu0 }
 0x186   : > { %v3434_v52 = vpop.f32.mrf.mxu1  ;;  %v6782_v59 = vadd.f32 %v3430_v44, %v3318_v9  ;;  %v3322_v61 = vadd.f32 %v3321_v51, %v6675_v20 }
 0x187   : > { %v3323_v57 = vpop.f32.mrf.mxu0 }
 0x188   : > { %v3436_v60 = vpop.f32.mrf.mxu1  ;;  %v6785_v14 = vadd.f32 %v3434_v52, %v3322_v61  ;;  %v3324_v2 = vadd.f32 %v3323_v57, %v6680_v26 }
 0x189   : > { %v3325_v0 = vpop.f32.mrf.mxu0 }
 0x18a   : > { %v3438_v3 = vpop.f32.mrf.mxu1  ;;  %v6788_v8 = vadd.f32 %v3436_v60, %v3324_v2  ;;  %v3326_v43 = vadd.f32 %v3325_v0, %v6684_v33 }
 0x18b   : > { %v3327_v6 = vpop.f32.mrf.mxu0 }
 0x18c   : > { %v3440_v11 = vpop.f32.mrf.mxu1  ;;  %v6791_v15 = vadd.f32 %v3438_v3, %v3326_v43  ;;  %v3328_v48 = vadd.f32 %v3327_v6, %v6688_v41 }
 0x18d   : > { %v3477_v12 = vpop.f32.mrf.mxu0 }
 0x18e   : > { %v3590_v20 = vpop.f32.mrf.mxu1  ;;  %v6794_v17 = vadd.f32 %v3440_v11, %v3328_v48  ;;  %v3478_v21 = vadd.f32 %v3477_v12, %v6691_v54 }
 0x18f   : > { %v3479_v18 = vpop.f32.mrf.mxu0 }
 0x190   : > { %v3592_v26 = vpop.f32.mrf.mxu1  ;;  %v6797_v58 = vadd.f32 %v3590_v20, %v3478_v21  ;;  %v3480_v27 = vadd.f32 %v3479_v18, %v6696_v1 }
 0x191   : > { %v3481_v25 = vpop.f32.mrf.mxu0 }
 0x192   : > { %v3594_v33 = vpop.f32.mrf.mxu1  ;;  %v6800_v30 = vadd.f32 %v3592_v26, %v3480_v27  ;;  %v3482_v35 = vadd.f32 %v3481_v25, %v6701_v10 }
 0x193   : > { %v3483_v31 = vpop.f32.mrf.mxu0 }
 0x194   : > { %v3596_v41 = vpop.f32.mrf.mxu1  ;;  %v6803_v40 = vadd.f32 %v3594_v33, %v3482_v35  ;;  %v3484_v39 = vadd.f32 %v3483_v31, %v6704_v16 }
 0x195   : > { %v3487_v37 = vpop.f32.mrf.mxu0 }
 0x196   : > { %v3600_v54 = vpop.f32.mrf.mxu1  ;;  %v6806_v47 = vadd.f32 %v3596_v41, %v3484_v39  ;;  %v3488_v45 = vadd.f32 %v3487_v37, %v6707_v22 }
 0x197   : > { %v3489_v44 = vpop.f32.mrf.mxu0 }
 0x198   : > { %v3602_v1 = vpop.f32.mrf.mxu1  ;;  %v6809_v9 = vadd.f32 %v3600_v54, %v3488_v45  ;;  %v3490_v51 = vadd.f32 %v3489_v44, %v6712_v32 }
 0x199   : > { %v3491_v52 = vpop.f32.mrf.mxu0 }
 0x19a   : > { %v3604_v10 = vpop.f32.mrf.mxu1  ;;  %v6812_v61 = vadd.f32 %v3602_v1, %v3490_v51  ;;  %v3492_v57 = vadd.f32 %v3491_v52, %v6717_v42 }
 0x19b   : > { %v3493_v60 = vpop.f32.mrf.mxu0 }
 0x19c   : > { %v3606_v16 = vpop.f32.mrf.mxu1  ;;  %v6815_v2 = vadd.f32 %v3604_v10, %v3492_v57  ;;  %v3494_v0 = vadd.f32 %v3493_v60, %v6720_v49 }
 0x19d   : > { %v3497_v3 = vpop.f32.mrf.mxu0 }
 0x19e   : > { %v3610_v22 = vpop.f32.mrf.mxu1  ;;  %v6818_v43 = vadd.f32 %v3606_v16, %v3494_v0  ;;  %v3498_v6 = vadd.f32 %v3497_v3, %v6723_v56 }
 0x19f   : > { %v3499_v11 = vpop.f32.mrf.mxu0 }
 0x1a0   : > { %v3612_v32 = vpop.f32.mrf.mxu1  ;;  %v6821_v48 = vadd.f32 %v3610_v22, %v3498_v6  ;;  %v3500_v12 = vadd.f32 %v3499_v11, %v6728_v5 }
 0x1a1   : > { %v3501_v20 = vpop.f32.mrf.mxu0 }
 0x1a2   : > { %v3614_v42 = vpop.f32.mrf.mxu1  ;;  %v6824_v21 = vadd.f32 %v3612_v32, %v3500_v12  ;;  %v3502_v18 = vadd.f32 %v3501_v20, %v6731_v13 }
 0x1a3   : > { %v3503_v26 = vpop.f32.mrf.mxu0 }
 0x1a4   : > { %v3616_v49 = vpop.f32.mrf.mxu1  ;;  %v6827_v27 = vadd.f32 %v3614_v42, %v3502_v18  ;;  %v3504_v25 = vadd.f32 %v3503_v26, %v6734_v53 }
 0x1a5   : > { %v3507_v33 = vpop.f32.mrf.mxu0 }
 0x1a6   : > { %v3620_v56 = vpop.f32.mrf.mxu1  ;;  %v6830_v35 = vadd.f32 %v3616_v49, %v3504_v25  ;;  %v3508_v31 = vadd.f32 %v3507_v33, %v6737_v23 }
 0x1a7   : > { %v3509_v41 = vpop.f32.mrf.mxu0 }
 0x1a8   : > { %v3622_v5 = vpop.f32.mrf.mxu1  ;;  %v6833_v39 = vadd.f32 %v3620_v56, %v3508_v31  ;;  %v3510_v37 = vadd.f32 %v3509_v41, %v6740_v28 }
 0x1a9   : > { %v3511_v54 = vpop.f32.mrf.mxu0 }
 0x1aa   : > { %v3624_v13 = vpop.f32.mrf.mxu1  ;;  %v6836_v45 = vadd.f32 %v3622_v5, %v3510_v37  ;;  %v3512_v44 = vadd.f32 %v3511_v54, %v6743_v36 }
 0x1ab   : > { %v3513_v1 = vpop.f32.mrf.mxu0 }
 0x1ac   : > { %v3626_v53 = vpop.f32.mrf.mxu1  ;;  %v6839_v51 = vadd.f32 %v3624_v13, %v3512_v44  ;;  %v3514_v52 = vadd.f32 %v3513_v1, %v6746_v63 }
 0x1ad   : > { %v3517_v10 = vpop.f32.mrf.mxu0 }
 0x1ae   : > { %v3630_v23 = vpop.f32.mrf.mxu1  ;;  %v6842_v57 = vadd.f32 %v3626_v53, %v3514_v52  ;;  %v3518_v60 = vadd.f32 %v3517_v10, %v6749_v4 }
 0x1af   : > { %v3519_v16 = vpop.f32.mrf.mxu0 }
 0x1b0   : > { %v3632_v28 = vpop.f32.mrf.mxu1  ;;  %v6845_v0 = vadd.f32 %v3630_v23, %v3518_v60  ;;  %v3520_v3 = vadd.f32 %v3519_v16, %v6752_v55 }
 0x1b1   : > { %v3521_v22 = vpop.f32.mrf.mxu0 }
 0x1b2   : > { %7225 = vst [vmem:[#allocation3_spill] sm:$0xff] %v6845_v0  ;;  %v3634_v36 = vpop.f32.mrf.mxu1  ;;  %v6848_v6 = vadd.f32 %v3632_v28, %v3520_v3  ;;  %v3522_v11 = vadd.f32 %v3521_v22, %v6755_v62 }
 0x1b3   : > { %v3523_v32 = vpop.f32.mrf.mxu0 }
 0x1b4   : > { %7226 = vst [vmem:[#allocation4_spill] sm:$0xff] %v6848_v6  ;;  %v3636_v63 = vpop.f32.mrf.mxu1  ;;  %v6851_v12 = vadd.f32 %v3634_v36, %v3522_v11  ;;  %v3524_v20 = vadd.f32 %v3523_v32, %v6758_v7 }
 0x1b5   : > { %v3527_v42 = vpop.f32.mrf.mxu0 }
 0x1b6   : > { %7227 = vst [vmem:[#allocation5_spill] sm:$0xff] %v6851_v12  ;;  %v3640_v4 = vpop.f32.mrf.mxu1  ;;  %v6854_v18 = vadd.f32 %v3636_v63, %v3524_v20  ;;  %v3528_v26 = vadd.f32 %v3527_v42, %v6761_v19 }
 0x1b7   : > { %v3529_v49 = vpop.f32.mrf.mxu0 }
 0x1b8   : > { %7228 = vst [vmem:[#allocation6_spill] sm:$0xff] %v6854_v18  ;;  %v3642_v55 = vpop.f32.mrf.mxu1  ;;  %v6857_v25 = vadd.f32 %v3640_v4, %v3528_v26  ;;  %v3530_v33 = vadd.f32 %v3529_v49, %v6764_v24 }
 0x1b9   : > { %v3531_v56 = vpop.f32.mrf.mxu0 }
 0x1ba   : > { %7229 = vst [vmem:[#allocation7_spill] sm:$0xff] %v6857_v25  ;;  %v3644_v62 = vpop.f32.mrf.mxu1  ;;  %v6860_v31 = vadd.f32 %v3642_v55, %v3530_v33  ;;  %v3532_v41 = vadd.f32 %v3531_v56, %v6767_v29 }
 0x1bb   : > { %v3533_v5 = vpop.f32.mrf.mxu0 }
 0x1bc   : > { %7230 = vst [vmem:[#allocation8_spill] sm:$0xff] %v6860_v31  ;;  %v3646_v7 = vpop.f32.mrf.mxu1  ;;  %v6863_v37 = vadd.f32 %v3644_v62, %v3532_v41  ;;  %v3534_v54 = vadd.f32 %v3533_v5, %v6770_v34 }
 0x1bd   : > { %v3537_v13 = vpop.f32.mrf.mxu0 }
 0x1be   : > { %7231 = vst [vmem:[#allocation9_spill] sm:$0xff] %v6863_v37  ;;  %v3650_v19 = vpop.f32.mrf.mxu1  ;;  %v6866_v44 = vadd.f32 %v3646_v7, %v3534_v54  ;;  %v3538_v1 = vadd.f32 %v3537_v13, %v6773_v38 }
 0x1bf   : > { %v3539_v53 = vpop.f32.mrf.mxu0 }
 0x1c0   : > { %7232 = vst [vmem:[#allocation10_spill] sm:$0xff] %v6866_v44  ;;  %v3652_v24 = vpop.f32.mrf.mxu1  ;;  %v6869_v52 = vadd.f32 %v3650_v19, %v3538_v1  ;;  %v3540_v10 = vadd.f32 %v3539_v53, %v6776_v46 }
 0x1c1   : > { %v3541_v23 = vpop.f32.mrf.mxu0 }
 0x1c2   : > { %7233 = vst [vmem:[#allocation11_spill] sm:$0xff] %v6869_v52  ;;  %v3654_v29 = vpop.f32.mrf.mxu1  ;;  %v6872_v60 = vadd.f32 %v3652_v24, %v3540_v10  ;;  %v3542_v16 = vadd.f32 %v3541_v23, %v6779_v50 }
 0x1c3   : > { %v3543_v28 = vpop.f32.mrf.mxu0 }
 0x1c4   : > { %7234 = vst [vmem:[#allocation12_spill] sm:$0xff] %v6872_v60  ;;  %v3656_v34 = vpop.f32.mrf.mxu1  ;;  %v6875_v3 = vadd.f32 %v3654_v29, %v3542_v16  ;;  %v3544_v22 = vadd.f32 %v3543_v28, %v6782_v59 }
 0x1c5   : > { %v3547_v36 = vpop.f32.mrf.mxu0 }
 0x1c6   : > { %7235 = vst [vmem:[#allocation13_spill] sm:$0xff] %v6875_v3  ;;  %v3660_v38 = vpop.f32.mrf.mxu1  ;;  %v6878_v11 = vadd.f32 %v3656_v34, %v3544_v22  ;;  %v3548_v32 = vadd.f32 %v3547_v36, %v6785_v14 }
 0x1c7   : > { %v3549_v63 = vpop.f32.mrf.mxu0 }
 0x1c8   : > { %7236 = vst [vmem:[#allocation14_spill] sm:$0xff] %v6878_v11  ;;  %v3662_v46 = vpop.f32.mrf.mxu1  ;;  %v6881_v20 = vadd.f32 %v3660_v38, %v3548_v32  ;;  %v3550_v42 = vadd.f32 %v3549_v63, %v6788_v8 }
 0x1c9   : > { %v3551_v4 = vpop.f32.mrf.mxu0 }
 0x1ca   : > { %7237 = vst [vmem:[#allocation15_spill] sm:$0xff] %v6881_v20  ;;  %v3664_v50 = vpop.f32.mrf.mxu1  ;;  %v6884_v26 = vadd.f32 %v3662_v46, %v3550_v42  ;;  %v3552_v49 = vadd.f32 %v3551_v4, %v6791_v15 }
 0x1cb   : > { %v3553_v55 = vpop.f32.mrf.mxu0 }
 0x1cc   : > { %7238 = vst [vmem:[#allocation16_spill] sm:$0xff] %v6884_v26  ;;  %v3666_v59 = vpop.f32.mrf.mxu1  ;;  %v6887_v33 = vadd.f32 %v3664_v50, %v3552_v49  ;;  %v3554_v56 = vadd.f32 %v3553_v55, %v6794_v17 }
 0x1cd   : > { %v3703_v62 = vpop.f32.mrf.mxu0 }
 0x1ce   : > { %7239 = vst [vmem:[#allocation17_spill] sm:$0xff] %v6887_v33  ;;  %v6890_v14 = vpop.f32.mrf.mxu1  ;;  %v6892_v41 = vadd.f32 %v3666_v59, %v3554_v56 }
 0x1cf   : > { %v3705_v5 = vpop.f32.mrf.mxu0 }
 0x1d0   : > { %7240 = vst [vmem:[#allocation18_spill] sm:$0xff] %v6892_v41  ;;  %v6894_v7 = vpop.f32.mrf.mxu1 }
 0x1d1   : > { %v3707_v8 = vpop.f32.mrf.mxu0 }
 0x1d2   : > { %v6896_v54 = vpop.f32.mrf.mxu1 }
 0x1d3   : > { %v3709_v13 = vpop.f32.mrf.mxu0 }
 0x1d4   : > { %v6898_v19 = vpop.f32.mrf.mxu1 }
 0x1d5   : > { %v3713_v15 = vpop.f32.mrf.mxu0 }
 0x1d6   : > { %v6900_v1 = vpop.f32.mrf.mxu1  ;;  %v3714_v25 = vadd.f32 %v3713_v15, %v6809_v9 }
 0x1d7   : > { %v3715_v53 = vpop.f32.mrf.mxu0 }
 0x1d8   : > { %v6902_v24 = vpop.f32.mrf.mxu1  ;;  %v3716_v18 = vadd.f32 %v3715_v53, %v6812_v61 }
 0x1d9   : > { %v3717_v17 = vpop.f32.mrf.mxu0 }
 0x1da   : > { %v6904_v10 = vpop.f32.mrf.mxu1 }
 0x1db   : > { %v3719_v23 = vpop.f32.mrf.mxu0 }
 0x1dc   : > { %v6906_v29 = vpop.f32.mrf.mxu1 }
 0x1dd   : > { %v3723_v16 = vpop.f32.mrf.mxu0 }
 0x1de   : > { %v6908_v28 = vpop.f32.mrf.mxu1  ;;  %v3724_v61 = vadd.f32 %v3723_v16, %v6821_v48  ;;  %v7263_v16 = vld [vmem:[#allocation7_spill] sm:$0xff] }
 0x1df   : > { %v3725_v34 = vpop.f32.mrf.mxu0 }
 0x1e0   : > { %v6910_v22 = vpop.f32.mrf.mxu1 }
 0x1e1   : > { %v3727_v36 = vpop.f32.mrf.mxu0 }
 0x1e2   : > { %v6912_v38 = vpop.f32.mrf.mxu1 }
 0x1e3   : > { %7241 = vst [vmem:[#allocation19_spill] sm:$0xff] %v6912_v38  ;;  %v3729_v32 = vpop.f32.mrf.mxu0 }
 0x1e4   : > { %v6914_v63 = vpop.f32.mrf.mxu1  ;;  %v3730_v48 = vadd.f32 %v3729_v32, %v6830_v35 }
 0x1e5   : > { %7242 = vst [vmem:[#allocation20_spill] sm:$0xff] %v6914_v63  ;;  %v3733_v46 = vpop.f32.mrf.mxu0 }
 0x1e6   : > { %v6916_v42 = vpop.f32.mrf.mxu1 }
 0x1e7   : > { %7243 = vst [vmem:[#allocation21_spill] sm:$0xff] %v6916_v42  ;;  %v3735_v4 = vpop.f32.mrf.mxu0 }
 0x1e8   : > { %v6918_v50 = vpop.f32.mrf.mxu1 }
 0x1e9   : > { %7244 = vst [vmem:[#allocation22_spill] sm:$0xff] %v6918_v50  ;;  %v3737_v49 = vpop.f32.mrf.mxu0  ;;  %v4109_v50 = vlaneseq }
 0x1ea   : > { %v6920_v55 = vpop.f32.mrf.mxu1 }
 0x1eb   : > { %7245 = vst [vmem:[#allocation23_spill] sm:$0xff] %v6920_v55  ;;  %v3739_v59 = vpop.f32.mrf.mxu0 }
 0x1ec   : > { %v6922_v56 = vpop.f32.mrf.mxu1  ;;  %v7266_v32 = vld [vmem:[#allocation20_spill] sm:$0xff] }
 0x1ed   : > { %7246 = vst [vmem:[#allocation24_spill] sm:$0xff] %v6922_v56  ;;  %v3743_v41 = vpop.f32.mrf.mxu0 }
 0x1ee   : > { %v6924_v33 = vpop.f32.mrf.mxu1 }
 0x1ef   : > { %7247 = vst [vmem:[#allocation25_spill] sm:$0xff] %v6924_v33  ;;  %v3745_v26 = vpop.f32.mrf.mxu0  ;;  %v4110_v33 = vshrl.u32 %v4109_v50, 7  ;;  %v3704_v50 = vadd.f32 %v3703_v62, %v6797_v58  ;;  %v3718_v58 = vadd.f32 %v3717_v17, %v6815_v2  ;;  %v7261_v17 = vld [vmem:[#allocation5_spill] sm:$0xff] }
 0x1f0   : > { %v6926_v20 = vpop.f32.mrf.mxu1 }
 0x1f1   : > { %7248 = vst [vmem:[#allocation26_spill] sm:$0xff] %v6926_v20  ;;  %v3747_v11 = vpop.f32.mrf.mxu0 }
 0x1f2   : > { %v6928_v3 = vpop.f32.mrf.mxu1 }
 0x1f3   : > { %7249 = vst [vmem:[#allocation27_spill] sm:$0xff] %v6928_v3  ;;  %v3749_v60 = vpop.f32.mrf.mxu0 }
 0x1f4   : > { %v6930_v52 = vpop.f32.mrf.mxu1 }
 0x1f5   : > { %7250 = vst [vmem:[#allocation28_spill] sm:$0xff] %v6930_v52  ;;  %v3753_v44 = vpop.f32.mrf.mxu0  ;;  %v4111_v52 = vsub.s32 0, %v4110_v33 }
 0x1f6   : > { %v6932_v37 = vpop.f32.mrf.mxu1 }
 0x1f7   : > { %7251 = vst [vmem:[#allocation29_spill] sm:$0xff] %v6932_v37  ;;  %v3755_v55 = vpop.f32.mrf.mxu0  ;;  %v4107_v37 = vld [vmem:[%s7222_s2] sm:$0x3] }
 0x1f8   : > { %v6934_v42 = vpop.f32.mrf.mxu1  ;;  %v6964_v0 = vrot.slane %v4107_v37, %v4111_v52 }
 0x1f9   : > { %7252 = vst [vmem:[#allocation30_spill] sm:$0xff] %v6934_v42  ;;  %v6936_v56 = vpop.f32.mrf.mxu0  ;;  %v4151_v42 = vld [vmem:[%s7223_s3] sm:$0x3] }
 0x1fa   : > { %7253 = vst [vmem:[#allocation31_spill] sm:$0xff] %v6936_v56  ;;  %v6938_v63 = vpop.f32.mrf.mxu1  ;;  %v4115_v56 = vsub.s32 1, %v4110_v33  ;;  %v6966_v33 = vrot.slane %v4151_v42, %v4111_v52 }
 0x1fb   : > { %7254 = vst [vmem:[#allocation32_spill] sm:$0xff] %v6938_v63  ;;  %v6940_v38 = vpop.f32.mrf.mxu0  ;;  %v3706_v63 = vadd.f32 %v3705_v5, %v6800_v30  ;;  %v3720_v30 = vadd.f32 %v3719_v23, %v6818_v43  ;;  %v3726_v5 = vadd.f32 %v3725_v34, %v6824_v21  ;;  %v3734_v21 = vadd.f32 %v3733_v46, %v6833_v39  ;;  %v7259_v39 = vld [vmem:[#allocation3_spill] sm:$0xff]  ;;  %v7262_v23 = vld [vmem:[#allocation6_spill] sm:$0xff]  ;;  %v7264_v34 = vld [vmem:[#allocation8_spill] sm:$0xff] }
 0x1fc   : > { %7255 = vst [vmem:[#allocation33_spill] sm:$0xff] %v6940_v38  ;;  %v6942_v20 = vpop.f32.mrf.mxu1  ;;  %v6970_v62 = vrot.slane %v4107_v37, %v4115_v56  ;;  %v6989_v37 = vadd.f32 %v6900_v1, %v3714_v25  ;;  %v3738_v25 = vadd.f32 %v3737_v49, %v6839_v51  ;;  %v3754_v51 = vadd.f32 %v3753_v44, %v7263_v16  ;;  %v7270_v44 = vld [vmem:[#allocation24_spill] sm:$0xff]  ;;  %v7280_v16 = vld [vmem:[#allocation27_spill] sm:$0xff] }
 0x1fd   : > { %7256 = vst [vmem:[#allocation34_spill] sm:$0xff] %v6942_v20  ;;  %v6944_v3 = vpop.f32.mrf.mxu0  ;;  %v6976_v9 = vadd.f32 %v6894_v7, %v3706_v63  ;;  %v3728_v7 = vadd.f32 %v3727_v36, %v6827_v27  ;;  %v7007_v27 = vadd.f32 %v6908_v28, %v3724_v61  ;;  %v7010_v35 = vadd.f32 %v6910_v22, %v3726_v5  ;;  %v7265_v36 = vld [vmem:[#allocation19_spill] sm:$0xff]  ;;  %v7267_v63 = vld [vmem:[#allocation21_spill] sm:$0xff] }
 0x1fe   : > { %7257 = vst [vmem:[#allocation35_spill] sm:$0xff] %v6944_v3  ;;  %v6946_v31 = vpop.f32.mrf.mxu1  ;;  %v3708_v3 = vadd.f32 %v3707_v8, %v6803_v40  ;;  %v6972_v40 = vrot.slane %v4151_v42, %v4115_v56  ;;  %v7022_v22 = vadd.f32 %v7266_v32, %v3730_v48  ;;  %v7275_v61 = vld [vmem:[#allocation25_spill] sm:$0xff] }
 0x1ff   : > { %7258 = vst [vmem:[#allocation36_spill] sm:$0xff] %v6946_v31  ;;  %v3765_v38 = vpop.f32.mrf.mxu0  ;;  %v3710_v31 = vadd.f32 %v3709_v13, %v6806_v47  ;;  %v3817_v47 = vadd.f32 %v6890_v14, %v3704_v50  ;;  %v6992_v14 = vadd.f32 %v6902_v24, %v3716_v18  ;;  %v3736_v13 = vadd.f32 %v3735_v4, %v6836_v45  ;;  %v7269_v4 = vld [vmem:[#allocation23_spill] sm:$0xff]  ;;  %v7273_v50 = vld [vmem:[#allocation10_spill] sm:$0xff]  ;;  %v7282_v32 = vld [vmem:[#allocation29_spill] sm:$0xff] }
 0x200   : > { %v6956_v20 = vpop.f32.mrf.mxu1  ;;  %v6983_v2 = vadd.f32 %v6896_v54, %v3708_v3  ;;  %v6999_v54 = vadd.f32 %v6904_v10, %v3718_v58  ;;  %v3740_v18 = vadd.f32 %v3739_v59, %v6842_v57  ;;  %v3744_v45 = vadd.f32 %v3743_v41, %v7259_v39 }
 0x201   : > { %v3767_v12 = vpop.f32.mrf.mxu0  ;;  %v6986_v43 = vadd.f32 %v6898_v19, %v3710_v31  ;;  %v7002_v31 = vadd.f32 %v6906_v29, %v3720_v30  ;;  %v7260_v19 = vld [vmem:[#allocation4_spill] sm:$0xff]  ;;  %v3748_v10 = vadd.f32 %v3747_v11, %v7261_v17  ;;  %v3750_v29 = vadd.f32 %v3749_v60, %v7262_v23  ;;  %v7272_v59 = vld [vmem:[#allocation31_spill] sm:$0xff] }
 0x202   : > { %v6962_v6 = vpop.f32.mrf.mxu1  ;;  %v3746_v1 = vadd.f32 %v3745_v26, %v7260_v19  ;;  %v3756_v57 = vadd.f32 %v3755_v55, %v7264_v34  ;;  %v7019_v28 = vadd.f32 %v7265_v36, %v3728_v7  ;;  %v7025_v41 = vadd.f32 %v7267_v63, %v3734_v21  ;;  %v7268_v26 = vld [vmem:[#allocation22_spill] sm:$0xff]  ;;  %v7271_v55 = vld [vmem:[#allocation9_spill] sm:$0xff]  ;;  %v7277_v21 = vld [vmem:[#allocation11_spill] sm:$0xff] }
 0x203   : > { %v3769_v8 = vpop.f32.mrf.mxu0  ;;  %v7028_v46 = vadd.f32 %v7268_v26, %v3736_v13  ;;  %v7031_v60 = vadd.f32 %v7269_v4, %v3738_v25  ;;  %v7034_v49 = vadd.f32 %v7270_v44, %v3740_v18  ;;  %v3758_v56 = vadd.f32 %v7272_v59, %v7271_v55  ;;  %v7274_v58 = vld [vmem:[#allocation33_spill] sm:$0xff]  ;;  %v7276_v7 = vld [vmem:[#allocation26_spill] sm:$0xff]  ;;  %v7279_v19 = vld [vmem:[#allocation12_spill] sm:$0xff] }
 0x204   : > { %v6980_v52 = vpop.f32.mrf.mxu1  ;;  %v3760_v30 = vadd.f32 %v7274_v58, %v7273_v50  ;;  %v3857_v5 = vadd.f32 %v7275_v61, %v3744_v45  ;;  %v3859_v48 = vadd.f32 %v7276_v7, %v3746_v1  ;;  %v3766_v17 = vadd.f32 %v3765_v38, %v7279_v19  ;;  %v7281_v34 = vld [vmem:[#allocation28_spill] sm:$0xff]  ;;  %v7283_v26 = vld [vmem:[#allocation30_spill] sm:$0xff]  ;;  %v7284_v44 = vld [vmem:[#allocation13_spill] sm:$0xff] }
 0x205   : > { %v3773_v15 = vpop.f32.mrf.mxu0  ;;  %v7278_v13 = vld [vmem:[#allocation35_spill] sm:$0xff]  ;;  %v3861_v18 = vadd.f32 %v7280_v16, %v3748_v10  ;;  %v3863_v36 = vadd.f32 %v7281_v34, %v3750_v29  ;;  %v3867_v63 = vadd.f32 %v7282_v32, %v3754_v51  ;;  %v7049_v4 = vadd.f32 %v7283_v26, %v3756_v57  ;;  %v7285_v55 = vld [vmem:[#allocation14_spill] sm:$0xff]  ;;  %v7287_v58 = vld [vmem:[#allocation16_spill] sm:$0xff] }
 0x206   : > { %v3886_v3 = vpop.f32.mrf.mxu1  ;;  %v3764_v39 = vadd.f32 %v7278_v13, %v7277_v21  ;;  %v3768_v45 = vadd.f32 %v3767_v12, %v7284_v44  ;;  %v3770_v1 = vadd.f32 %v3769_v8, %v7285_v55  ;;  %v7286_v59 = vld [vmem:[#allocation15_spill] sm:$0xff]  ;;  %v7288_v21 = vld [vmem:[#allocation32_spill] sm:$0xff]  ;;  %v7289_v29 = vld [vmem:[#allocation34_spill] sm:$0xff]  ;;  %v7065_v12 = vadd.f32 %v6956_v20, %v3766_v17 }
 0x207   : > { %v3775_v53 = vpop.f32.mrf.mxu0  ;;  %v3774_v50 = vadd.f32 %v3773_v15, %v7286_v59  ;;  %v7056_v10 = vadd.f32 %v7288_v21, %v3758_v56  ;;  %v7059_v13 = vadd.f32 %v7289_v29, %v3760_v30  ;;  %v7290_v19 = vld [vmem:[#allocation36_spill] sm:$0xff]  ;;  %v7291_v8 = vld [vmem:[#allocation17_spill] sm:$0xff]  ;;  %v7292_v34 = vld [vmem:[#allocation18_spill] sm:$0xff] }
 0x208   : > { %v3888_v24 = vpop.f32.mrf.mxu1  ;;  %v3776_v38 = vadd.f32 %v3775_v53, %v7287_v58  ;;  %v7062_v16 = vadd.f32 %v7290_v19, %v3764_v39  ;;  %v7074_v39 = vadd.f32 %v6962_v6, %v3768_v45  ;;  %v7077_v20 = vadd.f32 %v6980_v52, %v3770_v1 }
 0x209   : > { %v3777_v42 = vpop.f32.mrf.mxu0  ;;  %v7079_v17 = vadd.f32 %v3886_v3, %v3774_v50 }
 0x20a   : > { %v3890_v11 = vpop.f32.mrf.mxu1  ;;  %v3778_v15 = vadd.f32 %v3777_v42, %v7291_v8  ;;  %v7081_v42 = vadd.f32 %v3888_v24, %v3776_v38 }
 0x20b   : > { %v3779_v25 = vpop.f32.mrf.mxu0 }
 0x20c   : > { %v3892_v23 = vpop.f32.mrf.mxu1  ;;  %v3780_v53 = vadd.f32 %v3779_v25, %v7292_v34 }
 0x20d   : > { %v3929_v61 = vpop.f32.mrf.mxu0 }
 0x20e   : > { %v3969_v7 = vpop.f32.mrf.mxu1  ;;  %v3930_v51 = vadd.f32 %v3929_v61, %v3817_v47  ;;  %v7089_v6 = vadd.f32 %v3892_v23, %v3780_v53 }
 0x20f   : > { %v3970_v57 = vadd.f32 %v3969_v7, %v3857_v5  ;;  %v3931_v32 = vpop.f32.mrf.mxu0 }
 0x210   : > { %v3971_v26 = vpop.f32.mrf.mxu1  ;;  %v4119_v56 = vmul.f32 %v6964_v0, %v3930_v51  ;;  %v3932_v47 = vadd.f32 %v3931_v32, %v6976_v9 }
 0x211   : > { %v4135_v30 = vmul.f32 %v6964_v0, %v3970_v57  ;;  %v3972_v5 = vadd.f32 %v3971_v26, %v3859_v48  ;;  %v3933_v25 = vpop.f32.mrf.mxu0  ;;  %v7087_v48 = vadd.f32 %v3890_v11, %v3778_v15 }
 0x212   : > { %v3973_v44 = vpop.f32.mrf.mxu1  ;;  %v4163_v55 = vadd.f32 %v6966_v33, %v4119_v56  ;;  %v4120_v58 = vmul.f32 %v6970_v62, %v3932_v47  ;;  %v3934_v52 = vadd.f32 %v3933_v25, %v6983_v2 }
 0x213   : > { %v4179_v59 = vadd.f32 %v6966_v33, %v4135_v30  ;;  %v4136_v9 = vmul.f32 %v6970_v62, %v3972_v5  ;;  %v3974_v3 = vadd.f32 %v3973_v44, %v3861_v18  ;;  %v3935_v24 = vpop.f32.mrf.mxu0 }
 0x214   : > { %v3975_v45 = vpop.f32.mrf.mxu1  ;;  %v4195_v1 = vmax.f32 %v4163_v55, 0.0  ;;  %v4164_v38 = vadd.f32 %v6972_v40, %v4120_v58  ;;  %v4121_v23 = vmul.f32 %v6964_v0, %v3934_v52  ;;  %v3936_v7 = vadd.f32 %v3935_v24, %v6986_v43 }
 0x215   : > { %v4211_v50 = vmax.f32 %v4179_v59, 0.0  ;;  %v4180_v11 = vadd.f32 %v6972_v40, %v4136_v9  ;;  %v4137_v61 = vmul.f32 %v6964_v0, %v3974_v3  ;;  %v3976_v21 = vadd.f32 %v3975_v45, %v3863_v36  ;;  %v3939_v29 = vpop.f32.mrf.mxu0 }
 0x216   : > { %v3979_v2 = vpop.f32.mrf.mxu1  ;;  %4227 = vst [vmem:[%s7094_s7] sm:$0xff] %v4195_v1  ;;  %v4196_v18 = vmax.f32 %v4164_v38, 0.0  ;;  %v3940_v57 = vadd.f32 %v3939_v29, %v6989_v37  ;;  %v4165_v8 = vadd.f32 %v6966_v33, %v4121_v23  ;;  %v4122_v34 = vmul.f32 %v6970_v62, %v3936_v7 }
 0x217   : > { %4243 = vst [vmem:[%s7094_s7 + $0x80] sm:$0xff] %v4211_v50  ;;  %v4212_v51 = vmax.f32 %v4180_v11, 0.0  ;;  %v3980_v19 = vadd.f32 %v3979_v2, %v3867_v63  ;;  %v4181_v15 = vadd.f32 %v6966_v33, %v4137_v61  ;;  %v4138_v43 = vmul.f32 %v6970_v62, %v3976_v21  ;;  %v3941_v53 = vpop.f32.mrf.mxu0 }
 0x218   : > { %v3981_v36 = vpop.f32.mrf.mxu1  ;;  %4228 = vst [vmem:[%s7094_s7 + $0x8] sm:$0xff] %v4196_v18  ;;  %v4123_v32 = vmul.f32 %v6964_v0, %v3940_v57  ;;  %v3942_v37 = vadd.f32 %v3941_v53, %v6992_v14  ;;  %v4197_v56 = vmax.f32 %v4165_v8, 0.0  ;;  %v4166_v47 = vadd.f32 %v6972_v40, %v4122_v34 }
 0x219   : > { %4244 = vst [vmem:[%s7094_s7 + $0x88] sm:$0xff] %v4212_v51  ;;  %v4139_v26 = vmul.f32 %v6964_v0, %v3980_v19  ;;  %v3982_v63 = vadd.f32 %v3981_v36, %v7049_v4  ;;  %v4213_v30 = vmax.f32 %v4181_v15, 0.0  ;;  %v4182_v5 = vadd.f32 %v6972_v40, %v4138_v43  ;;  %v3943_v25 = vpop.f32.mrf.mxu0 }
 0x21a   : > { %v3983_v44 = vpop.f32.mrf.mxu1  ;;  %v4167_v55 = vadd.f32 %v6966_v33, %v4123_v32  ;;  %v4124_v58 = vmul.f32 %v6970_v62, %v3942_v37  ;;  %4229 = vst [vmem:[%s7094_s7 + $0x10] sm:$0xff] %v4197_v56  ;;  %v4198_v4 = vmax.f32 %v4166_v47, 0.0  ;;  %v3944_v52 = vadd.f32 %v3943_v25, %v6999_v54 }
 0x21b   : > { %v4183_v59 = vadd.f32 %v6966_v33, %v4139_v26  ;;  %v4140_v14 = vmul.f32 %v6970_v62, %v3982_v63  ;;  %4245 = vst [vmem:[%s7094_s7 + $0x90] sm:$0xff] %v4213_v30  ;;  %v4214_v9 = vmax.f32 %v4182_v5, 0.0  ;;  %v3984_v3 = vadd.f32 %v3983_v44, %v7056_v10  ;;  %v3945_v24 = vpop.f32.mrf.mxu0 }
 0x21c   : > { %v3985_v45 = vpop.f32.mrf.mxu1  ;;  %v4199_v1 = vmax.f32 %v4167_v55, 0.0  ;;  %v4168_v38 = vadd.f32 %v6972_v40, %v4124_v58  ;;  %4230 = vst [vmem:[%s7094_s7 + $0x18] sm:$0xff] %v4198_v4  ;;  %v4125_v23 = vmul.f32 %v6964_v0, %v3944_v52  ;;  %v3946_v54 = vadd.f32 %v3945_v24, %v7002_v31 }
 0x21d   : > { %v4215_v50 = vmax.f32 %v4183_v59, 0.0  ;;  %v4184_v11 = vadd.f32 %v6972_v40, %v4140_v14  ;;  %4246 = vst [vmem:[%s7094_s7 + $0x98] sm:$0xff] %v4214_v9  ;;  %v4141_v61 = vmul.f32 %v6964_v0, %v3984_v3  ;;  %v3986_v10 = vadd.f32 %v3985_v45, %v7059_v13  ;;  %v3949_v7 = vpop.f32.mrf.mxu0 }
 0x21e   : > { %v3989_v21 = vpop.f32.mrf.mxu1  ;;  %4231 = vst [vmem:[%s7094_s7 + $0x20] sm:$0xff] %v4199_v1  ;;  %v4200_v29 = vmax.f32 %v4168_v38, 0.0  ;;  %v3950_v18 = vadd.f32 %v3949_v7, %v7007_v27  ;;  %v4169_v57 = vadd.f32 %v6966_v33, %v4125_v23  ;;  %v4126_v31 = vmul.f32 %v6970_v62, %v3946_v54 }
 0x21f   : > { %4247 = vst [vmem:[%s7094_s7 + $0xa0] sm:$0xff] %v4215_v50  ;;  %v4216_v2 = vmax.f32 %v4184_v11, 0.0  ;;  %v3990_v51 = vadd.f32 %v3989_v21, %v7062_v16  ;;  %v4185_v19 = vadd.f32 %v6966_v33, %v4141_v61  ;;  %v4142_v8 = vmul.f32 %v6970_v62, %v3986_v10  ;;  %v3951_v13 = vpop.f32.mrf.mxu0 }
 0x220   : > { %v3991_v15 = vpop.f32.mrf.mxu1  ;;  %4232 = vst [vmem:[%s7094_s7 + $0x28] sm:$0xff] %v4200_v29  ;;  %v4127_v34 = vmul.f32 %v6964_v0, %v3950_v18  ;;  %v3952_v16 = vadd.f32 %v3951_v13, %v7010_v35  ;;  %v4201_v53 = vmax.f32 %v4169_v57, 0.0  ;;  %v4170_v32 = vadd.f32 %v6972_v40, %v4126_v31 }
 0x221   : > { %4248 = vst [vmem:[%s7094_s7 + $0xa8] sm:$0xff] %v4216_v2  ;;  %v4143_v27 = vmul.f32 %v6964_v0, %v3990_v51  ;;  %v3992_v43 = vadd.f32 %v3991_v15, %v7065_v12  ;;  %v4217_v36 = vmax.f32 %v4185_v19, 0.0  ;;  %v4186_v26 = vadd.f32 %v6972_v40, %v4142_v8  ;;  %v3953_v37 = vpop.f32.mrf.mxu0 }
 0x222   : > { %v3993_v63 = vpop.f32.mrf.mxu1  ;;  %v4171_v56 = vadd.f32 %v6966_v33, %v4127_v34  ;;  %v4128_v47 = vmul.f32 %v6970_v62, %v3952_v16  ;;  %4233 = vst [vmem:[%s7094_s7 + $0x30] sm:$0xff] %v4201_v53  ;;  %v4202_v12 = vmax.f32 %v4170_v32, 0.0  ;;  %v3954_v25 = vadd.f32 %v3953_v37, %v7019_v28 }
 0x223   : > { %v4187_v30 = vadd.f32 %v6966_v33, %v4143_v27  ;;  %v4144_v35 = vmul.f32 %v6970_v62, %v3992_v43  ;;  %4249 = vst [vmem:[%s7094_s7 + $0xb0] sm:$0xff] %v4217_v36  ;;  %v4218_v5 = vmax.f32 %v4186_v26, 0.0  ;;  %v3994_v44 = vadd.f32 %v3993_v63, %v7074_v39  ;;  %v3955_v55 = vpop.f32.mrf.mxu0 }
 0x224   : > { %v3995_v59 = vpop.f32.mrf.mxu1  ;;  %v4203_v58 = vmax.f32 %v4171_v56, 0.0  ;;  %v4172_v4 = vadd.f32 %v6972_v40, %v4128_v47  ;;  %4234 = vst [vmem:[%s7094_s7 + $0x38] sm:$0xff] %v4202_v12  ;;  %v4129_v52 = vmul.f32 %v6964_v0, %v3954_v25  ;;  %v3956_v28 = vadd.f32 %v3955_v55, %v7022_v22 }
 0x225   : > { %v4219_v14 = vmax.f32 %v4187_v30, 0.0  ;;  %v4188_v9 = vadd.f32 %v6972_v40, %v4144_v35  ;;  %4250 = vst [vmem:[%s7094_s7 + $0xb8] sm:$0xff] %v4218_v5  ;;  %v4145_v3 = vmul.f32 %v6964_v0, %v3994_v44  ;;  %v3996_v39 = vadd.f32 %v3995_v59, %v7077_v20  ;;  %v3959_v24 = vpop.f32.mrf.mxu0 }
 0x226   : > { %v3999_v45 = vpop.f32.mrf.mxu1  ;;  %4235 = vst [vmem:[%s7094_s7 + $0x40] sm:$0xff] %v4203_v58  ;;  %v4204_v1 = vmax.f32 %v4172_v4, 0.0  ;;  %v3960_v38 = vadd.f32 %v3959_v24, %v7025_v41  ;;  %v4173_v23 = vadd.f32 %v6966_v33, %v4129_v52  ;;  %v4130_v22 = vmul.f32 %v6970_v62, %v3956_v28 }
 0x227   : > { %4251 = vst [vmem:[%s7094_s7 + $0xc0] sm:$0xff] %v4219_v14  ;;  %v4220_v50 = vmax.f32 %v4188_v9, 0.0  ;;  %v4000_v11 = vadd.f32 %v3999_v45, %v7079_v17  ;;  %v4189_v61 = vadd.f32 %v6966_v33, %v4145_v3  ;;  %v4146_v54 = vmul.f32 %v6970_v62, %v3996_v39  ;;  %v3961_v20 = vpop.f32.mrf.mxu0 }
 0x228   : > { %v4001_v10 = vpop.f32.mrf.mxu1  ;;  %4236 = vst [vmem:[%s7094_s7 + $0x48] sm:$0xff] %v4204_v1  ;;  %v4131_v7 = vmul.f32 %v6964_v0, %v3960_v38  ;;  %v3962_v17 = vadd.f32 %v3961_v20, %v7028_v46  ;;  %v4205_v29 = vmax.f32 %v4173_v23, 0.0  ;;  %v4174_v18 = vadd.f32 %v6972_v40, %v4130_v22 }
 0x229   : > { %4252 = vst [vmem:[%s7094_s7 + $0xc8] sm:$0xff] %v4220_v50  ;;  %v4147_v41 = vmul.f32 %v6964_v0, %v4000_v11  ;;  %v4002_v21 = vadd.f32 %v4001_v10, %v7081_v42  ;;  %v4221_v2 = vmax.f32 %v4189_v61, 0.0  ;;  %v4190_v51 = vadd.f32 %v6972_v40, %v4146_v54  ;;  %v3963_v57 = vpop.f32.mrf.mxu0 }
 0x22a   : > { %v4003_v19 = vpop.f32.mrf.mxu1  ;;  %v4175_v31 = vadd.f32 %v6966_v33, %v4131_v7  ;;  %v4132_v13 = vmul.f32 %v6970_v62, %v3962_v17  ;;  %4237 = vst [vmem:[%s7094_s7 + $0x50] sm:$0xff] %v4205_v29  ;;  %v4206_v42 = vmax.f32 %v4174_v18, 0.0  ;;  %v3964_v34 = vadd.f32 %v3963_v57, %v7031_v60 }
 0x22b   : > { %v4191_v8 = vadd.f32 %v6966_v33, %v4147_v41  ;;  %v4148_v46 = vmul.f32 %v6970_v62, %v4002_v21  ;;  %4253 = vst [vmem:[%s7094_s7 + $0xd0] sm:$0xff] %v4221_v2  ;;  %v4222_v15 = vmax.f32 %v4190_v51, 0.0  ;;  %v4004_v27 = vadd.f32 %v4003_v19, %v7087_v48  ;;  %v3965_v16 = vpop.f32.mrf.mxu0 }
 0x22c   : > { %v4005_v43 = vpop.f32.mrf.mxu1  ;;  %v4207_v53 = vmax.f32 %v4175_v31, 0.0  ;;  %v4176_v32 = vadd.f32 %v6972_v40, %v4132_v13  ;;  %4238 = vst [vmem:[%s7094_s7 + $0x58] sm:$0xff] %v4206_v42  ;;  %v4133_v37 = vmul.f32 %v6964_v0, %v3964_v34  ;;  %v3966_v60 = vadd.f32 %v3965_v16, %v7034_v49 }
 0x22d   : > { %v4223_v36 = vmax.f32 %v4191_v8, 0.0  ;;  %v4192_v26 = vadd.f32 %v6972_v40, %v4148_v46  ;;  %4254 = vst [vmem:[%s7094_s7 + $0xd8] sm:$0xff] %v4222_v15  ;;  %v4149_v63 = vmul.f32 %v6964_v0, %v4004_v27  ;;  %v4006_v48 = vadd.f32 %v4005_v43, %v7089_v6 }
 0x22e   : > { %4239 = vst [vmem:[%s7094_s7 + $0x60] sm:$0xff] %v4207_v53  ;;  %v4208_v56 = vmax.f32 %v4176_v32, 0.0  ;;  %v4177_v47 = vadd.f32 %v6966_v33, %v4133_v37  ;;  %v4134_v12 = vmul.f32 %v6970_v62, %v3966_v60 }
 0x22f   : > { %4255 = vst [vmem:[%s7094_s7 + $0xe0] sm:$0xff] %v4223_v36  ;;  %v4224_v30 = vmax.f32 %v4192_v26, 0.0  ;;  %v4193_v35 = vadd.f32 %v6966_v33, %v4149_v63  ;;  %v4150_v0 = vmul.f32 %v6970_v62, %v4006_v48 }
 0x230   : > { %4240 = vst [vmem:[%s7094_s7 + $0x68] sm:$0xff] %v4208_v56  ;;  %v4209_v49 = vmax.f32 %v4177_v47, 0.0  ;;  %v4178_v6 = vadd.f32 %v6972_v40, %v4134_v12 }
 0x231   : > { %4256 = vst [vmem:[%s7094_s7 + $0xe8] sm:$0xff] %v4224_v30  ;;  %v4225_v5 = vmax.f32 %v4193_v35, 0.0  ;;  %v4194_v25 = vadd.f32 %v6972_v40, %v4150_v0 }
 0x232   : > { %4241 = vst [vmem:[%s7094_s7 + $0x70] sm:$0xff] %v4209_v49  ;;  %v4210_v44 = vmax.f32 %v4178_v6, 0.0 }
 0x233   : > { %4257 = vst [vmem:[%s7094_s7 + $0xf0] sm:$0xff] %v4225_v5  ;;  %v4226_v55 = vmax.f32 %v4194_v25, 0.0 }
 0x234   : > { %4242 = vst [vmem:[%s7094_s7 + $0x78] sm:$0xff] %v4210_v44 }
 0x235   : > { %4258 = vst [vmem:[%s7094_s7 + $0xf8] sm:$0xff] %v4226_v55 }
 0x236 PF: > { %s14_s17 = sadd.s32 1, %s5572_s17   ;;  %s7293_s15 = smov %s5568_s16 }
 0x237   : > { %p11_p5 = scmp.ge.s32.totalorder %s14_s17, 6   ;;  %s7294_s16 = smov %s7296_s18 }
 0x239   :  { %13 = sbr.rel (!%p11_p5) target bundleno = 2 (0x2), region = 83 }

</bundles_post_ra>
